<compile_context>
chip_gen: v7x
topology: tpu7x:2x2x1
jax: 0.10.0
libtpu: 0.0.40
codegen_flags: <defaults>
</compile_context>

<pallas_src>
import jax
import jax.numpy as jnp
import numpy as np
from jax.experimental import pallas as pl
from jax.experimental.pallas import tpu as pltpu  # noqa: F401  (TPU backend)

EPS = 1e-5


# ------------------------------ fused kernel -------------------------------

def fused_mnist_kernel(
    # conv unit 1
    x_ref,                  # (N*28, 28)    rows n*28+h, lanes w  (Cin = 1)
    sh1u_ref, sh1d_ref,     # (N*28, N*28)  block-diag row shifts (h-1 / h+1)
    w1b_ref,                # (3, 28, 448)  banded conv1 weights per kh
    b1l_ref,                # (1, 448)      conv1 bias, lane-expanded
    g1_ref, bt1_ref,        # (1, 16)       BN1 gamma / beta
    cg1_ref, cg1t_ref,      # (448, 16) / (16, 448)  lane<->channel maps
    re1_ref, ro1_ref,       # (N*14, N*28)  pool1 row selectors (even/odd h)
    ce1_ref, co1_ref,       # (448, 224)    pool1 lane selectors (even/odd w)
    # conv unit 2
    sh2u_ref, sh2d_ref,     # (N*14, N*14)
    w2b_ref,                # (3, 224, 448) banded conv2 weights per kh
    b2l_ref,                # (1, 448)
    g2_ref, bt2_ref,        # (1, 32)
    cg2_ref, cg2t_ref,      # (448, 32) / (32, 448)
    re2_ref, ro2_ref,       # (N*7, N*14)
    ce2_ref, co2_ref,       # (448, 224)
    # fully-connected head
    wwide_ref,              # (224, 896)  fc1 weight: [wo*32+c, r*128+j]
    rsel_ref,               # (7, N, N*7) per-row selectors for the fc1 gather
    fc1b_ref,               # (1, 128)
    w2p_ref,                # (128, 128)  fc2 weight padded to 128 lanes
    b2p_ref,                # (1, 128)
    # output
    o_ref,                  # (N, 128)    log-probs in columns [:10]
):
    f32 = jnp.float32

    def mm(a, b):
        return jnp.dot(a, b, preferred_element_type=f32)

    def bn_relu(q, cg, cgt, gamma, beta, n_spatial_per_row):
        # per-channel training-mode BatchNorm over all (n, h, w) positions
        inv_m = 1.0 / float(q.shape[0] * n_spatial_per_row)
        mean = mm(jnp.sum(q, axis=0, keepdims=True), cg) * inv_m        # (1,C)
        ex2 = mm(jnp.sum(q * q, axis=0, keepdims=True), cg) * inv_m     # (1,C)
        var = ex2 - mean * mean
        scale_c = gamma * jax.lax.rsqrt(var + EPS)                      # (1,C)
        shift_c = beta - mean * scale_c                                 # (1,C)
        scale_l = mm(scale_c, cgt)                                      # (1,W*C)
        shift_l = mm(shift_c, cgt)
        return jnp.maximum(q * scale_l + shift_l, 0.0)

    def maxpool(y, re, ro, ce, co):
        u = jnp.maximum(mm(re, y), mm(ro, y))        # pool over h (rows)
        return jnp.maximum(mm(u, ce), mm(u, co))     # pool over w (lanes)

    # ---------------- conv unit 1: conv + BN + ReLU + maxpool ----------------
    x = x_ref[...]                                   # (N*28, 28)
    a_up = mm(sh1u_ref[...], x)                      # input row h-1 (zero pad)
    a_dn = mm(sh1d_ref[...], x)                      # input row h+1 (zero pad)
    q1 = (mm(a_up, w1b_ref[0]) + mm(x, w1b_ref[1]) + mm(a_dn, w1b_ref[2])
          + b1l_ref[...])                            # (N*28, 448) lanes w*16+c
    y1 = bn_relu(q1, cg1_ref[...], cg1t_ref[...], g1_ref[...], bt1_ref[...], 28)
    p1 = maxpool(y1, re1_ref[...], ro1_ref[...], ce1_ref[...], co1_ref[...])
    # p1: (N*14, 224), rows n*14+h, lanes w*16+c

    # ---------------- conv unit 2: conv + BN + ReLU + maxpool ----------------
    b_up = mm(sh2u_ref[...], p1)
    b_dn = mm(sh2d_ref[...], p1)
    q2 = (mm(b_up, w2b_ref[0]) + mm(p1, w2b_ref[1]) + mm(b_dn, w2b_ref[2])
          + b2l_ref[...])                            # (N*14, 448) lanes w*32+c
    y2 = bn_relu(q2, cg2_ref[...], cg2t_ref[...], g2_ref[...], bt2_ref[...], 14)
    p2 = maxpool(y2, re2_ref[...], ro2_ref[...], ce2_ref[...], co2_ref[...])
    # p2: (N*7, 224), rows n*7+h, lanes w*32+c

    # ------------------------------- fc1 + ReLU ------------------------------
    # One lane-dense (224 x 896) matmul, then gather the "diagonal"
    # (row r within sample, lane block r) pairs with tiny selection matmuls.
    hwide = mm(p2, wwide_ref[...])                   # (N*7, 896)
    acc = mm(rsel_ref[0], hwide[:, 0:128])           # (N, 128)
    for r in range(1, 7):
        acc = acc + mm(rsel_ref[r], hwide[:, r * 128:(r + 1) * 128])
    hfc = jnp.maximum(acc + fc1b_ref[...], 0.0)      # (N, 128)

    # --------------------------- fc2 + log_softmax ---------------------------
    logits = mm(hfc, w2p_ref[...]) + b2p_ref[...]    # (N, 128), real cols [:10]
    real = logits[:, :10]
    m = jnp.max(real, axis=1, keepdims=True)
    lse = jnp.log(jnp.sum(jnp.exp(real - m), axis=1, keepdims=True))
    o_ref[...] = logits - m - lse                    # lane-dense 128-wide store


# -------------------------- one-time input prep -----------------------------

def prepare_inputs(params, n_batch):
    """Build all constant/selection matrices and reshuffled weights ONCE,
    outside the per-forward path.  Batch size is baked into the row-selection
    matrices (BN is batch-global anyway)."""
    f32 = np.float32
    N = n_batch
    hi = jax.lax.Precision.HIGHEST

    def band(width):
        b = np.zeros((width, width, 3), f32)
        for w in range(width):
            for kw in range(3):
                wi = w - 1 + kw
                if 0 <= wi < width:
                    b[wi, w, kw] = 1.0
        return b

    def shift_mats(n, h):
        eye_n = np.eye(n, dtype=f32)
        return (np.kron(eye_n, np.eye(h, k=-1, dtype=f32)),   # picks row h-1
                np.kron(eye_n, np.eye(h, k=1, dtype=f32)))    # picks row h+1

    def pool_row_sel(n, h):
        ho = h // 2
        e = np.zeros((ho, h), f32)
        o = np.zeros((ho, h), f32)
        e[np.arange(ho), 2 * np.arange(ho)] = 1.0
        o[np.arange(ho), 2 * np.arange(ho) + 1] = 1.0
        eye_n = np.eye(n, dtype=f32)
        return np.kron(eye_n, e), np.kron(eye_n, o)

    def pool_col_sel(w, c):
        wo = w // 2
        e = np.zeros((w, wo), f32)
        o = np.zeros((w, wo), f32)
        e[2 * np.arange(wo), np.arange(wo)] = 1.0
        o[2 * np.arange(wo) + 1, np.arange(wo)] = 1.0
        eye_c = np.eye(c, dtype=f32)
        return np.kron(e, eye_c), np.kron(o, eye_c)

    # Banded conv weights: w1b[kh][wi, w*16+co] = w1[co, 0, kh, wi-w+1]
    w1 = params["w1"].reshape(16, 3, 3)                          # (co, kh, kw)
    w1b = jnp.einsum("iwk,chk->hiwc", jnp.asarray(band(28)), w1,
                     precision=hi).reshape(3, 28, 28 * 16)
    # w2b[kh][wi*16+ci, w*32+co] = w2[co, ci, kh, wi-w+1]
    w2 = params["w2"]                                            # (co, ci, kh, kw)
    w2b = jnp.einsum("iwk,ochk->hicwo", jnp.asarray(band(14)), w2,
                     precision=hi).reshape(3, 14 * 16, 14 * 32)

    sh1u, sh1d = shift_mats(N, 28)
    sh2u, sh2d = shift_mats(N, 14)
    re1, ro1 = pool_row_sel(N, 28)
    ce1, co1 = pool_col_sel(28, 16)
    re2, ro2 = pool_row_sel(N, 14)
    ce2, co2 = pool_col_sel(14, 32)

    # lane (w*C+c) <-> channel (c) aggregation maps for the BN statistics
    cg1 = np.kron(np.ones((28, 1), f32), np.eye(16, dtype=f32))  # (448, 16)
    cg2 = np.kron(np.ones((14, 1), f32), np.eye(32, dtype=f32))  # (448, 32)

    # fc1 permuted so it consumes the in-kernel lane order (wo*32+c) directly:
    # wwide[wo*32+c, r*128+j] = fc1_w[j, c*49 + r*7 + wo]
    wwide = jnp.transpose(params["fc1_w"].reshape(128, 32, 7, 7),
                          (3, 1, 2, 0)).reshape(7 * 32, 7 * 128)
    rsel = np.zeros((7, N, N * 7), f32)
    for r in range(7):
        for n in range(N):
            rsel[r, n, n * 7 + r] = 1.0

    # fc2 padded to a lane-dense 128-wide output
    w2p = jnp.zeros((128, 128), jnp.float32).at[:, :10].set(params["fc2_w"].T)
    b2p = jnp.zeros((1, 128), jnp.float32).at[:, :10].set(params["fc2_b"][None, :])

    return (
        jnp.asarray(sh1u), jnp.asarray(sh1d),
        w1b,
        jnp.tile(params["b1"], 28)[None, :],
        params["g1"][None, :], params["bt1"][None, :],
        jnp.asarray(cg1), jnp.asarray(cg1.T),
        jnp.asarray(re1), jnp.asarray(ro1),
        jnp.asarray(ce1), jnp.asarray(co1),
        jnp.asarray(sh2u), jnp.asarray(sh2d),
        w2b,
        jnp.tile(params["b2"], 14)[None, :],
        params["g2"][None, :], params["bt2"][None, :],
        jnp.asarray(cg2), jnp.asarray(cg2.T),
        jnp.asarray(re2), jnp.asarray(ro2),
        jnp.asarray(ce2), jnp.asarray(co2),
        wwide, jnp.asarray(rsel),
        params["fc1_b"][None, :],
        w2p, b2p,
    )


# --------------------------------- forward ----------------------------------

def conv_network_forward(x_nchw, consts):
    """x_nchw: (N, 1, 28, 28).  Single fused pallas_call; everything stays in
    VMEM (~5 MB of operands, well under the scoped-VMEM limit on v5e/v6e/v7x)."""
    n = x_nchw.shape[0]
    x2d = x_nchw.reshape(n * 28, 28)            # rows n*28+h, lanes w (Cin=1)
    out_pad = pl.pallas_call(
        fused_mnist_kernel,
        out_shape=jax.ShapeDtypeStruct((n, 128), jnp.float32),
    )(x2d, *consts)
    return out_pad[:, :10]
    # NOTE: for large batches this should grow a row-tiled grid (with two-pass
    # BN statistics) and dimension_semantics=("parallel", ...) for megacore.


# --------------------------- pure-JAX reference ------------------------------

def reference_forward(x, params):
    hi = jax.lax.Precision.HIGHEST

    def unit(x, w, b, g, bt):
        y = jax.lax.conv_general_dilated(
            x, w, window_strides=(1, 1), padding=((1, 1), (1, 1)),
            dimension_numbers=("NCHW", "OIHW", "NCHW"), precision=hi)
        y = y + b[None, :, None, None]
        mean = jnp.mean(y, axis=(0, 2, 3), keepdims=True)
        var = jnp.mean((y - mean) ** 2, axis=(0, 2, 3), keepdims=True)
        y = (y - mean) * jax.lax.rsqrt(var + EPS)
        y = y * g[None, :, None, None] + bt[None, :, None, None]
        y = jnp.maximum(y, 0.0)
        return jax.lax.reduce_window(y, -jnp.inf, jax.lax.max,
                                     (1, 1, 2, 2), (1, 1, 2, 2), "VALID")

    y = unit(x, params["w1"], params["b1"], params["g1"], params["bt1"])
    y = unit(y, params["w2"], params["b2"], params["g2"], params["bt2"])
    flat = y.reshape(y.shape[0], -1)
    h = jnp.maximum(jnp.dot(flat, params["fc1_w"].T, precision=hi)
                    + params["fc1_b"], 0.0)
    logits = jnp.dot(h, params["fc2_w"].T, precision=hi) + params["fc2_b"]
    return jax.nn.log_softmax(logits, axis=1)


# ----------------------------------- init -----------------------------------

def init_params(key):
    ks = jax.random.split(key, 8)
    s = 0.05
    return {
        "w1": s * jax.random.normal(ks[0], (16, 1, 3, 3), jnp.float32),
        "b1": s * jax.random.normal(ks[1], (16,), jnp.float32),
        "g1": jnp.ones((16,), jnp.float32),
        "bt1": jnp.zeros((16,), jnp.float32),
        "w2": s * jax.random.normal(ks[2], (32, 16, 3, 3), jnp.float32),
        "b2": s * jax.random.normal(ks[3], (32,), jnp.float32),
        "g2": jnp.ones((32,), jnp.float32),
        "bt2": jnp.zeros((32,), jnp.float32),
        "fc1_w": s * jax.random.normal(ks[4], (128, 7 * 7 * 32), jnp.float32),
        "fc1_b": s * jax.random.normal(ks[5], (128,), jnp.float32),
        "fc2_w": s * jax.random.normal(ks[6], (10, 128), jnp.float32),
        "fc2_b": s * jax.random.normal(ks[7], (10,), jnp.float32),
    }


if __name__ == "__main__":
    key = jax.random.PRNGKey(0)
    pkey, xkey = jax.random.split(key)
    params = init_params(pkey)
    # fc1 expects 7*7*32 features -> 28x28 single-channel input.
    x = jax.random.normal(xkey, (2, 1, 28, 28), jnp.float32)

    consts = prepare_inputs(params, x.shape[0])   # once, outside the fwd path
    fwd = jax.jit(conv_network_forward)
    out = jax.block_until_ready(fwd(x, consts))

    assert out.shape == (2, 10), out.shape
    # log_softmax rows must exponentiate-sum to 1
    row_sums = jnp.sum(jnp.exp(out), axis=1)
    assert bool(jnp.all(jnp.abs(row_sums - 1.0) < 1e-4)), row_sums
    # cross-check against a pure-JAX reference of the PyTorch module
    ref = reference_forward(x, params)
    err = float(jnp.max(jnp.abs(out - ref)))
    assert err < 5e-2, f"max |pallas - reference| = {err}"
    print("KERNEL_OK")
</pallas_src>

<mosaic_0001>
module attributes {stable_mosaic.version = 11 : i64} {
  func.func @fused_mnist_kernel(%arg0: memref<56x28xf32, #tpu.memory_space<vmem>>, %arg1: memref<56x56xf32, #tpu.memory_space<vmem>>, %arg2: memref<56x56xf32, #tpu.memory_space<vmem>>, %arg3: memref<3x28x448xf32, #tpu.memory_space<vmem>>, %arg4: memref<1x448xf32, #tpu.memory_space<vmem>>, %arg5: memref<1x16xf32, #tpu.memory_space<vmem>>, %arg6: memref<1x16xf32, #tpu.memory_space<vmem>>, %arg7: memref<448x16xf32, #tpu.memory_space<vmem>>, %arg8: memref<16x448xf32, #tpu.memory_space<vmem>>, %arg9: memref<28x56xf32, #tpu.memory_space<vmem>>, %arg10: memref<28x56xf32, #tpu.memory_space<vmem>>, %arg11: memref<448x224xf32, #tpu.memory_space<vmem>>, %arg12: memref<448x224xf32, #tpu.memory_space<vmem>>, %arg13: memref<28x28xf32, #tpu.memory_space<vmem>>, %arg14: memref<28x28xf32, #tpu.memory_space<vmem>>, %arg15: memref<3x224x448xf32, #tpu.memory_space<vmem>>, %arg16: memref<1x448xf32, #tpu.memory_space<vmem>>, %arg17: memref<1x32xf32, #tpu.memory_space<vmem>>, %arg18: memref<1x32xf32, #tpu.memory_space<vmem>>, %arg19: memref<448x32xf32, #tpu.memory_space<vmem>>, %arg20: memref<32x448xf32, #tpu.memory_space<vmem>>, %arg21: memref<14x28xf32, #tpu.memory_space<vmem>>, %arg22: memref<14x28xf32, #tpu.memory_space<vmem>>, %arg23: memref<448x224xf32, #tpu.memory_space<vmem>>, %arg24: memref<448x224xf32, #tpu.memory_space<vmem>>, %arg25: memref<224x896xf32, #tpu.memory_space<vmem>>, %arg26: memref<7x2x14xf32, #tpu.memory_space<vmem>>, %arg27: memref<1x128xf32, #tpu.memory_space<vmem>>, %arg28: memref<128x128xf32, #tpu.memory_space<vmem>>, %arg29: memref<1x128xf32, #tpu.memory_space<vmem>>, %arg30: memref<2x128xf32, #tpu.memory_space<vmem>>) attributes {dimension_semantics = [], scalar_prefetch = 0 : i64, scratch_operands = 0 : i64, tpu.core_type = #tpu.core_type<tc>} {
    %c0 = arith.constant 0 : index
    %c0_0 = arith.constant 0 : index
    %0 = vector.load %arg0[%c0, %c0_0] : memref<56x28xf32, #tpu.memory_space<vmem>>, vector<56x28xf32>
    %c0_1 = arith.constant 0 : index
    %c0_2 = arith.constant 0 : index
    %1 = vector.load %arg1[%c0_1, %c0_2] : memref<56x56xf32, #tpu.memory_space<vmem>>, vector<56x56xf32>
    %cst = arith.constant dense<0.000000e+00> : vector<56x28xf32>
    %2 = tpu.matmul %1, %0, %cst {dimension_numbers = #tpu.dot_dimension_numbers<[1], [0], [0], [1], [0, 0, 1, 1], [], []>} : vector<56x56xf32>, vector<56x28xf32>, vector<56x28xf32> -> vector<56x28xf32>
    %c0_3 = arith.constant 0 : index
    %c0_4 = arith.constant 0 : index
    %3 = vector.load %arg2[%c0_3, %c0_4] : memref<56x56xf32, #tpu.memory_space<vmem>>, vector<56x56xf32>
    %cst_5 = arith.constant dense<0.000000e+00> : vector<56x28xf32>
    %4 = tpu.matmul %3, %0, %cst_5 {dimension_numbers = #tpu.dot_dimension_numbers<[1], [0], [0], [1], [0, 0, 1, 1], [], []>} : vector<56x56xf32>, vector<56x28xf32>, vector<56x28xf32> -> vector<56x28xf32>
    %c0_6 = arith.constant 0 : index
    %c0_7 = arith.constant 0 : index
    %c0_8 = arith.constant 0 : index
    %5 = vector.load %arg3[%c0_6, %c0_7, %c0_8] : memref<3x28x448xf32, #tpu.memory_space<vmem>>, vector<1x28x448xf32>
    %6 = vector.shape_cast %5 : vector<1x28x448xf32> to vector<28x448xf32>
    %cst_9 = arith.constant dense<0.000000e+00> : vector<56x448xf32>
    %7 = tpu.matmul %2, %6, %cst_9 {dimension_numbers = #tpu.dot_dimension_numbers<[1], [0], [0], [1], [0, 0, 1, 1], [], []>} : vector<56x28xf32>, vector<28x448xf32>, vector<56x448xf32> -> vector<56x448xf32>
    %c1 = arith.constant 1 : index
    %c0_10 = arith.constant 0 : index
    %c0_11 = arith.constant 0 : index
    %8 = vector.load %arg3[%c1, %c0_10, %c0_11] : memref<3x28x448xf32, #tpu.memory_space<vmem>>, vector<1x28x448xf32>
    %9 = vector.shape_cast %8 : vector<1x28x448xf32> to vector<28x448xf32>
    %cst_12 = arith.constant dense<0.000000e+00> : vector<56x448xf32>
    %10 = tpu.matmul %0, %9, %cst_12 {dimension_numbers = #tpu.dot_dimension_numbers<[1], [0], [0], [1], [0, 0, 1, 1], [], []>} : vector<56x28xf32>, vector<28x448xf32>, vector<56x448xf32> -> vector<56x448xf32>
    %11 = arith.addf %7, %10 : vector<56x448xf32>
    %c2 = arith.constant 2 : index
    %c0_13 = arith.constant 0 : index
    %c0_14 = arith.constant 0 : index
    %12 = vector.load %arg3[%c2, %c0_13, %c0_14] : memref<3x28x448xf32, #tpu.memory_space<vmem>>, vector<1x28x448xf32>
    %13 = vector.shape_cast %12 : vector<1x28x448xf32> to vector<28x448xf32>
    %cst_15 = arith.constant dense<0.000000e+00> : vector<56x448xf32>
    %14 = tpu.matmul %4, %13, %cst_15 {dimension_numbers = #tpu.dot_dimension_numbers<[1], [0], [0], [1], [0, 0, 1, 1], [], []>} : vector<56x28xf32>, vector<28x448xf32>, vector<56x448xf32> -> vector<56x448xf32>
    %15 = arith.addf %11, %14 : vector<56x448xf32>
    %c0_16 = arith.constant 0 : index
    %c0_17 = arith.constant 0 : index
    %16 = vector.load %arg4[%c0_16, %c0_17] : memref<1x448xf32, #tpu.memory_space<vmem>>, vector<1x448xf32>
    %17 = vector.broadcast %16 : vector<1x448xf32> to vector<56x448xf32>
    %18 = arith.addf %15, %17 : vector<56x448xf32>
    %c0_18 = arith.constant 0 : index
    %c0_19 = arith.constant 0 : index
    %19 = vector.load %arg7[%c0_18, %c0_19] : memref<448x16xf32, #tpu.memory_space<vmem>>, vector<448x16xf32>
    %c0_20 = arith.constant 0 : index
    %c0_21 = arith.constant 0 : index
    %20 = vector.load %arg8[%c0_20, %c0_21] : memref<16x448xf32, #tpu.memory_space<vmem>>, vector<16x448xf32>
    %c0_22 = arith.constant 0 : index
    %c0_23 = arith.constant 0 : index
    %21 = vector.load %arg5[%c0_22, %c0_23] : memref<1x16xf32, #tpu.memory_space<vmem>>, vector<1x16xf32>
    %c0_24 = arith.constant 0 : index
    %c0_25 = arith.constant 0 : index
    %22 = vector.load %arg6[%c0_24, %c0_25] : memref<1x16xf32, #tpu.memory_space<vmem>>, vector<1x16xf32>
    %cst_26 = arith.constant dense<0.000000e+00> : vector<448xf32>
    %23 = vector.multi_reduction <add>, %18, %cst_26 [0] : vector<56x448xf32> to vector<448xf32>
    %24 = vector.shape_cast %23 : vector<448xf32> to vector<1x448xf32>
    %cst_27 = arith.constant dense<0.000000e+00> : vector<1x16xf32>
    %25 = tpu.matmul %24, %19, %cst_27 {dimension_numbers = #tpu.dot_dimension_numbers<[1], [0], [0], [1], [0, 0, 1, 1], [], []>} : vector<1x448xf32>, vector<448x16xf32>, vector<1x16xf32> -> vector<1x16xf32>
    %cst_28 = arith.constant 6.37755089E-4 : f32
    %26 = vector.broadcast %cst_28 : f32 to vector<1x16xf32>
    %27 = arith.mulf %25, %26 : vector<1x16xf32>
    %28 = arith.mulf %18, %18 : vector<56x448xf32>
    %cst_29 = arith.constant dense<0.000000e+00> : vector<448xf32>
    %29 = vector.multi_reduction <add>, %28, %cst_29 [0] : vector<56x448xf32> to vector<448xf32>
    %30 = vector.shape_cast %29 : vector<448xf32> to vector<1x448xf32>
    %cst_30 = arith.constant dense<0.000000e+00> : vector<1x16xf32>
    %31 = tpu.matmul %30, %19, %cst_30 {dimension_numbers = #tpu.dot_dimension_numbers<[1], [0], [0], [1], [0, 0, 1, 1], [], []>} : vector<1x448xf32>, vector<448x16xf32>, vector<1x16xf32> -> vector<1x16xf32>
    %cst_31 = arith.constant 6.37755089E-4 : f32
    %32 = vector.broadcast %cst_31 : f32 to vector<1x16xf32>
    %33 = arith.mulf %31, %32 : vector<1x16xf32>
    %34 = arith.mulf %27, %27 : vector<1x16xf32>
    %35 = arith.subf %33, %34 : vector<1x16xf32>
    %cst_32 = arith.constant 9.99999974E-6 : f32
    %36 = vector.broadcast %cst_32 : f32 to vector<1x16xf32>
    %37 = arith.addf %35, %36 : vector<1x16xf32>
    %38 = math.rsqrt %37 : vector<1x16xf32>
    %39 = arith.mulf %21, %38 : vector<1x16xf32>
    %40 = arith.mulf %27, %39 : vector<1x16xf32>
    %41 = arith.subf %22, %40 : vector<1x16xf32>
    %cst_33 = arith.constant dense<0.000000e+00> : vector<1x448xf32>
    %42 = tpu.matmul %39, %20, %cst_33 {dimension_numbers = #tpu.dot_dimension_numbers<[1], [0], [0], [1], [0, 0, 1, 1], [], []>} : vector<1x16xf32>, vector<16x448xf32>, vector<1x448xf32> -> vector<1x448xf32>
    %cst_34 = arith.constant dense<0.000000e+00> : vector<1x448xf32>
    %43 = tpu.matmul %41, %20, %cst_34 {dimension_numbers = #tpu.dot_dimension_numbers<[1], [0], [0], [1], [0, 0, 1, 1], [], []>} : vector<1x16xf32>, vector<16x448xf32>, vector<1x448xf32> -> vector<1x448xf32>
    %44 = vector.broadcast %42 : vector<1x448xf32> to vector<56x448xf32>
    %45 = arith.mulf %18, %44 : vector<56x448xf32>
    %46 = vector.broadcast %43 : vector<1x448xf32> to vector<56x448xf32>
    %47 = arith.addf %45, %46 : vector<56x448xf32>
    %cst_35 = arith.constant 0.000000e+00 : f32
    %48 = vector.broadcast %cst_35 : f32 to vector<56x448xf32>
    %49 = arith.maximumf %47, %48 : vector<56x448xf32>
    %c0_36 = arith.constant 0 : index
    %c0_37 = arith.constant 0 : index
    %50 = vector.load %arg9[%c0_36, %c0_37] : memref<28x56xf32, #tpu.memory_space<vmem>>, vector<28x56xf32>
    %c0_38 = arith.constant 0 : index
    %c0_39 = arith.constant 0 : index
    %51 = vector.load %arg10[%c0_38, %c0_39] : memref<28x56xf32, #tpu.memory_space<vmem>>, vector<28x56xf32>
    %c0_40 = arith.constant 0 : index
    %c0_41 = arith.constant 0 : index
    %52 = vector.load %arg11[%c0_40, %c0_41] : memref<448x224xf32, #tpu.memory_space<vmem>>, vector<448x224xf32>
    %c0_42 = arith.constant 0 : index
    %c0_43 = arith.constant 0 : index
    %53 = vector.load %arg12[%c0_42, %c0_43] : memref<448x224xf32, #tpu.memory_space<vmem>>, vector<448x224xf32>
    %cst_44 = arith.constant dense<0.000000e+00> : vector<28x448xf32>
    %54 = tpu.matmul %50, %49, %cst_44 {dimension_numbers = #tpu.dot_dimension_numbers<[1], [0], [0], [1], [0, 0, 1, 1], [], []>} : vector<28x56xf32>, vector<56x448xf32>, vector<28x448xf32> -> vector<28x448xf32>
    %cst_45 = arith.constant dense<0.000000e+00> : vector<28x448xf32>
    %55 = tpu.matmul %51, %49, %cst_45 {dimension_numbers = #tpu.dot_dimension_numbers<[1], [0], [0], [1], [0, 0, 1, 1], [], []>} : vector<28x56xf32>, vector<56x448xf32>, vector<28x448xf32> -> vector<28x448xf32>
    %56 = arith.maximumf %54, %55 : vector<28x448xf32>
    %cst_46 = arith.constant dense<0.000000e+00> : vector<28x224xf32>
    %57 = tpu.matmul %56, %52, %cst_46 {dimension_numbers = #tpu.dot_dimension_numbers<[1], [0], [0], [1], [0, 0, 1, 1], [], []>} : vector<28x448xf32>, vector<448x224xf32>, vector<28x224xf32> -> vector<28x224xf32>
    %cst_47 = arith.constant dense<0.000000e+00> : vector<28x224xf32>
    %58 = tpu.matmul %56, %53, %cst_47 {dimension_numbers = #tpu.dot_dimension_numbers<[1], [0], [0], [1], [0, 0, 1, 1], [], []>} : vector<28x448xf32>, vector<448x224xf32>, vector<28x224xf32> -> vector<28x224xf32>
    %59 = arith.maximumf %57, %58 : vector<28x224xf32>
    %c0_48 = arith.constant 0 : index
    %c0_49 = arith.constant 0 : index
    %60 = vector.load %arg13[%c0_48, %c0_49] : memref<28x28xf32, #tpu.memory_space<vmem>>, vector<28x28xf32>
    %cst_50 = arith.constant dense<0.000000e+00> : vector<28x224xf32>
    %61 = tpu.matmul %60, %59, %cst_50 {dimension_numbers = #tpu.dot_dimension_numbers<[1], [0], [0], [1], [0, 0, 1, 1], [], []>} : vector<28x28xf32>, vector<28x224xf32>, vector<28x224xf32> -> vector<28x224xf32>
    %c0_51 = arith.constant 0 : index
    %c0_52 = arith.constant 0 : index
    %62 = vector.load %arg14[%c0_51, %c0_52] : memref<28x28xf32, #tpu.memory_space<vmem>>, vector<28x28xf32>
    %cst_53 = arith.constant dense<0.000000e+00> : vector<28x224xf32>
    %63 = tpu.matmul %62, %59, %cst_53 {dimension_numbers = #tpu.dot_dimension_numbers<[1], [0], [0], [1], [0, 0, 1, 1], [], []>} : vector<28x28xf32>, vector<28x224xf32>, vector<28x224xf32> -> vector<28x224xf32>
    %c0_54 = arith.constant 0 : index
    %c0_55 = arith.constant 0 : index
    %c0_56 = arith.constant 0 : index
    %64 = vector.load %arg15[%c0_54, %c0_55, %c0_56] : memref<3x224x448xf32, #tpu.memory_space<vmem>>, vector<1x224x448xf32>
    %65 = vector.shape_cast %64 : vector<1x224x448xf32> to vector<224x448xf32>
    %cst_57 = arith.constant dense<0.000000e+00> : vector<28x448xf32>
    %66 = tpu.matmul %61, %65, %cst_57 {dimension_numbers = #tpu.dot_dimension_numbers<[1], [0], [0], [1], [0, 0, 1, 1], [], []>} : vector<28x224xf32>, vector<224x448xf32>, vector<28x448xf32> -> vector<28x448xf32>
    %c1_58 = arith.constant 1 : index
    %c0_59 = arith.constant 0 : index
    %c0_60 = arith.constant 0 : index
    %67 = vector.load %arg15[%c1_58, %c0_59, %c0_60] : memref<3x224x448xf32, #tpu.memory_space<vmem>>, vector<1x224x448xf32>
    %68 = vector.shape_cast %67 : vector<1x224x448xf32> to vector<224x448xf32>
    %cst_61 = arith.constant dense<0.000000e+00> : vector<28x448xf32>
    %69 = tpu.matmul %59, %68, %cst_61 {dimension_numbers = #tpu.dot_dimension_numbers<[1], [0], [0], [1], [0, 0, 1, 1], [], []>} : vector<28x224xf32>, vector<224x448xf32>, vector<28x448xf32> -> vector<28x448xf32>
    %70 = arith.addf %66, %69 : vector<28x448xf32>
    %c2_62 = arith.constant 2 : index
    %c0_63 = arith.constant 0 : index
    %c0_64 = arith.constant 0 : index
    %71 = vector.load %arg15[%c2_62, %c0_63, %c0_64] : memref<3x224x448xf32, #tpu.memory_space<vmem>>, vector<1x224x448xf32>
    %72 = vector.shape_cast %71 : vector<1x224x448xf32> to vector<224x448xf32>
    %cst_65 = arith.constant dense<0.000000e+00> : vector<28x448xf32>
    %73 = tpu.matmul %63, %72, %cst_65 {dimension_numbers = #tpu.dot_dimension_numbers<[1], [0], [0], [1], [0, 0, 1, 1], [], []>} : vector<28x224xf32>, vector<224x448xf32>, vector<28x448xf32> -> vector<28x448xf32>
    %74 = arith.addf %70, %73 : vector<28x448xf32>
    %c0_66 = arith.constant 0 : index
    %c0_67 = arith.constant 0 : index
    %75 = vector.load %arg16[%c0_66, %c0_67] : memref<1x448xf32, #tpu.memory_space<vmem>>, vector<1x448xf32>
    %76 = vector.broadcast %75 : vector<1x448xf32> to vector<28x448xf32>
    %77 = arith.addf %74, %76 : vector<28x448xf32>
    %c0_68 = arith.constant 0 : index
    %c0_69 = arith.constant 0 : index
    %78 = vector.load %arg19[%c0_68, %c0_69] : memref<448x32xf32, #tpu.memory_space<vmem>>, vector<448x32xf32>
    %c0_70 = arith.constant 0 : index
    %c0_71 = arith.constant 0 : index
    %79 = vector.load %arg20[%c0_70, %c0_71] : memref<32x448xf32, #tpu.memory_space<vmem>>, vector<32x448xf32>
    %c0_72 = arith.constant 0 : index
    %c0_73 = arith.constant 0 : index
    %80 = vector.load %arg17[%c0_72, %c0_73] : memref<1x32xf32, #tpu.memory_space<vmem>>, vector<1x32xf32>
    %c0_74 = arith.constant 0 : index
    %c0_75 = arith.constant 0 : index
    %81 = vector.load %arg18[%c0_74, %c0_75] : memref<1x32xf32, #tpu.memory_space<vmem>>, vector<1x32xf32>
    %cst_76 = arith.constant dense<0.000000e+00> : vector<448xf32>
    %82 = vector.multi_reduction <add>, %77, %cst_76 [0] : vector<28x448xf32> to vector<448xf32>
    %83 = vector.shape_cast %82 : vector<448xf32> to vector<1x448xf32>
    %cst_77 = arith.constant dense<0.000000e+00> : vector<1x32xf32>
    %84 = tpu.matmul %83, %78, %cst_77 {dimension_numbers = #tpu.dot_dimension_numbers<[1], [0], [0], [1], [0, 0, 1, 1], [], []>} : vector<1x448xf32>, vector<448x32xf32>, vector<1x32xf32> -> vector<1x32xf32>
    %cst_78 = arith.constant 0.00255102036 : f32
    %85 = vector.broadcast %cst_78 : f32 to vector<1x32xf32>
    %86 = arith.mulf %84, %85 : vector<1x32xf32>
    %87 = arith.mulf %77, %77 : vector<28x448xf32>
    %cst_79 = arith.constant dense<0.000000e+00> : vector<448xf32>
    %88 = vector.multi_reduction <add>, %87, %cst_79 [0] : vector<28x448xf32> to vector<448xf32>
    %89 = vector.shape_cast %88 : vector<448xf32> to vector<1x448xf32>
    %cst_80 = arith.constant dense<0.000000e+00> : vector<1x32xf32>
    %90 = tpu.matmul %89, %78, %cst_80 {dimension_numbers = #tpu.dot_dimension_numbers<[1], [0], [0], [1], [0, 0, 1, 1], [], []>} : vector<1x448xf32>, vector<448x32xf32>, vector<1x32xf32> -> vector<1x32xf32>
    %cst_81 = arith.constant 0.00255102036 : f32
    %91 = vector.broadcast %cst_81 : f32 to vector<1x32xf32>
    %92 = arith.mulf %90, %91 : vector<1x32xf32>
    %93 = arith.mulf %86, %86 : vector<1x32xf32>
    %94 = arith.subf %92, %93 : vector<1x32xf32>
    %cst_82 = arith.constant 9.99999974E-6 : f32
    %95 = vector.broadcast %cst_82 : f32 to vector<1x32xf32>
    %96 = arith.addf %94, %95 : vector<1x32xf32>
    %97 = math.rsqrt %96 : vector<1x32xf32>
    %98 = arith.mulf %80, %97 : vector<1x32xf32>
    %99 = arith.mulf %86, %98 : vector<1x32xf32>
    %100 = arith.subf %81, %99 : vector<1x32xf32>
    %cst_83 = arith.constant dense<0.000000e+00> : vector<1x448xf32>
    %101 = tpu.matmul %98, %79, %cst_83 {dimension_numbers = #tpu.dot_dimension_numbers<[1], [0], [0], [1], [0, 0, 1, 1], [], []>} : vector<1x32xf32>, vector<32x448xf32>, vector<1x448xf32> -> vector<1x448xf32>
    %cst_84 = arith.constant dense<0.000000e+00> : vector<1x448xf32>
    %102 = tpu.matmul %100, %79, %cst_84 {dimension_numbers = #tpu.dot_dimension_numbers<[1], [0], [0], [1], [0, 0, 1, 1], [], []>} : vector<1x32xf32>, vector<32x448xf32>, vector<1x448xf32> -> vector<1x448xf32>
    %103 = vector.broadcast %101 : vector<1x448xf32> to vector<28x448xf32>
    %104 = arith.mulf %77, %103 : vector<28x448xf32>
    %105 = vector.broadcast %102 : vector<1x448xf32> to vector<28x448xf32>
    %106 = arith.addf %104, %105 : vector<28x448xf32>
    %cst_85 = arith.constant 0.000000e+00 : f32
    %107 = vector.broadcast %cst_85 : f32 to vector<28x448xf32>
    %108 = arith.maximumf %106, %107 : vector<28x448xf32>
    %c0_86 = arith.constant 0 : index
    %c0_87 = arith.constant 0 : index
    %109 = vector.load %arg21[%c0_86, %c0_87] : memref<14x28xf32, #tpu.memory_space<vmem>>, vector<14x28xf32>
    %c0_88 = arith.constant 0 : index
    %c0_89 = arith.constant 0 : index
    %110 = vector.load %arg22[%c0_88, %c0_89] : memref<14x28xf32, #tpu.memory_space<vmem>>, vector<14x28xf32>
    %c0_90 = arith.constant 0 : index
    %c0_91 = arith.constant 0 : index
    %111 = vector.load %arg23[%c0_90, %c0_91] : memref<448x224xf32, #tpu.memory_space<vmem>>, vector<448x224xf32>
    %c0_92 = arith.constant 0 : index
    %c0_93 = arith.constant 0 : index
    %112 = vector.load %arg24[%c0_92, %c0_93] : memref<448x224xf32, #tpu.memory_space<vmem>>, vector<448x224xf32>
    %cst_94 = arith.constant dense<0.000000e+00> : vector<14x448xf32>
    %113 = tpu.matmul %109, %108, %cst_94 {dimension_numbers = #tpu.dot_dimension_numbers<[1], [0], [0], [1], [0, 0, 1, 1], [], []>} : vector<14x28xf32>, vector<28x448xf32>, vector<14x448xf32> -> vector<14x448xf32>
    %cst_95 = arith.constant dense<0.000000e+00> : vector<14x448xf32>
    %114 = tpu.matmul %110, %108, %cst_95 {dimension_numbers = #tpu.dot_dimension_numbers<[1], [0], [0], [1], [0, 0, 1, 1], [], []>} : vector<14x28xf32>, vector<28x448xf32>, vector<14x448xf32> -> vector<14x448xf32>
    %115 = arith.maximumf %113, %114 : vector<14x448xf32>
    %cst_96 = arith.constant dense<0.000000e+00> : vector<14x224xf32>
    %116 = tpu.matmul %115, %111, %cst_96 {dimension_numbers = #tpu.dot_dimension_numbers<[1], [0], [0], [1], [0, 0, 1, 1], [], []>} : vector<14x448xf32>, vector<448x224xf32>, vector<14x224xf32> -> vector<14x224xf32>
    %cst_97 = arith.constant dense<0.000000e+00> : vector<14x224xf32>
    %117 = tpu.matmul %115, %112, %cst_97 {dimension_numbers = #tpu.dot_dimension_numbers<[1], [0], [0], [1], [0, 0, 1, 1], [], []>} : vector<14x448xf32>, vector<448x224xf32>, vector<14x224xf32> -> vector<14x224xf32>
    %118 = arith.maximumf %116, %117 : vector<14x224xf32>
    %c0_98 = arith.constant 0 : index
    %c0_99 = arith.constant 0 : index
    %119 = vector.load %arg25[%c0_98, %c0_99] : memref<224x896xf32, #tpu.memory_space<vmem>>, vector<224x896xf32>
    %cst_100 = arith.constant dense<0.000000e+00> : vector<14x896xf32>
    %120 = tpu.matmul %118, %119, %cst_100 {dimension_numbers = #tpu.dot_dimension_numbers<[1], [0], [0], [1], [0, 0, 1, 1], [], []>} : vector<14x224xf32>, vector<224x896xf32>, vector<14x896xf32> -> vector<14x896xf32>
    %c0_101 = arith.constant 0 : index
    %c0_102 = arith.constant 0 : index
    %c0_103 = arith.constant 0 : index
    %121 = vector.load %arg26[%c0_101, %c0_102, %c0_103] : memref<7x2x14xf32, #tpu.memory_space<vmem>>, vector<1x2x14xf32>
    %122 = vector.shape_cast %121 : vector<1x2x14xf32> to vector<2x14xf32>
    %123 = vector.extract_strided_slice %120 {offsets = [0, 0], sizes = [14, 128], strides = [1, 1]} : vector<14x896xf32> to vector<14x128xf32>
    %cst_104 = arith.constant dense<0.000000e+00> : vector<2x128xf32>
    %124 = tpu.matmul %122, %123, %cst_104 {dimension_numbers = #tpu.dot_dimension_numbers<[1], [0], [0], [1], [0, 0, 1, 1], [], []>} : vector<2x14xf32>, vector<14x128xf32>, vector<2x128xf32> -> vector<2x128xf32>
    %c1_105 = arith.constant 1 : index
    %c0_106 = arith.constant 0 : index
    %c0_107 = arith.constant 0 : index
    %125 = vector.load %arg26[%c1_105, %c0_106, %c0_107] : memref<7x2x14xf32, #tpu.memory_space<vmem>>, vector<1x2x14xf32>
    %126 = vector.shape_cast %125 : vector<1x2x14xf32> to vector<2x14xf32>
    %127 = vector.extract_strided_slice %120 {offsets = [0, 128], sizes = [14, 128], strides = [1, 1]} : vector<14x896xf32> to vector<14x128xf32>
    %cst_108 = arith.constant dense<0.000000e+00> : vector<2x128xf32>
    %128 = tpu.matmul %126, %127, %cst_108 {dimension_numbers = #tpu.dot_dimension_numbers<[1], [0], [0], [1], [0, 0, 1, 1], [], []>} : vector<2x14xf32>, vector<14x128xf32>, vector<2x128xf32> -> vector<2x128xf32>
    %129 = arith.addf %124, %128 : vector<2x128xf32>
    %c2_109 = arith.constant 2 : index
    %c0_110 = arith.constant 0 : index
    %c0_111 = arith.constant 0 : index
    %130 = vector.load %arg26[%c2_109, %c0_110, %c0_111] : memref<7x2x14xf32, #tpu.memory_space<vmem>>, vector<1x2x14xf32>
    %131 = vector.shape_cast %130 : vector<1x2x14xf32> to vector<2x14xf32>
    %132 = vector.extract_strided_slice %120 {offsets = [0, 256], sizes = [14, 128], strides = [1, 1]} : vector<14x896xf32> to vector<14x128xf32>
    %cst_112 = arith.constant dense<0.000000e+00> : vector<2x128xf32>
    %133 = tpu.matmul %131, %132, %cst_112 {dimension_numbers = #tpu.dot_dimension_numbers<[1], [0], [0], [1], [0, 0, 1, 1], [], []>} : vector<2x14xf32>, vector<14x128xf32>, vector<2x128xf32> -> vector<2x128xf32>
    %134 = arith.addf %129, %133 : vector<2x128xf32>
    %c3 = arith.constant 3 : index
    %c0_113 = arith.constant 0 : index
    %c0_114 = arith.constant 0 : index
    %135 = vector.load %arg26[%c3, %c0_113, %c0_114] : memref<7x2x14xf32, #tpu.memory_space<vmem>>, vector<1x2x14xf32>
    %136 = vector.shape_cast %135 : vector<1x2x14xf32> to vector<2x14xf32>
    %137 = vector.extract_strided_slice %120 {offsets = [0, 384], sizes = [14, 128], strides = [1, 1]} : vector<14x896xf32> to vector<14x128xf32>
    %cst_115 = arith.constant dense<0.000000e+00> : vector<2x128xf32>
    %138 = tpu.matmul %136, %137, %cst_115 {dimension_numbers = #tpu.dot_dimension_numbers<[1], [0], [0], [1], [0, 0, 1, 1], [], []>} : vector<2x14xf32>, vector<14x128xf32>, vector<2x128xf32> -> vector<2x128xf32>
    %139 = arith.addf %134, %138 : vector<2x128xf32>
    %c4 = arith.constant 4 : index
    %c0_116 = arith.constant 0 : index
    %c0_117 = arith.constant 0 : index
    %140 = vector.load %arg26[%c4, %c0_116, %c0_117] : memref<7x2x14xf32, #tpu.memory_space<vmem>>, vector<1x2x14xf32>
    %141 = vector.shape_cast %140 : vector<1x2x14xf32> to vector<2x14xf32>
    %142 = vector.extract_strided_slice %120 {offsets = [0, 512], sizes = [14, 128], strides = [1, 1]} : vector<14x896xf32> to vector<14x128xf32>
    %cst_118 = arith.constant dense<0.000000e+00> : vector<2x128xf32>
    %143 = tpu.matmul %141, %142, %cst_118 {dimension_numbers = #tpu.dot_dimension_numbers<[1], [0], [0], [1], [0, 0, 1, 1], [], []>} : vector<2x14xf32>, vector<14x128xf32>, vector<2x128xf32> -> vector<2x128xf32>
    %144 = arith.addf %139, %143 : vector<2x128xf32>
    %c5 = arith.constant 5 : index
    %c0_119 = arith.constant 0 : index
    %c0_120 = arith.constant 0 : index
    %145 = vector.load %arg26[%c5, %c0_119, %c0_120] : memref<7x2x14xf32, #tpu.memory_space<vmem>>, vector<1x2x14xf32>
    %146 = vector.shape_cast %145 : vector<1x2x14xf32> to vector<2x14xf32>
    %147 = vector.extract_strided_slice %120 {offsets = [0, 640], sizes = [14, 128], strides = [1, 1]} : vector<14x896xf32> to vector<14x128xf32>
    %cst_121 = arith.constant dense<0.000000e+00> : vector<2x128xf32>
    %148 = tpu.matmul %146, %147, %cst_121 {dimension_numbers = #tpu.dot_dimension_numbers<[1], [0], [0], [1], [0, 0, 1, 1], [], []>} : vector<2x14xf32>, vector<14x128xf32>, vector<2x128xf32> -> vector<2x128xf32>
    %149 = arith.addf %144, %148 : vector<2x128xf32>
    %c6 = arith.constant 6 : index
    %c0_122 = arith.constant 0 : index
    %c0_123 = arith.constant 0 : index
    %150 = vector.load %arg26[%c6, %c0_122, %c0_123] : memref<7x2x14xf32, #tpu.memory_space<vmem>>, vector<1x2x14xf32>
    %151 = vector.shape_cast %150 : vector<1x2x14xf32> to vector<2x14xf32>
    %152 = vector.extract_strided_slice %120 {offsets = [0, 768], sizes = [14, 128], strides = [1, 1]} : vector<14x896xf32> to vector<14x128xf32>
    %cst_124 = arith.constant dense<0.000000e+00> : vector<2x128xf32>
    %153 = tpu.matmul %151, %152, %cst_124 {dimension_numbers = #tpu.dot_dimension_numbers<[1], [0], [0], [1], [0, 0, 1, 1], [], []>} : vector<2x14xf32>, vector<14x128xf32>, vector<2x128xf32> -> vector<2x128xf32>
    %154 = arith.addf %149, %153 : vector<2x128xf32>
    %c0_125 = arith.constant 0 : index
    %c0_126 = arith.constant 0 : index
    %155 = vector.load %arg27[%c0_125, %c0_126] : memref<1x128xf32, #tpu.memory_space<vmem>>, vector<1x128xf32>
    %156 = vector.broadcast %155 : vector<1x128xf32> to vector<2x128xf32>
    %157 = arith.addf %154, %156 : vector<2x128xf32>
    %cst_127 = arith.constant 0.000000e+00 : f32
    %158 = vector.broadcast %cst_127 : f32 to vector<2x128xf32>
    %159 = arith.maximumf %157, %158 : vector<2x128xf32>
    %c0_128 = arith.constant 0 : index
    %c0_129 = arith.constant 0 : index
    %160 = vector.load %arg28[%c0_128, %c0_129] : memref<128x128xf32, #tpu.memory_space<vmem>>, vector<128x128xf32>
    %cst_130 = arith.constant dense<0.000000e+00> : vector<2x128xf32>
    %161 = tpu.matmul %159, %160, %cst_130 {dimension_numbers = #tpu.dot_dimension_numbers<[1], [0], [0], [1], [0, 0, 1, 1], [], []>} : vector<2x128xf32>, vector<128x128xf32>, vector<2x128xf32> -> vector<2x128xf32>
    %c0_131 = arith.constant 0 : index
    %c0_132 = arith.constant 0 : index
    %162 = vector.load %arg29[%c0_131, %c0_132] : memref<1x128xf32, #tpu.memory_space<vmem>>, vector<1x128xf32>
    %163 = vector.broadcast %162 : vector<1x128xf32> to vector<2x128xf32>
    %164 = arith.addf %161, %163 : vector<2x128xf32>
    %165 = vector.extract_strided_slice %164 {offsets = [0, 0], sizes = [2, 10], strides = [1, 1]} : vector<2x128xf32> to vector<2x10xf32>
    %cst_133 = arith.constant dense<0xFF800000> : vector<2xf32>
    %166 = vector.multi_reduction <maximumf>, %165, %cst_133 [1] : vector<2x10xf32> to vector<2xf32>
    %167 = vector.shape_cast %166 : vector<2xf32> to vector<2x1xf32>
    %168 = vector.broadcast %167 : vector<2x1xf32> to vector<2x10xf32>
    %169 = arith.subf %165, %168 : vector<2x10xf32>
    %170 = math.exp %169 : vector<2x10xf32>
    %cst_134 = arith.constant dense<0.000000e+00> : vector<2xf32>
    %171 = vector.multi_reduction <add>, %170, %cst_134 [1] : vector<2x10xf32> to vector<2xf32>
    %172 = vector.shape_cast %171 : vector<2xf32> to vector<2x1xf32>
    %173 = math.log %172 : vector<2x1xf32>
    %174 = vector.broadcast %167 : vector<2x1xf32> to vector<2x128xf32>
    %175 = arith.subf %164, %174 : vector<2x128xf32>
    %176 = vector.broadcast %173 : vector<2x1xf32> to vector<2x128xf32>
    %177 = arith.subf %175, %176 : vector<2x128xf32>
    %c0_135 = arith.constant 0 : index
    %c0_136 = arith.constant 0 : index
    %178 = vector.load %arg30[%c0_135, %c0_136] : memref<2x128xf32, #tpu.memory_space<vmem>>, vector<2x128xf32>
    tpu.vector_store %arg30[%c0_135, %c0_136], %177 {strides = array<i32>} : memref<2x128xf32, #tpu.memory_space<vmem>>, vector<2x128xf32>,
    return
  }
}

</mosaic_0001>

<bundles_post_ra>
// kernel: conv_network_forward.1
= control target key start
LH: loop header
LB: loop body
LE: loop exit
PB: predicated region body
PF: predicated region fallthrough
CT: control target
= control target key end

     0   :  { %s10644_s6 = smov 1   ;;  %s10645_s10 = smov 2   ;;  %s12537_s0 = inlined_call_operand.smem [shape: u32[31], index: -1, kind: input, shape index: {}] }
   0x1   :  { %s10724_s5 = sld [smem:[%s12537_s0]]   ;;  %s10646_s14 = smov 3  }
   0x2   :  { %s10729_s9 = sld [smem:[%s12537_s0 + %s10644_s6]]   ;;  %s10647_s18 = smov 4  }
   0x3   :  { %s10734_s13 = sld [smem:[%s12537_s0 + %s10645_s10]]   ;;  %s10648_s22 = smov 5  }
   0x4   :  { %s10739_s17 = sld [smem:[%s12537_s0 + %s10646_s14]]   ;;  %s10649_s26 = smov 6  }
   0x5   :  { %s10744_s21 = sld [smem:[%s12537_s0 + %s10647_s18]]   ;;  %s10650_s30 = smov 7  }
   0x6   :  { %s10749_s25 = sld [smem:[%s12537_s0 + %s10648_s22]]   ;;  %s10651_s4 = smov 8  }
   0x7   :  { %s10754_s29 = sld [smem:[%s12537_s0 + %s10649_s26]]   ;;  %s10652_s10 = smov 9  }
   0x8   :  { %s10759_s3 = sld [smem:[%s12537_s0 + %s10650_s30]]   ;;  %s10653_s15 = smov 10  }
   0x9   :  { %s10764_s8 = sld [smem:[%s12537_s0 + %s10651_s4]]   ;;  %s10654_s20 = smov 11  }
   0xa   :  { %s10769_s14 = sld [smem:[%s12537_s0 + %s10652_s10]]   ;;  %s10655_s26 = smov 12  }
   0xb   :  { %12597 = sst [smem:[#allocation63_spill]] %s10744_s21  ;;  %s10656_s1 = smov 13  }
   0xc   :  { %s10774_s19 = sld [smem:[%s12537_s0 + %s10653_s15]]   ;;  %s10657_s7 = smov 14  }
   0xd   :  { %12598 = sst [smem:[#allocation64_spill]] %s10754_s29  ;;  %s10658_s15 = smov 15  }
   0xe   :  { %12599 = sst [smem:[#allocation65_spill]] %s10759_s3  ;;  %s10659_s22 = smov 16  }
   0xf   :  { %s10779_s24 = sld [smem:[%s12537_s0 + %s10654_s20]]   ;;  %s10660_s28 = smov 17  }
  0x10   :  { %12600 = sst [smem:[#allocation66_spill]] %s10769_s14 }
  0x11   :  { %s10784_s30 = sld [smem:[%s12537_s0 + %s10655_s26]]  }
  0x12   :  { %s10789_s6 = sld [smem:[%s12537_s0 + %s10656_s1]]  }
  0x13   :  { %s10794_s12 = sld [smem:[%s12537_s0 + %s10657_s7]]   ;;  %s10661_s7 = smov 18  }
  0x14   :  { %s10799_s20 = sld [smem:[%s12537_s0 + %s10658_s15]]   ;;  %s10662_s15 = smov 19  }
  0x15   :  { %12601 = sst [smem:[#allocation67_spill]] %s10779_s24 }
  0x16   :  { %s10804_s27 = sld [smem:[%s12537_s0 + %s10659_s22]]   ;;  %s10663_s22 = smov 20  }
  0x17   :  { %s10809_s4 = sld [smem:[%s12537_s0 + %s10660_s28]]   ;;  %s10664_s28 = smov 21  }
  0x18   :  { %12602 = sst [smem:[#allocation68_spill]] %s10789_s6 }
  0x19   :  { %s10814_s3 = sld [smem:[%s12537_s0 + %s10661_s7]]   ;;  %s10665_s7 = smov 22  }
  0x1a   :  { %12603 = sst [smem:[#allocation69_spill]] %s10799_s20 }
  0x1b   :  { %s10819_s20 = sld [smem:[%s12537_s0 + %s10662_s15]]   ;;  %s10666_s15 = smov 23  }
  0x1c   :  { %s10824_s6 = sld [smem:[%s12537_s0 + %s10663_s22]]   ;;  %s10667_s22 = smov 24  }
  0x1d   :  { %12604 = sst [smem:[#allocation70_spill]] %s10809_s4 }
  0x1e   :  { %s10829_s4 = sld [smem:[%s12537_s0 + %s10664_s28]]   ;;  %s10668_s28 = smov 25  }
  0x1f   :  { %s10834_s24 = sld [smem:[%s12537_s0 + %s10665_s7]]   ;;  %s10669_s7 = smov 26  }
  0x20   :  { %s10849_s14 = sld [smem:[%s12537_s0 + %s10668_s28]]   ;;  %s10672_s28 = smov 29  }
  0x21   :  { %12605 = sst [smem:[#allocation71_spill]] %s10819_s20 }
  0x22   :  { %12606 = sst [smem:[#allocation72_spill]] %s10824_s6 }
  0x23   :  { %s10839_s20 = sld [smem:[%s12537_s0 + %s10666_s15]]   ;;  %s10670_s15 = smov 27  }
  0x24   :  { %s10844_s6 = sld [smem:[%s12537_s0 + %s10667_s22]]   ;;  %s10671_s22 = smov 28  }
  0x25   :  { %12607 = sst [smem:[#allocation73_spill]] %s10834_s24 }
  0x26   :  { %s10854_s24 = sld [smem:[%s12537_s0 + %s10669_s7]]   ;;  %s10673_s7 = smov 30  }
  0x27   :  { %s10859_s29 = sld [smem:[%s12537_s0 + %s10670_s15]]  }
  0x28   :  { %s10869_s21 = sld [smem:[%s12537_s0 + %s10672_s28]]  }
  0x2a   :  { %12608 = sst [smem:[#allocation74_spill]] %s10844_s6 }
  0x2b   :  { %s10864_s6 = sld [smem:[%s12537_s0 + %s10671_s22]]  }
  0x2c   :  { %12609 = sst [smem:[#allocation75_spill]] %s10854_s24 }
  0x2d   :  { %s10874_s24 = sld [smem:[%s12537_s0 + %s10673_s7]]  }
  0x2e   :  { %66 = vsyncpa [#allocation3], 0 }
  0x2f   :  { %67 = vsyncpa [#allocation6], 0 }
  0x30   :  { %68 = vsyncpa [#allocation9], 0 }
  0x31   :  { %69 = vsyncpa [#allocation12], 0 }
  0x32   :  { %70 = vsyncpa [#allocation15], 0 }
  0x33   :  { %71 = vsyncpa [#allocation18], 0 }
  0x34   :  { %72 = vsyncpa [#allocation21], 0 }
  0x35   :  { %73 = vsyncpa [#allocation24], 0 }
  0x36   :  { %74 = vsyncpa [#allocation27], 0 }
  0x37   :  { %75 = vsyncpa [#allocation30], 0 }
  0x38   :  { %76 = vsyncpa [#allocation33], 0 }
  0x39   :  { %77 = vsyncpa [#allocation36], 0 }
  0x3a   :  { %78 = vsyncpa [#allocation39], 0 }
  0x3b   :  { %79 = vsyncpa [#allocation42], 0 }
  0x3c   :  { %80 = vsyncpa [#allocation45], 0 }
  0x3d   :  { %81 = vsyncpa [#allocation4], 0  ;;  %s10674_s0 = smov [#allocation5]   ;;  %s10675_s16 = smov [#allocation8]  }
  0x3e   :  { %s99_s15 = sshll.u32 %s10674_s0, 4  ;;  %s123_s18 = sshll.u32 %s10675_s16, 4  ;;  %s100_s15 = int_to_ptr.vmem [resolvable:$true] %s99_s15  ;;  %s10876_s18 = int_to_ptr.vmem [resolvable:$true] %s123_s18 }
  0x3f   :  { %s9974_s22 = scalar_lea.hbm %s10729_s9, 896 }
  0x40   :  { %p9975_p0 = scmp.ne.s32.totalorder %s10729_s9, %s9974_s22  ;;  %p9978_p1 = scmp.lt.u32.totalorder %s9974_s22, %s10729_s9 }
  0x42   :  { %p9980_p2 = pnand %p9978_p1, %p9975_p0 }
  0x44   :  { %9983 = shalt.err (!%p9980_p2)
}
  0x45   :  { %s9984_s23 = scalar_lea.vmem %s100_s15, 896  ;;  %p9989_p4 = scmp.lt.s32.totalorder %s100_s15, %s100_s15 }
  0x46   :  { %p9985_p3 = scmp.ne.s32.totalorder %s100_s15, %s9984_s23  ;;  %p9990_p5 = scmp.lt.s32.totalorder %s9984_s23, %s9984_s23 }
  0x48   :  { %p9991_p6 = por %p9990_p5, %p9989_p4 }
  0x4a   :  { %p9992_p7 = pnand %p9991_p6, %p9985_p3 }
  0x4c   :  { %9995 = shalt.err (!%p9992_p7)
}
  0x4d   :  { %s10676_s26 = smov 128   ;;  %s10677_s28 = smov 8  }
  0x4e   :  { %105 = dma.hbm_to_vmem [thread:$0]  %s10729_s9, 896, %s100_s15, [#allocation6], %s10676_s26, %s10676_s26, %s10677_s28  }
  0x4f   :  { %s9996_s1 = scalar_lea.hbm %s10739_s17, 6144 }
  0x50   :  { %p9997_p8 = scmp.ne.s32.totalorder %s10739_s17, %s9996_s1  ;;  %p10000_p9 = scmp.lt.u32.totalorder %s9996_s1, %s10739_s17 }
  0x52   :  { %p10002_p10 = pnand %p10000_p9, %p9997_p8 }
  0x54   :  { %10005 = shalt.err (!%p10002_p10)
}
  0x55   :  { %s10006_s2 = scalar_lea.vmem %s10876_s18, 6144  ;;  %p10011_p12 = scmp.lt.s32.totalorder %s10876_s18, %s10876_s18 }
  0x56   :  { %p10007_p11 = scmp.ne.s32.totalorder %s10876_s18, %s10006_s2  ;;  %p10012_p13 = scmp.lt.s32.totalorder %s10006_s2, %s10006_s2 }
  0x58   :  { %p10013_p0 = por %p10012_p13, %p10011_p12 }
  0x5a   :  { %p10014_p1 = pnand %p10013_p0, %p10007_p11 }
  0x5c   :  { %10017 = shalt.err (!%p10014_p1)
}
  0x5d   :  { %s10678_s7 = smov 512   ;;  %s10679_s9 = smov 32  }
  0x5e   :  { %129 = dma.hbm_to_vmem [thread:$0]  %s10739_s17, 6144, %s10876_s18, [#allocation9], %s10678_s7, %s10678_s7, %s10679_s9  }
  0x5f   :  { %s10680_s10 = smov [#allocation11]   ;;  %s10681_s0 = smov [#allocation14]  }
  0x60   :  { %s146_s11 = sshll.u32 %s10680_s10, 4  ;;  %s167_s15 = sshll.u32 %s10681_s0, 4  ;;  %s147_s11 = int_to_ptr.vmem [resolvable:$true] %s146_s11  ;;  %s10897_s15 = int_to_ptr.vmem [resolvable:$true] %s167_s15 }
  0x61   :  { %s10018_s16 = scalar_lea.hbm %s10749_s25, 16 }
  0x62   :  { %p10019_p2 = scmp.ne.s32.totalorder %s10749_s25, %s10018_s16  ;;  %p10022_p3 = scmp.lt.u32.totalorder %s10018_s16, %s10749_s25 }
  0x64   :  { %p10024_p4 = pnand %p10022_p3, %p10019_p2 }
  0x66   :  { %10027 = shalt.err (!%p10024_p4)
}
  0x67   :  { %s10028_s22 = scalar_lea.vmem %s147_s11, 16  ;;  %s10032_s23 = scalar_lea.vmem %s147_s11, 32 }
  0x68   :  { %p10029_p5 = scmp.ne.s32.totalorder %s147_s11, %s10028_s22  ;;  %p10033_p6 = scmp.lt.s32.totalorder %s147_s11, %s147_s11 }
  0x69   :  { %p10034_p7 = scmp.lt.s32.totalorder %s10032_s23, %s10028_s22 }
  0x6b   :  { %p10035_p8 = por %p10034_p7, %p10033_p6 }
  0x6d   :  { %p10036_p9 = pnand %p10035_p8, %p10029_p5 }
  0x6f   :  { %10039 = shalt.err (!%p10036_p9)
}
  0x70   :  { %149 = dma.hbm_to_vmem [thread:$0]  %s10749_s25, 16, %s147_s11, [#allocation12]  }
  0x71   :  { %s10040_s17 = scalar_lea.hbm %s10764_s8, 1024 }
  0x72   :  { %p10041_p10 = scmp.ne.s32.totalorder %s10764_s8, %s10040_s17  ;;  %p10044_p11 = scmp.lt.u32.totalorder %s10040_s17, %s10764_s8 }
  0x74   :  { %p10046_p12 = pnand %p10044_p11, %p10041_p10 }
  0x76   :  { %10049 = shalt.err (!%p10046_p12)
}
  0x77   :  { %s10050_s18 = scalar_lea.vmem %s10897_s15, 1024  ;;  %p10055_p0 = scmp.lt.s32.totalorder %s10897_s15, %s10897_s15 }
  0x78   :  { %p10051_p13 = scmp.ne.s32.totalorder %s10897_s15, %s10050_s18  ;;  %p10056_p1 = scmp.lt.s32.totalorder %s10050_s18, %s10050_s18 }
  0x7a   :  { %p10057_p2 = por %p10056_p1, %p10055_p0 }
  0x7c   :  { %p10058_p3 = pnand %p10057_p2, %p10051_p13 }
  0x7e   :  { %10061 = shalt.err (!%p10058_p3)
}
  0x7f   :  { %173 = dma.hbm_to_vmem [thread:$0]  %s10764_s8, 1024, %s10897_s15, [#allocation15], %s10678_s7, %s10678_s7, %s10679_s9  }
  0x80   :  { %s10682_s25 = smov [#allocation17]   ;;  %s10062_s2 = scalar_lea.hbm %s10774_s19, 512 }
  0x81   :  { %s191_s1 = sshll.u32 %s10682_s25, 4  ;;  %p10063_p4 = scmp.ne.s32.totalorder %s10774_s19, %s10062_s2  ;;  %s192_s1 = int_to_ptr.vmem [resolvable:$true] %s191_s1 }
  0x82   :  { %p10066_p5 = scmp.lt.u32.totalorder %s10062_s2, %s10774_s19 }
  0x84   :  { %p10068_p6 = pnand %p10066_p5, %p10063_p4 }
  0x86   :  { %10071 = shalt.err (!%p10068_p6)
}
  0x87   :  { %s10072_s10 = scalar_lea.vmem %s192_s1, 512  ;;  %p10077_p8 = scmp.lt.s32.totalorder %s192_s1, %s192_s1 }
  0x88   :  { %p10073_p7 = scmp.ne.s32.totalorder %s192_s1, %s10072_s10  ;;  %p10078_p9 = scmp.lt.s32.totalorder %s10072_s10, %s10072_s10 }
  0x8a   :  { %p10079_p10 = por %p10078_p9, %p10077_p8 }
  0x8c   :  { %p10080_p11 = pnand %p10079_p10, %p10073_p7 }
  0x8e   :  { %10083 = shalt.err (!%p10080_p11)
}
  0x8f   :  { %197 = dma.hbm_to_vmem [thread:$0]  %s10774_s19, 512, %s192_s1, [#allocation18], %s10676_s26, %s10676_s26, %s10677_s28  }
  0x90   :  { %s10683_s8 = smov [#allocation20]   ;;  %s10684_s0 = smov [#allocation23]  }
  0x91   :  { %s215_s11 = sshll.u32 %s10683_s8, 4  ;;  %s239_s15 = sshll.u32 %s10684_s0, 4  ;;  %s216_s11 = int_to_ptr.vmem [resolvable:$true] %s215_s11  ;;  %s240_s15 = int_to_ptr.vmem [resolvable:$true] %s239_s15 }
  0x92   :  { %s10084_s16 = scalar_lea.hbm %s10784_s30, 14336 }
  0x93   :  { %p10085_p12 = scmp.ne.s32.totalorder %s10784_s30, %s10084_s16  ;;  %p10088_p13 = scmp.lt.u32.totalorder %s10084_s16, %s10784_s30 }
  0x95   :  { %p10090_p0 = pnand %p10088_p13, %p10085_p12 }
  0x97   :  { %10093 = shalt.err (!%p10090_p0)
}
  0x98   :  { %s10094_s22 = scalar_lea.vmem %s216_s11, 14336  ;;  %p10099_p2 = scmp.lt.s32.totalorder %s216_s11, %s216_s11 }
  0x99   :  { %p10095_p1 = scmp.ne.s32.totalorder %s216_s11, %s10094_s22  ;;  %p10100_p3 = scmp.lt.s32.totalorder %s10094_s22, %s10094_s22 }
  0x9b   :  { %p10101_p4 = por %p10100_p3, %p10099_p2 }
  0x9d   :  { %p10102_p5 = pnand %p10101_p4, %p10095_p1 }
  0x9f   :  { %10105 = shalt.err (!%p10102_p5)
}
  0xa0   :  { %s10685_s23 = smov 256   ;;  %s10686_s19 = smov 16  }
  0xa1   :  { %221 = dma.hbm_to_vmem [thread:$0]  %s10784_s30, 14336, %s216_s11, [#allocation21], %s10685_s23, %s10685_s23, %s10686_s19  }
  0xa2   :  { %s10106_s17 = scalar_lea.hbm %s10794_s12, 512 }
  0xa3   :  { %p10107_p6 = scmp.ne.s32.totalorder %s10794_s12, %s10106_s17  ;;  %p10110_p7 = scmp.lt.u32.totalorder %s10106_s17, %s10794_s12 }
  0xa5   :  { %p10112_p8 = pnand %p10110_p7, %p10107_p6 }
  0xa7   :  { %10115 = shalt.err (!%p10112_p8)
}
  0xa8   :  { %s10116_s18 = scalar_lea.vmem %s240_s15, 512  ;;  %p10121_p10 = scmp.lt.s32.totalorder %s240_s15, %s240_s15 }
  0xa9   :  { %p10117_p9 = scmp.ne.s32.totalorder %s240_s15, %s10116_s18  ;;  %p10122_p11 = scmp.lt.s32.totalorder %s10116_s18, %s10116_s18 }
  0xab   :  { %p10123_p12 = por %p10122_p11, %p10121_p10 }
  0xad   :  { %p10124_p13 = pnand %p10123_p12, %p10117_p9 }
  0xaf   :  { %10127 = shalt.err (!%p10124_p13)
}
  0xb0   :  { %245 = dma.hbm_to_vmem [thread:$0]  %s10794_s12, 512, %s240_s15, [#allocation24], %s10676_s26, %s10676_s26, %s10677_s28  }
  0xb1   :  { %s10687_s30 = smov [#allocation26]   ;;  %s10688_s1 = smov [#allocation29]  }
  0xb2   :  { %s264_s25 = sshll.u32 %s10687_s30, 4  ;;  %s284_s2 = sshll.u32 %s10688_s1, 4  ;;  %s265_s25 = int_to_ptr.vmem [resolvable:$true] %s264_s25  ;;  %s285_s2 = int_to_ptr.vmem [resolvable:$true] %s284_s2 }
  0xb3   :  { %s10128_s10 = scalar_lea.hbm %s10804_s27, 64 }
  0xb4   :  { %p10129_p0 = scmp.ne.s32.totalorder %s10804_s27, %s10128_s10  ;;  %p10132_p1 = scmp.lt.u32.totalorder %s10128_s10, %s10804_s27 }
  0xb6   :  { %p10134_p2 = pnand %p10132_p1, %p10129_p0 }
  0xb8   :  { %10137 = shalt.err (!%p10134_p2)
}
  0xb9   :  { %s10138_s8 = scalar_lea.vmem %s265_s25, 64  ;;  %p10143_p4 = scmp.lt.s32.totalorder %s265_s25, %s265_s25 }
  0xba   :  { %p10139_p3 = scmp.ne.s32.totalorder %s265_s25, %s10138_s8  ;;  %p10144_p5 = scmp.lt.s32.totalorder %s10138_s8, %s10138_s8 }
  0xbc   :  { %p10145_p6 = por %p10144_p5, %p10143_p4 }
  0xbe   :  { %p10146_p7 = pnand %p10145_p6, %p10139_p3 }
  0xc0   :  { %10149 = shalt.err (!%p10146_p7)
}
  0xc1   :  { %267 = dma.hbm_to_vmem [thread:$0]  %s10804_s27, 64, %s265_s25, [#allocation27]  }
  0xc2   :  { %s10150_s12 = scalar_lea.hbm %s10814_s3, 16 }
  0xc3   :  { %p10151_p8 = scmp.ne.s32.totalorder %s10814_s3, %s10150_s12  ;;  %p10154_p9 = scmp.lt.u32.totalorder %s10150_s12, %s10814_s3 }
  0xc5   :  { %p10156_p10 = pnand %p10154_p9, %p10151_p8 }
  0xc7   :  { %10159 = shalt.err (!%p10156_p10)
}
  0xc8   :  { %s10160_s11 = scalar_lea.vmem %s285_s2, 16  ;;  %s10164_s0 = scalar_lea.vmem %s285_s2, 32 }
  0xc9   :  { %p10161_p11 = scmp.ne.s32.totalorder %s285_s2, %s10160_s11  ;;  %p10165_p12 = scmp.lt.s32.totalorder %s285_s2, %s285_s2 }
  0xca   :  { %p10166_p13 = scmp.lt.s32.totalorder %s10164_s0, %s10160_s11 }
  0xcc   :  { %p10167_p0 = por %p10166_p13, %p10165_p12 }
  0xce   :  { %p10168_p1 = pnand %p10167_p0, %p10161_p11 }
  0xd0   :  { %10171 = shalt.err (!%p10168_p1)
}
  0xd1   :  { %287 = dma.hbm_to_vmem [thread:$0]  %s10814_s3, 16, %s285_s2, [#allocation30]  }
  0xd2   :  { %s10689_s27 = smov [#allocation32]   ;;  %s10690_s16 = smov [#allocation35]  }
  0xd3   :  { %s307_s15 = sshll.u32 %s10689_s27, 4  ;;  %s331_s22 = sshll.u32 %s10690_s16, 4  ;;  %s308_s15 = int_to_ptr.vmem [resolvable:$true] %s307_s15  ;;  %s332_s22 = int_to_ptr.vmem [resolvable:$true] %s331_s22 }
  0xd4   :  { %s10172_s17 = scalar_lea.hbm %s10829_s4, 256 }
  0xd5   :  { %p10173_p2 = scmp.ne.s32.totalorder %s10829_s4, %s10172_s17  ;;  %p10176_p3 = scmp.lt.u32.totalorder %s10172_s17, %s10829_s4 }
  0xd7   :  { %p10178_p4 = pnand %p10176_p3, %p10173_p2 }
  0xd9   :  { %10181 = shalt.err (!%p10178_p4)
}
  0xda   :  { %s10182_s18 = scalar_lea.vmem %s308_s15, 256  ;;  %p10187_p6 = scmp.lt.s32.totalorder %s308_s15, %s308_s15 }
  0xdb   :  { %p10183_p5 = scmp.ne.s32.totalorder %s308_s15, %s10182_s18  ;;  %p10188_p7 = scmp.lt.s32.totalorder %s10182_s18, %s10182_s18 }
  0xdd   :  { %p10189_p8 = por %p10188_p7, %p10187_p6 }
  0xdf   :  { %p10190_p9 = pnand %p10189_p8, %p10183_p5 }
  0xe1   :  { %10193 = shalt.err (!%p10190_p9)
}
  0xe2   :  { %313 = dma.hbm_to_vmem [thread:$0]  %s10829_s4, 256, %s308_s15, [#allocation33], %s10676_s26, %s10676_s26, %s10677_s28  }
  0xe3   :  { %s10194_s3 = scalar_lea.hbm %s10839_s20, 14336 }
  0xe4   :  { %p10195_p10 = scmp.ne.s32.totalorder %s10839_s20, %s10194_s3  ;;  %p10198_p11 = scmp.lt.u32.totalorder %s10194_s3, %s10839_s20 }
  0xe6   :  { %p10200_p12 = pnand %p10198_p11, %p10195_p10 }
  0xe8   :  { %10203 = shalt.err (!%p10200_p12)
}
  0xe9   :  { %s10204_s30 = scalar_lea.vmem %s332_s22, 14336  ;;  %p10209_p0 = scmp.lt.s32.totalorder %s332_s22, %s332_s22 }
  0xea   :  { %p10205_p13 = scmp.ne.s32.totalorder %s332_s22, %s10204_s30  ;;  %p10210_p1 = scmp.lt.s32.totalorder %s10204_s30, %s10204_s30 }
  0xec   :  { %p10211_p2 = por %p10210_p1, %p10209_p0 }
  0xee   :  { %p10212_p3 = pnand %p10211_p2, %p10205_p13 }
  0xf0   :  { %10215 = shalt.err (!%p10212_p3)
}
  0xf1   :  { %337 = dma.hbm_to_vmem [thread:$0]  %s10839_s20, 14336, %s332_s22, [#allocation36], %s10685_s23, %s10685_s23, %s10686_s19  }
  0xf2   :  { %s10691_s4 = smov [#allocation38]   ;;  %s10216_s1 = scalar_lea.hbm %s10849_s14, 25088 }
  0xf3   :  { %s355_s25 = sshll.u32 %s10691_s4, 4  ;;  %p10217_p4 = scmp.ne.s32.totalorder %s10849_s14, %s10216_s1  ;;  %s356_s25 = int_to_ptr.vmem [resolvable:$true] %s355_s25 }
  0xf4   :  { %p10220_p5 = scmp.lt.u32.totalorder %s10216_s1, %s10849_s14 }
  0xf6   :  { %p10222_p6 = pnand %p10220_p5, %p10217_p4 }
  0xf8   :  { %10225 = shalt.err (!%p10222_p6)
}
  0xf9   :  { %s10226_s2 = scalar_lea.vmem %s356_s25, 25088  ;;  %p10231_p8 = scmp.lt.s32.totalorder %s356_s25, %s356_s25 }
  0xfa   :  { %p10227_p7 = scmp.ne.s32.totalorder %s356_s25, %s10226_s2  ;;  %p10232_p9 = scmp.lt.s32.totalorder %s10226_s2, %s10226_s2 }
  0xfc   :  { %p10233_p10 = por %p10232_p9, %p10231_p8 }
  0xfe   :  { %p10234_p11 = pnand %p10233_p10, %p10227_p7 }
 0x100   :  { %10237 = shalt.err (!%p10234_p11)
}
 0x101   :  { %s10692_s10 = smov 896   ;;  %s10693_s20 = smov 56  }
 0x102   :  { %361 = dma.hbm_to_vmem [thread:$0]  %s10849_s14, 25088, %s356_s25, [#allocation39], %s10692_s10, %s10692_s10, %s10693_s20  }
 0x103   :  { %s10694_s8 = smov [#allocation41]   ;;  %s10695_s11 = smov [#allocation2]  }
 0x104   :  { %s380_s12 = sshll.u32 %s10694_s8, 4  ;;  %s87_s0 = sshll.u32 %s10695_s11, 4  ;;  %s381_s12 = int_to_ptr.vmem [resolvable:$true] %s380_s12  ;;  %s10962_s0 = int_to_ptr.vmem [resolvable:$true] %s87_s0 }
 0x105   :  { %s10238_s27 = scalar_lea.hbm %s10859_s29, 16 }
 0x106   :  { %p10239_p12 = scmp.ne.s32.totalorder %s10859_s29, %s10238_s27  ;;  %p10242_p13 = scmp.lt.u32.totalorder %s10238_s27, %s10859_s29 }
 0x108   :  { %p10244_p0 = pnand %p10242_p13, %p10239_p12 }
 0x10a   :  { %10247 = shalt.err (!%p10244_p0)
}
 0x10b   :  { %s10248_s15 = scalar_lea.vmem %s381_s12, 16  ;;  %s10252_s16 = scalar_lea.vmem %s381_s12, 32 }
 0x10c   :  { %p10249_p1 = scmp.ne.s32.totalorder %s381_s12, %s10248_s15  ;;  %p10253_p2 = scmp.lt.s32.totalorder %s381_s12, %s381_s12 }
 0x10d   :  { %p10254_p3 = scmp.lt.s32.totalorder %s10252_s16, %s10248_s15 }
 0x10f   :  { %p10255_p4 = por %p10254_p3, %p10253_p2 }
 0x111   :  { %p10256_p5 = pnand %p10255_p4, %p10249_p1 }
 0x113   :  { %10259 = shalt.err (!%p10256_p5)
}
 0x114   :  { %383 = dma.hbm_to_vmem [thread:$0]  %s10859_s29, 16, %s381_s12, [#allocation42]  }
 0x115   :  { %s10260_s14 = scalar_lea.hbm %s10724_s5, 896 }
 0x116   :  { %p10261_p6 = scmp.ne.s32.totalorder %s10724_s5, %s10260_s14  ;;  %p10264_p7 = scmp.lt.u32.totalorder %s10260_s14, %s10724_s5 }
 0x118   :  { %p10266_p8 = pnand %p10264_p7, %p10261_p6 }
 0x11a   :  { %10269 = shalt.err (!%p10266_p8)
}
 0x11b   :  { %s10270_s22 = scalar_lea.vmem %s10962_s0, 896  ;;  %p10275_p10 = scmp.lt.s32.totalorder %s10962_s0, %s10962_s0 }
 0x11c   :  { %p10271_p9 = scmp.ne.s32.totalorder %s10962_s0, %s10270_s22  ;;  %p10276_p11 = scmp.lt.s32.totalorder %s10270_s22, %s10270_s22 }
 0x11e   :  { %p10277_p12 = por %p10276_p11, %p10275_p10 }
 0x120   :  { %p10278_p13 = pnand %p10277_p12, %p10271_p9 }
 0x122   :  { %10281 = shalt.err (!%p10278_p13)
}
 0x123   :  { %93 = dma.hbm_to_vmem [thread:$0]  %s10724_s5, 896, %s10962_s0, [#allocation3], %s10676_s26, %s10676_s26, %s10677_s28  }
 0x124   :  { %s10696_s29 = smov [#allocation7]   ;;  %s10697_s18 = smov [#allocation10]  }
 0x125   :  { %s111_s17 = sshll.u32 %s10696_s29, 4  ;;  %s136_s3 = sshll.u32 %s10697_s18, 4  ;;  %s112_s17 = int_to_ptr.vmem [resolvable:$true] %s111_s17  ;;  %s137_s3 = int_to_ptr.vmem [resolvable:$true] %s136_s3 }
 0x126   :  { %s10282_s30 = scalar_lea.hbm %s10734_s13, 896 }
 0x127   :  { %p10283_p0 = scmp.ne.s32.totalorder %s10734_s13, %s10282_s30  ;;  %p10286_p1 = scmp.lt.u32.totalorder %s10282_s30, %s10734_s13 }
 0x129   :  { %p10288_p2 = pnand %p10286_p1, %p10283_p0 }
 0x12b   :  { %10291 = shalt.err (!%p10288_p2)
}
 0x12c   :  { %s10292_s4 = scalar_lea.vmem %s112_s17, 896  ;;  %p10297_p4 = scmp.lt.s32.totalorder %s112_s17, %s112_s17 }
 0x12d   :  { %p10293_p3 = scmp.ne.s32.totalorder %s112_s17, %s10292_s4  ;;  %p10298_p5 = scmp.lt.s32.totalorder %s10292_s4, %s10292_s4 }
 0x12f   :  { %p10299_p6 = por %p10298_p5, %p10297_p4 }
 0x131   :  { %p10300_p7 = pnand %p10299_p6, %p10293_p3 }
 0x133   :  { %10303 = shalt.err (!%p10300_p7)
}
 0x134   :  { %s12610_s5 = sld [smem:[#allocation63_spill]] }
 0x135   :  { %117 = dma.hbm_to_vmem [thread:$0]  %s10734_s13, 896, %s112_s17, [#allocation6], %s10676_s26, %s10676_s26, %s10677_s28  }
 0x13a   :  { %s10304_s25 = scalar_lea.hbm %s12610_s5, 64 }
 0x13b   :  { %p10305_p8 = scmp.ne.s32.totalorder %s12610_s5, %s10304_s25  ;;  %p10308_p9 = scmp.lt.u32.totalorder %s10304_s25, %s12610_s5 }
 0x13d   :  { %p10310_p10 = pnand %p10308_p9, %p10305_p8 }
 0x13f   :  { %10313 = shalt.err (!%p10310_p10)
}
 0x140   :  { %s10314_s1 = scalar_lea.vmem %s137_s3, 64  ;;  %p10319_p12 = scmp.lt.s32.totalorder %s137_s3, %s137_s3 }
 0x141   :  { %p10315_p11 = scmp.ne.s32.totalorder %s137_s3, %s10314_s1  ;;  %p10320_p13 = scmp.lt.s32.totalorder %s10314_s1, %s10314_s1 }
 0x143   :  { %p10321_p0 = por %p10320_p13, %p10319_p12 }
 0x145   :  { %p10322_p1 = pnand %p10321_p0, %p10315_p11 }
 0x147   :  { %10325 = shalt.err (!%p10322_p1)
}
 0x148   :  { %s12611_s2 = sld [smem:[#allocation64_spill]]  ;;  %s10698_s10 = smov [#allocation13]  }
 0x149   :  { %139 = dma.hbm_to_vmem [thread:$0]  %s12610_s5, 64, %s137_s3, [#allocation9]  }
 0x14a   :  { %s156_s20 = sshll.u32 %s10698_s10, 4  ;;  %s10699_s13 = smov [#allocation16]   ;;  %s157_s20 = int_to_ptr.vmem [resolvable:$true] %s156_s20 }
 0x14b   :  { %s179_s8 = sshll.u32 %s10699_s13, 4  ;;  %s10991_s8 = int_to_ptr.vmem [resolvable:$true] %s179_s8 }
 0x14e   :  { %s10326_s12 = scalar_lea.hbm %s12611_s2, 16 }
 0x14f   :  { %p10327_p2 = scmp.ne.s32.totalorder %s12611_s2, %s10326_s12  ;;  %p10330_p3 = scmp.lt.u32.totalorder %s10326_s12, %s12611_s2 }
 0x151   :  { %p10332_p4 = pnand %p10330_p3, %p10327_p2 }
 0x153   :  { %10335 = shalt.err (!%p10332_p4)
}
 0x154   :  { %s10336_s11 = scalar_lea.vmem %s157_s20, 16  ;;  %s10340_s0 = scalar_lea.vmem %s157_s20, 32 }
 0x155   :  { %p10337_p5 = scmp.ne.s32.totalorder %s157_s20, %s10336_s11  ;;  %p10341_p6 = scmp.lt.s32.totalorder %s157_s20, %s157_s20 }
 0x156   :  { %p10342_p7 = scmp.lt.s32.totalorder %s10340_s0, %s10336_s11 }
 0x158   :  { %p10343_p8 = por %p10342_p7, %p10341_p6 }
 0x15a   :  { %p10344_p9 = pnand %p10343_p8, %p10337_p5 }
 0x15c   :  { %10347 = shalt.err (!%p10344_p9)
}
 0x15d   :  { %s12612_s27 = sld [smem:[#allocation66_spill]] }
 0x15e   :  { %159 = dma.hbm_to_vmem [thread:$0]  %s12611_s2, 16, %s157_s20, [#allocation12]  }
 0x163   :  { %s10348_s15 = scalar_lea.hbm %s12612_s27, 512 }
 0x164   :  { %p10349_p10 = scmp.ne.s32.totalorder %s12612_s27, %s10348_s15  ;;  %p10352_p11 = scmp.lt.u32.totalorder %s10348_s15, %s12612_s27 }
 0x166   :  { %p10354_p12 = pnand %p10352_p11, %p10349_p10 }
 0x168   :  { %10357 = shalt.err (!%p10354_p12)
}
 0x169   :  { %s10358_s16 = scalar_lea.vmem %s10991_s8, 512  ;;  %p10363_p0 = scmp.lt.s32.totalorder %s10991_s8, %s10991_s8 }
 0x16a   :  { %p10359_p13 = scmp.ne.s32.totalorder %s10991_s8, %s10358_s16  ;;  %p10364_p1 = scmp.lt.s32.totalorder %s10358_s16, %s10358_s16 }
 0x16c   :  { %p10365_p2 = por %p10364_p1, %p10363_p0 }
 0x16e   :  { %p10366_p3 = pnand %p10365_p2, %p10359_p13 }
 0x170   :  { %10369 = shalt.err (!%p10366_p3)
}
 0x171   :  { %s12613_s14 = sld [smem:[#allocation67_spill]]  ;;  %s10700_s22 = smov [#allocation19]  }
 0x172   :  { %185 = dma.hbm_to_vmem [thread:$0]  %s12612_s27, 512, %s10991_s8, [#allocation15], %s10676_s26, %s10676_s26, %s10677_s28  }
 0x173   :  { %s203_s29 = sshll.u32 %s10700_s22, 4  ;;  %s10701_s17 = smov [#allocation22]   ;;  %s204_s29 = int_to_ptr.vmem [resolvable:$true] %s203_s29 }
 0x174   :  { %s227_s18 = sshll.u32 %s10701_s17, 4  ;;  %s11009_s18 = int_to_ptr.vmem [resolvable:$true] %s227_s18 }
 0x177   :  { %s10370_s3 = scalar_lea.hbm %s12613_s14, 14336 }
 0x178   :  { %p10371_p4 = scmp.ne.s32.totalorder %s12613_s14, %s10370_s3  ;;  %p10374_p5 = scmp.lt.u32.totalorder %s10370_s3, %s12613_s14 }
 0x17a   :  { %p10376_p6 = pnand %p10374_p5, %p10371_p4 }
 0x17c   :  { %10379 = shalt.err (!%p10376_p6)
}
 0x17d   :  { %s10380_s30 = scalar_lea.vmem %s204_s29, 14336  ;;  %p10385_p8 = scmp.lt.s32.totalorder %s204_s29, %s204_s29 }
 0x17e   :  { %p10381_p7 = scmp.ne.s32.totalorder %s204_s29, %s10380_s30  ;;  %p10386_p9 = scmp.lt.s32.totalorder %s10380_s30, %s10380_s30 }
 0x180   :  { %p10387_p10 = por %p10386_p9, %p10385_p8 }
 0x182   :  { %p10388_p11 = pnand %p10387_p10, %p10381_p7 }
 0x184   :  { %10391 = shalt.err (!%p10388_p11)
}
 0x185   :  { %s12614_s4 = sld [smem:[#allocation68_spill]] }
 0x186   :  { %209 = dma.hbm_to_vmem [thread:$0]  %s12613_s14, 14336, %s204_s29, [#allocation18], %s10685_s23, %s10685_s23, %s10686_s19  }
 0x18b   :  { %s10392_s5 = scalar_lea.hbm %s12614_s4, 512 }
 0x18c   :  { %p10393_p12 = scmp.ne.s32.totalorder %s12614_s4, %s10392_s5  ;;  %p10396_p13 = scmp.lt.u32.totalorder %s10392_s5, %s12614_s4 }
 0x18e   :  { %p10398_p0 = pnand %p10396_p13, %p10393_p12 }
 0x190   :  { %10401 = shalt.err (!%p10398_p0)
}
 0x191   :  { %s10402_s25 = scalar_lea.vmem %s11009_s18, 512  ;;  %p10407_p2 = scmp.lt.s32.totalorder %s11009_s18, %s11009_s18 }
 0x192   :  { %p10403_p1 = scmp.ne.s32.totalorder %s11009_s18, %s10402_s25  ;;  %p10408_p3 = scmp.lt.s32.totalorder %s10402_s25, %s10402_s25 }
 0x194   :  { %p10409_p4 = por %p10408_p3, %p10407_p2 }
 0x196   :  { %p10410_p5 = pnand %p10409_p4, %p10403_p1 }
 0x198   :  { %10413 = shalt.err (!%p10410_p5)
}
 0x199   :  { %s12615_s1 = sld [smem:[#allocation69_spill]]  ;;  %s10702_s2 = smov [#allocation25]  }
 0x19a   :  { %233 = dma.hbm_to_vmem [thread:$0]  %s12614_s4, 512, %s11009_s18, [#allocation21], %s10676_s26, %s10676_s26, %s10677_s28  }
 0x19b   :  { %s251_s10 = sshll.u32 %s10702_s2, 4  ;;  %s10703_s20 = smov [#allocation28]   ;;  %s252_s10 = int_to_ptr.vmem [resolvable:$true] %s251_s10 }
 0x19c   :  { %s274_s13 = sshll.u32 %s10703_s20, 4  ;;  %s275_s13 = int_to_ptr.vmem [resolvable:$true] %s274_s13 }
 0x19f   :  { %s10414_s8 = scalar_lea.hbm %s12615_s1, 43008 }
 0x1a0   :  { %p10415_p6 = scmp.ne.s32.totalorder %s12615_s1, %s10414_s8  ;;  %p10418_p7 = scmp.lt.u32.totalorder %s10414_s8, %s12615_s1 }
 0x1a2   :  { %p10420_p8 = pnand %p10418_p7, %p10415_p6 }
 0x1a4   :  { %10423 = shalt.err (!%p10420_p8)
}
 0x1a5   :  { %s10424_s12 = scalar_lea.vmem %s252_s10, 43008  ;;  %p10429_p10 = scmp.lt.s32.totalorder %s252_s10, %s252_s10 }
 0x1a6   :  { %p10425_p9 = scmp.ne.s32.totalorder %s252_s10, %s10424_s12  ;;  %p10430_p11 = scmp.lt.s32.totalorder %s10424_s12, %s10424_s12 }
 0x1a8   :  { %p10431_p12 = por %p10430_p11, %p10429_p10 }
 0x1aa   :  { %p10432_p13 = pnand %p10431_p12, %p10425_p9 }
 0x1ac   :  { %10435 = shalt.err (!%p10432_p13)
}
 0x1ad   :  { %s12616_s11 = sld [smem:[#allocation70_spill]] }
 0x1ae   :  { %257 = dma.hbm_to_vmem [thread:$0]  %s12615_s1, 43008, %s252_s10, [#allocation24], %s10678_s7, %s10678_s7, %s10679_s9  }
 0x1b3   :  { %s10436_s0 = scalar_lea.hbm %s12616_s11, 16 }
 0x1b4   :  { %p10437_p0 = scmp.ne.s32.totalorder %s12616_s11, %s10436_s0  ;;  %p10440_p1 = scmp.lt.u32.totalorder %s10436_s0, %s12616_s11 }
 0x1b6   :  { %p10442_p2 = pnand %p10440_p1, %p10437_p0 }
 0x1b8   :  { %10445 = shalt.err (!%p10442_p2)
}
 0x1b9   :  { %s10446_s27 = scalar_lea.vmem %s275_s13, 16  ;;  %s10450_s15 = scalar_lea.vmem %s275_s13, 32 }
 0x1ba   :  { %p10447_p3 = scmp.ne.s32.totalorder %s275_s13, %s10446_s27  ;;  %p10451_p4 = scmp.lt.s32.totalorder %s275_s13, %s275_s13 }
 0x1bb   :  { %p10452_p5 = scmp.lt.s32.totalorder %s10450_s15, %s10446_s27 }
 0x1bd   :  { %p10453_p6 = por %p10452_p5, %p10451_p4 }
 0x1bf   :  { %p10454_p7 = pnand %p10453_p6, %p10447_p3 }
 0x1c1   :  { %10457 = shalt.err (!%p10454_p7)
}
 0x1c2   :  { %s12617_s16 = sld [smem:[#allocation72_spill]]  ;;  %s10704_s14 = smov [#allocation31]  }
 0x1c3   :  { %277 = dma.hbm_to_vmem [thread:$0]  %s12616_s11, 16, %s275_s13, [#allocation27]  }
 0x1c4   :  { %s295_s22 = sshll.u32 %s10704_s14, 4  ;;  %s10705_s29 = smov [#allocation34]   ;;  %s296_s22 = int_to_ptr.vmem [resolvable:$true] %s295_s22 }
 0x1c5   :  { %s319_s17 = sshll.u32 %s10705_s29, 4  ;;  %s11041_s17 = int_to_ptr.vmem [resolvable:$true] %s319_s17 }
 0x1c8   :  { %s10458_s18 = scalar_lea.hbm %s12617_s16, 2048 }
 0x1c9   :  { %p10459_p8 = scmp.ne.s32.totalorder %s12617_s16, %s10458_s18  ;;  %p10462_p9 = scmp.lt.u32.totalorder %s10458_s18, %s12617_s16 }
 0x1cb   :  { %p10464_p10 = pnand %p10462_p9, %p10459_p8 }
 0x1cd   :  { %10467 = shalt.err (!%p10464_p10)
}
 0x1ce   :  { %s10468_s3 = scalar_lea.vmem %s296_s22, 2048  ;;  %p10473_p12 = scmp.lt.s32.totalorder %s296_s22, %s296_s22 }
 0x1cf   :  { %p10469_p11 = scmp.ne.s32.totalorder %s296_s22, %s10468_s3  ;;  %p10474_p13 = scmp.lt.s32.totalorder %s10468_s3, %s10468_s3 }
 0x1d1   :  { %p10475_p0 = por %p10474_p13, %p10473_p12 }
 0x1d3   :  { %p10476_p1 = pnand %p10475_p0, %p10469_p11 }
 0x1d5   :  { %10479 = shalt.err (!%p10476_p1)
}
 0x1d6   :  { %s12618_s30 = sld [smem:[#allocation73_spill]] }
 0x1d7   :  { %301 = dma.hbm_to_vmem [thread:$0]  %s12617_s16, 2048, %s296_s22, [#allocation30], %s10678_s7, %s10678_s7, %s10679_s9  }
 0x1dc   :  { %s10480_s4 = scalar_lea.hbm %s12618_s30, 256 }
 0x1dd   :  { %p10481_p2 = scmp.ne.s32.totalorder %s12618_s30, %s10480_s4  ;;  %p10484_p3 = scmp.lt.u32.totalorder %s10480_s4, %s12618_s30 }
 0x1df   :  { %p10486_p4 = pnand %p10484_p3, %p10481_p2 }
 0x1e1   :  { %10489 = shalt.err (!%p10486_p4)
}
 0x1e2   :  { %s10490_s5 = scalar_lea.vmem %s11041_s17, 256  ;;  %p10495_p6 = scmp.lt.s32.totalorder %s11041_s17, %s11041_s17 }
 0x1e3   :  { %p10491_p5 = scmp.ne.s32.totalorder %s11041_s17, %s10490_s5  ;;  %p10496_p7 = scmp.lt.s32.totalorder %s10490_s5, %s10490_s5 }
 0x1e5   :  { %p10497_p8 = por %p10496_p7, %p10495_p6 }
 0x1e7   :  { %p10498_p9 = pnand %p10497_p8, %p10491_p5 }
 0x1e9   :  { %10501 = shalt.err (!%p10498_p9)
}
 0x1ea   :  { %s12619_s7 = sld [smem:[#allocation74_spill]]  ;;  %s10706_s25 = smov [#allocation37]  }
 0x1eb   :  { %325 = dma.hbm_to_vmem [thread:$0]  %s12618_s30, 256, %s11041_s17, [#allocation33], %s10676_s26, %s10676_s26, %s10677_s28  }
 0x1ec   :  { %s343_s1 = sshll.u32 %s10706_s25, 4  ;;  %s10707_s2 = smov [#allocation40]   ;;  %s344_s1 = int_to_ptr.vmem [resolvable:$true] %s343_s1 }
 0x1ed   :  { %s367_s10 = sshll.u32 %s10707_s2, 4  ;;  %s11062_s10 = int_to_ptr.vmem [resolvable:$true] %s367_s10 }
 0x1f0   :  { %s10502_s20 = scalar_lea.hbm %s12619_s7, 14336 }
 0x1f1   :  { %p10503_p10 = scmp.ne.s32.totalorder %s12619_s7, %s10502_s20  ;;  %p10506_p11 = scmp.lt.u32.totalorder %s10502_s20, %s12619_s7 }
 0x1f3   :  { %p10508_p12 = pnand %p10506_p11, %p10503_p10 }
 0x1f5   :  { %10511 = shalt.err (!%p10508_p12)
}
 0x1f6   :  { %s10512_s13 = scalar_lea.vmem %s344_s1, 14336  ;;  %p10517_p0 = scmp.lt.s32.totalorder %s344_s1, %s344_s1 }
 0x1f7   :  { %p10513_p13 = scmp.ne.s32.totalorder %s344_s1, %s10512_s13  ;;  %p10518_p1 = scmp.lt.s32.totalorder %s10512_s13, %s10512_s13 }
 0x1f9   :  { %p10519_p2 = por %p10518_p1, %p10517_p0 }
 0x1fb   :  { %p10520_p3 = pnand %p10519_p2, %p10513_p13 }
 0x1fd   :  { %10523 = shalt.err (!%p10520_p3)
}
 0x1fe   :  { %s12620_s8 = sld [smem:[#allocation75_spill]] }
 0x1ff   :  { %349 = dma.hbm_to_vmem [thread:$0]  %s12619_s7, 14336, %s344_s1, [#allocation36], %s10685_s23, %s10685_s23, %s10686_s19  }
 0x204   :  { %s10524_s12 = scalar_lea.hbm %s12620_s8, 224 }
 0x205   :  { %p10525_p4 = scmp.ne.s32.totalorder %s12620_s8, %s10524_s12  ;;  %p10528_p5 = scmp.lt.u32.totalorder %s10524_s12, %s12620_s8 }
 0x207   :  { %p10530_p6 = pnand %p10528_p5, %p10525_p4 }
 0x209   :  { %10533 = shalt.err (!%p10530_p6)
}
 0x20a   :  { %s10534_s11 = scalar_lea.vmem %s11062_s10, 224  ;;  %p10539_p8 = scmp.lt.s32.totalorder %s11062_s10, %s11062_s10 }
 0x20b   :  { %p10535_p7 = scmp.ne.s32.totalorder %s11062_s10, %s10534_s11  ;;  %p10540_p9 = scmp.lt.s32.totalorder %s10534_s11, %s10534_s11 }
 0x20d   :  { %p10541_p10 = por %p10540_p9, %p10539_p8 }
 0x20f   :  { %p10542_p11 = pnand %p10541_p10, %p10535_p7 }
 0x211   :  { %10545 = shalt.err (!%p10542_p11)
}
 0x212   :  { %s10708_s0 = smov 2   ;;  %s10709_s23 = smov [#allocation43]  }
 0x213   :  { %373 = dma.hbm_to_vmem [thread:$0]  %s12620_s8, 224, %s11062_s10, [#allocation39], %s10679_s9, %s10679_s9, %s10708_s0  }
 0x214   :  { %s389_s19 = sshll.u32 %s10709_s23, 4  ;;  %s10710_s27 = smov [#allocation44]   ;;  %s390_s19 = int_to_ptr.vmem [resolvable:$true] %s389_s19 }
 0x215   :  { %s402_s15 = sshll.u32 %s10710_s27, 4  ;;  %s10546_s16 = scalar_lea.hbm %s10864_s6, 2048  ;;  %s403_s15 = int_to_ptr.vmem [resolvable:$true] %s402_s15 }
 0x216   :  { %p10547_p12 = scmp.ne.s32.totalorder %s10864_s6, %s10546_s16  ;;  %p10550_p13 = scmp.lt.u32.totalorder %s10546_s16, %s10864_s6 }
 0x218   :  { %p10552_p0 = pnand %p10550_p13, %p10547_p12 }
 0x21a   :  { %10555 = shalt.err (!%p10552_p0)
}
 0x21b   :  { %s10556_s14 = scalar_lea.vmem %s390_s19, 2048  ;;  %p10561_p2 = scmp.lt.s32.totalorder %s390_s19, %s390_s19 }
 0x21c   :  { %p10557_p1 = scmp.ne.s32.totalorder %s390_s19, %s10556_s14  ;;  %p10562_p3 = scmp.lt.s32.totalorder %s10556_s14, %s10556_s14 }
 0x21e   :  { %p10563_p4 = por %p10562_p3, %p10561_p2 }
 0x220   :  { %p10564_p5 = pnand %p10563_p4, %p10557_p1 }
 0x222   :  { %10567 = shalt.err (!%p10564_p5)
}
 0x223   :  { %395 = dma.hbm_to_vmem [thread:$0]  %s10864_s6, 2048, %s390_s19, [#allocation42], %s10676_s26, %s10676_s26, %s10677_s28  }
 0x224   :  { %s10568_s9 = scalar_lea.hbm %s10869_s21, 16 }
 0x225   :  { %p10569_p6 = scmp.ne.s32.totalorder %s10869_s21, %s10568_s9  ;;  %p10572_p7 = scmp.lt.u32.totalorder %s10568_s9, %s10869_s21 }
 0x227   :  { %p10574_p8 = pnand %p10572_p7, %p10569_p6 }
 0x229   :  { %10577 = shalt.err (!%p10574_p8)
}
 0x22a   :  { %s10578_s22 = scalar_lea.vmem %s403_s15, 16  ;;  %s10582_s29 = scalar_lea.vmem %s403_s15, 32 }
 0x22b   :  { %p10579_p9 = scmp.ne.s32.totalorder %s403_s15, %s10578_s22  ;;  %p10583_p10 = scmp.lt.s32.totalorder %s403_s15, %s403_s15 }
 0x22c   :  { %p10584_p11 = scmp.lt.s32.totalorder %s10582_s29, %s10578_s22 }
 0x22e   :  { %p10585_p12 = por %p10584_p11, %p10583_p10 }
 0x230   :  { %p10586_p13 = pnand %p10585_p12, %p10579_p9 }
 0x232   :  { %10589 = shalt.err (!%p10586_p13)
}
 0x233   :  { %405 = dma.hbm_to_vmem [thread:$0]  %s10869_s21, 16, %s403_s15, [#allocation45]  }
 0x234   :  { %10612 = dma.done.wait [#allocation3], 896  }
 0x235   :  { %10613 = vsyncadd [#allocation3], 4294966400 }
 0x236   :  { %10614 = dma.done.wait [#allocation6], 1792  }
 0x237   :  { %10615 = vsyncadd [#allocation6], 4294965504 }
 0x238   :  { %10616 = dma.done.wait [#allocation9], 6208  }
 0x239   :  { %10617 = vsyncadd [#allocation9], 4294961088 }
 0x23a   :  { %10618 = dma.done.wait [#allocation12], 32  }
 0x23b   :  { %10619 = vsyncadd [#allocation12], 4294967264 }
 0x23c   :  { %10620 = dma.done.wait [#allocation15], 1536  }
 0x23d   :  { %10621 = vsyncadd [#allocation15], 4294965760 }
 0x23e   :  { %10622 = dma.done.wait [#allocation18], 14848  }
 0x23f   :  { %10623 = vsyncadd [#allocation18], 4294952448 }
 0x240   :  { %10624 = dma.done.wait [#allocation21], 14848  }
 0x241   :  { %10625 = vsyncadd [#allocation21], 4294952448 }
 0x242   :  { %10626 = dma.done.wait [#allocation24], 43520  }
 0x243   :  { %10627 = vsyncadd [#allocation24], 4294923776 }
 0x244   :  { %10628 = dma.done.wait [#allocation27], 80  }
 0x245   :  { %10629 = vsyncadd [#allocation27], 4294967216 }
 0x246   :  { %10630 = dma.done.wait [#allocation30], 2064  }
 0x247   :  { %10631 = vsyncadd [#allocation30], 4294965232 }
 0x248   :  { %10632 = dma.done.wait [#allocation33], 512  }
 0x249   :  { %10633 = vsyncadd [#allocation33], 4294966784 }
 0x24a   :  { %10634 = dma.done.wait [#allocation36], 28672  }
 0x24b   :  { %10635 = vsyncadd [#allocation36], 4294938624 }
 0x24c   :  { %10636 = dma.done.wait [#allocation39], 25312  }
 0x24d   :  { %10637 = vsyncadd [#allocation39], 4294941984 }
 0x24e   :  { %10638 = dma.done.wait [#allocation42], 2064  }
 0x24f   :  { %10639 = vsyncadd [#allocation42], 4294965232 }
 0x250   :  { %10640 = dma.done.wait [#allocation45], 16  }
 0x251   :  { %10641 = vsyncadd [#allocation45], 4294967280  ;;  %v12556_v0 = vmov 0.0|0.0   ;;  %vm10712_vm0 = vmmov 0   ;;  %v12554_v1 = vmov 0.0   ;;  %v11099_v2 = vld [vmem:[#allocation2] sm:$0xff] }
 0x252   :  { %8222 = vmatprep.subr.bf16.mxu0 %v12556_v0  ;;  %8082 = vmatprep.mubr.msk.f32.mxu0 %vm10712_vm0, %v12554_v1  ;;  %v11101_v3 = vld [vmem:[#allocation2 + $0x8] sm:$0xff]  ;;  %v11103_v4 = vld [vmem:[#allocation2 + $0x10] sm:$0xff]  ;;  %v11107_v6 = vld [vmem:[#allocation2 + $0x18] sm:$0xff]  ;;  %vm504_vm1 = vcmask 457728   ;;  %vm809_vm2 = vcmask 1043456   ;;  %vm10714_vm3 = vmmov 1  }
 0x253   :  { %9774 = vmatprep.subr.bf16.mxu1 %v12556_v0  ;;  %8126 = vmatprep.mubr.msk.f32.mxu1 %vm10712_vm0, %v12554_v1  ;;  %v8223_v5 = vpack.c.bf16 %v11101_v3, %v11099_v2  ;;  %v8226_v7 = vpack.c.bf16 %v11107_v6, %v11103_v4  ;;  %v11112_v8 = vld [vmem:[#allocation2 + $0x20] sm:$0xff]  ;;  %v11114_v9 = vld [vmem:[#allocation2 + $0x28] sm:$0xff]  ;;  %v11122_v11 = vld [vmem:[#allocation2 + $0x30] sm:$0xff]  ;;  %v12621_v27 = vmov 0  ;;  %vm787_vm5 = vcmask 228352   ;;  %s12624_s21 = sld [smem:[#allocation65_spill]] }
 0x254   :  { %v8229_v10 = vpack.c.bf16 %v11114_v9, %v11112_v8  ;;  %v774_v12 = vld [vmem:[#allocation8 + $0x98] sm:$0xff]  ;;  %v497_v14 = vld [vmem:[#allocation5] sm:$0xff]  ;;  %v629_v17 = vld [vmem:[#allocation7 + $0x18] sm:$0xff]  ;;  %vm1727_vm6 = vcmask 523264   ;;  %vm2125_vm7 = vcmask 130048   ;;  %vm3977_vm8 = vcmask 785408  }
 0x255   :  { %8224 = vmatpush3.bf16.msra.mxu0 %v8223_v5  ;;  %9778 = vmatpush3.bf16.msra.mxu1 %v8223_v5  ;;  %v778_v13 = vld [vmem:[#allocation8 + $0xb8] sm:$0xff]  ;;  %v773_v15 = vld [vmem:[#allocation8 + $0x90] sm:$0xff]  ;;  %v630_v25 = vld [vmem:[#allocation7 + $0x20] sm:$0xff]  ;;  %s12671_s6 = sld [smem:[#allocation71_spill]]  ;;  %vm4823_vm9 = vcmask 519168   ;;  %vm5186_vm10 = vcmask 261120  }
 0x256   :  { %8225 = vmatprep.subr.bf16.mxu0 %v12556_v0  ;;  %9775 = vmatprep.subr.bf16.mxu1 %v12556_v0  ;;  %v777_v16 = vld [vmem:[#allocation8 + $0xb0] sm:$0xff]  ;;  %v8250_v18 = vpack.c.bf16 %v778_v13, %v774_v12  ;;  %v782_v20 = vld [vmem:[#allocation8 + $0xd8] sm:$0xff]  ;;  %vm11138_vm4 = vmpackc.low %vm809_vm2, %vm10714_vm3  ;;  %vm6958_vm11 = vcmask 1045504   ;;  %vm6954_vm13 = vcmask 113664   ;;  %vm7605_vm14 = vcmask 74752   ;;  %s10715_s26 = smov [#allocation46]  }
 0x257   :  { %v8252_v19 = vpack.c.bf16 %v777_v16, %v773_v15  ;;  %v786_v21 = vld [vmem:[#allocation8 + $0xf8] sm:$0xf]  ;;  %v781_v23 = vld [vmem:[#allocation8 + $0xd0] sm:$0xff]  ;;  %v12622_v27 = vsel %vm11138_vm4, 4294967295, %v12621_v27  ;;  %v499_v31 = vld [vmem:[#allocation5 + $0x10] sm:$0xff]  ;;  %s7625_s28 = sshll.u32 %s10715_s26, 4  ;;  %s7626_s28 = int_to_ptr.vmem [resolvable:$true] %s7625_s28 }
 0x258   :  { %v498_v22 = vld [vmem:[#allocation5 + $0x8] sm:$0xff]  ;;  %v785_v24 = vld [vmem:[#allocation8 + $0xf0] sm:$0xf]  ;;  %v8254_v26 = vpack.c.bf16 %v786_v21, %v782_v20  ;;  %12623 = vst [vmem:[#allocation76_spill] sm:$0xff] %v12622_v27  ;;  %v772_v33 = vld [vmem:[#allocation8 + $0x88] sm:$0xff]  ;;  %s10590_s17 = scalar_lea.vmem %s7626_s28, 32  ;;  %p10595_p1 = scmp.lt.s32.totalorder %s7626_s28, %s7626_s28 }
 0x259   :  { %8227 = vmatpush3.bf16.msra.mxu0 %v8226_v7  ;;  %9779 = vmatpush3.bf16.msra.mxu1 %v8226_v7  ;;  %v8257_v28 = vpack.c.bf16 %v785_v24, %v781_v23  ;;  %v757_v29 = vld [vmem:[#allocation8 + $0x18] sm:$0xff]  ;;  %v631_v32 = vld [vmem:[#allocation7 + $0x28] sm:$0xff]  ;;  %v776_v34 = vld [vmem:[#allocation8 + $0xa8] sm:$0xff]  ;;  %p10591_p0 = scmp.ne.s32.totalorder %s7626_s28, %s10590_s17  ;;  %p10596_p2 = scmp.lt.s32.totalorder %s10590_s17, %s10590_s17 }
 0x25a   :  { %8228 = vmatprep.subr.bf16.mxu0 %v12556_v0  ;;  %9776 = vmatprep.subr.bf16.mxu1 %v12556_v0  ;;  %v761_v30 = vld [vmem:[#allocation8 + $0x38] sm:$0xff]  ;;  %v500_v36 = vld [vmem:[#allocation5 + $0x18] sm:$0xff]  ;;  %v8240_v37 = vpack.c.bf16 %v776_v34, %v772_v33  ;;  %v756_v39 = vld [vmem:[#allocation8 + $0x10] sm:$0xff] }
 0x25b   :  { %v8270_v35 = vpack.c.bf16 %v761_v30, %v757_v29  ;;  %v632_v38 = vld [vmem:[#allocation7 + $0x30] sm:$0xff]  ;;  %v760_v40 = vld [vmem:[#allocation8 + $0x30] sm:$0xff]  ;;  %v503_v50 = vld [vmem:[#allocation5 + $0x30] sm:$0xff]  ;;  %p10597_p3 = por %p10596_p2, %p10595_p1 }
 0x25c   :  { %v501_v41 = vld [vmem:[#allocation5 + $0x20] sm:$0xff]  ;;  %v765_v42 = vld [vmem:[#allocation8 + $0x58] sm:$0xff]  ;;  %v8272_v44 = vpack.c.bf16 %v760_v40, %v756_v39  ;;  %v771_v51 = vld [vmem:[#allocation8 + $0x80] sm:$0xff] }
 0x25d   :  { %8230 = vmatpush3.bf16.msra.mxu0 %v8229_v10  ;;  %9780 = vmatpush3.bf16.msra.mxu1 %v8229_v10  ;;  %v769_v43 = vld [vmem:[#allocation8 + $0x78] sm:$0xf]  ;;  %v764_v46 = vld [vmem:[#allocation8 + $0x50] sm:$0xff]  ;;  %v775_v52 = vld [vmem:[#allocation8 + $0xa0] sm:$0xff]  ;;  %p10598_p4 = pnand %p10597_p3, %p10591_p0 }
 0x25e   :  { %8080 = vmatprep.subr.mxu0 %v12554_v1  ;;  %9777 = vmatprep.subr.mxu1 %v12554_v1  ;;  %v8274_v45 = vpack.c.bf16 %v769_v43, %v765_v42  ;;  %v768_v47 = vld [vmem:[#allocation8 + $0x70] sm:$0xf]  ;;  %v502_v48 = vld [vmem:[#allocation5 + $0x28] sm:$0xff]  ;;  %v780_v53 = vld [vmem:[#allocation8 + $0xc8] sm:$0xff]  ;;  %v8242_v56 = vpack.c.bf16 %v775_v52, %v771_v51 }
 0x25f   :  { %v8277_v49 = vpack.c.bf16 %v768_v47, %v764_v46  ;;  %v784_v54 = vld [vmem:[#allocation8 + $0xe8] sm:$0xf]  ;;  %v779_v58 = vld [vmem:[#allocation8 + $0xc0] sm:$0xff]  ;;  %v627_v62 = vld [vmem:[#allocation7 + $0x8] sm:$0xff] }
 0x260   :  { %v626_v55 = vld [vmem:[#allocation7] sm:$0xff]  ;;  %v8244_v57 = vpack.c.bf16 %v784_v54, %v780_v53  ;;  %v783_v59 = vld [vmem:[#allocation8 + $0xe0] sm:$0xf]  ;;  %v1295_v23 = vld [vmem:[#allocation8 + $0x158] sm:$0xff] }
 0x261   :  { %8081 = vmatpush3.msra.mxu0 %v11122_v11  ;;  %9781 = vmatpush3.msra.mxu1 %v11122_v11  ;;  %v755_v60 = vld [vmem:[#allocation8 + $0x8] sm:$0xff]  ;;  %v8247_v63 = vpack.c.bf16 %v783_v59, %v779_v58  ;;  %v758_v12 = vld [vmem:[#allocation8 + $0x20] sm:$0xff]  ;;  %v1294_v30 = vld [vmem:[#allocation8 + $0x150] sm:$0xff] }
 0x262   :  { %8083 = vmatmul.mubr.msk.f32.vlgmr.msra.gmra.mrb[0].mxu0 %vm504_vm1, %v497_v14  ;;  %8231 = vmatprep.subr.bf16.mxu0 %v12556_v0  ;;  %v759_v61 = vld [vmem:[#allocation8 + $0x28] sm:$0xff]  ;;  %v1284_v24 = vld [vmem:[#allocation8 + $0x100] sm:$0xff]  ;;  %v1298_v33 = vld [vmem:[#allocation8 + $0x170] sm:$0xf] }
 0x263   :  { %8085 = vmatprep.mubr.msk.f32.mxu0 %vm10712_vm0, %v12554_v1  ;;  %8233 = vmatpush3.bf16.msra.mxu0 %v8223_v5  ;;  %v8260_v5 = vpack.c.bf16 %v759_v61, %v755_v60  ;;  %v763_v13 = vld [vmem:[#allocation8 + $0x48] sm:$0xff]  ;;  %v8297_v39 = vpack.c.bf16 %v1298_v33, %v1294_v30  ;;  %v1657_v59 = vld [vmem:[%s12624_s21 + $0x100] sm:$0xff]  ;;  %v1658_v60 = vld [vmem:[%s12624_s21 + $0x108] sm:$0xff] }
 0x264   :  { %8234 = vmatprep.subr.bf16.mxu0 %v12556_v0  ;;  %8127 = vmatmul.mubr.msk.f32.vlgmr.msra.gmra.mrb[0].mxu1 %vm504_vm1, %v629_v17  ;;  %v767_v14 = vld [vmem:[#allocation8 + $0x68] sm:$0xf]  ;;  %v762_v17 = vld [vmem:[#allocation8 + $0x40] sm:$0xff]  ;;  %v1628_v30 = vld [vmem:[%s12624_s21 + $0x18] sm:$0xff] }
 0x265   :  { %8129 = vmatprep.mubr.msk.f32.mxu1 %vm10712_vm0, %v12554_v1  ;;  %8251 = vmatprep.subr.bf16.mxu1 %v8250_v18  ;;  %v8264_v16 = vpack.c.bf16 %v767_v14, %v763_v13  ;;  %v766_v18 = vld [vmem:[#allocation8 + $0x60] sm:$0xf]  ;;  %v1289_v20 = vld [vmem:[#allocation8 + $0x128] sm:$0xff]  ;;  %v1668_v33 = vld [vmem:[%s12624_s21 + $0x158] sm:$0xff] }
 0x266   :  { %8086 = vmatmul.mubr.msk.f32.gmra.mrb[2].mxu0 %vm504_vm1, %v498_v22  ;;  %8253 = vmatpush1.bf16.msra.mxu1 %v8252_v19  ;;  %v8267_v19 = vpack.c.bf16 %v766_v18, %v762_v17  ;;  %v1290_v22 = vld [vmem:[#allocation8 + $0x130] sm:$0xff]  ;;  %v1659_v14 = vld [vmem:[%s12624_s21 + $0x110] sm:$0xff]  ;;  %v1661_v17 = vld [vmem:[%s12624_s21 + $0x120] sm:$0xff] }
 0x267   :  { %8088 = vmatprep.mubr.msk.f32.mxu0 %vm10712_vm0, %v12554_v1  ;;  %8236 = vmatpush3.bf16.msra.mxu0 %v8226_v7  ;;  %v628_v7 = vld [vmem:[#allocation7 + $0x10] sm:$0xff]  ;;  %v1662_v18 = vld [vmem:[%s12624_s21 + $0x128] sm:$0xff]  ;;  %vm12483_vm12 = vmpackc.low %vm6958_vm11, %vm10714_vm3 }
 0x268   :  { %8237 = vmatprep.subr.bf16.mxu0 %v12556_v0  ;;  %8130 = vmatmul.mubr.msk.f32.gmra.mrb[2].mxu1 %vm504_vm1, %v630_v25  ;;  %v1299_v25 = vld [vmem:[#allocation8 + $0x178] sm:$0xf] }
 0x269   :  { %8132 = vmatprep.mubr.msk.f32.mxu1 %vm10712_vm0, %v12554_v1  ;;  %8256 = vmatprep.subr.msk.bf16.mxu1 %vm11138_vm4, %v8254_v26  ;;  %v1293_v26 = vld [vmem:[#allocation8 + $0x148] sm:$0xff] }
 0x26a   :  { %8089 = vmatmul.mubr.msk.f32.gmra.mrb[4].mxu0 %vm504_vm1, %v499_v31  ;;  %8259 = vmatpush1.bf16.msk.msra.mxu1 %vm11138_vm4, %v8257_v28  ;;  %v1297_v28 = vld [vmem:[#allocation8 + $0x168] sm:$0xf] }
 0x26b   :  { %8091 = vmatprep.mubr.msk.f32.mxu0 %vm10712_vm0, %v12554_v1  ;;  %8239 = vmatpush3.bf16.msra.mxu0 %v8229_v10  ;;  %v754_v10 = vld [vmem:[#allocation8] sm:$0xff]  ;;  %v8284_v34 = vpack.c.bf16 %v1297_v28, %v1293_v26  ;;  %v1643_v26 = vld [vmem:[%s12624_s21 + $0x90] sm:$0xff]  ;;  %v1644_v28 = vld [vmem:[%s12624_s21 + $0x98] sm:$0xff] }
 0x26c   :  { %8115 = vmatprep.subr.mxu0 %v12554_v1  ;;  %8133 = vmatmul.mubr.msk.f32.gmra.mrb[4].mxu1 %vm504_vm1, %v631_v32  ;;  %v8262_v15 = vpack.c.bf16 %v758_v12, %v754_v10  ;;  %v8294_v32 = vpack.c.bf16 %v1299_v25, %v1295_v23 }
 0x26d   :  { %8135 = vmatprep.mubr.msk.f32.mxu1 %vm10712_vm0, %v12554_v1  ;;  %8271 = vmatprep.subr.bf16.mxu1 %v8270_v35  ;;  %v1292_v35 = vld [vmem:[#allocation8 + $0x140] sm:$0xff] }
 0x26e   :  { %8092 = vmatmul.mubr.msk.f32.gmra.mrb[6].mxu0 %vm504_vm1, %v500_v36  ;;  %v1296_v36 = vld [vmem:[#allocation8 + $0x160] sm:$0xf] }
 0x26f   :  { %8094 = vmatprep.mubr.msk.f32.mxu0 %vm10712_vm0, %v12554_v1  ;;  %8116 = vmatpush3.msra.mxu0 %v11122_v11  ;;  %v8287_v40 = vpack.c.bf16 %v1296_v36, %v1292_v35  ;;  %v1645_v35 = vld [vmem:[%s12624_s21 + $0xa0] sm:$0xff]  ;;  %v1646_v36 = vld [vmem:[%s12624_s21 + $0xa8] sm:$0xff] }
 0x270   :  { %8136 = vmatmul.mubr.msk.f32.gmra.mrb[6].mxu1 %vm504_vm1, %v632_v38  ;;  %8241 = vmatprep.subr.bf16.mxu0 %v8240_v37 }
 0x271   :  { %993 = vmatprep.mubr.f32.mxu1 %v12554_v1 }
 0x272   :  { %8095 = vmatmul.mubr.msk.f32.gmra.mrb[8].mxu0 %vm504_vm1, %v501_v41 }
 0x273   :  { %8097 = vmatprep.mubr.msk.f32.mxu0 %vm10712_vm0, %v12554_v1 }
 0x274   :  { %7703 = vmatmul.mubr.msk.f32.vlgmr.msra.gmra.mrb[8].mxu1 %vm787_vm5, %v11099_v2 }
 0x275   :  { %999 = vmatprep.mubr.f32.mxu1 %v12554_v1  ;;  %8273 = vmatpush1.bf16.msra.mxu1 %v8272_v44 }
 0x276   :  { %8098 = vmatmul.mubr.msk.f32.gmra.mrb[10].mxu0 %vm504_vm1, %v502_v48  ;;  %8276 = vmatprep.subr.msk.bf16.mxu1 %vm11138_vm4, %v8274_v45 }
 0x277   :  { %8100 = vmatprep.mubr.msk.f32.mxu0 %vm10712_vm0, %v12554_v1 }
 0x278   :  { %7704 = vmatmul.mubr.msk.f32.gmra.mrb[10].mxu1 %vm787_vm5, %v11101_v3 }
 0x279   :  { %1005 = vmatprep.mubr.f32.mxu1 %v12554_v1  ;;  %8279 = vmatpush1.bf16.msk.msra.mxu1 %vm11138_vm4, %v8277_v49 }
 0x27a   :  { %8101 = vmatmul.mubr.msk.f32.gmra.mrb[12].mxu0 %vm504_vm1, %v503_v50 }
 0x27b   :  { %8117 = vmatprep.mubr.msk.f32.mxu0 %vm10712_vm0, %v12554_v1 }
 0x27c   :  { %7705 = vmatmul.mubr.msk.f32.gmra.mrb[12].mxu1 %vm787_vm5, %v11103_v4 }
 0x27d   :  { %1011 = vmatprep.mubr.f32.mxu1 %v12554_v1 }
 0x27e   :  { %8118 = vmatmul.mubr.msk.f32.vlgmr.msra.gmra.mrb[14].mxu0 %vm504_vm1, %v626_v55 }
 0x27f   :  { %8120 = vmatprep.mubr.msk.f32.mxu0 %vm10712_vm0, %v12554_v1  ;;  %8243 = vmatpush1.bf16.msra.mxu0 %v8242_v56 }
 0x280   :  { %8246 = vmatprep.subr.msk.bf16.mxu0 %vm11138_vm4, %v8244_v57  ;;  %7706 = vmatmul.mubr.msk.f32.gmra.mrb[14].mxu1 %vm787_vm5, %v11107_v6 }
 0x281   :  { %1017 = vmatprep.mubr.f32.mxu1 %v12554_v1 }
 0x282   :  { %8121 = vmatmul.mubr.msk.f32.gmra.mrb[16].mxu0 %vm504_vm1, %v627_v62  ;;  %v11279_v62 = vpack.c.bf16 %v1658_v60, %v1657_v59  ;;  %v1673_v59 = vld [vmem:[%s12624_s21 + $0x180] sm:$0xff]  ;;  %v1674_v60 = vld [vmem:[%s12624_s21 + $0x188] sm:$0xff] }
 0x283   :  { %8123 = vmatprep.mubr.msk.f32.mxu0 %vm10712_vm0, %v12554_v1  ;;  %8249 = vmatpush1.bf16.msk.msra.mxu0 %vm11138_vm4, %v8247_v63 }
 0x284   :  { %7707 = vmatmul.mubr.msk.f32.gmra.mrb[16].mxu1 %vm787_vm5, %v11112_v8  ;;  %8261 = vmatprep.subr.bf16.mxu0 %v8260_v5 }
 0x285   :  { %1023 = vmatprep.mubr.f32.mxu1 %v12554_v1 }
 0x286   :  { %8124 = vmatmul.mubr.msk.f32.gmra.mrb[18].mxu0 %vm504_vm1, %v628_v7 }
 0x287   :  { %886 = vmatprep.mubr.f32.mxu0 %v12554_v1 }
 0x288   :  { %7708 = vmatmul.mubr.msk.f32.gmra.mrb[18].mxu1 %vm787_vm5, %v11114_v9 }
 0x289   :  { %1029 = vmatprep.mubr.f32.mxu1 %v12554_v1 }
 0x28a   :  { %7694 = vmatmul.mubr.msk.f32.vlgmr.msra.gmra.mrb[20].mxu0 %vm787_vm5, %v11099_v2  ;;  %v1287_v2 = vld [vmem:[#allocation8 + $0x118] sm:$0xff] }
 0x28b   :  { %892 = vmatprep.mubr.f32.mxu0 %v12554_v1  ;;  %8263 = vmatpush1.bf16.msra.mxu0 %v8262_v15  ;;  %v1660_v15 = vld [vmem:[%s12624_s21 + $0x118] sm:$0xff] }
 0x28c   :  { %7709 = vmatmul.mubr.msk.f32.gmra.mrb[20].mxu1 %vm787_vm5, %v11122_v11  ;;  %8266 = vmatprep.subr.msk.bf16.mxu0 %vm11138_vm4, %v8264_v16  ;;  %v11315_v16 = vpack.c.bf16 %v1660_v15, %v1659_v14  ;;  %v1675_v14 = vld [vmem:[%s12624_s21 + $0x190] sm:$0xff]  ;;  %v1676_v15 = vld [vmem:[%s12624_s21 + $0x198] sm:$0xff] }
 0x28d   :  { %1240 = vmatprep.mubr.f32.mxu1 %v12554_v1 }
 0x28e   :  { %7695 = vmatmul.mubr.msk.f32.gmra.mrb[22].mxu0 %vm787_vm5, %v11101_v3  ;;  %v1291_v3 = vld [vmem:[#allocation8 + $0x138] sm:$0xff] }
 0x28f   :  { %898 = vmatprep.mubr.f32.mxu0 %v12554_v1  ;;  %8269 = vmatpush1.bf16.msk.msra.mxu0 %vm11138_vm4, %v8267_v19  ;;  %v11321_v19 = vpack.c.bf16 %v1662_v18, %v1661_v17  ;;  %v11422_v17 = vpack.c.bf16 %v1676_v15, %v1675_v14  ;;  %v1653_v18 = vld [vmem:[%s12624_s21 + $0xe0] sm:$0xff] }
 0x291   :  { %12628 = vst [vmem:[#allocation80_spill] sm:$0xff] %v11422_v17 }
 0x292   :  { %7696 = vmatmul.mubr.msk.f32.gmra.mrb[24].mxu0 %vm787_vm5, %v11103_v4  ;;  %v8290_v4 = vpack.c.bf16 %v1291_v3, %v1287_v2  ;;  %v1663_v2 = vld [vmem:[%s12624_s21 + $0x130] sm:$0xff]  ;;  %v1664_v3 = vld [vmem:[%s12624_s21 + $0x138] sm:$0xff] }
 0x293   :  { %904 = vmatprep.mubr.f32.mxu0 %v12554_v1 }
 0x294   :  { %8291 = vmatprep.subr.bf16.mxu1 %v8290_v4  ;;  %v11327_v4 = vpack.c.bf16 %v1664_v3, %v1663_v2  ;;  %v1654_v2 = vld [vmem:[%s12624_s21 + $0xe8] sm:$0xff] }
 0x295   :  { %v11428_v3 = vpack.c.bf16 %v1654_v2, %v1653_v18 }
 0x296   :  { %7697 = vmatmul.mubr.msk.f32.gmra.mrb[26].mxu0 %vm787_vm5, %v11107_v6  ;;  %v1285_v6 = vld [vmem:[#allocation8 + $0x108] sm:$0xff] }
 0x297   :  { %910 = vmatprep.mubr.f32.mxu0 %v12554_v1  ;;  %v8280_v21 = vpack.c.bf16 %v1289_v20, %v1285_v6  ;;  %v1641_v6 = vld [vmem:[%s12624_s21 + $0x80] sm:$0xff]  ;;  %v1642_v20 = vld [vmem:[%s12624_s21 + $0x88] sm:$0xff] }
 0x299   :  { %8281 = vmatprep.subr.bf16.mxu0 %v8280_v21  ;;  %v11332_v21 = vpack.c.bf16 %v1642_v20, %v1641_v6  ;;  %v1637_v6 = vld [vmem:[%s12624_s21 + $0x60] sm:$0xff]  ;;  %v1638_v20 = vld [vmem:[%s12624_s21 + $0x68] sm:$0xff] }
 0x29a   :  { %7698 = vmatmul.mubr.msk.f32.gmra.mrb[28].mxu0 %vm787_vm5, %v11112_v8  ;;  %v1286_v8 = vld [vmem:[#allocation8 + $0x110] sm:$0xff] }
 0x29b   :  { %916 = vmatprep.mubr.f32.mxu0 %v12554_v1  ;;  %v8292_v29 = vpack.c.bf16 %v1290_v22, %v1286_v8  ;;  %v1625_v8 = vld [vmem:[%s12624_s21] sm:$0xff]  ;;  %v1626_v22 = vld [vmem:[%s12624_s21 + $0x8] sm:$0xff] }
 0x29c   :  { %v11336_v23 = vpack.c.bf16 %v1626_v22, %v1625_v8  ;;  %v11432_v8 = vpack.c.bf16 %v1638_v20, %v1637_v6  ;;  %v1677_v22 = vld [vmem:[%s12624_s21 + $0x1a0] sm:$0xff] }
 0x29e   :  { %7699 = vmatmul.mubr.msk.f32.gmra.mrb[30].mxu0 %vm787_vm5, %v11114_v9  ;;  %v1288_v9 = vld [vmem:[#allocation8 + $0x120] sm:$0xff] }
 0x29f   :  { %922 = vmatprep.mubr.f32.mxu0 %v12554_v1 }
 0x2a2   :  { %7700 = vmatmul.mubr.msk.f32.gmra.mrb[32].mxu0 %vm787_vm5, %v11122_v11  ;;  %v8282_v11 = vpack.c.bf16 %v1288_v9, %v1284_v24  ;;  %v1665_v24 = vld [vmem:[%s12624_s21 + $0x140] sm:$0xff]  ;;  %v1666_v9 = vld [vmem:[%s12624_s21 + $0x148] sm:$0xff] }
 0x2a3   :  { %1133 = vmatprep.mubr.f32.mxu0 %v12554_v1  ;;  %v11342_v25 = vpack.c.bf16 %v1666_v9, %v1665_v24  ;;  %v1678_v24 = vld [vmem:[%s12624_s21 + $0x1a8] sm:$0xff] }
 0x2a4   :  { %v11438_v9 = vpack.c.bf16 %v1678_v24, %v1677_v22 }
 0x2a6   :  { %12629 = vst [vmem:[#allocation81_spill] sm:$0xff] %v11438_v9 }
 0x335   :  { %v592_v31 = vpop.f32.mrb[0].mxu0 }
 0x336   :  { %v8084_v37 = vpop.f32.mrb[1].mxu0  ;;  %7712 = vmatmul.mubr.msk.f32.vlgmr.msra.gmra.mrb[20].mxu0 %vm787_vm5, %v592_v31  ;;  %7721 = vmatmul.mubr.msk.f32.vlgmr.msra.gmra.mrb[8].mxu1 %vm787_vm5, %v592_v31 }
 0x337   :  { %1139 = vmatprep.mubr.f32.mxu0 %v12554_v1  ;;  %1246 = vmatprep.mubr.f32.mxu1 %v12554_v1  ;;  %v11240_v38 = vpop.f32.mrb[0].mxu1  ;;  %v11364_v37 = vpack.c.bf16 %v1646_v36, %v1645_v35  ;;  %v1680_v35 = vld [vmem:[%s12624_s21 + $0x1b8] sm:$0xff] }
 0x338   :  { %8293 = vmatpush1.bf16.msra.mxu1 %v8292_v29  ;;  %8283 = vmatpush1.bf16.msra.mxu0 %v8282_v11  ;;  %v8128_v41 = vpop.f32.mrb[1].mxu1  ;;  %v11348_v29 = vpack.c.bf16 %v1644_v28, %v1643_v26  ;;  %v1627_v11 = vld [vmem:[%s12624_s21 + $0x10] sm:$0xff]  ;;  %v1656_v28 = vld [vmem:[%s12624_s21 + $0xf8] sm:$0xff] }
 0x339   :  { %v597_v42 = vpop.f32.mrb[2].mxu0  ;;  %8296 = vmatprep.subr.msk.bf16.mxu1 %vm11138_vm4, %v8294_v32  ;;  %8286 = vmatprep.subr.msk.bf16.mxu0 %vm11138_vm4, %v8284_v34  ;;  %v11353_v31 = vpack.c.bf16 %v1628_v30, %v1627_v11  ;;  %v1667_v32 = vld [vmem:[%s12624_s21 + $0x150] sm:$0xff]  ;;  %v1669_v41 = vld [vmem:[%s12624_s21 + $0x160] sm:$0xff] }
 0x33a   :  { %v8087_v43 = vpop.f32.mrb[3].mxu0  ;;  %7713 = vmatmul.mubr.msk.f32.gmra.mrb[22].mxu0 %vm787_vm5, %v597_v42  ;;  %7722 = vmatmul.mubr.msk.f32.gmra.mrb[10].mxu1 %vm787_vm5, %v597_v42  ;;  %v11358_v34 = vpack.c.bf16 %v1668_v33, %v1667_v32  ;;  %v1670_v42 = vld [vmem:[%s12624_s21 + $0x168] sm:$0xff]  ;;  %v1655_v26 = vld [vmem:[%s12624_s21 + $0xf0] sm:$0xff]  ;;  %v1640_v32 = vld [vmem:[%s12624_s21 + $0x78] sm:$0xff] }
 0x33b   :  { %1145 = vmatprep.mubr.f32.mxu0 %v12554_v1  ;;  %1252 = vmatprep.mubr.f32.mxu1 %v12554_v1  ;;  %v11250_v44 = vpop.f32.mrb[2].mxu1  ;;  %v11374_v43 = vpack.c.bf16 %v1670_v42, %v1669_v41  ;;  %v1639_v11 = vld [vmem:[%s12624_s21 + $0x70] sm:$0xff]  ;;  %v11445_v30 = vpack.c.bf16 %v1656_v28, %v1655_v26 }
 0x33c   :  { %8299 = vmatpush1.bf16.msk.msra.mxu1 %vm11138_vm4, %v8297_v39  ;;  %8289 = vmatpush1.bf16.msk.msra.mxu0 %vm11138_vm4, %v8287_v40  ;;  %v8131_v45 = vpop.f32.mrb[3].mxu1  ;;  %v1630_v39 = vld [vmem:[%s12624_s21 + $0x28] sm:$0xff]  ;;  %v1679_v33 = vld [vmem:[%s12624_s21 + $0x1b0] sm:$0xff]  ;;  %v11450_v36 = vpack.c.bf16 %v1640_v32, %v1639_v11 }
 0x33d   :  { %v602_v46 = vpop.f32.mrb[4].mxu0  ;;  %8332 = vmatprep.subr.bf16.mxu1 %v12556_v0  ;;  %8301 = vmatprep.subr.bf16.mxu0 %v11332_v21  ;;  %12625 = vst [vmem:[#allocation77_spill] sm:$0xff] %v11374_v43  ;;  %v1648_v45 = vld [vmem:[%s12624_s21 + $0xb8] sm:$0xff] }
 0x33e   :  { %v8090_v47 = vpop.f32.mrb[5].mxu0  ;;  %7714 = vmatmul.mubr.msk.f32.gmra.mrb[24].mxu0 %vm787_vm5, %v602_v46  ;;  %7723 = vmatmul.mubr.msk.f32.gmra.mrb[12].mxu1 %vm787_vm5, %v602_v46  ;;  %12630 = vst [vmem:[#allocation82_spill] sm:$0xff] %v11450_v36 }
 0x33f   :  { %1151 = vmatprep.mubr.f32.mxu0 %v12554_v1  ;;  %1258 = vmatprep.mubr.f32.mxu1 %v12554_v1  ;;  %v745_v48 = vpop.f32.mrb[4].mxu1  ;;  %v1631_v47 = vld [vmem:[%s12624_s21 + $0x30] sm:$0xff] }
 0x340   :  { %v8134_v49 = vpop.f32.mrb[5].mxu1 }
 0x341   :  { %v607_v50 = vpop.f32.mrb[6].mxu0 }
 0x342   :  { %v8093_v51 = vpop.f32.mrb[7].mxu0  ;;  %7715 = vmatmul.mubr.msk.f32.gmra.mrb[26].mxu0 %vm787_vm5, %v607_v50  ;;  %7724 = vmatmul.mubr.msk.f32.gmra.mrb[14].mxu1 %vm787_vm5, %v607_v50  ;;  %v1671_v50 = vld [vmem:[%s12624_s21 + $0x170] sm:$0xff] }
 0x343   :  { %1157 = vmatprep.mubr.f32.mxu0 %v12554_v1  ;;  %1264 = vmatprep.mubr.f32.mxu1 %v12554_v1  ;;  %v750_v52 = vpop.f32.mrb[6].mxu1  ;;  %v1672_v51 = vld [vmem:[%s12624_s21 + $0x178] sm:$0xff] }
 0x344   :  { %v8137_v53 = vpop.f32.mrb[7].mxu1 }
 0x345   :  { %v612_v54 = vpop.f32.mrb[8].mxu0  ;;  %v1649_v53 = vld [vmem:[%s12624_s21 + $0xc0] sm:$0xff] }
 0x346   :  { %v8096_v55 = vpop.f32.mrb[9].mxu0  ;;  %7716 = vmatmul.mubr.msk.f32.gmra.mrb[28].mxu0 %vm787_vm5, %v612_v54  ;;  %7725 = vmatmul.mubr.msk.f32.gmra.mrb[16].mxu1 %vm787_vm5, %v612_v54  ;;  %v1650_v54 = vld [vmem:[%s12624_s21 + $0xc8] sm:$0xff] }
 0x347   :  { %1163 = vmatprep.mubr.f32.mxu0 %v12554_v1  ;;  %1270 = vmatprep.mubr.f32.mxu1 %v12554_v1  ;;  %v11397_v55 = vpack.c.bf16 %v1650_v54, %v1649_v53 }
 0x349   :  { %v617_v56 = vpop.f32.mrb[10].mxu0 }
 0x34a   :  { %v8099_v57 = vpop.f32.mrb[11].mxu0  ;;  %7717 = vmatmul.mubr.msk.f32.gmra.mrb[30].mxu0 %vm787_vm5, %v617_v56  ;;  %7726 = vmatmul.mubr.msk.f32.gmra.mrb[18].mxu1 %vm787_vm5, %v617_v56  ;;  %v1633_v56 = vld [vmem:[%s12624_s21 + $0x40] sm:$0xff] }
 0x34b   :  { %1169 = vmatprep.mubr.f32.mxu0 %v12554_v1  ;;  %1276 = vmatprep.mubr.f32.mxu1 %v12554_v1  ;;  %v1634_v57 = vld [vmem:[%s12624_s21 + $0x48] sm:$0xff] }
 0x34d   :  { %v622_v58 = vpop.f32.mrb[12].mxu0 }
 0x34e   :  { %v8102_v61 = vpop.f32.mrb[13].mxu0  ;;  %7718 = vmatmul.mubr.msk.f32.gmra.mrb[32].mxu0 %vm787_vm5, %v622_v58  ;;  %7727 = vmatmul.mubr.msk.f32.gmra.mrb[20].mxu1 %vm787_vm5, %v622_v58  ;;  %v11401_v58 = vpack.c.bf16 %v1634_v57, %v1633_v56 }
 0x34f   :  { %1397 = vmatprep.mubr.f32.mxu0 %v12554_v1  ;;  %1504 = vmatprep.mubr.f32.mxu1 %v12554_v1  ;;  %v11406_v61 = vpack.c.bf16 %v1674_v60, %v1673_v59 }
 0x351   :  { %v720_v63 = vpop.f32.mrb[14].mxu0  ;;  %12627 = vst [vmem:[#allocation79_spill] sm:$0xff] %v11406_v61 }
 0x352   :  { %v8119_v5 = vpop.f32.mrb[15].mxu0  ;;  %7730 = vmatmul.mubr.msk.f32.vlgmr.msra.gmra.mrb[20].mxu0 %vm787_vm5, %v720_v63  ;;  %7739 = vmatmul.mubr.msk.f32.vlgmr.msra.gmra.mrb[8].mxu1 %vm787_vm5, %v720_v63  ;;  %v1651_v63 = vld [vmem:[%s12624_s21 + $0xd0] sm:$0xff] }
 0x353   :  { %1403 = vmatprep.mubr.f32.mxu0 %v12554_v1  ;;  %1510 = vmatprep.mubr.f32.mxu1 %v12554_v1  ;;  %v1652_v5 = vld [vmem:[%s12624_s21 + $0xd8] sm:$0xff] }
 0x354   :  { %8334 = vmatpush1.bf16.msra.mxu1 %v11279_v62  ;;  %8303 = vmatpush3.bf16.msra.mxu0 %v11336_v23 }
 0x355   :  { %v725_v7 = vpop.f32.mrb[16].mxu0  ;;  %8335 = vmatprep.subr.bf16.mxu1 %v12556_v0  ;;  %8305 = vmatprep.subr.bf16.mxu0 %v11348_v29 }
 0x356   :  { %v8122_v10 = vpop.f32.mrb[17].mxu0  ;;  %7731 = vmatmul.mubr.msk.f32.gmra.mrb[22].mxu0 %vm787_vm5, %v725_v7  ;;  %7740 = vmatmul.mubr.msk.f32.gmra.mrb[10].mxu1 %vm787_vm5, %v725_v7  ;;  %v11412_v7 = vpack.c.bf16 %v1652_v5, %v1651_v63 }
 0x357   :  { %1409 = vmatprep.mubr.f32.mxu0 %v12554_v1  ;;  %1516 = vmatprep.mubr.f32.mxu1 %v12554_v1  ;;  %v1635_v10 = vld [vmem:[%s12624_s21 + $0x50] sm:$0xff] }
 0x358   :  { %8337 = vmatpush1.bf16.msra.mxu1 %v11315_v16  ;;  %8307 = vmatpush3.bf16.msra.mxu0 %v11353_v31 }
 0x359   :  { %v730_v12 = vpop.f32.mrb[18].mxu0  ;;  %8338 = vmatprep.subr.bf16.mxu1 %v12556_v0  ;;  %8309 = vmatprep.subr.bf16.mxu0 %v11364_v37 }
 0x35a   :  { %v8125_v13 = vpop.f32.mrb[19].mxu0  ;;  %7732 = vmatmul.mubr.msk.f32.gmra.mrb[24].mxu0 %vm787_vm5, %v730_v12  ;;  %7741 = vmatmul.mubr.msk.f32.gmra.mrb[12].mxu1 %vm787_vm5, %v730_v12  ;;  %v1636_v12 = vld [vmem:[%s12624_s21 + $0x58] sm:$0xff] }
 0x35b   :  { %1415 = vmatprep.mubr.f32.mxu0 %v12554_v1  ;;  %1522 = vmatprep.mubr.f32.mxu1 %v12554_v1  ;;  %v11416_v13 = vpack.c.bf16 %v1636_v12, %v1635_v10 }
 0x35c   :  { %8340 = vmatpush1.bf16.msra.mxu1 %v11321_v19 }
 0x35d   :  { %8341 = vmatprep.subr.bf16.mxu1 %v12556_v0 }
 0x35e   :  { %7733 = vmatmul.mubr.msk.f32.gmra.mrb[26].mxu0 %vm787_vm5, %v11240_v38  ;;  %7742 = vmatmul.mubr.msk.f32.gmra.mrb[14].mxu1 %vm787_vm5, %v11240_v38  ;;  %v1629_v38 = vld [vmem:[%s12624_s21 + $0x20] sm:$0xff] }
 0x35f   :  { %1421 = vmatprep.mubr.f32.mxu0 %v12554_v1  ;;  %1528 = vmatprep.mubr.f32.mxu1 %v12554_v1  ;;  %v11369_v40 = vpack.c.bf16 %v1630_v39, %v1629_v38  ;;  %v11453_v38 = vpack.c.bf16 %v1680_v35, %v1679_v33  ;;  %v1577_v39 = vlaneseq }
 0x360   :  { %8343 = vmatpush1.bf16.msra.mxu1 %v11327_v4 }
 0x361   :  { %8344 = vmatprep.subr.bf16.mxu1 %v12556_v0  ;;  %8311 = vmatpush3.bf16.msra.mxu0 %v11369_v40  ;;  %12631 = vst [vmem:[#allocation83_spill] sm:$0xff] %v11453_v38  ;;  %v11460_v41 = vshrl.u32 %v1577_v39, 7 }
 0x362   :  { %7734 = vmatmul.mubr.msk.f32.gmra.mrb[28].mxu0 %vm787_vm5, %v11250_v44  ;;  %7743 = vmatmul.mubr.msk.f32.gmra.mrb[16].mxu1 %vm787_vm5, %v11250_v44  ;;  %v1647_v44 = vld [vmem:[%s12624_s21 + $0xb0] sm:$0xff] }
 0x363   :  { %1427 = vmatprep.mubr.f32.mxu0 %v12554_v1  ;;  %1534 = vmatprep.mubr.f32.mxu1 %v12554_v1  ;;  %v11380_v46 = vpack.c.bf16 %v1648_v45, %v1647_v44  ;;  %12632 = vst [vmem:[#allocation84_spill] sm:$0xff] %v11460_v41  ;;  %v12553_v45 = vsub.s32 3, %v11460_v41  ;;  %v11469_v56 = vsub.s32 0, %v11460_v41  ;;  %v12551_v60 = vsub.s32 2, %v11460_v41 }
 0x364   :  { %8346 = vmatpush1.bf16.msra.mxu1 %v11342_v25 }
 0x365   :  { %8347 = vmatprep.subr.bf16.mxu1 %v12556_v0  ;;  %8313 = vmatprep.subr.bf16.mxu0 %v11380_v46  ;;  %12633 = vst [vmem:[#allocation85_spill] sm:$0xff] %v11469_v56 }
 0x366   :  { %7735 = vmatmul.mubr.msk.f32.gmra.mrb[30].mxu0 %vm787_vm5, %v745_v48  ;;  %7744 = vmatmul.mubr.msk.f32.gmra.mrb[18].mxu1 %vm787_vm5, %v745_v48  ;;  %v1632_v48 = vld [vmem:[%s12624_s21 + $0x38] sm:$0xff] }
 0x367   :  { %1433 = vmatprep.mubr.f32.mxu0 %v12554_v1  ;;  %1540 = vmatprep.mubr.f32.mxu1 %v12554_v1  ;;  %v11384_v49 = vpack.c.bf16 %v1632_v48, %v1631_v47  ;;  %v1575_v47 = vld [vmem:[#allocation10] sm:$0xf] }
 0x368   :  { %8349 = vmatpush1.bf16.msra.mxu1 %v11358_v34  ;;  %v11466_v53 = vrot.slane %v1575_v47, %v12553_v45  ;;  %v11483_v15 = vrot.slane %v1575_v47, %v11469_v56  ;;  %v11487_v6 = vrot.slane %v1575_v47, %v12551_v60 }
 0x369   :  { %8350 = vmatprep.subr.bf16.mxu1 %v12556_v0  ;;  %8315 = vmatpush3.bf16.msra.mxu0 %v11384_v49 }
 0x36a   :  { %7736 = vmatmul.mubr.msk.f32.gmra.mrb[32].mxu0 %vm787_vm5, %v750_v52  ;;  %7745 = vmatmul.mubr.msk.f32.gmra.mrb[20].mxu1 %vm787_vm5, %v750_v52  ;;  %v11390_v52 = vpack.c.bf16 %v1672_v51, %v1671_v50  ;;  %v12552_v51 = vsub.s32 1, %v11460_v41 }
 0x36b   :  { %8317 = vmatprep.subr.bf16.mxu0 %v11397_v55 }
 0x36c   :  { %8352 = vmatpush1.bf16.msra.mxu1 %v11374_v43  ;;  %12626 = vst [vmem:[#allocation78_spill] sm:$0xff] %v11390_v52  ;;  %v11474_v63 = vrot.slane %v1575_v47, %v12552_v51 }
 0x36d   :  { %8353 = vmatprep.subr.bf16.mxu1 %v12556_v0  ;;  %8319 = vmatpush3.bf16.msra.mxu0 %v11401_v58 }
 0x36e   :  { %8321 = vmatprep.subr.bf16.mxu0 %v11412_v7 }
 0x370   :  { %8355 = vmatpush1.bf16.msra.mxu1 %v11390_v52 }
 0x371   :  { %8356 = vmatprep.subr.bf16.mxu1 %v12556_v0  ;;  %8323 = vmatpush3.bf16.msra.mxu0 %v11416_v13 }
 0x372   :  { %8325 = vmatprep.subr.bf16.mxu0 %v11428_v3 }
 0x374   :  { %8358 = vmatpush1.bf16.msra.mxu1 %v11406_v61 }
 0x375   :  { %8359 = vmatprep.subr.bf16.mxu1 %v12556_v0  ;;  %8327 = vmatpush3.bf16.msra.mxu0 %v11432_v8 }
 0x376   :  { %8329 = vmatprep.subr.bf16.mxu0 %v11445_v30 }
 0x378   :  { %8361 = vmatpush1.bf16.msra.mxu1 %v11422_v17 }
 0x379   :  { %8362 = vmatprep.subr.bf16.mxu1 %v12556_v0  ;;  %8331 = vmatpush3.bf16.msra.mxu0 %v11450_v36 }
 0x37a   :  { %8369 = vmatprep.subr.bf16.mxu0 %v11332_v21 }
 0x37c   :  { %8364 = vmatpush1.bf16.msra.mxu1 %v11438_v9 }
 0x37d   :  { %8365 = vmatprep.subr.bf16.mxu1 %v12556_v0 }
 0x380   :  { %8367 = vmatpush1.bf16.msra.mxu1 %v11453_v38 }
 0x381   :  { %8400 = vmatprep.subr.bf16.mxu1 %v12556_v0 }
 0x425   :  { %v1399_v42 = vpop.f32.mrb[20].mxu0  ;;  %v1506_v44 = vpop.f32.mrb[8].mxu1 }
 0x426   :  { %v1401_v48 = vpop.f32.mrb[21].mxu0  ;;  %v1508_v50 = vpop.f32.mrb[9].mxu1  ;;  %v11509_v39 = vadd.f32 %v11483_v15, %v1399_v42 }
 0x427   :  { %v11480_v10 = vadd.f32 %v11466_v53, %v1508_v50  ;;  %v11490_v20 = vadd.f32 %v11474_v63, %v1401_v48 }
 0x429   :  { %v1405_v54 = vpop.f32.mrb[22].mxu0  ;;  %v1512_v21 = vpop.f32.mrb[10].mxu1  ;;  %12635 = vst [vmem:[#allocation87_spill] sm:$0xff] %v11480_v10  ;;  %12636 = vst [vmem:[#allocation88_spill] sm:$0xff] %v11490_v20  ;;  %v1894_v26 = vmul.f32 %v11480_v10, %v11480_v10  ;;  %v1728_v42 = vsel %vm1727_vm6, %v11480_v10, 0.0 }
 0x42a   :  { %v1407_v57 = vpop.f32.mrb[23].mxu0  ;;  %v1514_v59 = vpop.f32.mrb[11].mxu1  ;;  %v11500_v28 = vadd.f32 %v11483_v15, %v1405_v54  ;;  %v11503_v11 = vadd.f32 %v11487_v6, %v1512_v21  ;;  %v1892_v54 = vmul.f32 %v11490_v20, %v11490_v20 }
 0x42b   :  { %v11477_v5 = vadd.f32 %v11466_v53, %v1514_v59  ;;  %v11493_v22 = vadd.f32 %v11474_v63, %v1407_v57  ;;  %v11515_v57 = vadd.f32 %v11487_v6, %v1506_v44  ;;  %v1955_v60 = vsel %vm1727_vm6, %v1894_v26, 0.0 }
 0x42c   :  { %v1691_v51 = vadd.f32 %v11500_v28, %v11509_v39 }
 0x42d   :  { %12634 = vst [vmem:[#allocation86_spill] sm:$0xff] %v11477_v5  ;;  %v1411_v12 = vpop.f32.mrb[24].mxu0  ;;  %v1518_v14 = vpop.f32.mrb[12].mxu1  ;;  %12637 = vst [vmem:[#allocation89_spill] sm:$0xff] %v11493_v22  ;;  %v1898_v24 = vmul.f32 %v11477_v5, %v11477_v5  ;;  %v1896_v21 = vmul.f32 %v11493_v22, %v11493_v22  ;;  %v1729_v59 = vsel %vm1727_vm6, %v11477_v5, 0.0  ;;  %v1715_v45 = vadd.f32 %v11503_v11, %v11515_v57 }
 0x42e   :  { %v1413_v18 = vpop.f32.mrb[25].mxu0  ;;  %v1520_v2 = vpop.f32.mrb[13].mxu1  ;;  %v11530_v44 = vadd.f32 %v11487_v6, %v1518_v14 }
 0x42f   :  { %v11506_v32 = vadd.f32 %v11466_v53, %v1520_v2  ;;  %v11512_v47 = vadd.f32 %v11474_v63, %v1413_v18  ;;  %v1956_v18 = vsel %vm1727_vm6, %v1898_v24, 0.0  ;;  %v11527_v2 = vadd.f32 %v11483_v15, %v1411_v12 }
 0x430   :  { %v1703_v12 = vadd.f32 %v11493_v22, %v11490_v20  ;;  %v1730_v24 = vadd.f32 %v1729_v59, %v1728_v42  ;;  %v1931_v10 = vadd.f32 %v1896_v21, %v1892_v54  ;;  %v1957_v56 = vadd.f32 %v1956_v18, %v1955_v60 }
 0x431   :  { %12638 = vst [vmem:[#allocation90_spill] sm:$0xff] %v11506_v32  ;;  %v1417_v33 = vpop.f32.mrb[26].mxu0  ;;  %v1524_v35 = vpop.f32.mrb[14].mxu1  ;;  %12639 = vst [vmem:[#allocation91_spill] sm:$0xff] %v11512_v47  ;;  %v1902_v1 = vmul.f32 %v11506_v32, %v11506_v32  ;;  %v1900_v14 = vmul.f32 %v11512_v47, %v11512_v47  ;;  %v1692_v17 = vadd.f32 %v1691_v51, %v11527_v2  ;;  %v1731_v42 = vsel %vm1727_vm6, %v11506_v32, 0.0 }
 0x432   :  { %v1419_v48 = vpop.f32.mrb[27].mxu0  ;;  %v1526_v50 = vpop.f32.mrb[15].mxu1  ;;  %v11547_v38 = vadd.f32 %v11483_v15, %v1417_v33  ;;  %v11550_v9 = vadd.f32 %v11487_v6, %v1524_v35  ;;  %v1716_v59 = vadd.f32 %v1715_v45, %v11530_v44  ;;  %v1704_v45 = vadd.f32 %v1703_v12, %v11512_v47 }
 0x433   :  { %v11544_v26 = vadd.f32 %v11474_v63, %v1419_v48  ;;  %v11557_v48 = vadd.f32 %v11466_v53, %v1526_v50  ;;  %v1958_v22 = vsel %vm1727_vm6, %v1902_v1, 0.0  ;;  %v1932_v21 = vadd.f32 %v1931_v10, %v1900_v14 }
 0x434   :  { %v1693_v32 = vadd.f32 %v1692_v17, %v11547_v38  ;;  %v1732_v12 = vadd.f32 %v1731_v42, %v1730_v24  ;;  %v1959_v10 = vadd.f32 %v1958_v22, %v1957_v56 }
 0x435   :  { %v1423_v0 = vpop.f32.mrb[28].mxu0  ;;  %v1530_v41 = vpop.f32.mrb[16].mxu1  ;;  %12640 = vst [vmem:[#allocation92_spill] sm:$0xff] %v11544_v26  ;;  %12641 = vst [vmem:[#allocation93_spill] sm:$0xff] %v11557_v48  ;;  %v1904_v50 = vmul.f32 %v11544_v26, %v11544_v26  ;;  %v1705_v14 = vadd.f32 %v1704_v45, %v11544_v26  ;;  %v1906_v47 = vmul.f32 %v11557_v48, %v11557_v48 }
 0x436   :  { %v1425_v27 = vpop.f32.mrb[29].mxu0  ;;  %v1532_v5 = vpop.f32.mrb[17].mxu1  ;;  %v11561_v60 = vadd.f32 %v11483_v15, %v1423_v0  ;;  %v11564_v33 = vadd.f32 %v11487_v6, %v1530_v41  ;;  %v1717_v41 = vadd.f32 %v1716_v59, %v11550_v9 }
 0x437   :  { %v11567_v35 = vadd.f32 %v11474_v63, %v1425_v27  ;;  %v11573_v18 = vadd.f32 %v11466_v53, %v1532_v5  ;;  %v1733_v5 = vsel %vm1727_vm6, %v11557_v48, 0.0  ;;  %v1933_v52 = vadd.f32 %v1932_v21, %v1904_v50 }
 0x438   :  { %v1694_v17 = vadd.f32 %v1693_v32, %v11561_v60  ;;  %v1718_v59 = vadd.f32 %v1717_v41, %v11564_v33  ;;  %v1734_v50 = vadd.f32 %v1733_v5, %v1732_v12  ;;  %v1960_v36 = vsel %vm1727_vm6, %v1906_v47, 0.0 }
 0x439   :  { %12642 = vst [vmem:[#allocation94_spill] sm:$0xff] %v11567_v35  ;;  %v1429_v51 = vpop.f32.mrb[30].mxu0  ;;  %v1536_v54 = vpop.f32.mrb[18].mxu1  ;;  %12643 = vst [vmem:[#allocation95_spill] sm:$0xff] %v11573_v18  ;;  %v1910_v56 = vmul.f32 %v11573_v18, %v11573_v18  ;;  %v1706_v26 = vadd.f32 %v1705_v14, %v11567_v35 }
 0x43a   :  { %v1431_v1 = vpop.f32.mrb[31].mxu0  ;;  %v1538_v0 = vpop.f32.mrb[19].mxu1  ;;  %v11578_v27 = vadd.f32 %v11483_v15, %v1429_v51  ;;  %v11581_v20 = vadd.f32 %v11487_v6, %v1536_v54  ;;  %v1908_v51 = vmul.f32 %v11567_v35, %v11567_v35 }
 0x43b   :  { %v11595_v22 = vadd.f32 %v11474_v63, %v1431_v1  ;;  %v11598_v24 = vadd.f32 %v11466_v53, %v1538_v0  ;;  %v1735_v1 = vsel %vm1727_vm6, %v11573_v18, 0.0  ;;  %v1961_v18 = vadd.f32 %v1960_v36, %v1959_v10 }
 0x43c   :  { %v1695_v32 = vadd.f32 %v1694_v17, %v11578_v27  ;;  %v1719_v41 = vadd.f32 %v1718_v59, %v11581_v20  ;;  %v1934_v17 = vadd.f32 %v1933_v52, %v1908_v51  ;;  %v1736_v5 = vadd.f32 %v1735_v1, %v1734_v50 }
 0x43d   :  { %v1435_v61 = vpop.f32.mrb[32].mxu0  ;;  %v1542_v54 = vpop.f32.mrb[20].mxu1  ;;  %12644 = vst [vmem:[#allocation96_spill] sm:$0xff] %v11595_v22  ;;  %12645 = vst [vmem:[#allocation97_spill] sm:$0xff] %v11598_v24  ;;  %v1912_v0 = vmul.f32 %v11595_v22, %v11595_v22  ;;  %v1914_v12 = vmul.f32 %v11598_v24, %v11598_v24 }
 0x43e   :  { %v1437_v42 = vpop.f32.mrb[33].mxu0  ;;  %v1544_v45 = vpop.f32.mrb[21].mxu1  ;;  %v11603_v48 = vadd.f32 %v11483_v15, %v1435_v61  ;;  %v11606_v21 = vadd.f32 %v11487_v6, %v1542_v54  ;;  %v1707_v15 = vadd.f32 %v1706_v26, %v11595_v22  ;;  %v1737_v6 = vsel %vm1727_vm6, %v11598_v24, 0.0 }
 0x43f   :  { %v11622_v14 = vadd.f32 %v11474_v63, %v1437_v42  ;;  %v1962_v54 = vsel %vm1727_vm6, %v1910_v56, 0.0  ;;  %v1935_v51 = vadd.f32 %v1934_v17, %v1912_v0  ;;  %v1738_v22 = vadd.f32 %v1737_v6, %v1736_v5 }
 0x440   :  { %v1696_v59 = vadd.f32 %v1695_v32, %v11603_v48  ;;  %v1720_v61 = vadd.f32 %v1719_v41, %v11606_v21  ;;  %v11629_v41 = vadd.f32 %v11466_v53, %v1544_v45  ;;  %v1964_v63 = vsel %vm1727_vm6, %v1914_v12, 0.0 }
 0x441   :  { %12646 = vst [vmem:[#allocation98_spill] sm:$0xff] %v11622_v14  ;;  %v1708_v32 = vadd.f32 %v1707_v15, %v11622_v14  ;;  %v1916_v26 = vmul.f32 %v11622_v14, %v11622_v14  ;;  %v1963_v1 = vadd.f32 %v1962_v54, %v1961_v18  ;;  %v1891_v18 = vmul.f32 %v11509_v39, %v11509_v39 }
 0x442   :  { %v1697_v47 = vrot.slane %v1696_v59, 4  ;;  %v1721_v52 = vrot.slane %v1720_v61, 4  ;;  %v1739_v56 = vsel %vm1727_vm6, %v11629_v41, 0.0  ;;  %v1918_v53 = vmul.f32 %v11629_v41, %v11629_v41 }
 0x443   :  { %v1709_v42 = vrot.slane %v1708_v32, 4  ;;  %v1936_v50 = vadd.f32 %v1935_v51, %v1916_v26  ;;  %v1740_v17 = vadd.f32 %v1739_v56, %v1738_v22  ;;  %v1965_v36 = vadd.f32 %v1964_v63, %v1963_v1 }
 0x444   :  { %v1698_v24 = vadd.f32 %v1697_v47, %v1696_v59  ;;  %v1722_v35 = vadd.f32 %v1721_v52, %v1720_v61  ;;  %v1895_v59 = vmul.f32 %v11500_v28, %v11500_v28  ;;  %v1966_v61 = vsel %vm1727_vm6, %v1918_v53, 0.0 }
 0x445   :  { %v1710_v43 = vadd.f32 %v1709_v42, %v1708_v32  ;;  %v1937_v14 = vrot.slane %v1936_v50, 4  ;;  %v1741_v45 = vrot.slane %v1740_v17, 4  ;;  %v1967_v5 = vadd.f32 %v1966_v61, %v1965_v36 }
 0x446   :  { %v1699_v0 = vrot.slane %v1698_v24, 2  ;;  %v1723_v15 = vrot.slane %v1722_v35, 2  ;;  %v1899_v54 = vmul.f32 %v11527_v2, %v11527_v2  ;;  %v1919_v63 = vadd.f32 %v1895_v59, %v1891_v18 }
 0x447   :  { %v1711_v6 = vrot.slane %v1710_v43, 2  ;;  %v1938_v12 = vadd.f32 %v1937_v14, %v1936_v50  ;;  %v1742_v22 = vadd.f32 %v1741_v45, %v1740_v17  ;;  %v1968_v26 = vrot.slane %v1967_v5, 4 }
 0x448   :  { %v1700_v10 = vadd.f32 %v1699_v0, %v1698_v24  ;;  %v1724_v47 = vadd.f32 %v1723_v15, %v1722_v35  ;;  %v1903_v14 = vmul.f32 %v11547_v38, %v11547_v38  ;;  %v1920_v0 = vadd.f32 %v1919_v63, %v1899_v54 }
 0x449   :  { %v1712_v52 = vadd.f32 %v1711_v6, %v1710_v43  ;;  %v1939_v51 = vrot.slane %v1938_v12, 2  ;;  %v1743_v32 = vrot.slane %v1742_v22, 2  ;;  %v1969_v50 = vadd.f32 %v1968_v26, %v1967_v5 }
 0x44a   :  { %v1701_v24 = vrot.slane %v1700_v10, 1  ;;  %v1725_v17 = vrot.slane %v1724_v47, 1  ;;  %v1907_v35 = vmul.f32 %v11561_v60, %v11561_v60  ;;  %v1921_v59 = vadd.f32 %v1920_v0, %v1903_v14  ;;  %v12650_v14 = vld [vmem:[#allocation78_spill] sm:$0xff] }
 0x44b   :  { %v1713_v42 = vrot.slane %v1712_v52, 1  ;;  %v1940_v56 = vadd.f32 %v1939_v51, %v1938_v12  ;;  %v1744_v1 = vadd.f32 %v1743_v32, %v1742_v22  ;;  %v1970_v45 = vrot.slane %v1969_v50, 2 }
 0x44c   :  { %v1702_v43 = vadd.f32 %v1701_v24, %v1700_v10  ;;  %v1911_v6 = vmul.f32 %v11578_v27, %v11578_v27  ;;  %v1726_v22 = vadd.f32 %v1725_v17, %v1724_v47  ;;  %v1922_v5 = vadd.f32 %v1921_v59, %v1907_v35  ;;  %v12654_v17 = vld [vmem:[#allocation81_spill] sm:$0xff] }
 0x44d   :  { %v1714_v53 = vadd.f32 %v1713_v42, %v1712_v52  ;;  %v1941_v36 = vrot.slane %v1940_v56, 1  ;;  %v1745_v15 = vrot.slane %v1744_v1, 1  ;;  %v1971_v18 = vadd.f32 %v1970_v45, %v1969_v50  ;;  %v12648_v42 = vld [vmem:[#allocation77_spill] sm:$0xff]  ;;  %v12652_v50 = vld [vmem:[#allocation79_spill] sm:$0xff] }
 0x44e   :  { %v1915_v54 = vmul.f32 %v11603_v48, %v11603_v48  ;;  %v1923_v52 = vadd.f32 %v1922_v5, %v1911_v6  ;;  %v12647_v47 = vmov 0.0|0.0   ;;  %v1909_v24 = vmul.f32 %v11564_v33, %v11564_v33  ;;  %v1681_v45 = vld [vmem:[#allocation14] sm:$0xff] }
 0x44f   :  { %1814 = vmatprep.mubr.f32.mxu0 %v1714_v53  ;;  %v1942_v61 = vadd.f32 %v1941_v36, %v1940_v56  ;;  %v1746_v12 = vadd.f32 %v1745_v15, %v1744_v1  ;;  %v1972_v10 = vrot.slane %v1971_v18, 1  ;;  %v12653_v1 = vld [vmem:[#allocation80_spill] sm:$0xff]  ;;  %v12655_v36 = vld [vmem:[#allocation83_spill] sm:$0xff]  ;;  %v1686_v15 = vld [vmem:[#allocation14 + $0x28] sm:$0xff] }
 0x450   :  { %1815 = vmatmul.mubr.f32.vlgmr.msra.gmra.mrb[34].mxu0 %v1702_v43  ;;  %v1682_v43 = vld [vmem:[#allocation14 + $0x8] sm:$0xff]  ;;  %v1685_v59 = vld [vmem:[#allocation14 + $0x20] sm:$0xff] }
 0x451   :  { %8371 = vmatpush3.bf16.msra.mxu0 %v11336_v23  ;;  %2041 = vmatprep.mubr.f32.mxu0 %v1942_v61  ;;  %v1973_v51 = vadd.f32 %v1972_v10, %v1971_v18  ;;  %v1924_v23 = vadd.f32 %v1923_v52, %v1915_v54  ;;  %v8436_v61 = vpack.c.bf16 %v1686_v15, %v1682_v43  ;;  %v1688_v18 = vld [vmem:[#allocation14 + $0x38] sm:$0xff]  ;;  %v12658_v43 = vld [vmem:[#allocation89_spill] sm:$0xff] }
 0x452   :  { %7746 = vmatprep.mubr.msk.f32.mxu1 %vm1727_vm6, %v1746_v12  ;;  %8373 = vmatprep.subr.bf16.mxu0 %v11348_v29  ;;  %v8438_v6 = vpack.c.bf16 %v1685_v59, %v1681_v45  ;;  %v1684_v12 = vld [vmem:[#allocation14 + $0x18] sm:$0xff] }
 0x453   :  { %1885 = vmatmul.mubr.f32.vlgmr.msra.gmra.mrb[22].mxu1 %v1726_v22  ;;  %v1925_v29 = vrot.slane %v1924_v23, 4  ;;  %v8440_v22 = vpack.c.bf16 %v1688_v18, %v1684_v12  ;;  %v12659_v45 = vld [vmem:[#allocation91_spill] sm:$0xff]  ;;  %v12660_v59 = vld [vmem:[#allocation92_spill] sm:$0xff] }
 0x454   :  { %8402 = vmatpush1.bf16.msra.mxu1 %v11279_v62  ;;  %7747 = vmatprep.mubr.msk.f32.mxu1 %vm1727_vm6, %v1973_v51  ;;  %v1897_v62 = vmul.f32 %v11503_v11, %v11503_v11 }
 0x455   :  { %8375 = vmatpush3.bf16.msra.mxu0 %v11353_v31  ;;  %8403 = vmatprep.subr.bf16.mxu1 %v12647_v47  ;;  %v1893_v31 = vmul.f32 %v11515_v57, %v11515_v57 }
 0x456   :  { %8377 = vmatprep.subr.bf16.mxu0 %v11364_v37  ;;  %v1901_v37 = vmul.f32 %v11530_v44, %v11530_v44 }
 0x458   :  { %8405 = vmatpush1.bf16.msra.mxu1 %v11315_v16  ;;  %v1926_v16 = vadd.f32 %v1925_v29, %v1924_v23 }
 0x459   :  { %8379 = vmatpush3.bf16.msra.mxu0 %v11369_v40  ;;  %8406 = vmatprep.subr.bf16.mxu1 %v12647_v47  ;;  %v1943_v40 = vadd.f32 %v1897_v62, %v1893_v31 }
 0x45a   :  { %8381 = vmatprep.subr.bf16.mxu0 %v11380_v46  ;;  %v1905_v46 = vmul.f32 %v11550_v9, %v11550_v9 }
 0x45c   :  { %8408 = vmatpush1.bf16.msra.mxu1 %v11321_v19  ;;  %v1944_v19 = vadd.f32 %v1943_v40, %v1901_v37 }
 0x45d   :  { %8383 = vmatpush3.bf16.msra.mxu0 %v11384_v49  ;;  %8409 = vmatprep.subr.bf16.mxu1 %v12647_v47  ;;  %v1927_v49 = vrot.slane %v1926_v16, 2 }
 0x45e   :  { %8385 = vmatprep.subr.bf16.mxu0 %v11397_v55  ;;  %v1945_v32 = vadd.f32 %v1944_v19, %v1905_v46  ;;  %v1913_v55 = vmul.f32 %v11581_v20, %v11581_v20 }
 0x460   :  { %8411 = vmatpush1.bf16.msra.mxu1 %v11327_v4  ;;  %v1946_v26 = vadd.f32 %v1945_v32, %v1909_v24  ;;  %v1917_v4 = vmul.f32 %v11606_v21, %v11606_v21 }
 0x461   :  { %8387 = vmatpush3.bf16.msra.mxu0 %v11401_v58  ;;  %8412 = vmatprep.subr.bf16.mxu1 %v12647_v47  ;;  %v1928_v58 = vadd.f32 %v1927_v49, %v1926_v16 }
 0x462   :  { %8389 = vmatprep.subr.bf16.mxu0 %v11412_v7  ;;  %v1947_v63 = vadd.f32 %v1946_v26, %v1913_v55  ;;  %v1683_v55 = vld [vmem:[#allocation14 + $0x10] sm:$0xff] }
 0x463   :  { %v1687_v26 = vld [vmem:[#allocation14 + $0x30] sm:$0xff] }
 0x464   :  { %8414 = vmatpush1.bf16.msra.mxu1 %v11342_v25  ;;  %v1948_v7 = vadd.f32 %v1947_v63, %v1917_v4  ;;  %v1929_v25 = vrot.slane %v1928_v58, 1  ;;  %v1689_v4 = vld [vmem:[#allocation11] sm:$0x1]  ;;  %v8442_v63 = vpack.c.bf16 %v1687_v26, %v1683_v55 }
 0x465   :  { %8391 = vmatpush3.bf16.msra.mxu0 %v11416_v13  ;;  %8415 = vmatprep.subr.bf16.mxu1 %v12647_v47  ;;  %v12649_v13 = vld [vmem:[#allocation82_spill] sm:$0xff] }
 0x466   :  { %8393 = vmatprep.subr.bf16.mxu0 %v11428_v3  ;;  %v1949_v56 = vrot.slane %v1948_v7, 4  ;;  %v1930_v3 = vadd.f32 %v1929_v25, %v1928_v58 }
 0x468   :  { %8417 = vmatpush1.bf16.msra.mxu1 %v11358_v34  ;;  %v1950_v34 = vadd.f32 %v1949_v56, %v1948_v7 }
 0x469   :  { %8395 = vmatpush3.bf16.msra.mxu0 %v11432_v8  ;;  %8418 = vmatprep.subr.bf16.mxu1 %v12647_v47  ;;  %v12651_v8 = vmov 0.0  }
 0x46a   :  { %8397 = vmatprep.subr.bf16.mxu0 %v11445_v30  ;;  %v1951_v30 = vrot.slane %v1950_v34, 2 }
 0x46c   :  { %8420 = vmatpush1.bf16.msra.mxu1 %v12648_v42  ;;  %v1952_v0 = vadd.f32 %v1951_v30, %v1950_v34  ;;  %v1690_v42 = vld [vmem:[#allocation13] sm:$0x1] }
 0x46d   :  { %8399 = vmatpush3.bf16.msra.mxu0 %v12649_v13  ;;  %8421 = vmatprep.subr.bf16.mxu1 %v12647_v47 }
 0x46e   :  { %v1953_v53 = vrot.slane %v1952_v0, 1  ;;  %8437 = vmatprep.subr.bf16.mxu0 %v8436_v61 }
 0x470   :  { %8423 = vmatpush1.bf16.msra.mxu1 %v12650_v14  ;;  %2042 = vmatmul.mubr.f32.vlgmr.msra.gmra.mrb[36].mxu0 %v1930_v3  ;;  %v1954_v35 = vadd.f32 %v1953_v53, %v1952_v0  ;;  %v12656_v3 = vld [vmem:[#allocation85_spill] sm:$0xff] }
 0x471   :  { %8424 = vmatprep.subr.bf16.mxu1 %v12647_v47  ;;  %2193 = vmatprep.mubr.f32.mxu0 %v12651_v8 }
 0x472   :  { %8439 = vmatpush1.bf16.msra.mxu0 %v8438_v6 }
 0x473   :  { %8441 = vmatprep.subr.bf16.mxu0 %v8440_v22 }
 0x474   :  { %8426 = vmatpush1.bf16.msra.mxu1 %v12652_v50 }
 0x475   :  { %8427 = vmatprep.subr.bf16.mxu1 %v12647_v47 }
 0x478   :  { %8429 = vmatpush1.bf16.msra.mxu1 %v12653_v1 }
 0x479   :  { %8430 = vmatprep.subr.bf16.mxu1 %v12647_v47 }
 0x47c   :  { %8432 = vmatpush1.bf16.msra.mxu1 %v12654_v17 }
 0x47d   :  { %8433 = vmatprep.subr.bf16.mxu1 %v12647_v47 }
 0x480   :  { %8435 = vmatpush1.bf16.msra.mxu1 %v12655_v36  ;;  %v12657_v36 = vld [vmem:[#allocation88_spill] sm:$0xff] }
 0x483   :  { %2112 = vmatmul.mubr.f32.vlgmr.msra.gmra.mrb[24].mxu1 %v1954_v35 }
 0x484   :  { %3030 = vmatprep.mubr.f32.mxu1 %v12651_v8 }
 0x523   :  { %v7922_v5 = vpop.f32.mrb[34].mxu0 }
 0x524   :  { %v7923_v54 = vpop.f32.mrb[35].mxu0 }
 0x525   :  { %v7924_v10 = vadd.f32 %v7923_v54, %v7922_v5  ;;  %v12662_v5 = vld [vmem:[#allocation96_spill] sm:$0xff] }
 0x526   :  { %v1886_v52 = vpop.f32.mrb[22].mxu1 }
 0x527   :  { %v1887_v51 = vadd.f32 %v7924_v10, %v1886_v52  ;;  %v1888_v23 = vpop.f32.mrb[23].mxu1  ;;  %v12663_v10 = vld [vmem:[#allocation98_spill] sm:$0xff] }
 0x529   :  { %v1890_v37 = vmul.f32 0.0006377551, %v1887_v51 }
 0x52b   :  { %v2118_v19 = vmul.f32 %v1890_v37, %v1890_v37 }
 0x543   :  { %v7957_v29 = vpop.f32.mrb[36].mxu0 }
 0x544   :  { %v7958_v62 = vpop.f32.mrb[37].mxu0 }
 0x545   :  { %v7959_v31 = vadd.f32 %v7958_v62, %v7957_v29 }
 0x556   :  { %v2113_v16 = vpop.f32.mrb[24].mxu1 }
 0x557   :  { %v2114_v40 = vadd.f32 %v7959_v31, %v2113_v16  ;;  %v2115_v46 = vpop.f32.mrb[25].mxu1 }
 0x558   :  { %v12666_v46 = vld [vmem:[#allocation90_spill] sm:$0xff] }
 0x559   :  { %v2117_v24 = vmul.f32 0.0006377551, %v2114_v40  ;;  %v12665_v40 = vld [vmem:[#allocation86_spill] sm:$0xff] }
 0x55b   :  { %v2119_v49 = vsub.f32 %v2117_v24, %v2118_v19  ;;  %v12667_v24 = vld [vmem:[#allocation93_spill] sm:$0xff] }
 0x55d   :  { %v2120_v32 = vadd.f32 1e-05, %v2119_v49 }
 0x55f   :  { %9966 = vrsqrt.f32 %v2120_v32 }
 0x569   :  { %v9967_v58 = vpop.eup %9966 }
 0x56a   :  { %v2122_v7 = vmul.f32 %v9967_v58, %v1689_v4 }
 0x56c   :  { %7748 = vmatmul.mubr.msk.f32.vlgmr.msra.gmra.mrb[38].mxu0 %vm2125_vm7, %v2122_v7  ;;  %v2123_v25 = vmul.f32 %v2122_v7, %v1890_v37  ;;  %v12664_v37 = vld [vmem:[#allocation87_spill] sm:$0xff] }
 0x56d   :  { %8443 = vmatpush1.bf16.msra.mxu0 %v8442_v63  ;;  %2264 = vmatprep.mubr.f32.mxu0 %v12651_v8 }
 0x56e   :  { %8445 = vmatprep.subr.bf16.mxu0 %v8436_v61  ;;  %v2124_v56 = vsub.f32 %v1690_v42, %v2123_v25 }
 0x570   :  { %7749 = vmatmul.mubr.msk.f32.vlgmr.msra.gmra.mrb[40].mxu0 %vm2125_vm7, %v2122_v7 }
 0x571   :  { %8447 = vmatpush1.bf16.msra.mxu0 %v8438_v6  ;;  %2338 = vmatprep.mubr.f32.mxu0 %v12651_v8 }
 0x572   :  { %8449 = vmatprep.subr.bf16.mxu0 %v8440_v22  ;;  %v12661_v22 = vld [vmem:[#allocation94_spill] sm:$0xff] }
 0x574   :  { %7750 = vmatmul.mubr.msk.f32.vlgmr.msra.gmra.mrb[42].mxu0 %vm2125_vm7, %v2124_v56 }
 0x575   :  { %8451 = vmatpush1.bf16.msra.mxu0 %v8442_v63  ;;  %2409 = vmatprep.mubr.f32.mxu0 %v12651_v8 }
 0x578   :  { %7751 = vmatmul.mubr.msk.f32.vlgmr.msra.gmra.mrb[44].mxu0 %vm2125_vm7, %v2124_v56 }
 0x579   :  { %2840 = vmatprep.mubr.f32.mxu0 %v12651_v8 }
 0x63f   :  { %v2195_v13 = vpop.f32.mrb[38].mxu0 }
 0x640   :  { %v2419_v14 = vrot.slane %v2195_v13, %v12656_v3  ;;  %v2197_v34 = vpop.f32.mrb[39].mxu0 }
 0x641   :  { %v2423_v50 = vrot.slane %v2197_v34, %v12656_v3 }
 0x642   :  { %v2432_v30 = vmul.f32 %v2419_v14, %v11509_v39  ;;  %v2436_v1 = vmul.f32 %v2419_v14, %v11500_v28  ;;  %v2440_v0 = vmul.f32 %v2419_v14, %v11527_v2  ;;  %v2444_v17 = vmul.f32 %v2419_v14, %v11547_v38 }
 0x643   :  { %v2266_v53 = vpop.f32.mrb[40].mxu0  ;;  %v2433_v35 = vmul.f32 %v2423_v50, %v12657_v36  ;;  %v2437_v15 = vmul.f32 %v2423_v50, %v12658_v43  ;;  %v2441_v61 = vmul.f32 %v2423_v50, %v12659_v45  ;;  %v2445_v6 = vmul.f32 %v2423_v50, %v12660_v59 }
 0x644   :  { %v2427_v12 = vrot.slane %v2266_v53, %v12656_v3  ;;  %v2268_v18 = vpop.f32.mrb[41].mxu0  ;;  %v2449_v39 = vmul.f32 %v2423_v50, %v12661_v22  ;;  %v2453_v28 = vmul.f32 %v2423_v50, %v12662_v5  ;;  %v2448_v2 = vmul.f32 %v2419_v14, %v11561_v60 }
 0x645   :  { %v2431_v38 = vrot.slane %v2268_v18, %v12656_v3  ;;  %v2452_v54 = vmul.f32 %v2419_v14, %v11578_v27  ;;  %v2457_v52 = vmul.f32 %v2423_v50, %v12663_v10  ;;  %v2456_v51 = vmul.f32 %v2419_v14, %v11603_v48 }
 0x646   :  { %v2434_v23 = vmul.f32 %v2427_v12, %v11515_v57  ;;  %v11735_v29 = vmul.f32 %v2427_v12, %v11503_v11  ;;  %v11738_v62 = vmul.f32 %v2427_v12, %v11530_v44  ;;  %v11741_v31 = vmul.f32 %v2427_v12, %v11550_v9  ;;  %v12668_v11 = vld [vmem:[#allocation95_spill] sm:$0xff]  ;;  %v12669_v44 = vld [vmem:[#allocation97_spill] sm:$0xff] }
 0x647   :  { %v2340_v60 = vpop.f32.mrb[42].mxu0  ;;  %v2435_v16 = vmul.f32 %v2431_v38, %v12664_v37  ;;  %v2439_v27 = vmul.f32 %v2431_v38, %v12665_v40  ;;  %v2443_v19 = vmul.f32 %v2431_v38, %v12666_v46  ;;  %v2447_v48 = vmul.f32 %v2431_v38, %v12667_v24 }
 0x648   :  { %v2463_v57 = vrot.slane %v2340_v60, %v12656_v3  ;;  %v2342_v49 = vpop.f32.mrb[43].mxu0  ;;  %v11749_v32 = vmul.f32 %v2431_v38, %v12668_v11  ;;  %v11752_v55 = vmul.f32 %v2431_v38, %v12669_v44  ;;  %v11755_v9 = vmul.f32 %v2427_v12, %v11564_v33 }
 0x649   :  { %v2467_v26 = vrot.slane %v2342_v49, %v12656_v3  ;;  %v11759_v4 = vmul.f32 %v2427_v12, %v11581_v20  ;;  %v11762_v58 = vmul.f32 %v2431_v38, %v11629_v41  ;;  %v11765_v63 = vmul.f32 %v2427_v12, %v11606_v21 }
 0x64a   :  { %v2476_v7 = vadd.f32 %v2463_v57, %v2432_v30  ;;  %v2480_v25 = vadd.f32 %v2463_v57, %v2436_v1  ;;  %v2484_v42 = vadd.f32 %v2463_v57, %v2440_v0  ;;  %v2488_v56 = vadd.f32 %v2463_v57, %v2444_v17 }
 0x64b   :  { %v2411_v13 = vpop.f32.mrb[44].mxu0  ;;  %v2477_v14 = vadd.f32 %v2467_v26, %v2433_v35  ;;  %v2481_v34 = vadd.f32 %v2467_v26, %v2437_v15  ;;  %v2485_v33 = vadd.f32 %v2467_v26, %v2441_v61  ;;  %v2489_v50 = vadd.f32 %v2467_v26, %v2445_v6 }
 0x64c   :  { %v11768_v53 = vrot.slane %v2411_v13, %v12656_v3  ;;  %v2413_v20 = vpop.f32.mrb[45].mxu0  ;;  %v2504_v36 = vmax.f32 %v2476_v7, 0.0  ;;  %v2508_v43 = vmax.f32 %v2480_v25, 0.0  ;;  %v2512_v41 = vmax.f32 %v2484_v42, 0.0 }
 0x64d   :  { %v2475_v45 = vrot.slane %v2413_v20, %v12656_v3  ;;  %v2505_v21 = vmax.f32 %v2477_v14, 0.0  ;;  %v2509_v59 = vmax.f32 %v2481_v34, 0.0  ;;  %v2513_v30 = vmax.f32 %v2485_v33, 0.0 }
 0x64e   :  { %v8454_v1 = vpack.c.bf16 %v2508_v43, %v2504_v36  ;;  %v2517_v0 = vmax.f32 %v2489_v50, 0.0  ;;  %v2516_v17 = vmax.f32 %v2488_v56, 0.0  ;;  %v2493_v12 = vadd.f32 %v2467_v26, %v2449_v39  ;;  %v2543_v36 = vld [vmem:[#allocation19 + $0x18] sm:$0xff] }
 0x64f   :  { %v8452_v35 = vpack.c.bf16 %v2509_v59, %v2505_v21  ;;  %v2497_v15 = vadd.f32 %v2467_v26, %v2453_v28  ;;  %v2492_v61 = vadd.f32 %v2463_v57, %v2448_v2  ;;  %v2496_v6 = vadd.f32 %v2463_v57, %v2452_v54  ;;  %v11805_v59 = vld [vmem:[#allocation17] sm:$0xff] }
 0x650   :  { %v8456_v18 = vpack.c.bf16 %v2517_v0, %v2513_v30  ;;  %v8458_v22 = vpack.c.bf16 %v2516_v17, %v2512_v41  ;;  %v2521_v5 = vmax.f32 %v2493_v12, 0.0  ;;  %v2501_v38 = vadd.f32 %v2467_v26, %v2457_v52  ;;  %v11801_v41 = vld [vmem:[#allocation16] sm:$0xff]  ;;  %v2545_v30 = vld [vmem:[#allocation19 + $0x28] sm:$0xff]  ;;  %v2546_v12 = vld [vmem:[#allocation19 + $0x30] sm:$0xff] }
 0x651   :  { %8453 = vmatprep.subr.bf16.mxu0 %v8452_v35  ;;  %8477 = vmatprep.subr.bf16.mxu1 %v8452_v35  ;;  %v2525_v10 = vmax.f32 %v2497_v15, 0.0  ;;  %v2520_v60 = vmax.f32 %v2492_v61, 0.0  ;;  %v2524_v37 = vmax.f32 %v2496_v6, 0.0  ;;  %v2500_v40 = vadd.f32 %v2463_v57, %v2456_v51  ;;  %v11813_v0 = vld [vmem:[#allocation16 + $0x8] sm:$0xff]  ;;  %v2544_v17 = vld [vmem:[#allocation19 + $0x20] sm:$0xff] }
 0x652   :  { %8455 = vmatpush1.bf16.msra.mxu0 %v8454_v1  ;;  %8479 = vmatpush1.bf16.msra.mxu1 %v8454_v1  ;;  %v2479_v46 = vadd.f32 %v2475_v45, %v2435_v16  ;;  %v2483_v24 = vadd.f32 %v2475_v45, %v2439_v27  ;;  %v2478_v39 = vadd.f32 %v11768_v53, %v2434_v23  ;;  %v2529_v54 = vmax.f32 %v2501_v38, 0.0  ;;  %v2547_v1 = vld [vmem:[#allocation19 + $0x38] sm:$0xff]  ;;  %v11818_v35 = vld [vmem:[#allocation17 + $0x8] sm:$0xff]  ;;  %v2550_v38 = vld [vmem:[#allocation19 + $0x50] sm:$0xff] }
 0x653   :  { %8457 = vmatprep.subr.bf16.mxu0 %v8456_v18  ;;  %8481 = vmatprep.subr.bf16.mxu1 %v8456_v18  ;;  %v8460_v28 = vpack.c.bf16 %v2525_v10, %v2521_v5  ;;  %v8462_v2 = vpack.c.bf16 %v2524_v37, %v2520_v60  ;;  %v2482_v52 = vadd.f32 %v11768_v53, %v11735_v29  ;;  %v2528_v43 = vmax.f32 %v2500_v40, 0.0  ;;  %v2549_v6 = vld [vmem:[#allocation19 + $0x48] sm:$0xff]  ;;  %v2551_v18 = vld [vmem:[#allocation19 + $0x58] sm:$0xff]  ;;  %v2548_v5 = vld [vmem:[#allocation19 + $0x40] sm:$0xff] }
 0x654   :  { %v2507_v49 = vmax.f32 %v2479_v46, 0.0  ;;  %v2511_v11 = vmax.f32 %v2483_v24, 0.0  ;;  %v2506_v44 = vmax.f32 %v2478_v39, 0.0  ;;  %v2487_v26 = vadd.f32 %v2475_v45, %v2443_v19  ;;  %v11830_v10 = vld [vmem:[#allocation17 + $0x10] sm:$0xff]  ;;  %v2553_v46 = vld [vmem:[#allocation19 + $0x68] sm:$0xff]  ;;  %v2555_v24 = vld [vmem:[#allocation19 + $0x78] sm:$0xff] }
 0x655   :  { %v2510_v7 = vmax.f32 %v2482_v52, 0.0  ;;  %v2491_v51 = vadd.f32 %v2475_v45, %v2447_v48  ;;  %v2486_v16 = vadd.f32 %v11768_v53, %v11738_v62  ;;  %v2490_v23 = vadd.f32 %v11768_v53, %v11741_v31  ;;  %v11837_v39 = vld [vmem:[#allocation16 + $0x18] sm:$0xf] }
 0x656   :  { %8459 = vmatpush1.bf16.msra.mxu0 %v8458_v22  ;;  %8483 = vmatpush1.bf16.msra.mxu1 %v8458_v22  ;;  %v11778_v27 = vpack.c.bf16 %v2511_v11, %v2507_v49  ;;  %v2515_v57 = vmax.f32 %v2487_v26, 0.0  ;;  %v2495_v25 = vadd.f32 %v2475_v45, %v11749_v32  ;;  %v2499_v29 = vadd.f32 %v2475_v45, %v11752_v55  ;;  %v11824_v22 = vld [vmem:[#allocation16 + $0x10] sm:$0xff]  ;;  %v11845_v52 = vld [vmem:[#allocation17 + $0x18] sm:$0xf]  ;;  %v2557_v11 = vld [vmem:[#allocation19 + $0x88] sm:$0xff] }
 0x657   :  { %8461 = vmatprep.subr.bf16.mxu0 %v8460_v28  ;;  %8485 = vmatprep.subr.bf16.mxu1 %v8460_v28  ;;  %v11782_v19 = vpack.c.bf16 %v2510_v7, %v2506_v44  ;;  %v2519_v48 = vmax.f32 %v2491_v51, 0.0  ;;  %v2514_v42 = vmax.f32 %v2486_v16, 0.0  ;;  %v2518_v56 = vmax.f32 %v2490_v23, 0.0  ;;  %v2552_v28 = vld [vmem:[#allocation19 + $0x60] sm:$0xff]  ;;  %v2559_v44 = vld [vmem:[#allocation19 + $0x98] sm:$0xff]  ;;  %v2558_v51 = vld [vmem:[#allocation19 + $0x90] sm:$0xff] }
 0x658   :  { %v2523_v62 = vmax.f32 %v2495_v25, 0.0  ;;  %v2527_v13 = vmax.f32 %v2499_v29, 0.0  ;;  %v2494_v31 = vadd.f32 %v11768_v53, %v11755_v9  ;;  %v2498_v14 = vadd.f32 %v11768_v53, %v11759_v4  ;;  %v2541_v4 = vld [vmem:[#allocation19 + $0x8] sm:$0xff]  ;;  %v2556_v7 = vld [vmem:[#allocation19 + $0x80] sm:$0xff] }
 0x659   :  { %v11788_v34 = vpack.c.bf16 %v2519_v48, %v2515_v57  ;;  %v11790_v32 = vpack.c.bf16 %v2518_v56, %v2514_v42  ;;  %v11793_v55 = vadd.f32 %v2475_v45, %v11762_v58  ;;  %v11797_v33 = vadd.f32 %v11768_v53, %v11765_v63  ;;  %v2540_v58 = vld [vmem:[#allocation19] sm:$0xff]  ;;  %v2542_v45 = vld [vmem:[#allocation19 + $0x10] sm:$0xff]  ;;  %v2561_v23 = vld [vmem:[#allocation19 + $0xa8] sm:$0xff] }
 0x65a   :  { %8463 = vmatpush1.bf16.msra.mxu0 %v8462_v2  ;;  %8487 = vmatpush1.bf16.msra.mxu1 %v8462_v2  ;;  %v11799_v50 = vpack.c.bf16 %v2527_v13, %v2523_v62  ;;  %v2522_v20 = vmax.f32 %v2494_v31, 0.0  ;;  %v2526_v9 = vmax.f32 %v2498_v14, 0.0  ;;  %v8500_v63 = vpack.c.bf16 %v2543_v36, %v2541_v4  ;;  %v2554_v2 = vld [vmem:[#allocation19 + $0x70] sm:$0xff]  ;;  %v2563_v57 = vld [vmem:[#allocation19 + $0xb8] sm:$0xff]  ;;  %v2560_v29 = vld [vmem:[#allocation19 + $0xa0] sm:$0xff] }
 0x65b   :  { %2788 = vmatprep.subr.mxu0 %v2529_v54  ;;  %2978 = vmatprep.subr.mxu1 %v2529_v54  ;;  %v8502_v53 = vpack.c.bf16 %v2542_v45, %v2540_v58  ;;  %v8504_v15 = vpack.c.bf16 %v2547_v1, %v2545_v30  ;;  %v8506_v61 = vpack.c.bf16 %v2546_v12, %v2544_v17  ;;  %v2531_v37 = vmax.f32 %v11793_v55, 0.0  ;;  %v2562_v48 = vld [vmem:[#allocation19 + $0xb0] sm:$0xff]  ;;  %v2565_v42 = vld [vmem:[#allocation19 + $0xc8] sm:$0xff]  ;;  %v2567_v56 = vld [vmem:[#allocation19 + $0xd8] sm:$0xff] }
 0x65c   :  { %v11803_v21 = vpack.c.bf16 %v2526_v9, %v2522_v20  ;;  %v8508_v60 = vpack.c.bf16 %v2551_v18, %v2549_v6  ;;  %v8510_v40 = vpack.c.bf16 %v2550_v38, %v2548_v5  ;;  %v2530_v54 = vmax.f32 %v11797_v33, 0.0  ;;  %v2566_v13 = vld [vmem:[#allocation19 + $0xd0] sm:$0xff]  ;;  %v2653_v31 = vld [vmem:[#allocation20 + $0x8] sm:$0xff]  ;;  %v2571_v9 = vld [vmem:[#allocation19 + $0xf8] sm:$0xff] }
 0x65d   :  { %v8512_v49 = vpack.c.bf16 %v2555_v24, %v2553_v46  ;;  %v8514_v26 = vpack.c.bf16 %v2554_v2, %v2552_v28  ;;  %v8516_v16 = vpack.c.bf16 %v2559_v44, %v2557_v11  ;;  %v8518_v25 = vpack.c.bf16 %v2558_v51, %v2556_v7  ;;  %v2569_v20 = vld [vmem:[#allocation19 + $0xe8] sm:$0xff]  ;;  %v2570_v36 = vld [vmem:[#allocation19 + $0xf0] sm:$0xff]  ;;  %v2575_v30 = vld [vmem:[#allocation19 + $0x118] sm:$0xff] }
 0x65e   :  { %2789 = vmatpush1.msra.mxu0 %v2528_v43  ;;  %2979 = vmatpush1.msra.mxu1 %v2528_v43  ;;  %v8522_v62 = vpack.c.bf16 %v2562_v48, %v2560_v29  ;;  %v8524_v14 = vpack.c.bf16 %v2567_v56, %v2565_v42  ;;  %v2652_v43 = vld [vmem:[#allocation20] sm:$0xff]  ;;  %v2657_v58 = vld [vmem:[#allocation20 + $0x28] sm:$0xff]  ;;  %v8528_v45 = vpack.c.bf16 %v2571_v9, %v2569_v20  ;;  %v2663_v18 = vld [vmem:[#allocation20 + $0x58] sm:$0xff] }
 0x65f   :  { %7752 = vmatmul.mubr.msk.f32.vlgmr.msra.gmra.mrb[46].mxu0 %vm504_vm1, %v11801_v41  ;;  %8465 = vmatprep.subr.bf16.mxu0 %v11778_v27  ;;  %v2572_v1 = vld [vmem:[#allocation19 + $0x100] sm:$0xff]  ;;  %v2579_v5 = vld [vmem:[#allocation19 + $0x138] sm:$0xff]  ;;  %v2662_v24 = vld [vmem:[#allocation20 + $0x50] sm:$0xff] }
 0x660   :  { %7760 = vmatmul.mubr.msk.f32.vlgmr.msra.gmra.mrb[26].mxu1 %vm504_vm1, %v11805_v59  ;;  %8467 = vmatpush1.bf16.msra.mxu0 %v11782_v19  ;;  %v2656_v12 = vld [vmem:[#allocation20 + $0x20] sm:$0xff]  ;;  %v2667_v2 = vld [vmem:[#allocation20 + $0x78] sm:$0xff]  ;;  %v2582_v7 = vld [vmem:[#allocation19 + $0x150] sm:$0xff] }
 0x661   :  { %8469 = vmatprep.subr.bf16.mxu0 %v11788_v34  ;;  %2846 = vmatprep.mubr.f32.mxu0 %v12651_v8  ;;  %v2660_v46 = vld [vmem:[#allocation20 + $0x40] sm:$0xff]  ;;  %v2669_v29 = vld [vmem:[#allocation20 + $0x88] sm:$0xff]  ;;  %v2671_v48 = vld [vmem:[#allocation20 + $0x98] sm:$0xff] }
 0x662   :  { %3036 = vmatprep.mubr.f32.mxu1 %v12651_v8  ;;  %8501 = vmatprep.subr.bf16.mxu1 %v8500_v63  ;;  %v2659_v63 = vld [vmem:[#allocation20 + $0x38] sm:$0xff]  ;;  %v8622_v11 = vpack.c.bf16 %v2662_v24, %v2660_v46  ;;  %v2664_v44 = vld [vmem:[#allocation20 + $0x60] sm:$0xff]  ;;  %v2673_v20 = vld [vmem:[#allocation20 + $0xa8] sm:$0xff] }
 0x663   :  { %7753 = vmatmul.mubr.msk.f32.gmra.mrb[48].mxu0 %vm504_vm1, %v11813_v0  ;;  %8503 = vmatpush1.bf16.msra.mxu1 %v8502_v53  ;;  %v2573_v53 = vld [vmem:[#allocation19 + $0x108] sm:$0xff]  ;;  %v8616_v17 = vpack.c.bf16 %v2659_v63, %v2657_v58  ;;  %v2668_v42 = vld [vmem:[#allocation20 + $0x80] sm:$0xff]  ;;  %v2675_v9 = vld [vmem:[#allocation20 + $0xb8] sm:$0xff] }
 0x664   :  { %8471 = vmatpush1.bf16.msra.mxu0 %v11790_v32  ;;  %2852 = vmatprep.mubr.f32.mxu0 %v12651_v8  ;;  %v8532_v6 = vpack.c.bf16 %v2575_v30, %v2573_v53  ;;  %v2674_v58 = vld [vmem:[#allocation20 + $0xb0] sm:$0xff]  ;;  %v2595_v63 = vld [vmem:[#allocation19 + $0x1b8] sm:$0xff]  ;;  %v2677_v53 = vld [vmem:[#allocation20 + $0xc8] sm:$0xff] }
 0x665   :  { %8473 = vmatprep.subr.bf16.mxu0 %v11799_v50  ;;  %7761 = vmatmul.mubr.msk.f32.gmra.mrb[28].mxu1 %vm504_vm1, %v11818_v35  ;;  %v2679_v30 = vld [vmem:[#allocation20 + $0xd8] sm:$0xff]  ;;  %v2680_v46 = vld [vmem:[#allocation20 + $0xe0] sm:$0xff]  ;;  %v2682_v24 = vld [vmem:[#allocation20 + $0xf0] sm:$0xff] }
 0x666   :  { %3042 = vmatprep.mubr.f32.mxu1 %v12651_v8  ;;  %8505 = vmatprep.subr.bf16.mxu1 %v8504_v15  ;;  %v2658_v15 = vld [vmem:[#allocation20 + $0x30] sm:$0xff] }
 0x667   :  { %7754 = vmatmul.mubr.msk.f32.gmra.mrb[50].mxu0 %vm504_vm1, %v11824_v22  ;;  %8507 = vmatpush1.bf16.msra.mxu1 %v8506_v61  ;;  %v2661_v61 = vld [vmem:[#allocation20 + $0x48] sm:$0xff]  ;;  %v8618_v38 = vpack.c.bf16 %v2658_v15, %v2656_v12  ;;  %v8636_v12 = vpack.c.bf16 %v2679_v30, %v2677_v53  ;;  %v2678_v15 = vld [vmem:[#allocation20 + $0xd0] sm:$0xff] }
 0x668   :  { %8475 = vmatpush1.bf16.msra.mxu0 %v11803_v21  ;;  %2858 = vmatprep.mubr.f32.mxu0 %v12651_v8 }
 0x669   :  { %2877 = vmatprep.subr.mxu0 %v2531_v37  ;;  %7762 = vmatmul.mubr.msk.f32.gmra.mrb[30].mxu1 %vm504_vm1, %v11830_v10 }
 0x66a   :  { %3048 = vmatprep.mubr.f32.mxu1 %v12651_v8  ;;  %8509 = vmatprep.subr.bf16.mxu1 %v8508_v60  ;;  %v2576_v60 = vld [vmem:[#allocation19 + $0x120] sm:$0xff] }
 0x66b   :  { %7755 = vmatmul.mubr.msk.f32.gmra.mrb[52].mxu0 %vm504_vm1, %v11837_v39  ;;  %8511 = vmatpush1.bf16.msra.mxu1 %v8510_v40  ;;  %v8620_v40 = vpack.c.bf16 %v2663_v18, %v2661_v61  ;;  %v2597_v61 = vld [vmem:[#allocation19 + $0x1c8] sm:$0xff] }
 0x66c   :  { %2878 = vmatpush1.msra.mxu0 %v2530_v54  ;;  %2929 = vmatprep.mubr.f32.mxu0 %v12651_v8  ;;  %v2681_v18 = vld [vmem:[#allocation20 + $0xe8] sm:$0xff] }
 0x66d   :  { %8489 = vmatprep.subr.bf16.mxu0 %v11778_v27  ;;  %7763 = vmatmul.mubr.msk.f32.gmra.mrb[32].mxu1 %vm504_vm1, %v11845_v52  ;;  %v8520_v27 = vpack.c.bf16 %v2563_v57, %v2561_v23  ;;  %v2585_v57 = vld [vmem:[#allocation19 + $0x168] sm:$0xff] }
 0x66e   :  { %8513 = vmatprep.subr.bf16.mxu1 %v8512_v49  ;;  %v2583_v49 = vld [vmem:[#allocation19 + $0x158] sm:$0xff] }
 0x66f   :  { %7756 = vmatmul.mubr.msk.f32.vlgmr.msra.gmra.mrb[54].mxu0 %vm504_vm1, %v11801_v41  ;;  %8515 = vmatpush1.bf16.msra.mxu1 %v8514_v26  ;;  %v2654_v41 = vld [vmem:[#allocation20 + $0x10] sm:$0xff]  ;;  %v2580_v26 = vld [vmem:[#allocation19 + $0x140] sm:$0xff] }
 0x670   :  { %8491 = vmatpush1.bf16.msra.mxu0 %v11782_v19  ;;  %2935 = vmatprep.mubr.f32.mxu0 %v12651_v8  ;;  %v2564_v19 = vld [vmem:[#allocation19 + $0xc0] sm:$0xff]  ;;  %v8614_v55 = vpack.c.bf16 %v2654_v41, %v2652_v43  ;;  %v2590_v43 = vld [vmem:[#allocation19 + $0x190] sm:$0xff]  ;;  %v8632_v41 = vpack.c.bf16 %v2675_v9, %v2673_v20 }
 0x671   :  { %8493 = vmatprep.subr.bf16.mxu0 %v11788_v34  ;;  %8517 = vmatprep.subr.bf16.mxu1 %v8516_v16  ;;  %v2655_v34 = vld [vmem:[#allocation20 + $0x18] sm:$0xff]  ;;  %v8526_v4 = vpack.c.bf16 %v2566_v13, %v2564_v19  ;;  %v2666_v16 = vld [vmem:[#allocation20 + $0x70] sm:$0xff]  ;;  %v8628_v13 = vpack.c.bf16 %v2671_v48, %v2669_v29 }
 0x672   :  { %v2586_v19 = vld [vmem:[#allocation19 + $0x170] sm:$0xff] }
 0x673   :  { %7757 = vmatmul.mubr.msk.f32.gmra.mrb[56].mxu0 %vm504_vm1, %v11813_v0  ;;  %8519 = vmatpush1.bf16.msra.mxu1 %v8518_v25  ;;  %v2574_v0 = vld [vmem:[#allocation19 + $0x110] sm:$0xff]  ;;  %v2587_v25 = vld [vmem:[#allocation19 + $0x178] sm:$0xff] }
 0x674   :  { %8495 = vmatpush1.bf16.msra.mxu0 %v11790_v32  ;;  %2941 = vmatprep.mubr.f32.mxu0 %v12651_v8  ;;  %v2568_v32 = vld [vmem:[#allocation19 + $0xe0] sm:$0xff]  ;;  %v8534_v33 = vpack.c.bf16 %v2574_v0, %v2572_v1  ;;  %v8544_v56 = vpack.c.bf16 %v2587_v25, %v2585_v57  ;;  %v2693_v57 = vld [vmem:[#allocation20 + $0x148] sm:$0xff]  ;;  %v2695_v25 = vld [vmem:[#allocation20 + $0x158] sm:$0xff] }
 0x675   :  { %8497 = vmatprep.subr.bf16.mxu0 %v11799_v50  ;;  %8521 = vmatprep.subr.bf16.mxu1 %v8520_v27  ;;  %v8612_v50 = vpack.c.bf16 %v2655_v34, %v2653_v31  ;;  %v8626_v27 = vpack.c.bf16 %v2666_v16, %v2664_v44  ;;  %v2670_v31 = vld [vmem:[#allocation20 + $0x90] sm:$0xff]  ;;  %v2591_v34 = vld [vmem:[#allocation19 + $0x198] sm:$0xff]  ;;  %v2592_v0 = vld [vmem:[#allocation19 + $0x1a0] sm:$0xff]  ;;  %v8652_v48 = vpack.c.bf16 %v2695_v25, %v2693_v57 }
 0x676   :  { %v2689_v44 = vld [vmem:[#allocation20 + $0x128] sm:$0xff]  ;;  %v2688_v16 = vld [vmem:[#allocation20 + $0x120] sm:$0xff] }
 0x677   :  { %7758 = vmatmul.mubr.msk.f32.gmra.mrb[58].mxu0 %vm504_vm1, %v11824_v22  ;;  %8523 = vmatpush1.bf16.msra.mxu1 %v8522_v62  ;;  %v2577_v22 = vld [vmem:[#allocation19 + $0x128] sm:$0xff]  ;;  %v2584_v62 = vld [vmem:[#allocation19 + $0x160] sm:$0xff] }
 0x678   :  { %8499 = vmatpush1.bf16.msra.mxu0 %v11803_v21  ;;  %2947 = vmatprep.mubr.f32.mxu0 %v12651_v8  ;;  %v8530_v21 = vpack.c.bf16 %v2570_v36, %v2568_v32  ;;  %v8536_v28 = vpack.c.bf16 %v2579_v5, %v2577_v22  ;;  %v2672_v32 = vld [vmem:[#allocation20 + $0xa0] sm:$0xff]  ;;  %v2683_v22 = vld [vmem:[#allocation20 + $0xf8] sm:$0xff] }
 0x679   :  { %3067 = vmatprep.subr.mxu0 %v2531_v37  ;;  %8525 = vmatprep.subr.bf16.mxu1 %v8524_v14  ;;  %v2578_v37 = vld [vmem:[#allocation19 + $0x130] sm:$0xff]  ;;  %v2589_v14 = vld [vmem:[#allocation19 + $0x188] sm:$0xff] }
 0x67a   :  { %v8548_v36 = vpack.c.bf16 %v2591_v34, %v2589_v14  ;;  %v2701_v14 = vld [vmem:[#allocation20 + $0x188] sm:$0xff]  ;;  %v2703_v34 = vld [vmem:[#allocation20 + $0x198] sm:$0xff] }
 0x67b   :  { %7759 = vmatmul.mubr.msk.f32.gmra.mrb[60].mxu0 %vm504_vm1, %v11837_v39  ;;  %8527 = vmatpush1.bf16.msra.mxu1 %v8526_v4  ;;  %v2665_v39 = vld [vmem:[#allocation20 + $0x68] sm:$0xff]  ;;  %v8630_v4 = vpack.c.bf16 %v2670_v31, %v2668_v42  ;;  %v2698_v31 = vld [vmem:[#allocation20 + $0x170] sm:$0xff]  ;;  %v8660_v9 = vpack.c.bf16 %v2703_v34, %v2701_v14  ;;  %v2615_v14 = vld [vmem:[#allocation19 + $0x258] sm:$0xff] }
 0x67c   :  { %3068 = vmatpush1.msra.mxu0 %v2530_v54  ;;  %3119 = vmatprep.mubr.f32.mxu0 %v12651_v8  ;;  %v2581_v54 = vld [vmem:[#allocation19 + $0x148] sm:$0xff]  ;;  %v8624_v51 = vpack.c.bf16 %v2667_v2, %v2665_v39 }
 0x67d   :  { %8613 = vmatprep.subr.bf16.mxu0 %v8612_v50  ;;  %8529 = vmatprep.subr.bf16.mxu1 %v8528_v45  ;;  %v8540_v23 = vpack.c.bf16 %v2583_v49, %v2581_v54  ;;  %v2588_v50 = vld [vmem:[#allocation19 + $0x180] sm:$0xff]  ;;  %v2593_v45 = vld [vmem:[#allocation19 + $0x1a8] sm:$0xff]  ;;  %v8642_v54 = vpack.c.bf16 %v2682_v24, %v2680_v46  ;;  %v2719_v24 = vld [vmem:[#allocation20 + $0x218] sm:$0xff] }
 0x67e   :  { %v8552_v1 = vpack.c.bf16 %v2595_v63, %v2593_v45  ;;  %v2685_v39 = vld [vmem:[#allocation20 + $0x108] sm:$0xff]  ;;  %v2711_v63 = vld [vmem:[#allocation20 + $0x1d8] sm:$0xff] }
 0x67f   :  { %7764 = vmatmul.mubr.msk.f32.vlgmr.msra.gmra.mrb[62].mxu0 %vm504_vm1, %v11805_v59  ;;  %8531 = vmatpush1.bf16.msra.mxu1 %v8530_v21  ;;  %v8538_v59 = vpack.c.bf16 %v2578_v37, %v2576_v60  ;;  %v8550_v21 = vpack.c.bf16 %v2590_v43, %v2588_v50  ;;  %v2596_v60 = vld [vmem:[#allocation19 + $0x1c0] sm:$0xff]  ;;  %v2598_v37 = vld [vmem:[#allocation19 + $0x1d0] sm:$0xff]  ;;  %v2697_v42 = vld [vmem:[#allocation20 + $0x168] sm:$0xff] }
 0x680   :  { %3125 = vmatprep.mubr.f32.mxu0 %v12651_v8  ;;  %8615 = vmatpush1.bf16.msra.mxu0 %v8614_v55  ;;  %v2676_v55 = vld [vmem:[#allocation20 + $0xc0] sm:$0xff]  ;;  %v8558_v2 = vpack.c.bf16 %v2598_v37, %v2596_v60  ;;  %v2709_v45 = vld [vmem:[#allocation20 + $0x1c8] sm:$0xff]  ;;  %v2607_v60 = vld [vmem:[#allocation19 + $0x218] sm:$0xff] }
 0x681   :  { %8617 = vmatprep.subr.bf16.mxu0 %v8616_v17  ;;  %8533 = vmatprep.subr.bf16.mxu1 %v8532_v6  ;;  %v2594_v17 = vld [vmem:[#allocation19 + $0x1b0] sm:$0xff]  ;;  %v2599_v6 = vld [vmem:[#allocation19 + $0x1d8] sm:$0xff]  ;;  %v8668_v30 = vpack.c.bf16 %v2711_v63, %v2709_v45  ;;  %v2717_v37 = vld [vmem:[#allocation20 + $0x208] sm:$0xff] }
 0x682   :  { %v8554_v5 = vpack.c.bf16 %v2594_v17, %v2592_v0  ;;  %v2603_v0 = vld [vmem:[#allocation19 + $0x1f8] sm:$0xff]  ;;  %v2713_v17 = vld [vmem:[#allocation20 + $0x1e8] sm:$0xff]  ;;  %v2724_v63 = vld [vmem:[#allocation20 + $0x240] sm:$0xff] }
 0x683   :  { %7765 = vmatmul.mubr.msk.f32.gmra.mrb[64].mxu0 %vm504_vm1, %v11818_v35  ;;  %8535 = vmatpush1.bf16.msra.mxu1 %v8534_v33  ;;  %v8542_v35 = vpack.c.bf16 %v2582_v7, %v2580_v26  ;;  %v8638_v33 = vpack.c.bf16 %v2678_v15, %v2676_v55  ;;  %v2691_v26 = vld [vmem:[#allocation20 + $0x138] sm:$0xff]  ;;  %v2725_v34 = vld [vmem:[#allocation20 + $0x248] sm:$0xff] }
 0x684   :  { %3131 = vmatprep.mubr.f32.mxu0 %v12651_v8  ;;  %8619 = vmatpush1.bf16.msra.mxu0 %v8618_v38  ;;  %v8556_v38 = vpack.c.bf16 %v2599_v6, %v2597_v61  ;;  %v2715_v15 = vld [vmem:[#allocation20 + $0x1f8] sm:$0xff]  ;;  %v2600_v61 = vld [vmem:[#allocation19 + $0x1e0] sm:$0xff]  ;;  %v2602_v6 = vld [vmem:[#allocation19 + $0x1f0] sm:$0xff] }
 0x685   :  { %8621 = vmatprep.subr.bf16.mxu0 %v8620_v40  ;;  %8537 = vmatprep.subr.bf16.mxu1 %v8536_v28  ;;  %v8640_v40 = vpack.c.bf16 %v2683_v22, %v2681_v18  ;;  %v2687_v28 = vld [vmem:[#allocation20 + $0x118] sm:$0xff]  ;;  %v8672_v18 = vpack.c.bf16 %v2715_v15, %v2713_v17  ;;  %v8562_v22 = vpack.c.bf16 %v2602_v6, %v2600_v61  ;;  %v2616_v6 = vld [vmem:[#allocation19 + $0x260] sm:$0xff] }
 0x686   :  { %v8644_v49 = vpack.c.bf16 %v2687_v28, %v2685_v39  ;;  %v8676_v39 = vpack.c.bf16 %v2719_v24, %v2717_v37  ;;  %v2604_v28 = vld [vmem:[#allocation19 + $0x200] sm:$0xff]  ;;  %v2730_v37 = vld [vmem:[#allocation20 + $0x270] sm:$0xff] }
 0x687   :  { %7766 = vmatmul.mubr.msk.f32.gmra.mrb[66].mxu0 %vm504_vm1, %v11830_v10  ;;  %8539 = vmatpush1.bf16.msra.mxu1 %v8538_v59  ;;  %v8546_v10 = vpack.c.bf16 %v2586_v19, %v2584_v62  ;;  %v2684_v59 = vld [vmem:[#allocation20 + $0x100] sm:$0xff] }
 0x688   :  { %3137 = vmatprep.mubr.f32.mxu0 %v12651_v8  ;;  %8623 = vmatpush1.bf16.msra.mxu0 %v8622_v11  ;;  %v2686_v11 = vld [vmem:[#allocation20 + $0x110] sm:$0xff] }
 0x689   :  { %8625 = vmatprep.subr.bf16.mxu0 %v8624_v51  ;;  %8541 = vmatprep.subr.bf16.mxu1 %v8540_v23  ;;  %v8646_v7 = vpack.c.bf16 %v2686_v11, %v2684_v59  ;;  %v8648_v51 = vpack.c.bf16 %v2691_v26, %v2689_v44  ;;  %v2690_v23 = vld [vmem:[#allocation20 + $0x130] sm:$0xff]  ;;  %v2609_v11 = vld [vmem:[#allocation19 + $0x228] sm:$0xff] }
 0x68a   :  { %v8650_v29 = vpack.c.bf16 %v2690_v23, %v2688_v16  ;;  %v2718_v59 = vld [vmem:[#allocation20 + $0x210] sm:$0xff]  ;;  %v2723_v16 = vld [vmem:[#allocation20 + $0x238] sm:$0xff] }
 0x68b   :  { %7767 = vmatmul.mubr.msk.f32.gmra.mrb[68].mxu0 %vm504_vm1, %v11845_v52  ;;  %8543 = vmatpush1.bf16.msra.mxu1 %v8542_v35  ;;  %v8634_v52 = vpack.c.bf16 %v2674_v58, %v2672_v32  ;;  %v2692_v35 = vld [vmem:[#allocation20 + $0x140] sm:$0xff]  ;;  %v2705_v32 = vld [vmem:[#allocation20 + $0x1a8] sm:$0xff]  ;;  %v2706_v58 = vld [vmem:[#allocation20 + $0x1b0] sm:$0xff] }
 0x68c   :  { %8627 = vmatpush1.bf16.msra.mxu0 %v8626_v27  ;;  %8545 = vmatprep.subr.bf16.mxu1 %v8544_v56  ;;  %v2694_v27 = vld [vmem:[#allocation20 + $0x150] sm:$0xff]  ;;  %v2699_v56 = vld [vmem:[#allocation20 + $0x178] sm:$0xff] }
 0x68d   :  { %8629 = vmatprep.subr.bf16.mxu0 %v8628_v13  ;;  %v8654_v62 = vpack.c.bf16 %v2694_v27, %v2692_v35  ;;  %v8656_v19 = vpack.c.bf16 %v2699_v56, %v2697_v42  ;;  %v2696_v13 = vld [vmem:[#allocation20 + $0x160] sm:$0xff]  ;;  %v2610_v27 = vld [vmem:[#allocation19 + $0x230] sm:$0xff] }
 0x68e   :  { %v8658_v20 = vpack.c.bf16 %v2698_v31, %v2696_v13  ;;  %v2608_v35 = vld [vmem:[#allocation19 + $0x220] sm:$0xff]  ;;  %v2613_v13 = vld [vmem:[#allocation19 + $0x248] sm:$0xff] }
 0x68f   :  { %8547 = vmatpush1.bf16.msra.mxu1 %v8546_v10  ;;  %v2700_v10 = vld [vmem:[#allocation20 + $0x180] sm:$0xff] }
 0x690   :  { %8631 = vmatpush1.bf16.msra.mxu0 %v8630_v4  ;;  %8549 = vmatprep.subr.bf16.mxu1 %v8548_v36  ;;  %v2702_v4 = vld [vmem:[#allocation20 + $0x190] sm:$0xff]  ;;  %v2707_v36 = vld [vmem:[#allocation20 + $0x1b8] sm:$0xff] }
 0x691   :  { %8633 = vmatprep.subr.bf16.mxu0 %v8632_v41  ;;  %v8662_v50 = vpack.c.bf16 %v2702_v4, %v2700_v10  ;;  %v8664_v43 = vpack.c.bf16 %v2707_v36, %v2705_v32  ;;  %v2704_v41 = vld [vmem:[#allocation20 + $0x1a0] sm:$0xff]  ;;  %v8570_v4 = vpack.c.bf16 %v2610_v27, %v2608_v35  ;;  %v2627_v27 = vld [vmem:[#allocation19 + $0x2b8] sm:$0xff] }
 0x692   :  { %v8666_v53 = vpack.c.bf16 %v2706_v58, %v2704_v41  ;;  %v2612_v36 = vld [vmem:[#allocation19 + $0x240] sm:$0xff]  ;;  %v8572_v58 = vpack.c.bf16 %v2615_v14, %v2613_v13  ;;  %v2626_v14 = vld [vmem:[#allocation19 + $0x2b0] sm:$0xff] }
 0x693   :  { %8551 = vmatpush1.bf16.msra.mxu1 %v8550_v21  ;;  %v2708_v21 = vld [vmem:[#allocation20 + $0x1c0] sm:$0xff] }
 0x694   :  { %8635 = vmatpush1.bf16.msra.mxu0 %v8634_v52  ;;  %8553 = vmatprep.subr.bf16.mxu1 %v8552_v1  ;;  %v2710_v52 = vld [vmem:[#allocation20 + $0x1d0] sm:$0xff]  ;;  %v2601_v1 = vld [vmem:[#allocation19 + $0x1e8] sm:$0xff] }
 0x695   :  { %8637 = vmatprep.subr.bf16.mxu0 %v8636_v12  ;;  %v8670_v55 = vpack.c.bf16 %v2710_v52, %v2708_v21  ;;  %v8560_v12 = vpack.c.bf16 %v2603_v0, %v2601_v1  ;;  %v2729_v1 = vld [vmem:[#allocation20 + $0x268] sm:$0xff]  ;;  %v2731_v0 = vld [vmem:[#allocation20 + $0x278] sm:$0xff] }
 0x697   :  { %8555 = vmatpush1.bf16.msra.mxu1 %v8554_v5  ;;  %v2712_v5 = vld [vmem:[#allocation20 + $0x1e0] sm:$0xff] }
 0x698   :  { %8639 = vmatpush1.bf16.msra.mxu0 %v8638_v33  ;;  %8557 = vmatprep.subr.bf16.mxu1 %v8556_v38  ;;  %v2714_v33 = vld [vmem:[#allocation20 + $0x1f0] sm:$0xff]  ;;  %v2605_v38 = vld [vmem:[#allocation19 + $0x208] sm:$0xff] }
 0x699   :  { %8641 = vmatprep.subr.bf16.mxu0 %v8640_v40  ;;  %v8674_v40 = vpack.c.bf16 %v2714_v33, %v2712_v5  ;;  %v8564_v46 = vpack.c.bf16 %v2607_v60, %v2605_v38  ;;  %v8688_v38 = vpack.c.bf16 %v2731_v0, %v2729_v1  ;;  %v2728_v60 = vld [vmem:[#allocation20 + $0x260] sm:$0xff]  ;;  %v2742_v1 = vld [vmem:[#allocation20 + $0x2d0] sm:$0xff]  ;;  %v2633_v0 = vld [vmem:[#allocation19 + $0x2e8] sm:$0xff] }
 0x69b   :  { %8559 = vmatpush1.bf16.msra.mxu1 %v8558_v2  ;;  %v2606_v2 = vld [vmem:[#allocation19 + $0x210] sm:$0xff] }
 0x69c   :  { %8643 = vmatpush1.bf16.msra.mxu0 %v8642_v54  ;;  %8561 = vmatprep.subr.bf16.mxu1 %v8560_v12 }
 0x69d   :  { %8645 = vmatprep.subr.bf16.mxu0 %v8644_v49  ;;  %v2716_v49 = vld [vmem:[#allocation20 + $0x200] sm:$0xff] }
 0x69f   :  { %8563 = vmatpush1.bf16.msra.mxu1 %v8562_v22 }
 0x6a0   :  { %8647 = vmatpush1.bf16.msra.mxu0 %v8646_v7  ;;  %8565 = vmatprep.subr.bf16.mxu1 %v8564_v46  ;;  %v2611_v7 = vld [vmem:[#allocation19 + $0x238] sm:$0xff] }
 0x6a1   :  { %8649 = vmatprep.subr.bf16.mxu0 %v8648_v51  ;;  %v2721_v51 = vld [vmem:[#allocation20 + $0x228] sm:$0xff]  ;;  %v8568_v42 = vpack.c.bf16 %v2611_v7, %v2609_v11  ;;  %v8690_v11 = vpack.c.bf16 %v2730_v37, %v2728_v60  ;;  %v2634_v60 = vld [vmem:[#allocation19 + $0x2f0] sm:$0xff]  ;;  %v2744_v37 = vld [vmem:[#allocation20 + $0x2e0] sm:$0xff] }
 0x6a2   :  { %v8680_v56 = vpack.c.bf16 %v2723_v16, %v2721_v51 }
 0x6a4   :  { %8651 = vmatpush1.bf16.msra.mxu0 %v8650_v29  ;;  %v8566_v29 = vpack.c.bf16 %v2606_v2, %v2604_v28  ;;  %v2733_v28 = vld [vmem:[#allocation20 + $0x288] sm:$0xff]  ;;  %v2735_v2 = vld [vmem:[#allocation20 + $0x298] sm:$0xff] }
 0x6a5   :  { %8653 = vmatprep.subr.bf16.mxu0 %v8652_v48  ;;  %v8678_v48 = vpack.c.bf16 %v2718_v59, %v2716_v49 }
 0x6a8   :  { %8655 = vmatpush1.bf16.msra.mxu0 %v8654_v62  ;;  %v2720_v62 = vld [vmem:[#allocation20 + $0x220] sm:$0xff] }
 0x6a9   :  { %8657 = vmatprep.subr.bf16.mxu0 %v8656_v19  ;;  %v2722_v19 = vld [vmem:[#allocation20 + $0x230] sm:$0xff] }
 0x6aa   :  { %v8682_v32 = vpack.c.bf16 %v2722_v19, %v2720_v62 }
 0x6ac   :  { %8659 = vmatpush1.bf16.msra.mxu0 %v8658_v20  ;;  %v2727_v20 = vld [vmem:[#allocation20 + $0x258] sm:$0xff] }
 0x6ad   :  { %8661 = vmatprep.subr.bf16.mxu0 %v8660_v9  ;;  %v8684_v45 = vpack.c.bf16 %v2727_v20, %v2725_v34 }
 0x6b0   :  { %8663 = vmatpush1.bf16.msra.mxu0 %v8662_v50  ;;  %v2614_v50 = vld [vmem:[#allocation19 + $0x250] sm:$0xff] }
 0x6b1   :  { %8665 = vmatprep.subr.bf16.mxu0 %v8664_v43  ;;  %v8574_v15 = vpack.c.bf16 %v2614_v50, %v2612_v36  ;;  %v2631_v50 = vld [vmem:[#allocation19 + $0x2d8] sm:$0xff] }
 0x6b4   :  { %8667 = vmatpush1.bf16.msra.mxu0 %v8666_v53  ;;  %v2726_v53 = vld [vmem:[#allocation20 + $0x250] sm:$0xff] }
 0x6b5   :  { %8669 = vmatprep.subr.bf16.mxu0 %v8668_v30  ;;  %v2617_v30 = vld [vmem:[#allocation19 + $0x268] sm:$0xff]  ;;  %v8686_v61 = vpack.c.bf16 %v2726_v53, %v2724_v63  ;;  %v2628_v63 = vld [vmem:[#allocation19 + $0x2c0] sm:$0xff]  ;;  %v2630_v53 = vld [vmem:[#allocation19 + $0x2d0] sm:$0xff] }
 0x6b8   :  { %8671 = vmatpush1.bf16.msra.mxu0 %v8670_v55  ;;  %v2619_v55 = vld [vmem:[#allocation19 + $0x278] sm:$0xff] }
 0x6b9   :  { %8673 = vmatprep.subr.bf16.mxu0 %v8672_v18  ;;  %v2618_v18 = vld [vmem:[#allocation19 + $0x270] sm:$0xff]  ;;  %v8576_v33 = vpack.c.bf16 %v2619_v55, %v2617_v30  ;;  %v2740_v55 = vld [vmem:[#allocation20 + $0x2c0] sm:$0xff] }
 0x6ba   :  { %v8578_v59 = vpack.c.bf16 %v2618_v18, %v2616_v6  ;;  %v8590_v6 = vpack.c.bf16 %v2630_v53, %v2628_v63  ;;  %v8702_v18 = vpack.c.bf16 %v2742_v1, %v2740_v55  ;;  %v2644_v53 = vld [vmem:[#allocation19 + $0x340] sm:$0xff] }
 0x6bb   :  { %v2756_v1 = vld [vmem:[#allocation20 + $0x340] sm:$0xff] }
 0x6bc   :  { %8675 = vmatpush1.bf16.msra.mxu0 %v8674_v40  ;;  %v2621_v40 = vld [vmem:[#allocation19 + $0x288] sm:$0xff] }
 0x6bd   :  { %8677 = vmatprep.subr.bf16.mxu0 %v8676_v39  ;;  %v2623_v39 = vld [vmem:[#allocation19 + $0x298] sm:$0xff] }
 0x6be   :  { %v8580_v16 = vpack.c.bf16 %v2623_v39, %v2621_v40  ;;  %v2746_v40 = vld [vmem:[#allocation20 + $0x2f0] sm:$0xff]  ;;  %v2639_v39 = vld [vmem:[#allocation19 + $0x318] sm:$0xff] }
 0x732   :  { %v2842_v54 = vpop.f32.mrb[46].mxu0 }
 0x733   :  { %v3032_v44 = vpop.f32.mrb[26].mxu1  ;;  %v2844_v26 = vpop.f32.mrb[47].mxu0 }
 0x734   :  { %v3144_v23 = vmax.f32 %v2842_v54, %v3032_v44  ;;  %v3034_v57 = vpop.f32.mrb[27].mxu1  ;;  %v2620_v44 = vld [vmem:[#allocation19 + $0x280] sm:$0xff] }
 0x735   :  { %v3145_v25 = vmax.f32 %v2844_v26, %v3034_v57  ;;  %v2622_v26 = vld [vmem:[#allocation19 + $0x290] sm:$0xff]  ;;  %v2732_v57 = vld [vmem:[#allocation20 + $0x280] sm:$0xff] }
 0x736   :  { %v2848_v31 = vpop.f32.mrb[48].mxu0  ;;  %v8582_v19 = vpack.c.bf16 %v2622_v26, %v2620_v44 }
 0x737   :  { %3236 = vmatprep.mubr.f32.mxu1 %v3145_v25  ;;  %3414 = vmatprep.mubr.f32.mxu0 %v3145_v25  ;;  %v2850_v9 = vpop.f32.mrb[49].mxu0  ;;  %v2734_v25 = vld [vmem:[#allocation20 + $0x290] sm:$0xff] }
 0x738   :  { %3237 = vmatmul.mubr.f32.vlgmr.msra.gmra.mrb[34].mxu1 %v3144_v23  ;;  %3415 = vmatmul.mubr.f32.vlgmr.msra.gmra.mrb[70].mxu0 %v3144_v23  ;;  %v3038_v10 = vpop.f32.mrb[28].mxu1  ;;  %v8692_v23 = vpack.c.bf16 %v2735_v2, %v2733_v28  ;;  %v8694_v13 = vpack.c.bf16 %v2734_v25, %v2732_v57  ;;  %v2749_v28 = vld [vmem:[#allocation20 + $0x308] sm:$0xff]  ;;  %v2751_v2 = vld [vmem:[#allocation20 + $0x318] sm:$0xff] }
 0x739   :  { %8567 = vmatpush1.bf16.msra.mxu1 %v8566_v29  ;;  %8679 = vmatpush1.bf16.msra.mxu0 %v8678_v48  ;;  %v3148_v43 = vmax.f32 %v2848_v31, %v3038_v10  ;;  %v3040_v41 = vpop.f32.mrb[29].mxu1  ;;  %v2625_v48 = vld [vmem:[#allocation19 + $0x2a8] sm:$0xff]  ;;  %v2624_v31 = vld [vmem:[#allocation19 + $0x2a0] sm:$0xff]  ;;  %v2738_v10 = vld [vmem:[#allocation20 + $0x2b0] sm:$0xff]  ;;  %v8708_v25 = vpack.c.bf16 %v2751_v2, %v2749_v28 }
 0x73a   :  { %8569 = vmatprep.subr.bf16.mxu1 %v8568_v42  ;;  %8681 = vmatprep.subr.bf16.mxu0 %v8680_v56  ;;  %v3149_v21 = vmax.f32 %v2850_v9, %v3040_v41  ;;  %v2854_v52 = vpop.f32.mrb[50].mxu0  ;;  %v2737_v42 = vld [vmem:[#allocation20 + $0x2a8] sm:$0xff]  ;;  %v2739_v56 = vld [vmem:[#allocation20 + $0x2b8] sm:$0xff]  ;;  %v8584_v34 = vpack.c.bf16 %v2627_v27, %v2625_v48  ;;  %v2736_v9 = vld [vmem:[#allocation20 + $0x2a0] sm:$0xff] }
 0x73b   :  { %v2856_v17 = vpop.f32.mrb[51].mxu0  ;;  %v8696_v20 = vpack.c.bf16 %v2739_v56, %v2737_v42  ;;  %v2743_v41 = vld [vmem:[#allocation20 + $0x2d8] sm:$0xff]  ;;  %v2760_v28 = vld [vmem:[#allocation20 + $0x360] sm:$0xff]  ;;  %v2762_v2 = vld [vmem:[#allocation20 + $0x370] sm:$0xff] }
 0x73c   :  { %v3044_v12 = vpop.f32.mrb[30].mxu1  ;;  %3242 = vmatprep.mubr.f32.mxu1 %v3149_v21  ;;  %3420 = vmatprep.mubr.f32.mxu0 %v3149_v21  ;;  %v2643_v48 = vld [vmem:[#allocation19 + $0x338] sm:$0xff] }
 0x73d   :  { %8571 = vmatpush1.bf16.msra.mxu1 %v8570_v4  ;;  %8683 = vmatpush1.bf16.msra.mxu0 %v8682_v32  ;;  %v3152_v22 = vmax.f32 %v2854_v52, %v3044_v12  ;;  %v3046_v5 = vpop.f32.mrb[31].mxu1  ;;  %v2629_v32 = vld [vmem:[#allocation19 + $0x2c8] sm:$0xff]  ;;  %v2635_v12 = vld [vmem:[#allocation19 + $0x2f8] sm:$0xff] }
 0x73e   :  { %8573 = vmatprep.subr.bf16.mxu1 %v8572_v58  ;;  %8685 = vmatprep.subr.bf16.mxu0 %v8684_v45  ;;  %v2860_v46 = vpop.f32.mrb[52].mxu0  ;;  %v3153_v24 = vmax.f32 %v2856_v17, %v3046_v5  ;;  %v8586_v58 = vpack.c.bf16 %v2626_v14, %v2624_v31  ;;  %v8698_v45 = vpack.c.bf16 %v2738_v10, %v2736_v9  ;;  %v2755_v27 = vld [vmem:[#allocation20 + $0x338] sm:$0xff]  ;;  %v2642_v31 = vld [vmem:[#allocation19 + $0x330] sm:$0xff]  ;;  %v2645_v10 = vld [vmem:[#allocation19 + $0x348] sm:$0xff] }
 0x73f   :  { %3243 = vmatmul.mubr.f32.gmra.mrb[36].mxu1 %v3148_v43  ;;  %3421 = vmatmul.mubr.f32.gmra.mrb[72].mxu0 %v3148_v43  ;;  %v2862_v54 = vpop.f32.mrb[53].mxu0  ;;  %v2741_v43 = vld [vmem:[#allocation20 + $0x2c8] sm:$0xff]  ;;  %v8588_v21 = vpack.c.bf16 %v2631_v50, %v2629_v32  ;;  %v2754_v9 = vld [vmem:[#allocation20 + $0x330] sm:$0xff]  ;;  %v2647_v50 = vld [vmem:[#allocation19 + $0x358] sm:$0xff] }
 0x740   :  { %v3050_v49 = vpop.f32.mrb[32].mxu1  ;;  %3248 = vmatprep.mubr.f32.mxu1 %v3153_v24  ;;  %3426 = vmatprep.mubr.f32.mxu0 %v3153_v24  ;;  %v8700_v52 = vpack.c.bf16 %v2743_v41, %v2741_v43  ;;  %v2637_v24 = vld [vmem:[#allocation19 + $0x308] sm:$0xff]  ;;  %v2759_v41 = vld [vmem:[#allocation20 + $0x358] sm:$0xff]  ;;  %v8604_v55 = vpack.c.bf16 %v2647_v50, %v2645_v10 }
 0x741   :  { %8575 = vmatpush1.bf16.msra.mxu1 %v8574_v15  ;;  %8687 = vmatpush1.bf16.msra.mxu0 %v8686_v61  ;;  %v3156_v7 = vmax.f32 %v2860_v46, %v3050_v49  ;;  %v3052_v51 = vpop.f32.mrb[33].mxu1  ;;  %v2745_v15 = vld [vmem:[#allocation20 + $0x2e8] sm:$0xff]  ;;  %v2747_v61 = vld [vmem:[#allocation20 + $0x2f8] sm:$0xff]  ;;  %v8706_v49 = vpack.c.bf16 %v2746_v40, %v2744_v37  ;;  %v8596_v26 = vpack.c.bf16 %v2639_v39, %v2637_v24  ;;  %v2650_v39 = vld [vmem:[#allocation19 + $0x370] sm:$0xff] }
 0x742   :  { %8577 = vmatprep.subr.bf16.mxu1 %v8576_v33  ;;  %8689 = vmatprep.subr.bf16.mxu0 %v8688_v38  ;;  %v11887_v29 = vpop.f32.mrb[54].mxu0  ;;  %v3157_v35 = vmax.f32 %v2862_v54, %v3052_v51  ;;  %v8592_v33 = vpack.c.bf16 %v2635_v12, %v2633_v0  ;;  %v8704_v38 = vpack.c.bf16 %v2747_v61, %v2745_v15  ;;  %v2750_v51 = vld [vmem:[#allocation20 + $0x310] sm:$0xff]  ;;  %v2757_v43 = vld [vmem:[#allocation20 + $0x348] sm:$0xff]  ;;  %v3868_v50 = vld [vmem:[#allocation25 + $0x398] sm:$0xff] }
 0x743   :  { %v11889_v62 = vpop.f32.mrb[55].mxu0  ;;  %3249 = vmatmul.mubr.f32.gmra.mrb[38].mxu1 %v3152_v22  ;;  %3427 = vmatmul.mubr.f32.gmra.mrb[74].mxu0 %v3152_v22  ;;  %v2632_v22 = vld [vmem:[#allocation19 + $0x2e0] sm:$0xff]  ;;  %v2758_v0 = vld [vmem:[#allocation20 + $0x350] sm:$0xff]  ;;  %v2649_v12 = vld [vmem:[#allocation19 + $0x368] sm:$0xff] }
 0x744   :  { %3254 = vmatprep.mubr.f32.mxu1 %v3157_v35  ;;  %3432 = vmatprep.mubr.f32.mxu0 %v3157_v35  ;;  %v8594_v54 = vpack.c.bf16 %v2634_v60, %v2632_v22  ;;  %v2753_v35 = vld [vmem:[#allocation20 + $0x328] sm:$0xff]  ;;  %v2648_v60 = vld [vmem:[#allocation19 + $0x360] sm:$0xff] }
 0x745   :  { %8579 = vmatpush1.bf16.msra.mxu1 %v8578_v59  ;;  %8691 = vmatpush1.bf16.msra.mxu0 %v8690_v11  ;;  %v2636_v59 = vld [vmem:[#allocation19 + $0x300] sm:$0xff]  ;;  %v2638_v11 = vld [vmem:[#allocation19 + $0x310] sm:$0xff] }
 0x746   :  { %8581 = vmatprep.subr.bf16.mxu1 %v8580_v16  ;;  %8693 = vmatprep.subr.bf16.mxu0 %v8692_v23  ;;  %v11891_v4 = vpop.f32.mrb[56].mxu0  ;;  %v2641_v16 = vld [vmem:[#allocation19 + $0x328] sm:$0xff]  ;;  %v8598_v56 = vpack.c.bf16 %v2638_v11, %v2636_v59  ;;  %v8722_v59 = vpack.c.bf16 %v2762_v2, %v2760_v28  ;;  %v3884_v2 = vld [vmem:[#allocation25 + $0x418] sm:$0xff] }
 0x747   :  { %v11893_v36 = vpop.f32.mrb[57].mxu0  ;;  %3255 = vmatmul.mubr.f32.gmra.mrb[40].mxu1 %v3156_v7  ;;  %3433 = vmatmul.mubr.f32.gmra.mrb[76].mxu0 %v3156_v7  ;;  %v2748_v7 = vld [vmem:[#allocation20 + $0x300] sm:$0xff]  ;;  %v3886_v28 = vld [vmem:[#allocation25 + $0x428] sm:$0xff] }
 0x749   :  { %8583 = vmatpush1.bf16.msra.mxu1 %v8582_v19  ;;  %8695 = vmatpush1.bf16.msra.mxu0 %v8694_v13  ;;  %v8710_v19 = vpack.c.bf16 %v2750_v51, %v2748_v7  ;;  %v2640_v13 = vld [vmem:[#allocation19 + $0x320] sm:$0xff] }
 0x74a   :  { %8585 = vmatprep.subr.bf16.mxu1 %v8584_v34  ;;  %8697 = vmatprep.subr.bf16.mxu0 %v8696_v20  ;;  %v11895_v30 = vpop.f32.mrb[58].mxu0  ;;  %v8600_v34 = vpack.c.bf16 %v2643_v48, %v2641_v16  ;;  %v2752_v20 = vld [vmem:[#allocation20 + $0x320] sm:$0xff] }
 0x74b   :  { %v11897_v17 = vpop.f32.mrb[59].mxu0  ;;  %v8714_v63 = vpack.c.bf16 %v2754_v9, %v2752_v20  ;;  %v3866_v20 = vld [vmem:[#allocation25 + $0x388] sm:$0xff] }
 0x74d   :  { %8587 = vmatpush1.bf16.msra.mxu1 %v8586_v58  ;;  %8699 = vmatpush1.bf16.msra.mxu0 %v8698_v45  ;;  %v8602_v45 = vpack.c.bf16 %v2642_v31, %v2640_v13 }
 0x74e   :  { %8589 = vmatprep.subr.bf16.mxu1 %v8588_v21  ;;  %8701 = vmatprep.subr.bf16.mxu0 %v8700_v52  ;;  %v11899_v5 = vpop.f32.mrb[60].mxu0  ;;  %v2646_v21 = vld [vmem:[#allocation19 + $0x350] sm:$0xff] }
 0x74f   :  { %v11901_v46 = vpop.f32.mrb[61].mxu0 }
 0x751   :  { %8591 = vmatpush1.bf16.msra.mxu1 %v8590_v6  ;;  %8703 = vmatpush1.bf16.msra.mxu0 %v8702_v18  ;;  %v2651_v6 = vld [vmem:[#allocation19 + $0x378] sm:$0xff]  ;;  %v2761_v18 = vld [vmem:[#allocation20 + $0x368] sm:$0xff] }
 0x752   :  { %v3121_v44 = vpop.f32.mrb[62].mxu0  ;;  %8593 = vmatprep.subr.bf16.mxu1 %v8592_v33  ;;  %8705 = vmatprep.subr.bf16.mxu0 %v8704_v38  ;;  %v8606_v33 = vpack.c.bf16 %v2646_v21, %v2644_v53  ;;  %v8718_v38 = vpack.c.bf16 %v2758_v0, %v2756_v1  ;;  %v8608_v40 = vpack.c.bf16 %v2651_v6, %v2649_v12  ;;  %v3869_v21 = vld [vmem:[#allocation25 + $0x3a0] sm:$0xff]  ;;  %v3874_v1 = vld [vmem:[#allocation25 + $0x3c8] sm:$0xff] }
 0x753   :  { %v11904_v23 = vmax.f32 %v11887_v29, %v3121_v44  ;;  %v3123_v57 = vpop.f32.mrb[63].mxu0  ;;  %v8712_v29 = vpack.c.bf16 %v2755_v27, %v2753_v35  ;;  %v3878_v12 = vld [vmem:[#allocation25 + $0x3e8] sm:$0xff]  ;;  %v3536_v6 = vld [vmem:[#allocation22] sm:$0xff] }
 0x754   :  { %v3147_v42 = vmax.f32 %v11889_v62, %v3123_v57 }
 0x755   :  { %8595 = vmatpush1.bf16.msra.mxu1 %v8594_v54  ;;  %8707 = vmatpush1.bf16.msra.mxu0 %v8706_v49 }
 0x756   :  { %v3127_v14 = vpop.f32.mrb[64].mxu0  ;;  %8597 = vmatprep.subr.bf16.mxu1 %v8596_v26  ;;  %7768 = vmatprep.mubr.msk.f32.mxu1 %vm1727_vm6, %v3147_v42 }
 0x757   :  { %v3150_v32 = vmax.f32 %v11891_v4, %v3127_v14  ;;  %8709 = vmatprep.subr.bf16.mxu0 %v8708_v25  ;;  %7772 = vmatprep.mubr.msk.f32.mxu0 %vm1727_vm6, %v3147_v42  ;;  %v3129_v62 = vpop.f32.mrb[65].mxu0  ;;  %v8716_v4 = vpack.c.bf16 %v2759_v41, %v2757_v43  ;;  %v3872_v43 = vld [vmem:[#allocation25 + $0x3b8] sm:$0xff] }
 0x758   :  { %v3151_v58 = vmax.f32 %v11893_v36, %v3129_v62  ;;  %v2763_v36 = vld [vmem:[#allocation20 + $0x378] sm:$0xff]  ;;  %v3870_v62 = vld [vmem:[#allocation25 + $0x3a8] sm:$0xff]  ;;  %v8800_v53 = vpack.c.bf16 %v3872_v43, %v3868_v50 }
 0x759   :  { %8599 = vmatpush1.bf16.msra.mxu1 %v8598_v56  ;;  %8711 = vmatpush1.bf16.msra.mxu0 %v8710_v19  ;;  %v8720_v24 = vpack.c.bf16 %v2763_v36, %v2761_v18  ;;  %v3647_v18 = vld [vmem:[#allocation23] sm:$0xff]  ;;  %v3898_v50 = vld [vmem:[#allocation25 + $0x488] sm:$0xff] }
 0x75a   :  { %v3133_v52 = vpop.f32.mrb[66].mxu0  ;;  %8601 = vmatprep.subr.bf16.mxu1 %v8600_v34  ;;  %8713 = vmatprep.subr.bf16.mxu0 %v8712_v29  ;;  %v3902_v43 = vld [vmem:[#allocation25 + $0x4a8] sm:$0xff] }
 0x75b   :  { %v3154_v15 = vmax.f32 %v11895_v30, %v3133_v52  ;;  %v3135_v61 = vpop.f32.mrb[67].mxu0  ;;  %v3867_v52 = vld [vmem:[#allocation25 + $0x390] sm:$0xff] }
 0x75c   :  { %v3155_v22 = vmax.f32 %v11897_v17, %v3135_v61  ;;  %v8610_v17 = vpack.c.bf16 %v2650_v39, %v2648_v60  ;;  %v3880_v61 = vld [vmem:[#allocation25 + $0x3f8] sm:$0xff]  ;;  %v3875_v60 = vld [vmem:[#allocation25 + $0x3d0] sm:$0xff]  ;;  %v3882_v39 = vld [vmem:[#allocation25 + $0x408] sm:$0xff] }
 0x75d   :  { %8603 = vmatpush1.bf16.msra.mxu1 %v8602_v45  ;;  %8715 = vmatpush1.bf16.msra.mxu0 %v8714_v63  ;;  %v8744_v63 = vpack.c.bf16 %v3870_v62, %v3866_v20  ;;  %v3895_v62 = vld [vmem:[#allocation25 + $0x470] sm:$0xff] }
 0x75e   :  { %v3139_v37 = vpop.f32.mrb[68].mxu0  ;;  %8605 = vmatprep.subr.bf16.mxu1 %v8604_v55  ;;  %8717 = vmatprep.subr.bf16.mxu0 %v8716_v4  ;;  %v3871_v55 = vld [vmem:[#allocation25 + $0x3b0] sm:$0xff] }
 0x75f   :  { %v3158_v30 = vmax.f32 %v11899_v5, %v3139_v37  ;;  %v3141_v54 = vpop.f32.mrb[69].mxu0  ;;  %v3879_v37 = vld [vmem:[#allocation25 + $0x3f0] sm:$0xff] }
 0x760   :  { %v3159_v49 = vmax.f32 %v11901_v46, %v3141_v54  ;;  %v3537_v54 = vld [vmem:[#allocation22 + $0x8] sm:$0xff] }
 0x761   :  { %8607 = vmatpush1.bf16.msra.mxu1 %v8606_v33  ;;  %8719 = vmatpush1.bf16.msra.mxu0 %v8718_v38  ;;  %v3873_v33 = vld [vmem:[#allocation25 + $0x3c0] sm:$0xff] }
 0x762   :  { %8609 = vmatprep.subr.bf16.mxu1 %v8608_v40  ;;  %8721 = vmatprep.subr.bf16.mxu0 %v8720_v24  ;;  %v3877_v38 = vld [vmem:[#allocation25 + $0x3e0] sm:$0xff]  ;;  %v8748_v40 = vpack.c.bf16 %v3878_v12, %v3874_v1  ;;  %v3899_v1 = vld [vmem:[#allocation25 + $0x490] sm:$0xff]  ;;  %v8760_v12 = vpack.c.bf16 %v3902_v43, %v3898_v50  ;;  %v3936_v50 = vld [vmem:[#allocation25 + $0x5b8] sm:$0xff] }
 0x765   :  { %8611 = vmatpush1.bf16.msra.mxu1 %v8610_v17  ;;  %8723 = vmatpush1.bf16.msra.mxu0 %v8722_v59  ;;  %v8750_v17 = vpack.c.bf16 %v3877_v38, %v3873_v33  ;;  %v8806_v59 = vpack.c.bf16 %v3879_v37, %v3875_v60  ;;  %v3905_v37 = vld [vmem:[#allocation25 + $0x4c0] sm:$0xff] }
 0x768   :  { %3326 = vmatmul.mubr.f32.vlgmr.msra.gmra.mrb[34].mxu1 %v11904_v23  ;;  %3504 = vmatmul.mubr.f32.vlgmr.msra.gmra.mrb[70].mxu0 %v11904_v23 }
 0x769   :  { %7769 = vmatprep.mubr.msk.f32.mxu1 %vm1727_vm6, %v3151_v58  ;;  %7773 = vmatprep.mubr.msk.f32.mxu0 %vm1727_vm6, %v3151_v58  ;;  %v3865_v58 = vld [vmem:[#allocation25 + $0x380] sm:$0xff] }
 0x76a   :  { %v8746_v36 = vpack.c.bf16 %v3869_v21, %v3865_v58  ;;  %v3900_v58 = vld [vmem:[#allocation25 + $0x498] sm:$0xff] }
 0x76c   :  { %3332 = vmatmul.mubr.f32.gmra.mrb[36].mxu1 %v3150_v32  ;;  %3510 = vmatmul.mubr.f32.gmra.mrb[72].mxu0 %v3150_v32 }
 0x76d   :  { %7770 = vmatprep.mubr.msk.f32.mxu1 %vm1727_vm6, %v3155_v22  ;;  %7774 = vmatprep.mubr.msk.f32.mxu0 %vm1727_vm6, %v3155_v22  ;;  %v8802_v22 = vpack.c.bf16 %v3871_v55, %v3867_v52  ;;  %v3897_v55 = vld [vmem:[#allocation25 + $0x480] sm:$0xff] }
 0x770   :  { %3338 = vmatmul.mubr.f32.gmra.mrb[38].mxu1 %v3154_v15  ;;  %3516 = vmatmul.mubr.f32.gmra.mrb[74].mxu0 %v3154_v15  ;;  %v3876_v15 = vld [vmem:[#allocation25 + $0x3d8] sm:$0xff] }
 0x771   :  { %7771 = vmatprep.mubr.msk.f32.mxu1 %vm1727_vm6, %v3159_v49  ;;  %7775 = vmatprep.mubr.msk.f32.mxu0 %vm1727_vm6, %v3159_v49  ;;  %v8804_v24 = vpack.c.bf16 %v3880_v61, %v3876_v15  ;;  %v3648_v49 = vld [vmem:[#allocation23 + $0x8] sm:$0xff]  ;;  %v3903_v61 = vld [vmem:[#allocation25 + $0x4b0] sm:$0xff] }
 0x772   :  { %v8818_v38 = vpack.c.bf16 %v3903_v61, %v3899_v1  ;;  %v3942_v1 = vld [vmem:[#allocation25 + $0x5e8] sm:$0xff] }
 0x774   :  { %3344 = vmatmul.mubr.f32.gmra.mrb[40].mxu1 %v3158_v30  ;;  %3522 = vmatmul.mubr.f32.gmra.mrb[76].mxu0 %v3158_v30  ;;  %v3888_v30 = vld [vmem:[#allocation25 + $0x438] sm:$0xff] }
 0x775   :  { %3622 = vmatprep.mubr.f32.mxu1 %v12651_v8  ;;  %3727 = vmatprep.mubr.f32.mxu0 %v12651_v8 }
 0x83b   :  { %v3327_v5 = vpop.f32.mrb[34].mxu1  ;;  %v3505_v46 = vpop.f32.mrb[70].mxu0 }
 0x83c   :  { %v11925_v11 = vmax.f32 %v3327_v5, %v3505_v46  ;;  %v3329_v44 = vpop.f32.mrb[35].mxu1  ;;  %v3507_v26 = vpop.f32.mrb[71].mxu0  ;;  %v3881_v5 = vld [vmem:[#allocation25 + $0x400] sm:$0xff] }
 0x83d   :  { %v11927_v7 = vmax.f32 %v3329_v44, %v3507_v26  ;;  %v3885_v46 = vld [vmem:[#allocation25 + $0x420] sm:$0xff]  ;;  %v3883_v44 = vld [vmem:[#allocation25 + $0x410] sm:$0xff] }
 0x83e   :  { %v3887_v26 = vld [vmem:[#allocation25 + $0x430] sm:$0xff] }
 0x83f   :  { %v3333_v51 = vpop.f32.mrb[36].mxu1  ;;  %v3511_v16 = vpop.f32.mrb[72].mxu0 }
 0x840   :  { %v11929_v23 = vmax.f32 %v3333_v51, %v3511_v16  ;;  %v3335_v57 = vpop.f32.mrb[37].mxu1  ;;  %v3513_v25 = vpop.f32.mrb[73].mxu0  ;;  %v8752_v51 = vpack.c.bf16 %v3886_v28, %v3882_v39  ;;  %v8808_v16 = vpack.c.bf16 %v3888_v30, %v3884_v2  ;;  %v3911_v28 = vld [vmem:[#allocation25 + $0x4f0] sm:$0xff]  ;;  %v3914_v2 = vld [vmem:[#allocation25 + $0x508] sm:$0xff] }
 0x841   :  { %v11931_v48 = vmax.f32 %v3335_v57, %v3513_v25  ;;  %v3890_v57 = vld [vmem:[#allocation25 + $0x448] sm:$0xff] }
 0x842   :  { %v8726_v56 = vpack.c.bf16 %v11929_v23, %v11925_v11  ;;  %v3894_v25 = vld [vmem:[#allocation25 + $0x468] sm:$0xff] }
 0x843   :  { %v3339_v35 = vpop.f32.mrb[38].mxu1  ;;  %v3517_v27 = vpop.f32.mrb[74].mxu0  ;;  %v8724_v42 = vpack.c.bf16 %v11931_v48, %v11927_v7  ;;  %v8756_v20 = vpack.c.bf16 %v3894_v25, %v3890_v57  ;;  %v3918_v30 = vld [vmem:[#allocation25 + $0x528] sm:$0xff]  ;;  %v3924_v25 = vld [vmem:[#allocation25 + $0x558] sm:$0xff] }
 0x844   :  { %v11937_v19 = vmax.f32 %v3339_v35, %v3517_v27  ;;  %v3341_v13 = vpop.f32.mrb[39].mxu1  ;;  %v3519_v31 = vpop.f32.mrb[75].mxu0  ;;  %v3892_v35 = vld [vmem:[#allocation25 + $0x458] sm:$0xff]  ;;  %v3926_v57 = vld [vmem:[#allocation25 + $0x568] sm:$0xff] }
 0x845   :  { %v11939_v14 = vmax.f32 %v3341_v13, %v3519_v31  ;;  %8725 = vmatprep.subr.bf16.mxu1 %v8724_v42  ;;  %8735 = vmatprep.subr.bf16.mxu0 %v8724_v42  ;;  %v3896_v27 = vld [vmem:[#allocation25 + $0x478] sm:$0xff]  ;;  %v3538_v42 = vld [vmem:[#allocation22 + $0x10] sm:$0xff]  ;;  %v8754_v13 = vpack.c.bf16 %v3885_v46, %v3881_v5  ;;  %v8810_v31 = vpack.c.bf16 %v3887_v26, %v3883_v44  ;;  %v3917_v46 = vld [vmem:[#allocation25 + $0x520] sm:$0xff] }
 0x846   :  { %8727 = vmatpush1.bf16.msra.mxu1 %v8726_v56  ;;  %8737 = vmatpush1.bf16.msra.mxu0 %v8726_v56  ;;  %v3649_v56 = vld [vmem:[#allocation23 + $0x10] sm:$0xff]  ;;  %v8768_v5 = vpack.c.bf16 %v3918_v30, %v3914_v2 }
 0x847   :  { %v3345_v34 = vpop.f32.mrb[40].mxu1  ;;  %v3523_v29 = vpop.f32.mrb[76].mxu0  ;;  %v3915_v44 = vld [vmem:[#allocation25 + $0x510] sm:$0xff] }
 0x848   :  { %v11941_v9 = vmax.f32 %v3345_v34, %v3523_v29  ;;  %v3347_v10 = vpop.f32.mrb[41].mxu1  ;;  %v3525_v32 = vpop.f32.mrb[77].mxu0  ;;  %v3889_v34 = vld [vmem:[#allocation25 + $0x440] sm:$0xff] }
 0x849   :  { %v11943_v41 = vmax.f32 %v3347_v10, %v3525_v32  ;;  %v3893_v29 = vld [vmem:[#allocation25 + $0x460] sm:$0xff]  ;;  %v8812_v10 = vpack.c.bf16 %v3896_v27, %v3892_v35  ;;  %v3891_v32 = vld [vmem:[#allocation25 + $0x450] sm:$0xff]  ;;  %v3928_v35 = vld [vmem:[#allocation25 + $0x578] sm:$0xff] }
 0x84a   :  { %v8731_v4 = vpack.c.bf16 %v11941_v9, %v11937_v19  ;;  %v8758_v21 = vpack.c.bf16 %v3893_v29, %v3889_v34  ;;  %v8814_v52 = vpack.c.bf16 %v3895_v62, %v3891_v32  ;;  %v3923_v34 = vld [vmem:[#allocation25 + $0x550] sm:$0xff]  ;;  %v8828_v29 = vpack.c.bf16 %v3928_v35, %v3924_v25  ;;  %v3934_v32 = vld [vmem:[#allocation25 + $0x5a8] sm:$0xff]  ;;  %v3932_v62 = vld [vmem:[#allocation25 + $0x598] sm:$0xff] }
 0x84b   :  { %v8728_v45 = vpack.c.bf16 %v11943_v41, %v11939_v14  ;;  %v3953_v25 = vld [vmem:[#allocation25 + $0x640] sm:$0xff] }
 0x84c   :  { %v3957_v35 = vld [vmem:[#allocation25 + $0x660] sm:$0xff] }
 0x84d   :  { %8730 = vmatprep.subr.msk.bf16.mxu1 %vm11138_vm4, %v8728_v45  ;;  %8740 = vmatprep.subr.msk.bf16.mxu0 %vm11138_vm4, %v8728_v45  ;;  %v3904_v45 = vld [vmem:[#allocation25 + $0x4b8] sm:$0xff] }
 0x84e   :  { %8733 = vmatpush1.bf16.msk.msra.mxu1 %vm11138_vm4, %v8731_v4  ;;  %8743 = vmatpush1.bf16.msk.msra.mxu0 %vm11138_vm4, %v8731_v4  ;;  %v3901_v4 = vld [vmem:[#allocation25 + $0x4a0] sm:$0xff]  ;;  %v8816_v15 = vpack.c.bf16 %v3904_v45, %v3900_v58 }
 0x84f   :  { %8745 = vmatprep.subr.bf16.mxu1 %v8744_v63  ;;  %8801 = vmatprep.subr.bf16.mxu0 %v8800_v53  ;;  %v3539_v63 = vld [vmem:[#allocation22 + $0x18] sm:$0xf]  ;;  %v8762_v33 = vpack.c.bf16 %v3901_v4, %v3897_v55  ;;  %v3935_v55 = vld [vmem:[#allocation25 + $0x5b0] sm:$0xff]  ;;  %v3938_v4 = vld [vmem:[#allocation25 + $0x5c8] sm:$0xff] }
 0x850   :  { %v3650_v53 = vld [vmem:[#allocation23 + $0x18] sm:$0xf] }
 0x851   :  { %7778 = vmatmul.mubr.msk.f32.vlgmr.msra.gmra.mrb[42].mxu1 %vm787_vm5, %v3536_v6  ;;  %7784 = vmatmul.mubr.msk.f32.vlgmr.msra.gmra.mrb[78].mxu0 %vm787_vm5, %v3647_v18  ;;  %v3906_v6 = vld [vmem:[#allocation25 + $0x4c8] sm:$0xff] }
 0x852   :  { %8747 = vmatpush1.bf16.msra.mxu1 %v8746_v36  ;;  %8803 = vmatpush1.bf16.msra.mxu0 %v8802_v22  ;;  %v3910_v18 = vld [vmem:[#allocation25 + $0x4e8] sm:$0xff]  ;;  %v3908_v36 = vld [vmem:[#allocation25 + $0x4d8] sm:$0xff] }
 0x853   :  { %3628 = vmatprep.mubr.f32.mxu1 %v12651_v8  ;;  %3733 = vmatprep.mubr.f32.mxu0 %v12651_v8  ;;  %v3912_v22 = vld [vmem:[#allocation25 + $0x4f8] sm:$0xff]  ;;  %v8764_v60 = vpack.c.bf16 %v3910_v18, %v3906_v6  ;;  %v8780_v18 = vpack.c.bf16 %v3942_v1, %v3938_v4 }
 0x854   :  { %8749 = vmatprep.subr.bf16.mxu1 %v8748_v40  ;;  %8805 = vmatprep.subr.bf16.mxu0 %v8804_v24  ;;  %v3909_v40 = vld [vmem:[#allocation25 + $0x4e0] sm:$0xff]  ;;  %v3907_v24 = vld [vmem:[#allocation25 + $0x4d0] sm:$0xff]  ;;  %v8820_v39 = vpack.c.bf16 %v3912_v22, %v3908_v36 }
 0x855   :  { %7779 = vmatmul.mubr.msk.f32.gmra.mrb[44].mxu1 %vm787_vm5, %v3537_v54  ;;  %7785 = vmatmul.mubr.msk.f32.gmra.mrb[80].mxu0 %vm787_vm5, %v3648_v49  ;;  %v3916_v54 = vld [vmem:[#allocation25 + $0x518] sm:$0xff]  ;;  %v3937_v36 = vld [vmem:[#allocation25 + $0x5c0] sm:$0xff] }
 0x856   :  { %8751 = vmatpush1.bf16.msra.mxu1 %v8750_v17  ;;  %8807 = vmatpush1.bf16.msra.mxu0 %v8806_v59  ;;  %v3920_v49 = vld [vmem:[#allocation25 + $0x538] sm:$0xff]  ;;  %v8766_v17 = vpack.c.bf16 %v3909_v40, %v3905_v37  ;;  %v8822_v59 = vpack.c.bf16 %v3911_v28, %v3907_v24  ;;  %v3941_v22 = vld [vmem:[#allocation25 + $0x5e0] sm:$0xff]  ;;  %v3946_v37 = vld [vmem:[#allocation25 + $0x608] sm:$0xff] }
 0x857   :  { %3634 = vmatprep.mubr.f32.mxu1 %v12651_v8  ;;  %3739 = vmatprep.mubr.f32.mxu0 %v12651_v8  ;;  %v8824_v26 = vpack.c.bf16 %v3920_v49, %v3916_v54  ;;  %v3950_v40 = vld [vmem:[#allocation25 + $0x628] sm:$0xff]  ;;  %v3948_v24 = vld [vmem:[#allocation25 + $0x618] sm:$0xff]  ;;  %v8782_v28 = vpack.c.bf16 %v3941_v22, %v3937_v36  ;;  %v3945_v54 = vld [vmem:[#allocation25 + $0x600] sm:$0xff] }
 0x858   :  { %8753 = vmatprep.subr.bf16.mxu1 %v8752_v51  ;;  %8809 = vmatprep.subr.bf16.mxu0 %v8808_v16  ;;  %v3919_v51 = vld [vmem:[#allocation25 + $0x530] sm:$0xff]  ;;  %v3922_v16 = vld [vmem:[#allocation25 + $0x548] sm:$0xff]  ;;  %v8784_v30 = vpack.c.bf16 %v3950_v40, %v3946_v37  ;;  %v3949_v49 = vld [vmem:[#allocation25 + $0x620] sm:$0xff] }
 0x859   :  { %7780 = vmatmul.mubr.msk.f32.gmra.mrb[46].mxu1 %vm787_vm5, %v3538_v42  ;;  %7786 = vmatmul.mubr.msk.f32.gmra.mrb[82].mxu0 %vm787_vm5, %v3649_v56  ;;  %v8826_v42 = vpack.c.bf16 %v3919_v51, %v3915_v44  ;;  %v8772_v56 = vpack.c.bf16 %v3926_v57, %v3922_v16  ;;  %v3956_v44 = vld [vmem:[#allocation25 + $0x658] sm:$0xff]  ;;  %v8786_v51 = vpack.c.bf16 %v3949_v49, %v3945_v54  ;;  %v3753_v36 = vld [vmem:[#allocation25 + $0x8] sm:$0xff] }
 0x85a   :  { %8755 = vmatpush1.bf16.msra.mxu1 %v8754_v13  ;;  %8811 = vmatpush1.bf16.msra.mxu0 %v8810_v31  ;;  %v3921_v13 = vld [vmem:[#allocation25 + $0x540] sm:$0xff]  ;;  %v3757_v22 = vld [vmem:[#allocation25 + $0x28] sm:$0xff] }
 0x85b   :  { %3640 = vmatprep.mubr.f32.mxu1 %v12651_v8  ;;  %3745 = vmatprep.mubr.f32.mxu0 %v12651_v8  ;;  %v3925_v31 = vld [vmem:[#allocation25 + $0x560] sm:$0xff]  ;;  %v8856_v40 = vpack.c.bf16 %v3757_v22, %v3753_v36  ;;  %v3761_v54 = vld [vmem:[#allocation25 + $0x48] sm:$0xff]  ;;  %v3786_v36 = vld [vmem:[#allocation25 + $0x110] sm:$0xff] }
 0x85c   :  { %8757 = vmatprep.subr.bf16.mxu1 %v8756_v20  ;;  %8813 = vmatprep.subr.bf16.mxu0 %v8812_v10  ;;  %v3927_v20 = vld [vmem:[#allocation25 + $0x570] sm:$0xff]  ;;  %v3930_v10 = vld [vmem:[#allocation25 + $0x588] sm:$0xff]  ;;  %v8774_v43 = vpack.c.bf16 %v3925_v31, %v3921_v13 }
 0x85d   :  { %7781 = vmatmul.mubr.msk.f32.gmra.mrb[48].mxu1 %vm787_vm5, %v3539_v63  ;;  %7787 = vmatmul.mubr.msk.f32.gmra.mrb[84].mxu0 %vm787_vm5, %v3650_v53  ;;  %v8830_v58 = vpack.c.bf16 %v3927_v20, %v3923_v34  ;;  %v8776_v45 = vpack.c.bf16 %v3934_v32, %v3930_v10  ;;  %v3929_v63 = vld [vmem:[#allocation25 + $0x580] sm:$0xff]  ;;  %v3962_v13 = vld [vmem:[#allocation25 + $0x688] sm:$0xff]  ;;  %v3964_v34 = vld [vmem:[#allocation25 + $0x698] sm:$0xff]  ;;  %v8790_v20 = vpack.c.bf16 %v3957_v35, %v3953_v25 }
 0x85e   :  { %8759 = vmatpush1.bf16.msra.mxu1 %v8758_v21  ;;  %7788 = vmatprep.mubr.msk.f32.mxu1 %vm3977_vm8, %v11927_v7  ;;  %v3933_v53 = vld [vmem:[#allocation25 + $0x5a0] sm:$0xff]  ;;  %v3931_v21 = vld [vmem:[#allocation25 + $0x590] sm:$0xff]  ;;  %v3966_v31 = vld [vmem:[#allocation25 + $0x6a8] sm:$0xff] }
 0x85f   :  { %8815 = vmatpush1.bf16.msra.mxu0 %v8814_v52  ;;  %7792 = vmatprep.mubr.msk.f32.mxu0 %vm3977_vm8, %v11927_v7  ;;  %v3913_v7 = vld [vmem:[#allocation25 + $0x500] sm:$0xff]  ;;  %v8832_v52 = vpack.c.bf16 %v3936_v50, %v3932_v62  ;;  %v8778_v61 = vpack.c.bf16 %v3933_v53, %v3929_v63  ;;  %v8834_v6 = vpack.c.bf16 %v3935_v55, %v3931_v21  ;;  %v3970_v63 = vld [vmem:[#allocation25 + $0x6c8] sm:$0xff]  ;;  %v3972_v21 = vld [vmem:[#allocation25 + $0x6d8] sm:$0xff] }
 0x860   :  { %8761 = vmatprep.subr.bf16.mxu1 %v8760_v12  ;;  %8817 = vmatprep.subr.bf16.mxu0 %v8816_v15  ;;  %v8770_v27 = vpack.c.bf16 %v3917_v46, %v3913_v7  ;;  %v3940_v12 = vld [vmem:[#allocation25 + $0x5d8] sm:$0xff]  ;;  %v3954_v7 = vld [vmem:[#allocation25 + $0x648] sm:$0xff]  ;;  %v8792_v32 = vpack.c.bf16 %v3966_v31, %v3962_v13  ;;  %v3961_v62 = vld [vmem:[#allocation25 + $0x680] sm:$0xff] }
 0x861   :  { %v3944_v15 = vld [vmem:[#allocation25 + $0x5f8] sm:$0xff]  ;;  %v3958_v46 = vld [vmem:[#allocation25 + $0x668] sm:$0xff]  ;;  %v3965_v50 = vld [vmem:[#allocation25 + $0x6a0] sm:$0xff] }
 0x862   :  { %8763 = vmatpush1.bf16.msra.mxu1 %v8762_v33  ;;  %v3939_v33 = vld [vmem:[#allocation25 + $0x5d0] sm:$0xff]  ;;  %v8788_v57 = vpack.c.bf16 %v3958_v46, %v3954_v7  ;;  %v3974_v53 = vld [vmem:[#allocation25 + $0x6e8] sm:$0xff]  ;;  %v8794_v55 = vpack.c.bf16 %v3965_v50, %v3961_v62  ;;  %v3783_v50 = vld [vmem:[#allocation25 + $0xf8] sm:$0xff] }
 0x863   :  { %8819 = vmatpush1.bf16.msra.mxu0 %v8818_v38  ;;  %8765 = vmatprep.subr.bf16.mxu1 %v8764_v60  ;;  %v8836_v38 = vpack.c.bf16 %v3944_v15, %v3940_v12  ;;  %v3943_v60 = vld [vmem:[#allocation25 + $0x5f0] sm:$0xff]  ;;  %v8796_v1 = vpack.c.bf16 %v3974_v53, %v3970_v63  ;;  %v3969_v12 = vld [vmem:[#allocation25 + $0x6c0] sm:$0xff]  ;;  %v3765_v49 = vld [vmem:[#allocation25 + $0x68] sm:$0xff] }
 0x864   :  { %8821 = vmatprep.subr.bf16.mxu0 %v8820_v39  ;;  %v3952_v39 = vld [vmem:[#allocation25 + $0x638] sm:$0xff]  ;;  %v8838_v2 = vpack.c.bf16 %v3943_v60, %v3939_v33  ;;  %v3973_v15 = vld [vmem:[#allocation25 + $0x6e0] sm:$0xff]  ;;  %v8860_v46 = vpack.c.bf16 %v3765_v49, %v3761_v54  ;;  %v3769_v25 = vld [vmem:[#allocation25 + $0x88] sm:$0xff] }
 0x865   :  { %v3755_v33 = vld [vmem:[#allocation25 + $0x18] sm:$0xff]  ;;  %v8798_v60 = vpack.c.bf16 %v3973_v15, %v3969_v12  ;;  %v3773_v35 = vld [vmem:[#allocation25 + $0xa8] sm:$0xff]  ;;  %v3776_v63 = vld [vmem:[#allocation25 + $0xc0] sm:$0xff] }
 0x866   :  { %8767 = vmatpush1.bf16.msra.mxu1 %v8766_v17  ;;  %v3947_v17 = vld [vmem:[#allocation25 + $0x610] sm:$0xff]  ;;  %v8864_v31 = vpack.c.bf16 %v3773_v35, %v3769_v25  ;;  %v3781_v62 = vld [vmem:[#allocation25 + $0xe8] sm:$0xff]  ;;  %v3780_v53 = vld [vmem:[#allocation25 + $0xe0] sm:$0xff] }
 0x867   :  { %8823 = vmatpush1.bf16.msra.mxu0 %v8822_v59  ;;  %8769 = vmatprep.subr.bf16.mxu1 %v8768_v5  ;;  %v8840_v59 = vpack.c.bf16 %v3952_v39, %v3948_v24  ;;  %v3951_v5 = vld [vmem:[#allocation25 + $0x630] sm:$0xff]  ;;  %v3752_v39 = vld [vmem:[#allocation25] sm:$0xff]  ;;  %v8870_v12 = vpack.c.bf16 %v3780_v53, %v3776_v63  ;;  %v3801_v49 = vld [vmem:[#allocation25 + $0x188] sm:$0xff] }
 0x868   :  { %8825 = vmatprep.subr.bf16.mxu0 %v8824_v26  ;;  %v3960_v26 = vld [vmem:[#allocation25 + $0x678] sm:$0xff]  ;;  %v8842_v16 = vpack.c.bf16 %v3951_v5, %v3947_v17  ;;  %v3790_v22 = vld [vmem:[#allocation25 + $0x130] sm:$0xff]  ;;  %v3809_v25 = vld [vmem:[#allocation25 + $0x1c8] sm:$0xff] }
 0x869   :  { %v3763_v17 = vld [vmem:[#allocation25 + $0x58] sm:$0xff]  ;;  %v3798_v54 = vld [vmem:[#allocation25 + $0x170] sm:$0xff]  ;;  %v3813_v35 = vld [vmem:[#allocation25 + $0x1e8] sm:$0xff] }
 0x86a   :  { %8771 = vmatpush1.bf16.msra.mxu1 %v8770_v27  ;;  %v3955_v27 = vld [vmem:[#allocation25 + $0x650] sm:$0xff]  ;;  %v3816_v63 = vld [vmem:[#allocation25 + $0x200] sm:$0xff] }
 0x86b   :  { %8827 = vmatpush1.bf16.msra.mxu0 %v8826_v42  ;;  %8773 = vmatprep.subr.bf16.mxu1 %v8772_v56  ;;  %v8844_v42 = vpack.c.bf16 %v3960_v26, %v3956_v44  ;;  %v3959_v56 = vld [vmem:[#allocation25 + $0x670] sm:$0xff]  ;;  %v3760_v44 = vld [vmem:[#allocation25 + $0x40] sm:$0xff] }
 0x86c   :  { %8829 = vmatprep.subr.bf16.mxu0 %v8828_v29  ;;  %v3968_v29 = vld [vmem:[#allocation25 + $0x6b8] sm:$0xff]  ;;  %v8846_v10 = vpack.c.bf16 %v3959_v56, %v3955_v27  ;;  %v3764_v26 = vld [vmem:[#allocation25 + $0x60] sm:$0xff] }
 0x86d   :  { %v3771_v27 = vld [vmem:[#allocation25 + $0x98] sm:$0xff]  ;;  %v8862_v56 = vpack.c.bf16 %v3764_v26, %v3760_v44  ;;  %v3800_v44 = vld [vmem:[#allocation25 + $0x180] sm:$0xff] }
 0x86e   :  { %8775 = vmatpush1.bf16.msra.mxu1 %v8774_v43  ;;  %v3963_v43 = vld [vmem:[#allocation25 + $0x690] sm:$0xff]  ;;  %v3804_v26 = vld [vmem:[#allocation25 + $0x1a0] sm:$0xff] }
 0x86f   :  { %8831 = vmatpush1.bf16.msra.mxu0 %v8830_v58  ;;  %8777 = vmatprep.subr.bf16.mxu1 %v8776_v45  ;;  %v8848_v58 = vpack.c.bf16 %v3968_v29, %v3964_v34  ;;  %v3967_v45 = vld [vmem:[#allocation25 + $0x6b0] sm:$0xff]  ;;  %v3768_v34 = vld [vmem:[#allocation25 + $0x80] sm:$0xff] }
 0x870   :  { %8833 = vmatprep.subr.bf16.mxu0 %v8832_v52  ;;  %v3976_v52 = vld [vmem:[#allocation25 + $0x6f8] sm:$0xff]  ;;  %v8850_v4 = vpack.c.bf16 %v3967_v45, %v3963_v43  ;;  %v3772_v29 = vld [vmem:[#allocation25 + $0xa0] sm:$0xff] }
 0x871   :  { %v8866_v43 = vpack.c.bf16 %v3772_v29, %v3768_v34  ;;  %v3808_v34 = vld [vmem:[#allocation25 + $0x1c0] sm:$0xff] }
 0x872   :  { %8779 = vmatpush1.bf16.msra.mxu1 %v8778_v61  ;;  %v3971_v61 = vld [vmem:[#allocation25 + $0x6d0] sm:$0xff]  ;;  %v3812_v29 = vld [vmem:[#allocation25 + $0x1e0] sm:$0xff] }
 0x873   :  { %8835 = vmatpush1.bf16.msra.mxu0 %v8834_v6  ;;  %8781 = vmatprep.subr.bf16.mxu1 %v8780_v18  ;;  %v8852_v6 = vpack.c.bf16 %v3976_v52, %v3972_v21  ;;  %v3975_v18 = vld [vmem:[#allocation25 + $0x6f0] sm:$0xff]  ;;  %v3820_v53 = vld [vmem:[#allocation25 + $0x220] sm:$0xff] }
 0x874   :  { %8837 = vmatprep.subr.bf16.mxu0 %v8836_v38  ;;  %v3759_v38 = vld [vmem:[#allocation25 + $0x38] sm:$0xff]  ;;  %v8854_v37 = vpack.c.bf16 %v3975_v18, %v3971_v61  ;;  %v3778_v21 = vld [vmem:[#allocation25 + $0xd0] sm:$0xff]  ;;  %v3788_v18 = vld [vmem:[#allocation25 + $0x120] sm:$0xff] }
 0x875   :  { %v8912_v24 = vpack.c.bf16 %v3759_v38, %v3755_v33  ;;  %v3782_v52 = vld [vmem:[#allocation25 + $0xf0] sm:$0xff]  ;;  %v3793_v33 = vld [vmem:[#allocation25 + $0x148] sm:$0xff] }
 0x876   :  { %8783 = vmatpush1.bf16.msra.mxu1 %v8782_v28  ;;  %v3756_v28 = vld [vmem:[#allocation25 + $0x20] sm:$0xff]  ;;  %v8926_v15 = vpack.c.bf16 %v3782_v52, %v3778_v21  ;;  %v3797_v38 = vld [vmem:[#allocation25 + $0x168] sm:$0xff]  ;;  %v3818_v21 = vld [vmem:[#allocation25 + $0x210] sm:$0xff] }
 0x877   :  { %8839 = vmatpush1.bf16.msra.mxu0 %v8838_v2  ;;  %8785 = vmatprep.subr.bf16.mxu1 %v8784_v30  ;;  %v3754_v2 = vld [vmem:[#allocation25 + $0x10] sm:$0xff]  ;;  %v8858_v5 = vpack.c.bf16 %v3756_v28, %v3752_v39  ;;  %v3792_v39 = vld [vmem:[#allocation25 + $0x140] sm:$0xff] }
 0x878   :  { %8841 = vmatprep.subr.bf16.mxu0 %v8840_v59  ;;  %v3758_v30 = vld [vmem:[#allocation25 + $0x30] sm:$0xff]  ;;  %v3767_v59 = vld [vmem:[#allocation25 + $0x78] sm:$0xff]  ;;  %v3796_v28 = vld [vmem:[#allocation25 + $0x160] sm:$0xff] }
 0x879   :  { %v8914_v7 = vpack.c.bf16 %v3758_v30, %v3754_v2  ;;  %v3794_v2 = vld [vmem:[#allocation25 + $0x150] sm:$0xff] }
 0x87a   :  { %8787 = vmatpush1.bf16.msra.mxu1 %v8786_v51  ;;  %v3762_v51 = vld [vmem:[#allocation25 + $0x50] sm:$0xff] }
 0x87b   :  { %8843 = vmatpush1.bf16.msra.mxu0 %v8842_v16  ;;  %8789 = vmatprep.subr.bf16.mxu1 %v8788_v57  ;;  %v8916_v16 = vpack.c.bf16 %v3767_v59, %v3763_v17  ;;  %v3766_v57 = vld [vmem:[#allocation25 + $0x70] sm:$0xff]  ;;  %v3805_v17 = vld [vmem:[#allocation25 + $0x1a8] sm:$0xff]  ;;  %v3803_v59 = vld [vmem:[#allocation25 + $0x198] sm:$0xff] }
 0x87c   :  { %8845 = vmatprep.subr.bf16.mxu0 %v8844_v42  ;;  %v3775_v42 = vld [vmem:[#allocation25 + $0xb8] sm:$0xff]  ;;  %v8918_v13 = vpack.c.bf16 %v3766_v57, %v3762_v51  ;;  %v3802_v51 = vld [vmem:[#allocation25 + $0x190] sm:$0xff] }
 0x87d   :  { %v3806_v57 = vld [vmem:[#allocation25 + $0x1b0] sm:$0xff] }
 0x87e   :  { %8791 = vmatpush1.bf16.msra.mxu1 %v8790_v20  ;;  %v3770_v20 = vld [vmem:[#allocation25 + $0x90] sm:$0xff] }
 0x87f   :  { %8847 = vmatpush1.bf16.msra.mxu0 %v8846_v10  ;;  %8793 = vmatprep.subr.bf16.mxu1 %v8792_v32  ;;  %v3774_v10 = vld [vmem:[#allocation25 + $0xb0] sm:$0xff]  ;;  %v3777_v32 = vld [vmem:[#allocation25 + $0xc8] sm:$0xff] }
 0x880   :  { %8849 = vmatprep.subr.bf16.mxu0 %v8848_v58  ;;  %v8922_v58 = vpack.c.bf16 %v3774_v10, %v3770_v20  ;;  %v8868_v45 = vpack.c.bf16 %v3781_v62, %v3777_v32  ;;  %v3810_v20 = vld [vmem:[#allocation25 + $0x1d0] sm:$0xff]  ;;  %v3817_v32 = vld [vmem:[#allocation25 + $0x208] sm:$0xff] }
 0x881   :  { %v3814_v10 = vld [vmem:[#allocation25 + $0x1f0] sm:$0xff]  ;;  %v3821_v62 = vld [vmem:[#allocation25 + $0x228] sm:$0xff] }
 0x882   :  { %8795 = vmatpush1.bf16.msra.mxu1 %v8794_v55  ;;  %v3785_v55 = vld [vmem:[#allocation25 + $0x108] sm:$0xff]  ;;  %v3822_v52 = vld [vmem:[#allocation25 + $0x230] sm:$0xff] }
 0x883   :  { %8851 = vmatpush1.bf16.msra.mxu0 %v8850_v4  ;;  %8797 = vmatprep.subr.bf16.mxu1 %v8796_v1  ;;  %v3789_v4 = vld [vmem:[#allocation25 + $0x128] sm:$0xff]  ;;  %v3791_v1 = vld [vmem:[#allocation25 + $0x138] sm:$0xff] }
 0x884   :  { %8853 = vmatprep.subr.bf16.mxu0 %v8852_v6  ;;  %v8872_v61 = vpack.c.bf16 %v3789_v4, %v3785_v55  ;;  %v3784_v6 = vld [vmem:[#allocation25 + $0x100] sm:$0xff]  ;;  %v3825_v55 = vld [vmem:[#allocation25 + $0x248] sm:$0xff] }
 0x885   :  { %v3829_v4 = vld [vmem:[#allocation25 + $0x268] sm:$0xff] }
 0x886   :  { %8799 = vmatpush1.bf16.msra.mxu1 %v8798_v60  ;;  %v3795_v60 = vld [vmem:[#allocation25 + $0x158] sm:$0xff] }
 0x887   :  { %8855 = vmatpush1.bf16.msra.mxu0 %v8854_v37  ;;  %8857 = vmatprep.subr.bf16.mxu1 %v8856_v40  ;;  %v8874_v37 = vpack.c.bf16 %v3788_v18, %v3784_v6  ;;  %v8930_v40 = vpack.c.bf16 %v3790_v22, %v3786_v36  ;;  %v3824_v6 = vld [vmem:[#allocation25 + $0x240] sm:$0xff]  ;;  %v3826_v36 = vld [vmem:[#allocation25 + $0x250] sm:$0xff] }
 0x888   :  { %8913 = vmatprep.subr.bf16.mxu0 %v8912_v24  ;;  %v8876_v24 = vpack.c.bf16 %v3797_v38, %v3793_v33  ;;  %v3828_v18 = vld [vmem:[#allocation25 + $0x260] sm:$0xff]  ;;  %v3830_v22 = vld [vmem:[#allocation25 + $0x270] sm:$0xff]  ;;  %v3833_v33 = vld [vmem:[#allocation25 + $0x288] sm:$0xff] }
 0x889   :  { %4054 = vmatmul.mubr.f32.vlgmr.msra.gmra.mrb[50].mxu1 %v11925_v11  ;;  %v3837_v38 = vld [vmem:[#allocation25 + $0x2a8] sm:$0xff] }
 0x88a   :  { %4143 = vmatmul.mubr.f32.vlgmr.msra.gmra.mrb[86].mxu0 %v11925_v11  ;;  %7789 = vmatprep.mubr.msk.f32.mxu1 %vm3977_vm8, %v11931_v48  ;;  %v8920_v11 = vpack.c.bf16 %v3775_v42, %v3771_v27  ;;  %v3811_v27 = vld [vmem:[#allocation25 + $0x1d8] sm:$0xff] }
 0x88b   :  { %7793 = vmatprep.mubr.msk.f32.mxu0 %vm3977_vm8, %v11931_v48  ;;  %8859 = vmatpush1.bf16.msra.mxu1 %v8858_v5  ;;  %v3779_v48 = vld [vmem:[#allocation25 + $0xd8] sm:$0xff] }
 0x88c   :  { %8915 = vmatpush1.bf16.msra.mxu0 %v8914_v7  ;;  %8861 = vmatprep.subr.bf16.mxu1 %v8860_v46  ;;  %v3807_v5 = vld [vmem:[#allocation25 + $0x1b8] sm:$0xff]  ;;  %v8934_v7 = vpack.c.bf16 %v3798_v54, %v3794_v2  ;;  %v8880_v46 = vpack.c.bf16 %v3805_v17, %v3801_v49  ;;  %v3834_v2 = vld [vmem:[#allocation25 + $0x290] sm:$0xff]  ;;  %v3841_v49 = vld [vmem:[#allocation25 + $0x2c8] sm:$0xff] }
 0x88d   :  { %4060 = vmatmul.mubr.f32.gmra.mrb[52].mxu1 %v11929_v23  ;;  %8917 = vmatprep.subr.bf16.mxu0 %v8916_v16  ;;  %v8936_v16 = vpack.c.bf16 %v3807_v5, %v3803_v59  ;;  %v3815_v42 = vld [vmem:[#allocation25 + $0x1f8] sm:$0xff]  ;;  %v3838_v54 = vld [vmem:[#allocation25 + $0x2b0] sm:$0xff]  ;;  %v3845_v17 = vld [vmem:[#allocation25 + $0x2e8] sm:$0xff] }
 0x88e   :  { %4149 = vmatmul.mubr.f32.gmra.mrb[88].mxu0 %v11929_v23  ;;  %7790 = vmatprep.mubr.msk.f32.mxu1 %vm3977_vm8, %v11939_v14  ;;  %v8924_v23 = vpack.c.bf16 %v3783_v50, %v3779_v48  ;;  %v3819_v48 = vld [vmem:[#allocation25 + $0x218] sm:$0xff] }
 0x88f   :  { %7794 = vmatprep.mubr.msk.f32.mxu0 %vm3977_vm8, %v11939_v14  ;;  %8863 = vmatpush1.bf16.msra.mxu1 %v8862_v56  ;;  %v3787_v14 = vld [vmem:[#allocation25 + $0x118] sm:$0xff]  ;;  %v8882_v56 = vpack.c.bf16 %v3804_v26, %v3800_v44  ;;  %v3840_v44 = vld [vmem:[#allocation25 + $0x2c0] sm:$0xff] }
 0x890   :  { %8919 = vmatpush1.bf16.msra.mxu0 %v8918_v13  ;;  %8865 = vmatprep.subr.bf16.mxu1 %v8864_v31  ;;  %v8938_v13 = vpack.c.bf16 %v3806_v57, %v3802_v51  ;;  %v8884_v31 = vpack.c.bf16 %v3813_v35, %v3809_v25  ;;  %v3823_v50 = vld [vmem:[#allocation25 + $0x238] sm:$0xff]  ;;  %v3844_v26 = vld [vmem:[#allocation25 + $0x2e0] sm:$0xff]  ;;  %v3842_v51 = vld [vmem:[#allocation25 + $0x2d0] sm:$0xff] }
 0x891   :  { %4066 = vmatmul.mubr.f32.gmra.mrb[54].mxu1 %v11937_v19  ;;  %8921 = vmatprep.subr.bf16.mxu0 %v8920_v11  ;;  %v8940_v11 = vpack.c.bf16 %v3815_v42, %v3811_v27  ;;  %v3843_v59 = vld [vmem:[#allocation25 + $0x2d8] sm:$0xff]  ;;  %v3846_v57 = vld [vmem:[#allocation25 + $0x2f0] sm:$0xff]  ;;  %v3849_v25 = vld [vmem:[#allocation25 + $0x308] sm:$0xff] }
 0x892   :  { %4155 = vmatmul.mubr.f32.gmra.mrb[90].mxu0 %v11937_v19  ;;  %7791 = vmatprep.mubr.msk.f32.mxu1 %vm3977_vm8, %v11943_v41  ;;  %v8928_v19 = vpack.c.bf16 %v3791_v1, %v3787_v14  ;;  %v3827_v14 = vld [vmem:[#allocation25 + $0x258] sm:$0xff]  ;;  %v3853_v35 = vld [vmem:[#allocation25 + $0x328] sm:$0xff] }
 0x893   :  { %7795 = vmatprep.mubr.msk.f32.mxu0 %vm3977_vm8, %v11943_v41  ;;  %8867 = vmatpush1.bf16.msra.mxu1 %v8866_v43  ;;  %v3799_v41 = vld [vmem:[#allocation25 + $0x178] sm:$0xff]  ;;  %v8886_v43 = vpack.c.bf16 %v3812_v29, %v3808_v34  ;;  %v3848_v34 = vld [vmem:[#allocation25 + $0x300] sm:$0xff] }
 0x894   :  { %8923 = vmatpush1.bf16.msra.mxu0 %v8922_v58  ;;  %8869 = vmatprep.subr.bf16.mxu1 %v8868_v45  ;;  %v8932_v30 = vpack.c.bf16 %v3799_v41, %v3795_v60  ;;  %v8942_v58 = vpack.c.bf16 %v3814_v10, %v3810_v20  ;;  %v8888_v45 = vpack.c.bf16 %v3821_v62, %v3817_v32  ;;  %v3831_v1 = vld [vmem:[#allocation25 + $0x278] sm:$0xff]  ;;  %v3852_v29 = vld [vmem:[#allocation25 + $0x320] sm:$0xff]  ;;  %v3850_v20 = vld [vmem:[#allocation25 + $0x310] sm:$0xff] }
 0x895   :  { %4072 = vmatmul.mubr.f32.gmra.mrb[56].mxu1 %v11941_v9  ;;  %8925 = vmatprep.subr.bf16.mxu0 %v8924_v23  ;;  %v8944_v23 = vpack.c.bf16 %v3823_v50, %v3819_v48  ;;  %v3835_v60 = vld [vmem:[#allocation25 + $0x298] sm:$0xff]  ;;  %v3854_v10 = vld [vmem:[#allocation25 + $0x330] sm:$0xff]  ;;  %v3857_v32 = vld [vmem:[#allocation25 + $0x348] sm:$0xff] }
 0x896   :  { %4161 = vmatmul.mubr.f32.gmra.mrb[92].mxu0 %v11941_v9  ;;  %v8878_v9 = vpack.c.bf16 %v3796_v28, %v3792_v39  ;;  %v3839_v41 = vld [vmem:[#allocation25 + $0x2b8] sm:$0xff]  ;;  %v3832_v39 = vld [vmem:[#allocation25 + $0x280] sm:$0xff]  ;;  %v3861_v62 = vld [vmem:[#allocation25 + $0x368] sm:$0xff] }
 0x897   :  { %8871 = vmatpush1.bf16.msra.mxu1 %v8870_v12  ;;  %v8890_v12 = vpack.c.bf16 %v3820_v53, %v3816_v63  ;;  %v3836_v28 = vld [vmem:[#allocation25 + $0x2a0] sm:$0xff]  ;;  %v3847_v5 = vld [vmem:[#allocation25 + $0x2f8] sm:$0xff] }
 0x898   :  { %8927 = vmatpush1.bf16.msra.mxu0 %v8926_v15  ;;  %8873 = vmatprep.subr.bf16.mxu1 %v8872_v61  ;;  %v8946_v15 = vpack.c.bf16 %v3822_v52, %v3818_v21  ;;  %v8892_v61 = vpack.c.bf16 %v3829_v4, %v3825_v55  ;;  %v3851_v27 = vld [vmem:[#allocation25 + $0x318] sm:$0xff]  ;;  %v3856_v63 = vld [vmem:[#allocation25 + $0x340] sm:$0xff]  ;;  %v3858_v21 = vld [vmem:[#allocation25 + $0x350] sm:$0xff] }
 0x899   :  { %8929 = vmatprep.subr.bf16.mxu0 %v8928_v19  ;;  %v8948_v19 = vpack.c.bf16 %v3831_v1, %v3827_v14  ;;  %v3855_v42 = vld [vmem:[#allocation25 + $0x338] sm:$0xff]  ;;  %v3860_v53 = vld [vmem:[#allocation25 + $0x360] sm:$0xff]  ;;  %v3862_v52 = vld [vmem:[#allocation25 + $0x370] sm:$0xff] }
 0x89a   :  { %v3859_v48 = vld [vmem:[#allocation25 + $0x358] sm:$0xff]  ;;  %v4359_v55 = vld [vmem:[#allocation25 + $0x708] sm:$0xff] }
 0x89b   :  { %8875 = vmatpush1.bf16.msra.mxu1 %v8874_v37  ;;  %v8894_v37 = vpack.c.bf16 %v3828_v18, %v3824_v6  ;;  %v3863_v50 = vld [vmem:[#allocation25 + $0x378] sm:$0xff]  ;;  %v4363_v4 = vld [vmem:[#allocation25 + $0x728] sm:$0xff]  ;;  %v4358_v18 = vld [vmem:[#allocation25 + $0x700] sm:$0xff] }
 0x89c   :  { %8931 = vmatpush1.bf16.msra.mxu0 %v8930_v40  ;;  %8877 = vmatprep.subr.bf16.mxu1 %v8876_v24  ;;  %v8950_v40 = vpack.c.bf16 %v3830_v22, %v3826_v36  ;;  %v8896_v24 = vpack.c.bf16 %v3837_v38, %v3833_v33  ;;  %v4361_v14 = vld [vmem:[#allocation25 + $0x718] sm:$0xff]  ;;  %v4362_v36 = vld [vmem:[#allocation25 + $0x720] sm:$0xff]  ;;  %v4364_v22 = vld [vmem:[#allocation25 + $0x730] sm:$0xff] }
 0x89d   :  { %8933 = vmatprep.subr.bf16.mxu0 %v8932_v30  ;;  %v8952_v30 = vpack.c.bf16 %v3839_v41, %v3835_v60  ;;  %v4365_v1 = vld [vmem:[#allocation25 + $0x738] sm:$0xff]  ;;  %v4367_v33 = vld [vmem:[#allocation25 + $0x748] sm:$0xff] }
 0x89e   :  { %v9024_v6 = vpack.c.bf16 %v4365_v1, %v4361_v14  ;;  %v4371_v38 = vld [vmem:[#allocation25 + $0x768] sm:$0xff]  ;;  %v4369_v60 = vld [vmem:[#allocation25 + $0x758] sm:$0xff] }
 0x89f   :  { %8879 = vmatpush1.bf16.msra.mxu1 %v8878_v9  ;;  %v8898_v9 = vpack.c.bf16 %v3836_v28, %v3832_v39  ;;  %v4373_v41 = vld [vmem:[#allocation25 + $0x778] sm:$0xff]  ;;  %v4366_v39 = vld [vmem:[#allocation25 + $0x740] sm:$0xff] }
 0x8a0   :  { %8935 = vmatpush1.bf16.msra.mxu0 %v8934_v7  ;;  %8881 = vmatprep.subr.bf16.mxu1 %v8880_v46  ;;  %v8954_v7 = vpack.c.bf16 %v3838_v54, %v3834_v2  ;;  %v8900_v46 = vpack.c.bf16 %v3845_v17, %v3841_v49  ;;  %v4370_v28 = vld [vmem:[#allocation25 + $0x760] sm:$0xff]  ;;  %v8972_v54 = vpack.c.bf16 %v4371_v38, %v4367_v33  ;;  %v4368_v17 = vld [vmem:[#allocation25 + $0x750] sm:$0xff]  ;;  %v4393_v14 = vld [vmem:[#allocation25 + $0x818] sm:$0xff] }
 0x8a1   :  { %8937 = vmatprep.subr.bf16.mxu0 %v8936_v16  ;;  %v8956_v16 = vpack.c.bf16 %v3847_v5, %v3843_v59  ;;  %v9028_v49 = vpack.c.bf16 %v4373_v41, %v4369_v60  ;;  %v4372_v59 = vld [vmem:[#allocation25 + $0x770] sm:$0xff]  ;;  %v4375_v5 = vld [vmem:[#allocation25 + $0x788] sm:$0xff]  ;;  %v4397_v1 = vld [vmem:[#allocation25 + $0x838] sm:$0xff] }
 0x8a2   :  { %v4392_v33 = vld [vmem:[#allocation25 + $0x810] sm:$0xff]  ;;  %v4399_v60 = vld [vmem:[#allocation25 + $0x848] sm:$0xff] }
 0x8a3   :  { %8883 = vmatpush1.bf16.msra.mxu1 %v8882_v56  ;;  %v8902_v56 = vpack.c.bf16 %v3844_v26, %v3840_v44  ;;  %v4381_v44 = vld [vmem:[#allocation25 + $0x7b8] sm:$0xff]  ;;  %v8974_v26 = vpack.c.bf16 %v4370_v28, %v4366_v39  ;;  %v4396_v38 = vld [vmem:[#allocation25 + $0x830] sm:$0xff] }
 0x8a4   :  { %8939 = vmatpush1.bf16.msra.mxu0 %v8938_v13  ;;  %8885 = vmatprep.subr.bf16.mxu1 %v8884_v31  ;;  %v8958_v13 = vpack.c.bf16 %v3846_v57, %v3842_v51  ;;  %v8904_v31 = vpack.c.bf16 %v3853_v35, %v3849_v25  ;;  %v9030_v51 = vpack.c.bf16 %v4372_v59, %v4368_v17  ;;  %v4378_v57 = vld [vmem:[#allocation25 + $0x7a0] sm:$0xff]  ;;  %v4405_v39 = vld [vmem:[#allocation25 + $0x878] sm:$0xff] }
 0x8a5   :  { %8941 = vmatprep.subr.bf16.mxu0 %v8940_v11  ;;  %v8960_v11 = vpack.c.bf16 %v3855_v42, %v3851_v27 }
 0x8a7   :  { %8887 = vmatpush1.bf16.msra.mxu1 %v8886_v43  ;;  %v8906_v43 = vpack.c.bf16 %v3852_v29, %v3848_v34 }
 0x8a8   :  { %8943 = vmatpush1.bf16.msra.mxu0 %v8942_v58  ;;  %8889 = vmatprep.subr.bf16.mxu1 %v8888_v45  ;;  %v8962_v58 = vpack.c.bf16 %v3854_v10, %v3850_v20  ;;  %v8908_v45 = vpack.c.bf16 %v3861_v62, %v3857_v32  ;;  %v4387_v20 = vld [vmem:[#allocation25 + $0x7e8] sm:$0xff]  ;;  %v4389_v10 = vld [vmem:[#allocation25 + $0x7f8] sm:$0xff] }
 0x8a9   :  { %8945 = vmatprep.subr.bf16.mxu0 %v8944_v23  ;;  %v8964_v23 = vpack.c.bf16 %v3863_v50, %v3859_v48  ;;  %v4382_v48 = vld [vmem:[#allocation25 + $0x7c0] sm:$0xff] }
 0x8aa   :  { %v4386_v50 = vld [vmem:[#allocation25 + $0x7e0] sm:$0xff] }
 0x8ab   :  { %8891 = vmatpush1.bf16.msra.mxu1 %v8890_v12  ;;  %v8910_v12 = vpack.c.bf16 %v3860_v53, %v3856_v63  ;;  %v4384_v53 = vld [vmem:[#allocation25 + $0x7d0] sm:$0xff] }
 0x8ac   :  { %8947 = vmatpush1.bf16.msra.mxu0 %v8946_v15  ;;  %8893 = vmatprep.subr.bf16.mxu1 %v8892_v61  ;;  %v8966_v15 = vpack.c.bf16 %v3862_v52, %v3858_v21  ;;  %v8968_v61 = vpack.c.bf16 %v4363_v4, %v4359_v55  ;;  %v4388_v21 = vld [vmem:[#allocation25 + $0x7f0] sm:$0xff]  ;;  %v4395_v4 = vld [vmem:[#allocation25 + $0x828] sm:$0xff] }
 0x8ad   :  { %8949 = vmatprep.subr.bf16.mxu0 %v8948_v19  ;;  %v4360_v19 = vld [vmem:[#allocation25 + $0x710] sm:$0xff] }
 0x8af   :  { %8895 = vmatpush1.bf16.msra.mxu1 %v8894_v37 }
 0x8b0   :  { %8951 = vmatpush1.bf16.msra.mxu0 %v8950_v40  ;;  %8897 = vmatprep.subr.bf16.mxu1 %v8896_v24  ;;  %v8970_v40 = vpack.c.bf16 %v4362_v36, %v4358_v18  ;;  %v9026_v24 = vpack.c.bf16 %v4364_v22, %v4360_v19  ;;  %v9040_v22 = vpack.c.bf16 %v4397_v1, %v4393_v14  ;;  %v4422_v1 = vld [vmem:[#allocation25 + $0x900] sm:$0xff] }
 0x8b1   :  { %8953 = vmatprep.subr.bf16.mxu0 %v8952_v30 }
 0x8b3   :  { %8899 = vmatpush1.bf16.msra.mxu1 %v8898_v9 }
 0x8b4   :  { %8955 = vmatpush1.bf16.msra.mxu0 %v8954_v7  ;;  %8901 = vmatprep.subr.bf16.mxu1 %v8900_v46  ;;  %v4379_v7 = vld [vmem:[#allocation25 + $0x7a8] sm:$0xff]  ;;  %v4377_v46 = vld [vmem:[#allocation25 + $0x798] sm:$0xff] }
 0x8b5   :  { %8957 = vmatprep.subr.bf16.mxu0 %v8956_v16  ;;  %v4374_v16 = vld [vmem:[#allocation25 + $0x780] sm:$0xff]  ;;  %v8976_v27 = vpack.c.bf16 %v4379_v7, %v4375_v5  ;;  %v9032_v42 = vpack.c.bf16 %v4381_v44, %v4377_v46  ;;  %v4400_v5 = vld [vmem:[#allocation25 + $0x850] sm:$0xff]  ;;  %v4407_v46 = vld [vmem:[#allocation25 + $0x888] sm:$0xff] }
 0x8b6   :  { %v8978_v32 = vpack.c.bf16 %v4378_v57, %v4374_v16  ;;  %v4404_v7 = vld [vmem:[#allocation25 + $0x870] sm:$0xff]  ;;  %v4411_v44 = vld [vmem:[#allocation25 + $0x8a8] sm:$0xff] }
 0x8b7   :  { %8903 = vmatpush1.bf16.msra.mxu1 %v8902_v56  ;;  %v4376_v56 = vld [vmem:[#allocation25 + $0x790] sm:$0xff]  ;;  %v9046_v57 = vpack.c.bf16 %v4404_v7, %v4400_v5  ;;  %v4445_v5 = vld [vmem:[#allocation25 + $0x9b8] sm:$0xff] }
 0x8b8   :  { %8959 = vmatpush1.bf16.msra.mxu0 %v8958_v13  ;;  %8905 = vmatprep.subr.bf16.mxu1 %v8904_v31  ;;  %v4380_v13 = vld [vmem:[#allocation25 + $0x7b0] sm:$0xff]  ;;  %v4383_v31 = vld [vmem:[#allocation25 + $0x7c8] sm:$0xff] }
 0x8b9   :  { %8961 = vmatprep.subr.bf16.mxu0 %v8960_v11  ;;  %v4385_v11 = vld [vmem:[#allocation25 + $0x7d8] sm:$0xff]  ;;  %v9034_v62 = vpack.c.bf16 %v4380_v13, %v4376_v56  ;;  %v4408_v13 = vld [vmem:[#allocation25 + $0x890] sm:$0xff] }
 0x8ba   :  { %v9036_v63 = vpack.c.bf16 %v4389_v10, %v4385_v11  ;;  %v4417_v11 = vld [vmem:[#allocation25 + $0x8d8] sm:$0xff] }
 0x8bb   :  { %8907 = vmatpush1.bf16.msra.mxu1 %v8906_v43  ;;  %v4421_v10 = vld [vmem:[#allocation25 + $0x8f8] sm:$0xff] }
 0x8bc   :  { %8963 = vmatpush1.bf16.msra.mxu0 %v8962_v58  ;;  %8909 = vmatprep.subr.bf16.mxu1 %v8908_v45  ;;  %v8980_v45 = vpack.c.bf16 %v4387_v20, %v4383_v31  ;;  %v4412_v31 = vld [vmem:[#allocation25 + $0x8b0] sm:$0xff]  ;;  %v4419_v20 = vld [vmem:[#allocation25 + $0x8e8] sm:$0xff] }
 0x8bd   :  { %8965 = vmatprep.subr.bf16.mxu0 %v8964_v23  ;;  %v4391_v23 = vld [vmem:[#allocation25 + $0x808] sm:$0xff] }
 0x8be   :  { %v8984_v19 = vpack.c.bf16 %v4395_v4, %v4391_v23  ;;  %v4425_v23 = vld [vmem:[#allocation25 + $0x918] sm:$0xff] }
 0x8bf   :  { %8911 = vmatpush1.bf16.msra.mxu1 %v8910_v12  ;;  %v8982_v12 = vpack.c.bf16 %v4386_v50, %v4382_v48  ;;  %v4418_v48 = vld [vmem:[#allocation25 + $0x8e0] sm:$0xff] }
 0x8c0   :  { %8967 = vmatpush1.bf16.msra.mxu0 %v8966_v15  ;;  %8969 = vmatprep.subr.bf16.mxu1 %v8968_v61  ;;  %v9038_v15 = vpack.c.bf16 %v4388_v21, %v4384_v53  ;;  %v4390_v61 = vld [vmem:[#allocation25 + $0x800] sm:$0xff]  ;;  %v4423_v53 = vld [vmem:[#allocation25 + $0x908] sm:$0xff] }
 0x8c1   :  { %9025 = vmatprep.subr.bf16.mxu0 %v9024_v6  ;;  %v4394_v6 = vld [vmem:[#allocation25 + $0x820] sm:$0xff]  ;;  %v4427_v21 = vld [vmem:[#allocation25 + $0x928] sm:$0xff] }
 0x8c2   :  { %v8986_v28 = vpack.c.bf16 %v4394_v6, %v4390_v61  ;;  %v4424_v6 = vld [vmem:[#allocation25 + $0x910] sm:$0xff] }
 0x924   :  { %v3624_v37 = vpop.f32.mrb[42].mxu1  ;;  %v11995_v2 = vpop.f32.mrb[78].mxu0 }
 0x925   :  { %v3626_v30 = vpop.f32.mrb[43].mxu1  ;;  %v11997_v9 = vpop.f32.mrb[79].mxu0 }
 0x926   :  { %7796 = vmatprep.mubr.msk.f32.mxu1 %vm3977_vm8, %v3626_v30  ;;  %7800 = vmatprep.mubr.msk.f32.mxu0 %vm3977_vm8, %v3626_v30  ;;  %v9042_v30 = vpack.c.bf16 %v4396_v38, %v4392_v33  ;;  %v4433_v33 = vld [vmem:[#allocation25 + $0x958] sm:$0xff] }
 0x927   :  { %4244 = vmatmul.mubr.f32.vlgmr.msra.gmra.mrb[50].mxu1 %v3624_v37  ;;  %4333 = vmatmul.mubr.f32.vlgmr.msra.gmra.mrb[86].mxu0 %v3624_v37  ;;  %v4437_v38 = vld [vmem:[#allocation25 + $0x978] sm:$0xff] }
 0x928   :  { %8971 = vmatpush1.bf16.msra.mxu1 %v8970_v40  ;;  %9027 = vmatpush1.bf16.msra.mxu0 %v9026_v24  ;;  %v3630_v25 = vpop.f32.mrb[44].mxu1  ;;  %v12001_v35 = vpop.f32.mrb[80].mxu0  ;;  %v4403_v40 = vld [vmem:[#allocation25 + $0x868] sm:$0xff]  ;;  %v4401_v24 = vld [vmem:[#allocation25 + $0x858] sm:$0xff] }
 0x929   :  { %8973 = vmatprep.subr.bf16.mxu1 %v8972_v54  ;;  %9029 = vmatprep.subr.bf16.mxu0 %v9028_v49  ;;  %v3632_v34 = vpop.f32.mrb[45].mxu1  ;;  %v12003_v29 = vpop.f32.mrb[81].mxu0  ;;  %v4398_v54 = vld [vmem:[#allocation25 + $0x840] sm:$0xff]  ;;  %v8988_v17 = vpack.c.bf16 %v4403_v40, %v4399_v60  ;;  %v9044_v59 = vpack.c.bf16 %v4405_v39, %v4401_v24 }
 0x92a   :  { %7797 = vmatprep.mubr.msk.f32.mxu1 %vm3977_vm8, %v3632_v34  ;;  %7801 = vmatprep.mubr.msk.f32.mxu0 %vm3977_vm8, %v3632_v34  ;;  %v4402_v49 = vld [vmem:[#allocation25 + $0x860] sm:$0xff]  ;;  %v4415_v34 = vld [vmem:[#allocation25 + $0x8c8] sm:$0xff] }
 0x92b   :  { %4250 = vmatmul.mubr.f32.gmra.mrb[52].mxu1 %v3630_v25  ;;  %4339 = vmatmul.mubr.f32.gmra.mrb[88].mxu0 %v3630_v25  ;;  %v8990_v16 = vpack.c.bf16 %v4402_v49, %v4398_v54  ;;  %v4406_v25 = vld [vmem:[#allocation25 + $0x880] sm:$0xff]  ;;  %v8996_v50 = vpack.c.bf16 %v4419_v20, %v4415_v34  ;;  %v4436_v54 = vld [vmem:[#allocation25 + $0x970] sm:$0xff]  ;;  %v4439_v49 = vld [vmem:[#allocation25 + $0x988] sm:$0xff] }
 0x92c   :  { %8975 = vmatpush1.bf16.msra.mxu1 %v8974_v26  ;;  %9031 = vmatpush1.bf16.msra.mxu0 %v9030_v51  ;;  %v3636_v43 = vpop.f32.mrb[46].mxu1  ;;  %v12007_v58 = vpop.f32.mrb[82].mxu0  ;;  %v4409_v26 = vld [vmem:[#allocation25 + $0x898] sm:$0xff]  ;;  %v4430_v40 = vld [vmem:[#allocation25 + $0x940] sm:$0xff] }
 0x92d   :  { %8977 = vmatprep.subr.bf16.mxu1 %v8976_v27  ;;  %9033 = vmatprep.subr.bf16.mxu0 %v9032_v42  ;;  %v3638_v52 = vpop.f32.mrb[47].mxu1  ;;  %v12009_v55 = vpop.f32.mrb[83].mxu0  ;;  %v4413_v51 = vld [vmem:[#allocation25 + $0x8b8] sm:$0xff]  ;;  %v4410_v27 = vld [vmem:[#allocation25 + $0x8a0] sm:$0xff]  ;;  %v8992_v42 = vpack.c.bf16 %v4411_v44, %v4407_v46 }
 0x92e   :  { %7798 = vmatprep.mubr.msk.f32.mxu1 %vm3977_vm8, %v3638_v52  ;;  %7802 = vmatprep.mubr.msk.f32.mxu0 %vm3977_vm8, %v3638_v52  ;;  %v9048_v56 = vpack.c.bf16 %v4413_v51, %v4409_v26  ;;  %v4429_v52 = vld [vmem:[#allocation25 + $0x938] sm:$0xff]  ;;  %v4434_v24 = vld [vmem:[#allocation25 + $0x960] sm:$0xff] }
 0x92f   :  { %4256 = vmatmul.mubr.f32.gmra.mrb[54].mxu1 %v3636_v43  ;;  %4345 = vmatmul.mubr.f32.gmra.mrb[90].mxu0 %v3636_v43  ;;  %v9052_v43 = vpack.c.bf16 %v4421_v10, %v4417_v11  ;;  %v9056_v61 = vpack.c.bf16 %v4429_v52, %v4425_v23  ;;  %v9006_v7 = vpack.c.bf16 %v4434_v24, %v4430_v40  ;;  %v4438_v44 = vld [vmem:[#allocation25 + $0x980] sm:$0xff]  ;;  %v4468_v40 = vld [vmem:[#allocation25 + $0xa70] sm:$0xff] }
 0x930   :  { %8979 = vmatpush1.bf16.msra.mxu1 %v8978_v32  ;;  %9035 = vmatpush1.bf16.msra.mxu0 %v9034_v62  ;;  %v3642_v18 = vpop.f32.mrb[48].mxu1  ;;  %v12013_v36 = vpop.f32.mrb[84].mxu0  ;;  %v8994_v32 = vpack.c.bf16 %v4410_v27, %v4406_v25  ;;  %v4414_v62 = vld [vmem:[#allocation25 + $0x8c0] sm:$0xff]  ;;  %v4444_v25 = vld [vmem:[#allocation25 + $0x9b0] sm:$0xff]  ;;  %v4447_v27 = vld [vmem:[#allocation25 + $0x9c8] sm:$0xff] }
 0x931   :  { %8981 = vmatprep.subr.bf16.mxu1 %v8980_v45  ;;  %9037 = vmatprep.subr.bf16.mxu0 %v9036_v63  ;;  %v3644_v41 = vpop.f32.mrb[49].mxu1  ;;  %v12015_v37 = vpop.f32.mrb[85].mxu0  ;;  %v4416_v45 = vld [vmem:[#allocation25 + $0x8d0] sm:$0xff]  ;;  %v8998_v4 = vpack.c.bf16 %v4418_v48, %v4414_v62  ;;  %v4442_v26 = vld [vmem:[#allocation25 + $0x9a0] sm:$0xff]  ;;  %v4455_v48 = vld [vmem:[#allocation25 + $0xa08] sm:$0xff] }
 0x932   :  { %7799 = vmatprep.mubr.msk.f32.mxu1 %vm3977_vm8, %v3644_v41  ;;  %7803 = vmatprep.mubr.msk.f32.mxu0 %vm3977_vm8, %v3644_v41  ;;  %v4420_v63 = vld [vmem:[#allocation25 + $0x8f0] sm:$0xff]  ;;  %v4446_v20 = vld [vmem:[#allocation25 + $0x9c0] sm:$0xff] }
 0x933   :  { %4262 = vmatmul.mubr.f32.gmra.mrb[56].mxu1 %v3642_v18  ;;  %4351 = vmatmul.mubr.f32.gmra.mrb[92].mxu0 %v3642_v18  ;;  %v9054_v14 = vpack.c.bf16 %v4420_v63, %v4416_v45  ;;  %v4428_v18 = vld [vmem:[#allocation25 + $0x930] sm:$0xff]  ;;  %v4450_v11 = vld [vmem:[#allocation25 + $0x9e0] sm:$0xff]  ;;  %v4461_v45 = vld [vmem:[#allocation25 + $0xa38] sm:$0xff] }
 0x934   :  { %8983 = vmatpush1.bf16.msra.mxu1 %v8982_v12  ;;  %9039 = vmatpush1.bf16.msra.mxu0 %v9038_v15  ;;  %v4426_v12 = vld [vmem:[#allocation25 + $0x920] sm:$0xff]  ;;  %v9000_v15 = vpack.c.bf16 %v4427_v21, %v4423_v53  ;;  %v9058_v41 = vpack.c.bf16 %v4428_v18, %v4424_v6  ;;  %v4452_v62 = vld [vmem:[#allocation25 + $0x9f0] sm:$0xff]  ;;  %v9014_v63 = vpack.c.bf16 %v4450_v11, %v4446_v20  ;;  %v4469_v6 = vld [vmem:[#allocation25 + $0xa78] sm:$0xff] }
 0x935   :  { %8985 = vmatprep.subr.bf16.mxu1 %v8984_v19  ;;  %9041 = vmatprep.subr.bf16.mxu0 %v9040_v22  ;;  %v4431_v19 = vld [vmem:[#allocation25 + $0x948] sm:$0xff]  ;;  %v9002_v60 = vpack.c.bf16 %v4426_v12, %v4422_v1  ;;  %v4454_v21 = vld [vmem:[#allocation25 + $0xa00] sm:$0xff]  ;;  %v4460_v1 = vld [vmem:[#allocation25 + $0xa30] sm:$0xff] }
 0x936   :  { %7804 = vmatprep.mubr.msk.f32.mxu1 %vm3977_vm8, %v11997_v9  ;;  %7808 = vmatprep.mubr.msk.f32.mxu0 %vm3977_vm8, %v11997_v9  ;;  %v9050_v9 = vpack.c.bf16 %v4412_v31, %v4408_v13  ;;  %v4435_v22 = vld [vmem:[#allocation25 + $0x968] sm:$0xff]  ;;  %v4453_v13 = vld [vmem:[#allocation25 + $0x9f8] sm:$0xff]  ;;  %v9010_v31 = vpack.c.bf16 %v4442_v26, %v4438_v44  ;;  %v4458_v23 = vld [vmem:[#allocation25 + $0xa20] sm:$0xff] }
 0x937   :  { %v9004_v39 = vpack.c.bf16 %v4435_v22, %v4431_v19  ;;  %v4463_v12 = vld [vmem:[#allocation25 + $0xa48] sm:$0xff]  ;;  %v9018_v18 = vpack.c.bf16 %v4458_v23, %v4454_v21  ;;  %v4462_v22 = vld [vmem:[#allocation25 + $0xa40] sm:$0xff]  ;;  %v4730_v24 = vld [vmem:[%s12671_s6 + $0x80] sm:$0xff] }
 0x938   :  { %8987 = vmatpush1.bf16.msra.mxu1 %v8986_v28  ;;  %9043 = vmatpush1.bf16.msra.mxu0 %v9042_v30  ;;  %v9060_v28 = vpack.c.bf16 %v4437_v38, %v4433_v33  ;;  %v4432_v30 = vld [vmem:[#allocation25 + $0x950] sm:$0xff]  ;;  %v4751_v26 = vld [vmem:[%s12671_s6 + $0x128] sm:$0xff]  ;;  %v4757_v20 = vld [vmem:[%s12671_s6 + $0x158] sm:$0xff] }
 0x939   :  { %8989 = vmatprep.subr.bf16.mxu1 %v8988_v17  ;;  %9045 = vmatprep.subr.bf16.mxu0 %v9044_v59  ;;  %v4443_v17 = vld [vmem:[#allocation25 + $0x9a8] sm:$0xff]  ;;  %v4441_v59 = vld [vmem:[#allocation25 + $0x998] sm:$0xff]  ;;  %v9062_v46 = vpack.c.bf16 %v4436_v54, %v4432_v30  ;;  %v4750_v44 = vld [vmem:[%s12671_s6 + $0x120] sm:$0xff] }
 0x93a   :  { %v9008_v51 = vpack.c.bf16 %v4443_v17, %v4439_v49  ;;  %v4746_v49 = vld [vmem:[%s12671_s6 + $0x100] sm:$0xff]  ;;  %v4747_v17 = vld [vmem:[%s12671_s6 + $0x108] sm:$0xff]  ;;  %v4737_v21 = vld [vmem:[%s12671_s6 + $0xb8] sm:$0xff] }
 0x93c   :  { %8991 = vmatpush1.bf16.msra.mxu1 %v8990_v16  ;;  %9047 = vmatpush1.bf16.msra.mxu0 %v9046_v57  ;;  %v9064_v16 = vpack.c.bf16 %v4445_v5, %v4441_v59  ;;  %v4440_v57 = vld [vmem:[#allocation25 + $0x990] sm:$0xff]  ;;  %v12030_v59 = vpack.c.bf16 %v4747_v17, %v4746_v49  ;;  %v4748_v5 = vld [vmem:[%s12671_s6 + $0x110] sm:$0xff] }
 0x93d   :  { %8993 = vmatprep.subr.bf16.mxu1 %v8992_v42  ;;  %9049 = vmatprep.subr.bf16.mxu0 %v9048_v56  ;;  %v4451_v42 = vld [vmem:[#allocation25 + $0x9e8] sm:$0xff]  ;;  %v4449_v56 = vld [vmem:[#allocation25 + $0x9d8] sm:$0xff]  ;;  %v9066_v34 = vpack.c.bf16 %v4444_v25, %v4440_v57  ;;  %v4764_v49 = vld [vmem:[%s12671_s6 + $0x190] sm:$0xff] }
 0x93e   :  { %v9012_v10 = vpack.c.bf16 %v4451_v42, %v4447_v27  ;;  %v4755_v57 = vld [vmem:[%s12671_s6 + $0x148] sm:$0xff]  ;;  %v4733_v27 = vld [vmem:[%s12671_s6 + $0x98] sm:$0xff] }
 0x940   :  { %8995 = vmatpush1.bf16.msra.mxu1 %v8994_v32  ;;  %9051 = vmatpush1.bf16.msra.mxu0 %v9050_v9  ;;  %v9068_v32 = vpack.c.bf16 %v4453_v13, %v4449_v56  ;;  %v4448_v9 = vld [vmem:[#allocation25 + $0x9d0] sm:$0xff]  ;;  %v4716_v56 = vld [vmem:[%s12671_s6 + $0x10] sm:$0xff]  ;;  %v4717_v13 = vld [vmem:[%s12671_s6 + $0x18] sm:$0xff] }
 0x941   :  { %8997 = vmatprep.subr.bf16.mxu1 %v8996_v50  ;;  %9053 = vmatprep.subr.bf16.mxu0 %v9052_v43  ;;  %v4459_v50 = vld [vmem:[#allocation25 + $0xa28] sm:$0xff]  ;;  %v4457_v43 = vld [vmem:[#allocation25 + $0xa18] sm:$0xff]  ;;  %v9070_v53 = vpack.c.bf16 %v4452_v62, %v4448_v9  ;;  %v4718_v62 = vld [vmem:[%s12671_s6 + $0x20] sm:$0xff] }
 0x942   :  { %v9016_v52 = vpack.c.bf16 %v4459_v50, %v4455_v48  ;;  %v4719_v48 = vld [vmem:[%s12671_s6 + $0x28] sm:$0xff]  ;;  %v4758_v50 = vld [vmem:[%s12671_s6 + $0x160] sm:$0xff] }
 0x944   :  { %8999 = vmatpush1.bf16.msra.mxu1 %v8998_v4  ;;  %9055 = vmatpush1.bf16.msra.mxu0 %v9054_v14  ;;  %v9072_v4 = vpack.c.bf16 %v4461_v45, %v4457_v43  ;;  %v4456_v14 = vld [vmem:[#allocation25 + $0xa10] sm:$0xff]  ;;  %v12108_v43 = vpack.c.bf16 %v4719_v48, %v4718_v62  ;;  %v4759_v45 = vld [vmem:[%s12671_s6 + $0x168] sm:$0xff] }
 0x945   :  { %9001 = vmatprep.subr.bf16.mxu1 %v9000_v15  ;;  %9057 = vmatprep.subr.bf16.mxu0 %v9056_v61  ;;  %v4467_v15 = vld [vmem:[#allocation25 + $0xa68] sm:$0xff]  ;;  %v4465_v61 = vld [vmem:[#allocation25 + $0xa58] sm:$0xff]  ;;  %v9074_v19 = vpack.c.bf16 %v4460_v1, %v4456_v14  ;;  %v4760_v14 = vld [vmem:[%s12671_s6 + $0x170] sm:$0xff] }
 0x946   :  { %v9020_v33 = vpack.c.bf16 %v4467_v15, %v4463_v12  ;;  %v9076_v38 = vpack.c.bf16 %v4469_v6, %v4465_v61  ;;  %v4761_v12 = vld [vmem:[%s12671_s6 + $0x178] sm:$0xff]  ;;  %v4738_v61 = vld [vmem:[%s12671_s6 + $0xc0] sm:$0xff]  ;;  %v4739_v6 = vld [vmem:[%s12671_s6 + $0xc8] sm:$0xff] }
 0x947   :  { %v12127_v15 = vpack.c.bf16 %v4761_v12, %v4760_v14 }
 0x948   :  { %9003 = vmatpush1.bf16.msra.mxu1 %v9002_v60  ;;  %9059 = vmatpush1.bf16.msra.mxu0 %v9058_v41  ;;  %v4466_v60 = vld [vmem:[#allocation25 + $0xa60] sm:$0xff]  ;;  %v4464_v41 = vld [vmem:[#allocation25 + $0xa50] sm:$0xff] }
 0x949   :  { %9005 = vmatprep.subr.bf16.mxu1 %v9004_v39  ;;  %9061 = vmatprep.subr.bf16.mxu0 %v9060_v28  ;;  %v4731_v39 = vld [vmem:[%s12671_s6 + $0x88] sm:$0xff]  ;;  %v9022_v28 = vpack.c.bf16 %v4466_v60, %v4462_v22  ;;  %v9078_v30 = vpack.c.bf16 %v4468_v40, %v4464_v41  ;;  %v4740_v40 = vld [vmem:[%s12671_s6 + $0xd0] sm:$0xff] }
 0x94a   :  { %v12025_v54 = vpack.c.bf16 %v4731_v39, %v4730_v24  ;;  %v4723_v22 = vld [vmem:[%s12671_s6 + $0x48] sm:$0xff]  ;;  %v4741_v24 = vld [vmem:[%s12671_s6 + $0xd8] sm:$0xff] }
 0x94b   :  { %v4763_v60 = vld [vmem:[%s12671_s6 + $0x188] sm:$0xff]  ;;  %v12149_v39 = vpack.c.bf16 %v4741_v24, %v4740_v40 }
 0x94c   :  { %9007 = vmatpush1.bf16.msra.mxu1 %v9006_v7  ;;  %9063 = vmatpush1.bf16.msra.mxu0 %v9062_v46  ;;  %v4749_v7 = vld [vmem:[%s12671_s6 + $0x118] sm:$0xff] }
 0x94d   :  { %9009 = vmatprep.subr.bf16.mxu1 %v9008_v51  ;;  %9065 = vmatprep.subr.bf16.mxu0 %v9064_v16  ;;  %v12042_v46 = vpack.c.bf16 %v4749_v7, %v4748_v5  ;;  %v4753_v51 = vld [vmem:[%s12671_s6 + $0x138] sm:$0xff] }
 0x94e   :  { %v4765_v5 = vld [vmem:[%s12671_s6 + $0x198] sm:$0xff] }
 0x94f   :  { %v12159_v7 = vpack.c.bf16 %v4765_v5, %v4764_v49 }
 0x950   :  { %9011 = vmatpush1.bf16.msra.mxu1 %v9010_v31  ;;  %9067 = vmatpush1.bf16.msra.mxu0 %v9066_v34  ;;  %v4756_v31 = vld [vmem:[%s12671_s6 + $0x150] sm:$0xff]  ;;  %v12092_v34 = vpack.c.bf16 %v4717_v13, %v4716_v56  ;;  %v4745_v56 = vld [vmem:[%s12671_s6 + $0xf8] sm:$0xff] }
 0x951   :  { %9013 = vmatprep.subr.bf16.mxu1 %v9012_v10  ;;  %9069 = vmatprep.subr.bf16.mxu0 %v9068_v32  ;;  %v12095_v11 = vpack.c.bf16 %v4757_v20, %v4756_v31  ;;  %v4734_v10 = vld [vmem:[%s12671_s6 + $0xa0] sm:$0xff]  ;;  %v4735_v32 = vld [vmem:[%s12671_s6 + $0xa8] sm:$0xff]  ;;  %12672 = vst [vmem:[#allocation77_spill] sm:$0xff] %v12159_v7  ;;  %v4728_v13 = vld [vmem:[%s12671_s6 + $0x70] sm:$0xff] }
 0x952   :  { %v12100_v9 = vpack.c.bf16 %v4735_v32, %v4734_v10  ;;  %v4729_v20 = vld [vmem:[%s12671_s6 + $0x78] sm:$0xff]  ;;  %v4768_v10 = vld [vmem:[%s12671_s6 + $0x1b0] sm:$0xff] }
 0x953   :  { %v4769_v32 = vld [vmem:[%s12671_s6 + $0x1b8] sm:$0xff]  ;;  %v12186_v62 = vpack.c.bf16 %v4729_v20, %v4728_v13 }
 0x954   :  { %9015 = vmatpush1.bf16.msra.mxu1 %v9014_v63  ;;  %9071 = vmatpush1.bf16.msra.mxu0 %v9070_v53  ;;  %v12111_v63 = vpack.c.bf16 %v4759_v45, %v4758_v50  ;;  %v4736_v53 = vld [vmem:[%s12671_s6 + $0xb0] sm:$0xff]  ;;  %v12190_v48 = vpack.c.bf16 %v4769_v32, %v4768_v10 }
 0x955   :  { %9017 = vmatprep.subr.bf16.mxu1 %v9016_v52  ;;  %9073 = vmatprep.subr.bf16.mxu0 %v9072_v4  ;;  %v12117_v23 = vpack.c.bf16 %v4737_v21, %v4736_v53  ;;  %v4720_v52 = vld [vmem:[%s12671_s6 + $0x30] sm:$0xff]  ;;  %v4721_v4 = vld [vmem:[%s12671_s6 + $0x38] sm:$0xff] }
 0x956   :  { %v12123_v1 = vpack.c.bf16 %v4721_v4, %v4720_v52  ;;  %12674 = vst [vmem:[#allocation78_spill] sm:$0xff] %v12190_v48  ;;  %v4676_v50 = vld [vmem:[#allocation26] sm:$0xf] }
 0x957   :  { %v12675_v21 = vld [vmem:[#allocation84_spill] sm:$0xff] }
 0x958   :  { %9019 = vmatpush1.bf16.msra.mxu1 %v9018_v18  ;;  %9075 = vmatpush1.bf16.msra.mxu0 %v9074_v19  ;;  %v12133_v18 = vpack.c.bf16 %v4739_v6, %v4738_v61  ;;  %v4722_v19 = vld [vmem:[%s12671_s6 + $0x40] sm:$0xff]  ;;  %v12676_v52 = vsub.s32 3, %v12675_v21  ;;  %v12677_v61 = vsub.s32 1, %v12675_v21 }
 0x959   :  { %9021 = vmatprep.subr.bf16.mxu1 %v9020_v33  ;;  %9077 = vmatprep.subr.bf16.mxu0 %v9076_v38  ;;  %v4762_v33 = vld [vmem:[%s12671_s6 + $0x180] sm:$0xff]  ;;  %v12139_v38 = vpack.c.bf16 %v4723_v22, %v4722_v19 }
 0x95a   :  { %v12143_v41 = vpack.c.bf16 %v4763_v60, %v4762_v33  ;;  %v12199_v4 = vrot.slane %v4676_v50, %v12676_v52  ;;  %v4685_v6 = vrot.slane %v4676_v50, %v12677_v61 }
 0x95c   :  { %9023 = vmatpush1.bf16.msra.mxu1 %v9022_v28  ;;  %9079 = vmatpush1.bf16.msra.mxu0 %v9078_v30  ;;  %v4724_v28 = vld [vmem:[%s12671_s6 + $0x50] sm:$0xff]  ;;  %v4725_v30 = vld [vmem:[%s12671_s6 + $0x58] sm:$0xff] }
 0x95d   :  { %9112 = vmatprep.subr.bf16.mxu0 %v12647_v47  ;;  %9081 = vmatprep.subr.bf16.mxu1 %v12025_v54  ;;  %v12155_v17 = vpack.c.bf16 %v4725_v30, %v4724_v28  ;;  %v12680_v28 = vsub.s32 2, %v12675_v21 }
 0x95f   :  { %4547 = vmatmul.mubr.f32.vlgmr.msra.gmra.mrb[50].mxu1 %v11995_v2  ;;  %4636 = vmatmul.mubr.f32.vlgmr.msra.gmra.mrb[86].mxu0 %v11995_v2  ;;  %v12054_v2 = vpack.c.bf16 %v4751_v26, %v4750_v44  ;;  %v4742_v44 = vld [vmem:[%s12671_s6 + $0xe0] sm:$0xff]  ;;  %v4743_v26 = vld [vmem:[%s12671_s6 + $0xe8] sm:$0xff]  ;;  %v4689_v30 = vrot.slane %v4676_v50, %v12680_v28 }
 0x960   :  { %7805 = vmatprep.mubr.msk.f32.mxu1 %vm3977_vm8, %v12003_v29  ;;  %7809 = vmatprep.mubr.msk.f32.mxu0 %vm3977_vm8, %v12003_v29  ;;  %v4752_v29 = vld [vmem:[%s12671_s6 + $0x130] sm:$0xff] }
 0x961   :  { %9114 = vmatpush1.bf16.msra.mxu0 %v12030_v59 }
 0x962   :  { %9115 = vmatprep.subr.bf16.mxu0 %v12647_v47 }
 0x963   :  { %4553 = vmatmul.mubr.f32.gmra.mrb[52].mxu1 %v12001_v35  ;;  %4642 = vmatmul.mubr.f32.gmra.mrb[88].mxu0 %v12001_v35  ;;  %v12066_v35 = vpack.c.bf16 %v4753_v51, %v4752_v29  ;;  %v4726_v29 = vld [vmem:[%s12671_s6 + $0x60] sm:$0xff]  ;;  %v12166_v51 = vpack.c.bf16 %v4743_v26, %v4742_v44 }
 0x964   :  { %7806 = vmatprep.mubr.msk.f32.mxu1 %vm3977_vm8, %v12009_v55  ;;  %7810 = vmatprep.mubr.msk.f32.mxu0 %vm3977_vm8, %v12009_v55  ;;  %v4715_v55 = vld [vmem:[%s12671_s6 + $0x8] sm:$0xff] }
 0x965   :  { %9117 = vmatpush1.bf16.msra.mxu0 %v12042_v46 }
 0x966   :  { %9118 = vmatprep.subr.bf16.mxu0 %v12647_v47 }
 0x967   :  { %4559 = vmatmul.mubr.f32.gmra.mrb[54].mxu1 %v12007_v58  ;;  %4648 = vmatmul.mubr.f32.gmra.mrb[90].mxu0 %v12007_v58  ;;  %v4714_v58 = vld [vmem:[%s12671_s6] sm:$0xff] }
 0x968   :  { %7807 = vmatprep.mubr.msk.f32.mxu1 %vm3977_vm8, %v12015_v37  ;;  %7811 = vmatprep.mubr.msk.f32.mxu0 %vm3977_vm8, %v12015_v37  ;;  %v4754_v37 = vld [vmem:[%s12671_s6 + $0x140] sm:$0xff]  ;;  %v12076_v16 = vpack.c.bf16 %v4715_v55, %v4714_v58  ;;  %v4727_v58 = vld [vmem:[%s12671_s6 + $0x68] sm:$0xff] }
 0x969   :  { %9120 = vmatpush1.bf16.msra.mxu0 %v12054_v2  ;;  %v12079_v25 = vpack.c.bf16 %v4755_v57, %v4754_v37  ;;  %v4766_v55 = vld [vmem:[%s12671_s6 + $0x1a0] sm:$0xff]  ;;  %v4767_v37 = vld [vmem:[%s12671_s6 + $0x1a8] sm:$0xff]  ;;  %v12172_v57 = vpack.c.bf16 %v4727_v58, %v4726_v29 }
 0x96a   :  { %9121 = vmatprep.subr.bf16.mxu0 %v12647_v47  ;;  %9083 = vmatpush3.bf16.msra.mxu1 %v12076_v16 }
 0x96b   :  { %4565 = vmatmul.mubr.f32.gmra.mrb[56].mxu1 %v12013_v36  ;;  %4654 = vmatmul.mubr.f32.gmra.mrb[92].mxu0 %v12013_v36  ;;  %v4732_v36 = vld [vmem:[%s12671_s6 + $0x90] sm:$0xff] }
 0x96c   :  { %v12085_v42 = vpack.c.bf16 %v4733_v27, %v4732_v36  ;;  %v12174_v36 = vpack.c.bf16 %v4767_v37, %v4766_v55  ;;  %v4744_v27 = vld [vmem:[%s12671_s6 + $0xf0] sm:$0xff] }
 0x96d   :  { %9123 = vmatpush1.bf16.msra.mxu0 %v12066_v35  ;;  %v12180_v31 = vpack.c.bf16 %v4745_v56, %v4744_v27 }
 0x96e   :  { %9124 = vmatprep.subr.bf16.mxu0 %v12647_v47  ;;  %9085 = vmatprep.subr.bf16.mxu1 %v12085_v42  ;;  %12673 = vst [vmem:[#allocation82_spill] sm:$0xff] %v12174_v36 }
 0x96f   :  { %9087 = vmatpush3.bf16.msra.mxu1 %v12092_v34 }
 0x970   :  { %9089 = vmatprep.subr.bf16.mxu1 %v12100_v9 }
 0x971   :  { %9126 = vmatpush1.bf16.msra.mxu0 %v12079_v25 }
 0x972   :  { %9127 = vmatprep.subr.bf16.mxu0 %v12647_v47 }
 0x973   :  { %9091 = vmatpush3.bf16.msra.mxu1 %v12108_v43 }
 0x974   :  { %9093 = vmatprep.subr.bf16.mxu1 %v12117_v23 }
 0x975   :  { %9129 = vmatpush1.bf16.msra.mxu0 %v12095_v11 }
 0x976   :  { %9130 = vmatprep.subr.bf16.mxu0 %v12647_v47 }
 0x977   :  { %9095 = vmatpush3.bf16.msra.mxu1 %v12123_v1 }
 0x978   :  { %9097 = vmatprep.subr.bf16.mxu1 %v12133_v18 }
 0x979   :  { %9132 = vmatpush1.bf16.msra.mxu0 %v12111_v63 }
 0x97a   :  { %9133 = vmatprep.subr.bf16.mxu0 %v12647_v47 }
 0x97b   :  { %9099 = vmatpush3.bf16.msra.mxu1 %v12139_v38 }
 0x97c   :  { %9101 = vmatprep.subr.bf16.mxu1 %v12149_v39 }
 0x97d   :  { %9135 = vmatpush1.bf16.msra.mxu0 %v12127_v15 }
 0x97e   :  { %9136 = vmatprep.subr.bf16.mxu0 %v12647_v47 }
 0x97f   :  { %9103 = vmatpush3.bf16.msra.mxu1 %v12155_v17 }
 0x980   :  { %9105 = vmatprep.subr.bf16.mxu1 %v12166_v51 }
 0x981   :  { %9138 = vmatpush1.bf16.msra.mxu0 %v12143_v41 }
 0x982   :  { %9139 = vmatprep.subr.bf16.mxu0 %v12647_v47 }
 0x983   :  { %9107 = vmatpush3.bf16.msra.mxu1 %v12172_v57 }
 0x984   :  { %9109 = vmatprep.subr.bf16.mxu1 %v12180_v31 }
 0x985   :  { %9141 = vmatpush1.bf16.msra.mxu0 %v12159_v7 }
 0x986   :  { %9142 = vmatprep.subr.bf16.mxu0 %v12647_v47 }
 0x987   :  { %9111 = vmatpush3.bf16.msra.mxu1 %v12186_v62 }
 0x988   :  { %9149 = vmatprep.subr.bf16.mxu1 %v12025_v54  ;;  %v4681_v54 = vrot.slane %v4676_v50, %v12656_v3 }
 0x989   :  { %9144 = vmatpush1.bf16.msra.mxu0 %v12174_v36 }
 0x98a   :  { %9145 = vmatprep.subr.bf16.mxu0 %v12647_v47 }
 0x98d   :  { %9147 = vmatpush1.bf16.msra.mxu0 %v12190_v48 }
 0x98e   :  { %9180 = vmatprep.subr.bf16.mxu0 %v12647_v47 }
 0xa32   :  { %v4548_v45 = vpop.f32.mrb[50].mxu1  ;;  %v4637_v53 = vpop.f32.mrb[86].mxu0 }
 0xa33   :  { %v4550_v14 = vpop.f32.mrb[51].mxu1  ;;  %v4639_v12 = vpop.f32.mrb[87].mxu0  ;;  %v12220_v55 = vadd.f32 %v4681_v54, %v4548_v45  ;;  %v12232_v50 = vadd.f32 %v4689_v30, %v4637_v53 }
 0xa34   :  { %v12204_v19 = vadd.f32 %v12199_v4, %v4639_v12  ;;  %v12212_v49 = vadd.f32 %v4685_v6, %v4550_v14 }
 0xa36   :  { %12678 = vst [vmem:[#allocation79_spill] sm:$0xff] %v12204_v19  ;;  %v4554_v22 = vpop.f32.mrb[52].mxu1  ;;  %v4643_v33 = vpop.f32.mrb[88].mxu0  ;;  %12681 = vst [vmem:[#allocation81_spill] sm:$0xff] %v12212_v49  ;;  %v4979_v5 = vmul.f32 %v12204_v19, %v12204_v19  ;;  %v4977_v45 = vmul.f32 %v12212_v49, %v12212_v49  ;;  %v4818_v14 = vsel %vm1727_vm6, %v12204_v19, 0.0 }
 0xa37   :  { %v4556_v60 = vpop.f32.mrb[53].mxu1  ;;  %v4645_v40 = vpop.f32.mrb[89].mxu0  ;;  %v12216_v44 = vadd.f32 %v4681_v54, %v4554_v22  ;;  %v12222_v37 = vadd.f32 %v4689_v30, %v4643_v33 }
 0xa38   :  { %v12208_v24 = vadd.f32 %v12199_v4, %v4645_v40  ;;  %v12218_v26 = vadd.f32 %v4685_v6, %v4556_v60  ;;  %v5022_v12 = vsel %vm1727_vm6, %v4979_v5, 0.0 }
 0xa39   :  { %v4788_v61 = vadd.f32 %v12216_v44, %v12220_v55  ;;  %v4808_v60 = vadd.f32 %v12222_v37, %v12232_v50 }
 0xa3a   :  { %12679 = vst [vmem:[#allocation80_spill] sm:$0xff] %v12208_v24  ;;  %12682 = vst [vmem:[#allocation83_spill] sm:$0xff] %v12218_v26  ;;  %v4560_v29 = vpop.f32.mrb[54].mxu1  ;;  %v4649_v58 = vpop.f32.mrb[90].mxu0  ;;  %v4819_v13 = vsel %vm1727_vm6, %v12208_v24, 0.0  ;;  %v4983_v20 = vmul.f32 %v12208_v24, %v12208_v24  ;;  %v4981_v53 = vmul.f32 %v12218_v26, %v12218_v26  ;;  %v4798_v40 = vadd.f32 %v12218_v26, %v12212_v49 }
 0xa3b   :  { %v4562_v27 = vpop.f32.mrb[55].mxu1  ;;  %v4651_v56 = vpop.f32.mrb[91].mxu0  ;;  %v12228_v10 = vadd.f32 %v4681_v54, %v4560_v29  ;;  %v12236_v21 = vadd.f32 %v4689_v30, %v4649_v58  ;;  %v4820_v28 = vadd.f32 %v4819_v13, %v4818_v14 }
 0xa3c   :  { %v12230_v32 = vadd.f32 %v4685_v6, %v4562_v27  ;;  %v12239_v52 = vadd.f32 %v12199_v4, %v4651_v56  ;;  %v5023_v5 = vsel %vm1727_vm6, %v4983_v20, 0.0  ;;  %v5002_v14 = vadd.f32 %v4981_v53, %v4977_v45 }
 0xa3d   :  { %v4789_v56 = vadd.f32 %v4788_v61, %v12228_v10  ;;  %v4809_v19 = vadd.f32 %v4808_v60, %v12236_v21  ;;  %v5024_v49 = vadd.f32 %v5023_v5, %v5022_v12 }
 0xa3e   :  { %12683 = vst [vmem:[#allocation88_spill] sm:$0xff] %v12230_v32  ;;  %12684 = vst [vmem:[#allocation89_spill] sm:$0xff] %v12239_v52  ;;  %v4566_v22 = vpop.f32.mrb[56].mxu1  ;;  %v4655_v33 = vpop.f32.mrb[92].mxu0  ;;  %v4985_v0 = vmul.f32 %v12230_v32, %v12230_v32  ;;  %v4987_v3 = vmul.f32 %v12239_v52, %v12239_v52  ;;  %v4799_v20 = vadd.f32 %v4798_v40, %v12230_v32 }
 0xa3f   :  { %v12252_v29 = vadd.f32 %v4681_v54, %v4566_v22  ;;  %v4568_v58 = vpop.f32.mrb[57].mxu1  ;;  %v4657_v27 = vpop.f32.mrb[93].mxu0  ;;  %v12258_v24 = vadd.f32 %v4689_v30, %v4655_v33  ;;  %v4821_v30 = vsel %vm1727_vm6, %v12239_v52, 0.0 }
 0xa40   :  { %v12265_v13 = vadd.f32 %v4685_v6, %v4568_v58  ;;  %v5003_v6 = vadd.f32 %v5002_v14, %v4985_v0  ;;  %v5025_v53 = vsel %vm1727_vm6, %v4987_v3, 0.0  ;;  %v4822_v52 = vadd.f32 %v4821_v30, %v4820_v28 }
 0xa41   :  { %v4790_v54 = vsel %vm809_vm2, %v12252_v29, 0.0  ;;  %v4810_v61 = vsel %vm809_vm2, %v12258_v24, 0.0  ;;  %v5026_v12 = vadd.f32 %v5025_v53, %v5024_v49 }
 0xa42   :  { %12685 = vst [vmem:[#allocation91_spill] sm:$0xff] %v12265_v13  ;;  %v4791_v22 = vadd.f32 %v4790_v54, %v4789_v56  ;;  %v4811_v33 = vadd.f32 %v4810_v61, %v4809_v19  ;;  %v4800_v60 = vsel %vm809_vm2, %v12265_v13, 0.0  ;;  %v4989_v26 = vmul.f32 %v12265_v13, %v12265_v13 }
 0xa43   :  { %v4801_v45 = vadd.f32 %v4800_v60, %v4799_v20  ;;  %v12279_v54 = vadd.f32 %v12199_v4, %v4657_v27 }
 0xa44   :  { %v4792_v58 = vrot.slane %v4791_v22, 4  ;;  %v4812_v40 = vrot.slane %v4811_v33, 4  ;;  %v5004_v56 = vsel %vm809_vm2, %v4989_v26, 0.0 }
 0xa45   :  { %12686 = vst [vmem:[#allocation92_spill] sm:$0xff] %v12279_v54  ;;  %v4802_v61 = vrot.slane %v4801_v45, 4  ;;  %v5005_v32 = vadd.f32 %v5004_v56, %v5003_v6  ;;  %v4824_v13 = vsel %vm4823_vm9, %v12279_v54, 0.0  ;;  %v4991_v0 = vmul.f32 %v12279_v54, %v12279_v54 }
 0xa46   :  { %v4793_v19 = vadd.f32 %v4792_v58, %v4791_v22  ;;  %v4813_v48 = vadd.f32 %v4812_v40, %v4811_v33  ;;  %v4825_v3 = vadd.f32 %v4824_v13, %v4822_v52 }
 0xa47   :  { %v4803_v14 = vadd.f32 %v4802_v61, %v4801_v45  ;;  %v5027_v26 = vsel %vm4823_vm9, %v4991_v0, 0.0  ;;  %v5006_v4 = vrot.slane %v5005_v32, 4 }
 0xa48   :  { %v4794_v5 = vrot.slane %v4793_v19, 2  ;;  %v4814_v20 = vrot.slane %v4813_v48, 2  ;;  %v4826_v28 = vrot.slane %v4825_v3, 4  ;;  %v5028_v22 = vadd.f32 %v5027_v26, %v5026_v12 }
 0xa49   :  { %v4804_v30 = vrot.slane %v4803_v14, 2  ;;  %v5007_v60 = vadd.f32 %v5006_v4, %v5005_v32  ;;  %v4980_v12 = vmul.f32 %v12216_v44, %v12216_v44 }
 0xa4a   :  { %v4795_v27 = vadd.f32 %v4794_v5, %v4793_v19  ;;  %v4827_v33 = vadd.f32 %v4826_v28, %v4825_v3  ;;  %v5029_v6 = vrot.slane %v5028_v22, 4  ;;  %v4815_v56 = vadd.f32 %v4814_v20, %v4813_v48 }
 0xa4b   :  { %v4805_v58 = vadd.f32 %v4804_v30, %v4803_v14  ;;  %v5008_v36 = vrot.slane %v5007_v60, 2  ;;  %v4988_v48 = vmul.f32 %v12252_v29, %v12252_v29  ;;  %v4775_v30 = vld [vmem:[#allocation31 + $0x28] sm:$0xff] }
 0xa4c   :  { %v4796_v40 = vrot.slane %v4795_v27, 1  ;;  %v4828_v54 = vrot.slane %v4827_v33, 2  ;;  %v5030_v49 = vadd.f32 %v5029_v6, %v5028_v22  ;;  %v4816_v0 = vrot.slane %v4815_v56, 1  ;;  %v4774_v6 = vld [vmem:[#allocation31 + $0x20] sm:$0xff] }
 0xa4d   :  { %v4806_v53 = vrot.slane %v4805_v58, 1  ;;  %v5009_v52 = vadd.f32 %v5008_v36, %v5007_v60  ;;  %v4976_v36 = vmul.f32 %v12220_v55, %v12220_v55  ;;  %v4770_v60 = vld [vmem:[#allocation31] sm:$0xff] }
 0xa4e   :  { %v4829_v45 = vadd.f32 %v4828_v54, %v4827_v33  ;;  %v5031_v61 = vrot.slane %v5030_v49, 2  ;;  %v4797_v7 = vadd.f32 %v4796_v40, %v4795_v27  ;;  %v4984_v54 = vmul.f32 %v12228_v10, %v12228_v10  ;;  %v4783_v40 = vld [vmem:[#allocation31 + $0x68] sm:$0xff] }
 0xa4f   :  { %v4807_v13 = vadd.f32 %v4806_v53, %v4805_v58  ;;  %v5010_v19 = vrot.slane %v5009_v52, 1  ;;  %v4817_v26 = vadd.f32 %v4816_v0, %v4815_v56  ;;  %v4992_v4 = vadd.f32 %v4980_v12, %v4976_v36  ;;  %v4779_v58 = vld [vmem:[#allocation31 + $0x48] sm:$0xff]  ;;  %v4778_v53 = vld [vmem:[#allocation31 + $0x40] sm:$0xff] }
 0xa50   :  { %v4830_v32 = vrot.slane %v4829_v45, 1  ;;  %v5032_v5 = vadd.f32 %v5031_v61, %v5030_v49  ;;  %v9218_v56 = vpack.c.bf16 %v4774_v6, %v4770_v60  ;;  %v9220_v49 = vpack.c.bf16 %v4783_v40, %v4779_v58  ;;  %v12691_v58 = vld [vmem:[#allocation88_spill] sm:$0xff] }
 0xa51   :  { %4899 = vmatprep.mubr.f32.mxu1 %v4807_v13  ;;  %v5011_v3 = vadd.f32 %v5010_v19, %v5009_v52  ;;  %v4993_v28 = vadd.f32 %v4992_v4, %v4984_v54  ;;  %v4782_v52 = vld [vmem:[#allocation31 + $0x60] sm:$0xff]  ;;  %v4773_v13 = vld [vmem:[#allocation31 + $0x18] sm:$0xff] }
 0xa52   :  { %4900 = vmatmul.mubr.f32.vlgmr.msra.gmra.mrb[58].mxu1 %v4797_v7  ;;  %v4831_v14 = vadd.f32 %v4830_v32, %v4829_v45  ;;  %v5033_v20 = vrot.slane %v5032_v5, 1  ;;  %v4994_v7 = vsel %vm809_vm2, %v4988_v48, 0.0  ;;  %v4777_v45 = vld [vmem:[#allocation31 + $0x38] sm:$0xff]  ;;  %v9222_v61 = vpack.c.bf16 %v4782_v52, %v4778_v53 }
 0xa53   :  { %9151 = vmatpush3.bf16.msra.mxu1 %v12076_v16  ;;  %5102 = vmatprep.mubr.f32.mxu1 %v5011_v3  ;;  %v4995_v16 = vadd.f32 %v4994_v7, %v4993_v28  ;;  %v9224_v0 = vpack.c.bf16 %v4777_v45, %v4773_v13  ;;  %v12693_v13 = vld [vmem:[#allocation81_spill] sm:$0xff] }
 0xa54   :  { %9153 = vmatprep.subr.bf16.mxu1 %v12085_v42  ;;  %7812 = vmatprep.mubr.msk.f32.mxu0 %vm1727_vm6, %v4831_v14  ;;  %v5034_v27 = vadd.f32 %v5033_v20, %v5032_v5 }
 0xa55   :  { %4970 = vmatmul.mubr.f32.vlgmr.msra.gmra.mrb[94].mxu0 %v4817_v26  ;;  %v4996_v42 = vrot.slane %v4995_v16, 4 }
 0xa56   :  { %9182 = vmatpush1.bf16.msra.mxu0 %v12030_v59  ;;  %7813 = vmatprep.mubr.msk.f32.mxu0 %vm1727_vm6, %v5034_v27 }
 0xa57   :  { %9183 = vmatprep.subr.bf16.mxu0 %v12647_v47  ;;  %9155 = vmatpush3.bf16.msra.mxu1 %v12092_v34  ;;  %v4997_v59 = vadd.f32 %v4996_v42, %v4995_v16  ;;  %v4990_v34 = vmul.f32 %v12258_v24, %v12258_v24 }
 0xa58   :  { %9157 = vmatprep.subr.bf16.mxu1 %v12100_v9  ;;  %v4978_v9 = vmul.f32 %v12232_v50, %v12232_v50 }
 0xa5a   :  { %9185 = vmatpush1.bf16.msra.mxu0 %v12042_v46  ;;  %v4982_v46 = vmul.f32 %v12222_v37, %v12222_v37 }
 0xa5b   :  { %9186 = vmatprep.subr.bf16.mxu0 %v12647_v47  ;;  %9159 = vmatpush3.bf16.msra.mxu1 %v12108_v43  ;;  %v4986_v43 = vmul.f32 %v12236_v21, %v12236_v21 }
 0xa5c   :  { %9161 = vmatprep.subr.bf16.mxu1 %v12117_v23  ;;  %v5014_v23 = vsel %vm809_vm2, %v4990_v34, 0.0  ;;  %v4786_v34 = vld [vmem:[#allocation28] sm:$0x1] }
 0xa5e   :  { %9188 = vmatpush1.bf16.msra.mxu0 %v12054_v2  ;;  %v4998_v2 = vrot.slane %v4997_v59, 2 }
 0xa5f   :  { %9189 = vmatprep.subr.bf16.mxu0 %v12647_v47  ;;  %9163 = vmatpush3.bf16.msra.mxu1 %v12123_v1 }
 0xa60   :  { %9165 = vmatprep.subr.bf16.mxu1 %v12133_v18  ;;  %v4999_v1 = vadd.f32 %v4998_v2, %v4997_v59  ;;  %v4772_v59 = vld [vmem:[#allocation31 + $0x10] sm:$0xff]  ;;  %v4781_v2 = vld [vmem:[#allocation31 + $0x58] sm:$0xff] }
 0xa62   :  { %9191 = vmatpush1.bf16.msra.mxu0 %v12066_v35  ;;  %v5012_v35 = vadd.f32 %v4982_v46, %v4978_v9  ;;  %v4776_v46 = vld [vmem:[#allocation31 + $0x30] sm:$0xff]  ;;  %v4785_v9 = vld [vmem:[#allocation31 + $0x78] sm:$0xff] }
 0xa63   :  { %9192 = vmatprep.subr.bf16.mxu0 %v12647_v47  ;;  %9167 = vmatpush3.bf16.msra.mxu1 %v12139_v38 }
 0xa64   :  { %9169 = vmatprep.subr.bf16.mxu1 %v12149_v39  ;;  %v5013_v18 = vadd.f32 %v5012_v35, %v4986_v43  ;;  %v9226_v35 = vpack.c.bf16 %v4776_v46, %v4772_v59 }
 0xa66   :  { %9194 = vmatpush1.bf16.msra.mxu0 %v12079_v25  ;;  %v5015_v38 = vadd.f32 %v5014_v23, %v5013_v18  ;;  %v5000_v25 = vrot.slane %v4999_v1, 1  ;;  %v4780_v18 = vld [vmem:[#allocation31 + $0x50] sm:$0xff] }
 0xa67   :  { %9195 = vmatprep.subr.bf16.mxu0 %v12647_v47  ;;  %9171 = vmatpush3.bf16.msra.mxu1 %v12155_v17 }
 0xa68   :  { %9173 = vmatprep.subr.bf16.mxu1 %v12166_v51  ;;  %v5016_v39 = vrot.slane %v5015_v38, 4  ;;  %v5001_v17 = vadd.f32 %v5000_v25, %v4999_v1  ;;  %v9228_v1 = vpack.c.bf16 %v4785_v9, %v4781_v2 }
 0xa6a   :  { %9197 = vmatpush1.bf16.msra.mxu0 %v12095_v11  ;;  %v5017_v11 = vadd.f32 %v5016_v39, %v5015_v38  ;;  %v4784_v38 = vld [vmem:[#allocation31 + $0x70] sm:$0xff] }
 0xa6b   :  { %9198 = vmatprep.subr.bf16.mxu0 %v12647_v47  ;;  %9175 = vmatpush3.bf16.msra.mxu1 %v12172_v57  ;;  %v9230_v39 = vpack.c.bf16 %v4784_v38, %v4780_v18  ;;  %v12695_v38 = vld [vmem:[#allocation89_spill] sm:$0xff] }
 0xa6c   :  { %9177 = vmatprep.subr.bf16.mxu1 %v12180_v31  ;;  %v5018_v51 = vrot.slane %v5017_v11, 2  ;;  %v12688_v31 = vld [vmem:[#allocation82_spill] sm:$0xff] }
 0xa6e   :  { %9200 = vmatpush1.bf16.msra.mxu0 %v12111_v63  ;;  %v12687_v63 = vld [vmem:[#allocation77_spill] sm:$0xff]  ;;  %v5019_v57 = vadd.f32 %v5018_v51, %v5017_v11 }
 0xa6f   :  { %9201 = vmatprep.subr.bf16.mxu0 %v12647_v47  ;;  %9179 = vmatpush3.bf16.msra.mxu1 %v12186_v62  ;;  %v12689_v62 = vld [vmem:[#allocation78_spill] sm:$0xff] }
 0xa72   :  { %9203 = vmatpush1.bf16.msra.mxu0 %v12127_v15  ;;  %5103 = vmatmul.mubr.f32.vlgmr.msra.gmra.mrb[60].mxu1 %v5001_v17  ;;  %v5020_v15 = vrot.slane %v5019_v57, 1  ;;  %v4787_v17 = vld [vmem:[#allocation29] sm:$0x1] }
 0xa73   :  { %9204 = vmatprep.subr.bf16.mxu0 %v12647_v47  ;;  %5254 = vmatprep.mubr.f32.mxu1 %v12651_v8 }
 0xa74   :  { %v5021_v22 = vadd.f32 %v5020_v15, %v5019_v57  ;;  %v12690_v15 = vld [vmem:[#allocation85_spill] sm:$0xff] }
 0xa76   :  { %9206 = vmatpush1.bf16.msra.mxu0 %v12143_v41  ;;  %v4771_v41 = vld [vmem:[#allocation31 + $0x8] sm:$0xff] }
 0xa77   :  { %9207 = vmatprep.subr.bf16.mxu0 %v12647_v47  ;;  %v9216_v33 = vpack.c.bf16 %v4775_v30, %v4771_v41 }
 0xa79   :  { %9217 = vmatprep.subr.bf16.mxu1 %v9216_v33 }
 0xa7a   :  { %9209 = vmatpush1.bf16.msra.mxu0 %v12687_v63  ;;  %9219 = vmatpush1.bf16.msra.mxu1 %v9218_v56 }
 0xa7b   :  { %9210 = vmatprep.subr.bf16.mxu0 %v12647_v47  ;;  %9221 = vmatprep.subr.bf16.mxu1 %v9220_v49 }
 0xa7e   :  { %9212 = vmatpush1.bf16.msra.mxu0 %v12688_v31  ;;  %9223 = vmatpush1.bf16.msra.mxu1 %v9222_v61 }
 0xa7f   :  { %9213 = vmatprep.subr.bf16.mxu0 %v12647_v47  ;;  %9225 = vmatprep.subr.bf16.mxu1 %v9224_v0 }
 0xa82   :  { %9215 = vmatpush1.bf16.msra.mxu0 %v12689_v62 }
 0xa85   :  { %5173 = vmatmul.mubr.f32.vlgmr.msra.gmra.mrb[96].mxu0 %v5021_v22 }
 0xa86   :  { %6027 = vmatprep.mubr.f32.mxu0 %v12651_v8 }
 0xb25   :  { %v7992_v19 = vpop.f32.mrb[58].mxu1 }
 0xb26   :  { %v7993_v12 = vpop.f32.mrb[59].mxu1 }
 0xb27   :  { %v7994_v32 = vadd.f32 %v7993_v12, %v7992_v19 }
 0xb28   :  { %v4971_v5 = vpop.f32.mrb[94].mxu0 }
 0xb29   :  { %v4972_v48 = vadd.f32 %v7994_v32, %v4971_v5  ;;  %v4973_v3 = vpop.f32.mrb[95].mxu0 }
 0xb2b   :  { %v4975_v20 = vmul.f32 0.0025510204, %v4972_v48 }
 0xb2d   :  { %v5179_v28 = vmul.f32 %v4975_v20, %v4975_v20 }
 0xb45   :  { %v8027_v36 = vpop.f32.mrb[60].mxu1 }
 0xb46   :  { %v8028_v54 = vpop.f32.mrb[61].mxu1 }
 0xb47   :  { %v8029_v14 = vadd.f32 %v8028_v54, %v8027_v36  ;;  %v5562_v54 = vld [vmem:[#allocation35 + $0x8] sm:$0xff] }
 0xb58   :  { %v5174_v26 = vpop.f32.mrb[96].mxu0 }
 0xb59   :  { %v5175_v4 = vadd.f32 %v8029_v14, %v5174_v26  ;;  %v5176_v27 = vpop.f32.mrb[97].mxu0  ;;  %v5564_v14 = vld [vmem:[#allocation35 + $0x18] sm:$0xff] }
 0xb5a   :  { %v9288_v2 = vpack.c.bf16 %v5564_v14, %v5562_v54  ;;  %v5570_v54 = vld [vmem:[#allocation35 + $0x48] sm:$0xff]  ;;  %v5572_v14 = vld [vmem:[#allocation35 + $0x58] sm:$0xff] }
 0xb5b   :  { %v5178_v7 = vmul.f32 0.0025510204, %v5175_v4 }
 0xb5d   :  { %v5180_v16 = vsub.f32 %v5178_v7, %v5179_v28 }
 0xb5f   :  { %v5181_v42 = vadd.f32 1e-05, %v5180_v16 }
 0xb61   :  { %9968 = vrsqrt.f32 %v5181_v42 }
 0xb6b   :  { %v9969_v43 = vpop.eup %9968 }
 0xb6c   :  { %v5183_v23 = vmul.f32 %v9969_v43, %v4786_v34 }
 0xb6e   :  { %7814 = vmatmul.mubr.msk.f32.vlgmr.msra.gmra.mrb[62].mxu1 %vm5186_vm10, %v5183_v23  ;;  %v5184_v25 = vmul.f32 %v5183_v23, %v4975_v20 }
 0xb6f   :  { %9227 = vmatpush1.bf16.msra.mxu1 %v9226_v35  ;;  %5325 = vmatprep.mubr.f32.mxu1 %v12651_v8 }
 0xb70   :  { %9229 = vmatprep.subr.bf16.mxu1 %v9228_v1  ;;  %v5185_v11 = vsub.f32 %v4787_v17, %v5184_v25 }
 0xb73   :  { %9231 = vmatpush1.bf16.msra.mxu1 %v9230_v39 }
 0xb74   :  { %9233 = vmatprep.subr.bf16.mxu1 %v9216_v33 }
 0xb76   :  { %7815 = vmatmul.mubr.msk.f32.vlgmr.msra.gmra.mrb[64].mxu1 %vm5186_vm10, %v5183_v23 }
 0xb77   :  { %9235 = vmatpush1.bf16.msra.mxu1 %v9218_v56  ;;  %5399 = vmatprep.mubr.f32.mxu1 %v12651_v8  ;;  %v12692_v56 = vld [vmem:[#allocation91_spill] sm:$0xff] }
 0xb78   :  { %9237 = vmatprep.subr.bf16.mxu1 %v9220_v49 }
 0xb7b   :  { %9239 = vmatpush1.bf16.msra.mxu1 %v9222_v61 }
 0xb7c   :  { %9241 = vmatprep.subr.bf16.mxu1 %v9224_v0  ;;  %v12694_v0 = vld [vmem:[#allocation83_spill] sm:$0xff] }
 0xb7e   :  { %7816 = vmatmul.mubr.msk.f32.vlgmr.msra.gmra.mrb[66].mxu1 %vm5186_vm10, %v5185_v11 }
 0xb7f   :  { %9243 = vmatpush1.bf16.msra.mxu1 %v9226_v35  ;;  %5470 = vmatprep.mubr.f32.mxu1 %v12651_v8 }
 0xb80   :  { %9245 = vmatprep.subr.bf16.mxu1 %v9228_v1 }
 0xb83   :  { %9247 = vmatpush1.bf16.msra.mxu1 %v9230_v39  ;;  %v12696_v39 = vld [vmem:[#allocation92_spill] sm:$0xff] }
 0xb86   :  { %7817 = vmatmul.mubr.msk.f32.vlgmr.msra.gmra.mrb[68].mxu1 %vm5186_vm10, %v5185_v11 }
 0xb87   :  { %5867 = vmatprep.mubr.f32.mxu1 %v12651_v8 }
 0xc41   :  { %v5256_v51 = vpop.f32.mrb[62].mxu1 }
 0xc42   :  { %v5258_v63 = vpop.f32.mrb[63].mxu1  ;;  %v5480_v62 = vrot.slane %v5256_v51, %v12690_v15 }
 0xc43   :  { %v5484_v22 = vrot.slane %v5258_v63, %v12690_v15  ;;  %v12697_v63 = vld [vmem:[#allocation79_spill] sm:$0xff] }
 0xc44   :  { %v5493_v41 = vmul.f32 %v5480_v62, %v12220_v55  ;;  %v5497_v30 = vmul.f32 %v5480_v62, %v12216_v44  ;;  %v5501_v60 = vmul.f32 %v5480_v62, %v12228_v10  ;;  %v5505_v33 = vmul.f32 %v5480_v62, %v12252_v29 }
 0xc45   :  { %v5502_v40 = vmul.f32 %v5484_v22, %v12691_v58  ;;  %v5506_v49 = vmul.f32 %v5484_v22, %v12692_v56  ;;  %v5494_v45 = vmul.f32 %v5484_v22, %v12693_v13  ;;  %v5498_v10 = vmul.f32 %v5484_v22, %v12694_v0  ;;  %v5561_v13 = vld [vmem:[#allocation35] sm:$0xff] }
 0xc49   :  { %v5327_v57 = vpop.f32.mrb[64].mxu1 }
 0xc4a   :  { %v5329_v31 = vpop.f32.mrb[65].mxu1  ;;  %v5488_v61 = vrot.slane %v5327_v57, %v12690_v15  ;;  %v12698_v57 = vld [vmem:[#allocation80_spill] sm:$0xff] }
 0xc4b   :  { %v5492_v55 = vrot.slane %v5329_v31, %v12690_v15 }
 0xc4c   :  { %v5495_v59 = vmul.f32 %v5488_v61, %v12232_v50  ;;  %v5499_v9 = vmul.f32 %v5488_v61, %v12222_v37  ;;  %v5503_v43 = vmul.f32 %v5488_v61, %v12236_v21  ;;  %v5507_v18 = vmul.f32 %v5488_v61, %v12258_v24 }
 0xc4d   :  { %v5504_v25 = vmul.f32 %v5492_v55, %v12695_v38  ;;  %v5508_v17 = vmul.f32 %v5492_v55, %v12696_v39  ;;  %v5496_v37 = vmul.f32 %v5492_v55, %v12697_v63  ;;  %v5500_v21 = vmul.f32 %v5492_v55, %v12698_v57  ;;  %v5557_v55 = vld [vmem:[#allocation32] sm:$0xff]  ;;  %v5675_v38 = vld [vmem:[#allocation37 + $0x10] sm:$0xff]  ;;  %v5582_v63 = vld [vmem:[#allocation35 + $0xa8] sm:$0xff] }
 0xc51   :  { %v5401_v6 = vpop.f32.mrb[66].mxu1 }
 0xc52   :  { %v5512_v53 = vrot.slane %v5401_v6, %v12690_v15  ;;  %v5403_v52 = vpop.f32.mrb[67].mxu1 }
 0xc53   :  { %v5516_v44 = vrot.slane %v5403_v52, %v12690_v15 }
 0xc54   :  { %v5525_v19 = vadd.f32 %v5512_v53, %v5493_v41  ;;  %v5529_v29 = vadd.f32 %v5512_v53, %v5497_v30  ;;  %v5533_v12 = vadd.f32 %v5512_v53, %v5501_v60  ;;  %v5537_v32 = vadd.f32 %v5512_v53, %v5505_v33  ;;  %v5586_v60 = vld [vmem:[#allocation35 + $0xc8] sm:$0xff] }
 0xc55   :  { %v5534_v5 = vadd.f32 %v5516_v44, %v5502_v40  ;;  %v5538_v48 = vadd.f32 %v5516_v44, %v5506_v49  ;;  %v5526_v3 = vadd.f32 %v5516_v44, %v5494_v45  ;;  %v5530_v36 = vadd.f32 %v5516_v44, %v5498_v10  ;;  %v5563_v45 = vld [vmem:[#allocation35 + $0x10] sm:$0xff] }
 0xc56   :  { %v5541_v20 = vmax.f32 %v5525_v19, 0.0  ;;  %v5545_v26 = vmax.f32 %v5529_v29, 0.0  ;;  %v5549_v4 = vmax.f32 %v5533_v12, 0.0  ;;  %v5553_v27 = vmax.f32 %v5537_v32, 0.0  ;;  %v12388_v10 = vld [vmem:[#allocation34] sm:$0xff]  ;;  %v5566_v12 = vld [vmem:[#allocation35 + $0x28] sm:$0xff] }
 0xc57   :  { %v5550_v7 = vmax.f32 %v5534_v5, 0.0  ;;  %v5554_v28 = vmax.f32 %v5538_v48, 0.0  ;;  %v5542_v16 = vmax.f32 %v5526_v3, 0.0  ;;  %v5546_v42 = vmax.f32 %v5530_v36, 0.0  ;;  %v5568_v32 = vld [vmem:[#allocation35 + $0x38] sm:$0xff]  ;;  %v5565_v48 = vld [vmem:[#allocation35 + $0x20] sm:$0xff] }
 0xc58   :  { %v9255_v46 = vpack.c.bf16 %v5553_v27, %v5549_v4  ;;  %v9250_v34 = vpack.c.bf16 %v5545_v26, %v5541_v20  ;;  %v9290_v29 = vpack.c.bf16 %v5563_v45, %v5561_v13  ;;  %v5567_v3 = vld [vmem:[#allocation35 + $0x30] sm:$0xff]  ;;  %v5558_v36 = vld [vmem:[#allocation32 + $0x8] sm:$0x3f]  ;;  %v12395_v20 = vld [vmem:[#allocation34 + $0x8] sm:$0x3f]  ;;  %v9292_v26 = vpack.c.bf16 %v5568_v32, %v5566_v12 }
 0xc59   :  { %v5472_v35 = vpop.f32.mrb[68].mxu1  ;;  %v9248_v23 = vpack.c.bf16 %v5546_v42, %v5542_v16  ;;  %v9252_v1 = vpack.c.bf16 %v5554_v28, %v5550_v7  ;;  %v9294_v4 = vpack.c.bf16 %v5567_v3, %v5565_v48  ;;  %v9296_v27 = vpack.c.bf16 %v5572_v14, %v5570_v54  ;;  %v5569_v7 = vld [vmem:[#allocation35 + $0x40] sm:$0xff]  ;;  %v5571_v28 = vld [vmem:[#allocation35 + $0x50] sm:$0xff]  ;;  %v5574_v16 = vld [vmem:[#allocation35 + $0x68] sm:$0xff] }
 0xc5a   :  { %v5520_v11 = vrot.slane %v5472_v35, %v12690_v15  ;;  %v5474_v51 = vpop.f32.mrb[69].mxu1  ;;  %v5576_v42 = vld [vmem:[#allocation35 + $0x78] sm:$0xff]  ;;  %v5578_v35 = vld [vmem:[#allocation35 + $0x88] sm:$0xff]  ;;  %v5687_v12 = vld [vmem:[#allocation37 + $0x70] sm:$0xff] }
 0xc5b   :  { %v5524_v50 = vrot.slane %v5474_v51, %v12690_v15  ;;  %9249 = vmatprep.subr.bf16.mxu1 %v9248_v23  ;;  %9269 = vmatprep.subr.bf16.mxu0 %v9248_v23  ;;  %v5580_v23 = vld [vmem:[#allocation35 + $0x98] sm:$0xff]  ;;  %v5577_v51 = vld [vmem:[#allocation35 + $0x80] sm:$0xff]  ;;  %v5690_v32 = vld [vmem:[#allocation37 + $0x88] sm:$0xff] }
 0xc5c   :  { %v5527_v31 = vadd.f32 %v5520_v11, %v5495_v59  ;;  %v5531_v62 = vadd.f32 %v5520_v11, %v5499_v9  ;;  %v5535_v22 = vadd.f32 %v5520_v11, %v5503_v43  ;;  %v5539_v41 = vadd.f32 %v5520_v11, %v5507_v18  ;;  %9251 = vmatpush1.bf16.msra.mxu1 %v9250_v34  ;;  %v5674_v59 = vld [vmem:[#allocation37 + $0x8] sm:$0xff]  ;;  %v5573_v9 = vld [vmem:[#allocation35 + $0x60] sm:$0xff]  ;;  %v5575_v43 = vld [vmem:[#allocation35 + $0x70] sm:$0xff] }
 0xc5d   :  { %v5536_v24 = vadd.f32 %v5524_v50, %v5504_v25  ;;  %v5540_v30 = vadd.f32 %v5524_v50, %v5508_v17  ;;  %9271 = vmatpush1.bf16.msra.mxu0 %v9250_v34  ;;  %9254 = vmatprep.subr.msk.bf16.mxu1 %vm11138_vm4, %v9252_v1  ;;  %v5528_v33 = vadd.f32 %v5524_v50, %v5496_v37  ;;  %v5676_v34 = vld [vmem:[#allocation37 + $0x18] sm:$0xff]  ;;  %v5673_v18 = vld [vmem:[#allocation37] sm:$0xff]  ;;  %v5678_v25 = vld [vmem:[#allocation37 + $0x28] sm:$0xff] }
 0xc5e   :  { %v5543_v6 = vmax.f32 %v5527_v31, 0.0  ;;  %v5547_v15 = vmax.f32 %v5531_v62, 0.0  ;;  %v5551_v58 = vmax.f32 %v5535_v22, 0.0  ;;  %v5555_v40 = vmax.f32 %v5539_v41, 0.0  ;;  %9274 = vmatprep.subr.msk.bf16.mxu0 %vm11138_vm4, %v9252_v1  ;;  %v5680_v17 = vld [vmem:[#allocation37 + $0x38] sm:$0xff]  ;;  %v5677_v31 = vld [vmem:[#allocation37 + $0x20] sm:$0xff] }
 0xc5f   :  { %v5552_v56 = vmax.f32 %v5536_v24, 0.0  ;;  %v5556_v49 = vmax.f32 %v5540_v30, 0.0  ;;  %v5532_v53 = vadd.f32 %v5524_v50, %v5500_v21  ;;  %v5544_v52 = vmax.f32 %v5528_v33, 0.0  ;;  %v5579_v50 = vld [vmem:[#allocation35 + $0x90] sm:$0xff]  ;;  %v5584_v37 = vld [vmem:[#allocation35 + $0xb8] sm:$0xff]  ;;  %v5682_v22 = vld [vmem:[#allocation37 + $0x48] sm:$0xff] }
 0xc60   :  { %v12382_v61 = vpack.c.bf16 %v5555_v40, %v5551_v58  ;;  %9257 = vmatpush1.bf16.msk.msra.mxu1 %vm11138_vm4, %v9255_v46  ;;  %v9260_v44 = vpack.c.bf16 %v5547_v15, %v5543_v6  ;;  %v9400_v1 = vpack.c.bf16 %v5676_v34, %v5674_v59  ;;  %v9302_v39 = vpack.c.bf16 %v5575_v43, %v5573_v9  ;;  %v5679_v62 = vld [vmem:[#allocation37 + $0x30] sm:$0xff]  ;;  %v5684_v24 = vld [vmem:[#allocation37 + $0x58] sm:$0xff]  ;;  %v5581_v33 = vld [vmem:[#allocation35 + $0xa0] sm:$0xff] }
 0xc61   :  { %9277 = vmatpush1.bf16.msk.msra.mxu0 %vm11138_vm4, %v9255_v46  ;;  %v5548_v0 = vmax.f32 %v5532_v53, 0.0  ;;  %v9262_v19 = vpack.c.bf16 %v5556_v49, %v5552_v56  ;;  %v9298_v46 = vpack.c.bf16 %v5571_v28, %v5569_v7  ;;  %v9304_v11 = vpack.c.bf16 %v5580_v23, %v5578_v35  ;;  %v5583_v6 = vld [vmem:[#allocation35 + $0xb0] sm:$0xff]  ;;  %v5588_v15 = vld [vmem:[#allocation35 + $0xd8] sm:$0xff]  ;;  %v5681_v56 = vld [vmem:[#allocation37 + $0x40] sm:$0xff] }
 0xc62   :  { %9289 = vmatprep.subr.bf16.mxu0 %v9288_v2  ;;  %v9300_v2 = vpack.c.bf16 %v5576_v42, %v5574_v16  ;;  %v9402_v57 = vpack.c.bf16 %v5675_v38, %v5673_v18  ;;  %v9404_v21 = vpack.c.bf16 %v5680_v17, %v5678_v25  ;;  %v9306_v41 = vpack.c.bf16 %v5579_v50, %v5577_v51  ;;  %v5683_v49 = vld [vmem:[#allocation37 + $0x50] sm:$0xff]  ;;  %v5686_v53 = vld [vmem:[#allocation37 + $0x68] sm:$0xff]  ;;  %v5688_v13 = vld [vmem:[#allocation37 + $0x78] sm:$0xff] }
 0xc63   :  { %7820 = vmatmul.mubr.msk.f32.vlgmr.msra.gmra.mrb[70].mxu1 %vm787_vm5, %v5557_v55  ;;  %v9258_v5 = vpack.c.bf16 %v5548_v0, %v5544_v52  ;;  %v9308_v30 = vpack.c.bf16 %v5584_v37, %v5582_v63  ;;  %v9406_v58 = vpack.c.bf16 %v5679_v62, %v5677_v31  ;;  %v9408_v40 = vpack.c.bf16 %v5684_v24, %v5682_v22  ;;  %v5592_v0 = vld [vmem:[#allocation35 + $0xf8] sm:$0xff]  ;;  %v5591_v54 = vld [vmem:[#allocation35 + $0xf0] sm:$0xff]  ;;  %v5594_v14 = vld [vmem:[#allocation35 + $0x108] sm:$0xff] }
 0xc64   :  { %7828 = vmatmul.mubr.msk.f32.vlgmr.msra.gmra.mrb[98].mxu0 %vm787_vm5, %v12388_v10  ;;  %5873 = vmatprep.mubr.f32.mxu1 %v12651_v8  ;;  %v9310_v52 = vpack.c.bf16 %v5583_v6, %v5581_v33  ;;  %v9312_v45 = vpack.c.bf16 %v5588_v15, %v5586_v60  ;;  %v5692_v48 = vld [vmem:[#allocation37 + $0x98] sm:$0xff]  ;;  %v5691_v7 = vld [vmem:[#allocation37 + $0x90] sm:$0xff]  ;;  %v5694_v28 = vld [vmem:[#allocation37 + $0xa8] sm:$0xff] }
 0xc65   :  { %9259 = vmatprep.subr.bf16.mxu1 %v9258_v5  ;;  %6033 = vmatprep.mubr.f32.mxu0 %v12651_v8  ;;  %v5696_v42 = vld [vmem:[#allocation37 + $0xb8] sm:$0xff]  ;;  %v5595_v34 = vld [vmem:[#allocation35 + $0x110] sm:$0xff]  ;;  %v5693_v23 = vld [vmem:[#allocation37 + $0xa0] sm:$0xff] }
 0xc66   :  { %9261 = vmatpush1.bf16.msra.mxu1 %v9260_v44  ;;  %9291 = vmatpush1.bf16.msra.mxu0 %v9290_v29  ;;  %v5685_v29 = vld [vmem:[#allocation37 + $0x60] sm:$0xff]  ;;  %v5600_v9 = vld [vmem:[#allocation35 + $0x138] sm:$0xff]  ;;  %v9420_v35 = vpack.c.bf16 %v5696_v42, %v5694_v28  ;;  %v5698_v18 = vld [vmem:[#allocation37 + $0xc8] sm:$0xff] }
 0xc67   :  { %9264 = vmatprep.subr.msk.bf16.mxu1 %vm11138_vm4, %v9262_v19  ;;  %7821 = vmatmul.mubr.msk.f32.gmra.mrb[72].mxu1 %vm787_vm5, %v5558_v36  ;;  %v5700_v25 = vld [vmem:[#allocation37 + $0xd8] sm:$0xff]  ;;  %v5597_v17 = vld [vmem:[#allocation35 + $0x120] sm:$0xff]  ;;  %v5602_v51 = vld [vmem:[#allocation35 + $0x148] sm:$0xff] }
 0xc68   :  { %5944 = vmatprep.mubr.f32.mxu1 %v12651_v8  ;;  %7829 = vmatmul.mubr.msk.f32.gmra.mrb[100].mxu0 %vm787_vm5, %v12395_v20  ;;  %v5604_v50 = vld [vmem:[#allocation35 + $0x158] sm:$0xff]  ;;  %v9424_v37 = vpack.c.bf16 %v5700_v25, %v5698_v18  ;;  %v5702_v31 = vld [vmem:[#allocation37 + $0xe8] sm:$0xff]  ;;  %v5601_v24 = vld [vmem:[#allocation35 + $0x140] sm:$0xff] }
 0xc69   :  { %9293 = vmatprep.subr.bf16.mxu0 %v9292_v26  ;;  %v5596_v26 = vld [vmem:[#allocation35 + $0x118] sm:$0xff]  ;;  %v5606_v33 = vld [vmem:[#allocation35 + $0x168] sm:$0xff]  ;;  %v5613_v42 = vld [vmem:[#allocation35 + $0x1a0] sm:$0xff] }
 0xc6a   :  { %9267 = vmatpush1.bf16.msk.msra.mxu1 %vm11138_vm4, %v12382_v61  ;;  %9295 = vmatpush1.bf16.msra.mxu0 %v9294_v4  ;;  %v9416_v4 = vpack.c.bf16 %v5692_v48, %v5690_v32  ;;  %v9320_v59 = vpack.c.bf16 %v5596_v26, %v5594_v14  ;;  %v5704_v22 = vld [vmem:[#allocation37 + $0xf8] sm:$0xff]  ;;  %v5609_v48 = vld [vmem:[#allocation35 + $0x180] sm:$0xff] }
 0xc6b   :  { %9279 = vmatprep.subr.bf16.mxu1 %v9258_v5  ;;  %9297 = vmatprep.subr.bf16.mxu0 %v9296_v27  ;;  %v5689_v27 = vld [vmem:[#allocation37 + $0x80] sm:$0xff]  ;;  %v5608_v6 = vld [vmem:[#allocation35 + $0x178] sm:$0xff]  ;;  %v9428_v15 = vpack.c.bf16 %v5704_v22, %v5702_v31  ;;  %v5723_v22 = vld [vmem:[#allocation37 + $0x190] sm:$0xff] }
 0xc6c   :  { %v9418_v43 = vpack.c.bf16 %v5691_v7, %v5689_v27  ;;  %v5712_v32 = vld [vmem:[#allocation37 + $0x138] sm:$0xff]  ;;  %v5714_v27 = vld [vmem:[#allocation37 + $0x148] sm:$0xff]  ;;  %v5617_v25 = vld [vmem:[#allocation35 + $0x1c0] sm:$0xff] }
 0xc6d   :  { %7824 = vmatmul.mubr.msk.f32.vlgmr.msra.gmra.mrb[74].mxu1 %vm787_vm5, %v5557_v55  ;;  %v5587_v55 = vld [vmem:[#allocation35 + $0xd0] sm:$0xff]  ;;  %v5716_v28 = vld [vmem:[#allocation37 + $0x158] sm:$0xff] }
 0xc6e   :  { %9281 = vmatpush1.bf16.msra.mxu1 %v9260_v44  ;;  %5950 = vmatprep.mubr.f32.mxu1 %v12651_v8  ;;  %v5590_v44 = vld [vmem:[#allocation35 + $0xe8] sm:$0xff]  ;;  %v5720_v18 = vld [vmem:[#allocation37 + $0x178] sm:$0xff] }
 0xc6f   :  { %9284 = vmatprep.subr.msk.bf16.mxu1 %vm11138_vm4, %v9262_v19  ;;  %9299 = vmatpush1.bf16.msra.mxu0 %v9298_v46  ;;  %v9412_v19 = vpack.c.bf16 %v5688_v13, %v5686_v53  ;;  %v9316_v3 = vpack.c.bf16 %v5592_v0, %v5590_v44  ;;  %v5593_v46 = vld [vmem:[#allocation35 + $0x100] sm:$0xff]  ;;  %v5708_v53 = vld [vmem:[#allocation37 + $0x118] sm:$0xff] }
 0xc70   :  { %9301 = vmatprep.subr.bf16.mxu0 %v9300_v2  ;;  %v5598_v2 = vld [vmem:[#allocation35 + $0x128] sm:$0xff]  ;;  %v9322_v38 = vpack.c.bf16 %v5595_v34, %v5593_v46  ;;  %v5605_v13 = vld [vmem:[#allocation35 + $0x160] sm:$0xff]  ;;  %v5620_v34 = vld [vmem:[#allocation35 + $0x1d8] sm:$0xff] }
 0xc71   :  { %7825 = vmatmul.mubr.msk.f32.gmra.mrb[76].mxu1 %vm787_vm5, %v5558_v36  ;;  %v5589_v36 = vld [vmem:[#allocation35 + $0xe0] sm:$0xff]  ;;  %v5618_v46 = vld [vmem:[#allocation35 + $0x1c8] sm:$0xff] }
 0xc72   :  { %9287 = vmatpush1.bf16.msk.msra.mxu1 %vm11138_vm4, %v12382_v61  ;;  %6104 = vmatprep.mubr.f32.mxu1 %v12651_v8  ;;  %v5585_v61 = vld [vmem:[#allocation35 + $0xc0] sm:$0xff]  ;;  %v9318_v16 = vpack.c.bf16 %v5591_v54, %v5589_v36  ;;  %v5614_v36 = vld [vmem:[#allocation35 + $0x1a8] sm:$0xff]  ;;  %v5616_v54 = vld [vmem:[#allocation35 + $0x1b8] sm:$0xff] }
 0xc73   :  { %9401 = vmatprep.subr.bf16.mxu1 %v9400_v1  ;;  %9303 = vmatpush1.bf16.msra.mxu0 %v9302_v39  ;;  %v9314_v5 = vpack.c.bf16 %v5587_v55, %v5585_v61  ;;  %v5695_v1 = vld [vmem:[#allocation37 + $0xb0] sm:$0xff]  ;;  %v9324_v39 = vpack.c.bf16 %v5600_v9, %v5598_v2  ;;  %v5610_v61 = vld [vmem:[#allocation35 + $0x188] sm:$0xff]  ;;  %v5612_v55 = vld [vmem:[#allocation35 + $0x198] sm:$0xff]  ;;  %v9440_v9 = vpack.c.bf16 %v5716_v28, %v5714_v27 }
 0xc74   :  { %9305 = vmatprep.subr.bf16.mxu0 %v9304_v11  ;;  %v5599_v11 = vld [vmem:[#allocation35 + $0x130] sm:$0xff]  ;;  %v9422_v63 = vpack.c.bf16 %v5695_v1, %v5693_v23  ;;  %v5718_v23 = vld [vmem:[#allocation37 + $0x168] sm:$0xff] }
 0xc75   :  { %7832 = vmatmul.mubr.msk.f32.vlgmr.msra.gmra.mrb[78].mxu1 %vm787_vm5, %v12388_v10  ;;  %v9410_v10 = vpack.c.bf16 %v5683_v49, %v5681_v56  ;;  %v9326_v62 = vpack.c.bf16 %v5599_v11, %v5597_v17  ;;  %v5706_v56 = vld [vmem:[#allocation37 + $0x108] sm:$0xff]  ;;  %v9444_v11 = vpack.c.bf16 %v5720_v18, %v5718_v23  ;;  %v5739_v28 = vld [vmem:[#allocation37 + $0x210] sm:$0xff]  ;;  %v5629_v18 = vld [vmem:[#allocation35 + $0x220] sm:$0xff] }
 0xc76   :  { %6110 = vmatprep.mubr.f32.mxu1 %v12651_v8  ;;  %9403 = vmatpush1.bf16.msra.mxu1 %v9402_v57  ;;  %v5697_v57 = vld [vmem:[#allocation37 + $0xc0] sm:$0xff]  ;;  %v9432_v0 = vpack.c.bf16 %v5708_v53, %v5706_v56  ;;  %v5731_v53 = vld [vmem:[#allocation37 + $0x1d0] sm:$0xff] }
 0xc77   :  { %9405 = vmatprep.subr.bf16.mxu1 %v9404_v21  ;;  %9307 = vmatpush1.bf16.msra.mxu0 %v9306_v41  ;;  %v5699_v21 = vld [vmem:[#allocation37 + $0xd0] sm:$0xff]  ;;  %v9328_v41 = vpack.c.bf16 %v5604_v50, %v5602_v51  ;;  %v5717_v51 = vld [vmem:[#allocation37 + $0x160] sm:$0xff] }
 0xc78   :  { %9309 = vmatprep.subr.bf16.mxu0 %v9308_v30  ;;  %v5603_v30 = vld [vmem:[#allocation35 + $0x150] sm:$0xff]  ;;  %v9426_v60 = vpack.c.bf16 %v5699_v21, %v5697_v57  ;;  %v5724_v57 = vld [vmem:[#allocation37 + $0x198] sm:$0xff] }
 0xc79   :  { %7833 = vmatmul.mubr.msk.f32.gmra.mrb[80].mxu1 %vm787_vm5, %v12395_v20  ;;  %v9414_v20 = vpack.c.bf16 %v5687_v12, %v5685_v29  ;;  %v9330_v49 = vpack.c.bf16 %v5603_v30, %v5601_v24  ;;  %v5710_v29 = vld [vmem:[#allocation37 + $0x128] sm:$0xff]  ;;  %v5719_v50 = vld [vmem:[#allocation37 + $0x170] sm:$0xff]  ;;  %v5728_v24 = vld [vmem:[#allocation37 + $0x1b8] sm:$0xff] }
 0xc7a   :  { %9407 = vmatpush1.bf16.msra.mxu1 %v9406_v58  ;;  %v5701_v58 = vld [vmem:[#allocation37 + $0xe0] sm:$0xff]  ;;  %v9436_v26 = vpack.c.bf16 %v5712_v32, %v5710_v29  ;;  %v9446_v21 = vpack.c.bf16 %v5719_v50, %v5717_v51  ;;  %v5735_v32 = vld [vmem:[#allocation37 + $0x1f0] sm:$0xff]  ;;  %v5634_v51 = vld [vmem:[#allocation35 + $0x248] sm:$0xff] }
 0xc7b   :  { %9409 = vmatprep.subr.bf16.mxu1 %v9408_v40  ;;  %9311 = vmatpush1.bf16.msra.mxu0 %v9310_v52  ;;  %v5703_v40 = vld [vmem:[#allocation37 + $0xf0] sm:$0xff]  ;;  %v9332_v52 = vpack.c.bf16 %v5608_v6, %v5606_v33  ;;  %v5725_v6 = vld [vmem:[#allocation37 + $0x1a0] sm:$0xff] }
 0xc7c   :  { %9313 = vmatprep.subr.bf16.mxu0 %v9312_v45  ;;  %v5607_v45 = vld [vmem:[#allocation35 + $0x170] sm:$0xff]  ;;  %v9430_v44 = vpack.c.bf16 %v5703_v40, %v5701_v58  ;;  %v5732_v58 = vld [vmem:[#allocation37 + $0x1d8] sm:$0xff] }
 0xc7d   :  { %v9334_v12 = vpack.c.bf16 %v5607_v45, %v5605_v13  ;;  %v5622_v13 = vld [vmem:[#allocation35 + $0x1e8] sm:$0xff]  ;;  %v5624_v45 = vld [vmem:[#allocation35 + $0x1f8] sm:$0xff] }
 0xc7e   :  { %9411 = vmatpush1.bf16.msra.mxu1 %v9410_v10  ;;  %v5705_v10 = vld [vmem:[#allocation37 + $0x100] sm:$0xff] }
 0xc7f   :  { %9413 = vmatprep.subr.bf16.mxu1 %v9412_v19  ;;  %9315 = vmatpush1.bf16.msra.mxu0 %v9314_v5  ;;  %v5707_v19 = vld [vmem:[#allocation37 + $0x110] sm:$0xff]  ;;  %v9336_v5 = vpack.c.bf16 %v5612_v55, %v5610_v61  ;;  %v5734_v61 = vld [vmem:[#allocation37 + $0x1e8] sm:$0xff]  ;;  %v9348_v55 = vpack.c.bf16 %v5624_v45, %v5622_v13 }
 0xc80   :  { %9317 = vmatprep.subr.bf16.mxu0 %v9316_v3  ;;  %v5611_v3 = vld [vmem:[#allocation35 + $0x190] sm:$0xff]  ;;  %v9434_v14 = vpack.c.bf16 %v5707_v19, %v5705_v10 }
 0xc81   :  { %v9338_v7 = vpack.c.bf16 %v5611_v3, %v5609_v48  ;;  %v5623_v10 = vld [vmem:[#allocation35 + $0x1f0] sm:$0xff]  ;;  %v5626_v48 = vld [vmem:[#allocation35 + $0x208] sm:$0xff]  ;;  %v5628_v3 = vld [vmem:[#allocation35 + $0x218] sm:$0xff] }
 0xc82   :  { %9415 = vmatpush1.bf16.msra.mxu1 %v9414_v20  ;;  %v5709_v20 = vld [vmem:[#allocation37 + $0x120] sm:$0xff] }
 0xc83   :  { %9417 = vmatprep.subr.bf16.mxu1 %v9416_v4  ;;  %9319 = vmatpush1.bf16.msra.mxu0 %v9318_v16  ;;  %v5711_v4 = vld [vmem:[#allocation37 + $0x130] sm:$0xff]  ;;  %v9340_v16 = vpack.c.bf16 %v5616_v54, %v5614_v36  ;;  %v5738_v36 = vld [vmem:[#allocation37 + $0x208] sm:$0xff]  ;;  %v9352_v54 = vpack.c.bf16 %v5628_v3, %v5626_v48  ;;  %v5756_v3 = vld [vmem:[#allocation37 + $0x298] sm:$0xff] }
 0xc84   :  { %9321 = vmatprep.subr.bf16.mxu0 %v9320_v59  ;;  %v5615_v59 = vld [vmem:[#allocation35 + $0x1b0] sm:$0xff]  ;;  %v9438_v2 = vpack.c.bf16 %v5711_v4, %v5709_v20  ;;  %v5625_v20 = vld [vmem:[#allocation35 + $0x200] sm:$0xff]  ;;  %v5754_v48 = vld [vmem:[#allocation37 + $0x288] sm:$0xff] }
 0xc85   :  { %v9342_v1 = vpack.c.bf16 %v5615_v59, %v5613_v42  ;;  %v5627_v4 = vld [vmem:[#allocation35 + $0x210] sm:$0xff] }
 0xc86   :  { %9419 = vmatpush1.bf16.msra.mxu1 %v9418_v43  ;;  %v5713_v43 = vld [vmem:[#allocation37 + $0x140] sm:$0xff]  ;;  %v9354_v23 = vpack.c.bf16 %v5627_v4, %v5625_v20  ;;  %v5643_v20 = vld [vmem:[#allocation35 + $0x290] sm:$0xff] }
 0xc87   :  { %9421 = vmatprep.subr.bf16.mxu1 %v9420_v35  ;;  %9323 = vmatpush1.bf16.msra.mxu0 %v9322_v38  ;;  %v5715_v35 = vld [vmem:[#allocation37 + $0x150] sm:$0xff]  ;;  %v9344_v38 = vpack.c.bf16 %v5620_v34, %v5618_v46  ;;  %v5632_v46 = vld [vmem:[#allocation35 + $0x238] sm:$0xff]  ;;  %v5742_v34 = vld [vmem:[#allocation37 + $0x228] sm:$0xff] }
 0xc88   :  { %9325 = vmatprep.subr.bf16.mxu0 %v9324_v39  ;;  %v5619_v39 = vld [vmem:[#allocation35 + $0x1d0] sm:$0xff]  ;;  %v9442_v17 = vpack.c.bf16 %v5715_v35, %v5713_v43 }
 0xc8a   :  { %9423 = vmatpush1.bf16.msra.mxu1 %v9422_v63  ;;  %v9346_v63 = vpack.c.bf16 %v5619_v39, %v5617_v25 }
 0xc8b   :  { %9425 = vmatprep.subr.bf16.mxu1 %v9424_v37  ;;  %9327 = vmatpush1.bf16.msra.mxu0 %v9326_v62  ;;  %v5722_v37 = vld [vmem:[#allocation37 + $0x188] sm:$0xff]  ;;  %v5721_v62 = vld [vmem:[#allocation37 + $0x180] sm:$0xff] }
 0xc8c   :  { %9329 = vmatprep.subr.bf16.mxu0 %v9328_v41  ;;  %v9448_v31 = vpack.c.bf16 %v5724_v57, %v5722_v37  ;;  %v5726_v41 = vld [vmem:[#allocation37 + $0x1a8] sm:$0xff]  ;;  %v9450_v30 = vpack.c.bf16 %v5723_v22, %v5721_v62  ;;  %v5748_v57 = vld [vmem:[#allocation37 + $0x258] sm:$0xff] }
 0xc8d   :  { %v9452_v33 = vpack.c.bf16 %v5728_v24, %v5726_v41  ;;  %v5746_v37 = vld [vmem:[#allocation37 + $0x248] sm:$0xff] }
 0xc8e   :  { %9427 = vmatpush1.bf16.msra.mxu1 %v9426_v60  ;;  %v5727_v60 = vld [vmem:[#allocation37 + $0x1b0] sm:$0xff] }
 0xc8f   :  { %9429 = vmatprep.subr.bf16.mxu1 %v9428_v15  ;;  %9331 = vmatpush1.bf16.msra.mxu0 %v9330_v49  ;;  %v5730_v15 = vld [vmem:[#allocation37 + $0x1c8] sm:$0xff]  ;;  %v9454_v40 = vpack.c.bf16 %v5727_v60, %v5725_v6  ;;  %v5729_v49 = vld [vmem:[#allocation37 + $0x1c0] sm:$0xff] }
 0xc90   :  { %9333 = vmatprep.subr.bf16.mxu0 %v9332_v52  ;;  %v9456_v56 = vpack.c.bf16 %v5732_v58, %v5730_v15  ;;  %v9458_v52 = vpack.c.bf16 %v5731_v53, %v5729_v49  ;;  %v9472_v15 = vpack.c.bf16 %v5748_v57, %v5746_v37  ;;  %v5745_v58 = vld [vmem:[#allocation37 + $0x240] sm:$0xff]  ;;  %v5640_v49 = vld [vmem:[#allocation35 + $0x278] sm:$0xff]  ;;  %v5750_v53 = vld [vmem:[#allocation37 + $0x268] sm:$0xff] }
 0xc91   :  { %v5764_v37 = vld [vmem:[#allocation37 + $0x2d8] sm:$0xff] }
 0xc92   :  { %9431 = vmatpush1.bf16.msra.mxu1 %v9430_v44  ;;  %v5736_v44 = vld [vmem:[#allocation37 + $0x1f8] sm:$0xff] }
 0xc93   :  { %9433 = vmatprep.subr.bf16.mxu1 %v9432_v0  ;;  %9335 = vmatpush1.bf16.msra.mxu0 %v9334_v12  ;;  %v5621_v0 = vld [vmem:[#allocation35 + $0x1e0] sm:$0xff]  ;;  %v9460_v19 = vpack.c.bf16 %v5736_v44, %v5734_v61  ;;  %v5639_v44 = vld [vmem:[#allocation35 + $0x270] sm:$0xff] }
 0xc94   :  { %9337 = vmatprep.subr.bf16.mxu0 %v9336_v5  ;;  %v9350_v29 = vpack.c.bf16 %v5623_v10, %v5621_v0  ;;  %v5733_v12 = vld [vmem:[#allocation37 + $0x1e0] sm:$0xff] }
 0xc95   :  { %v9462_v5 = vpack.c.bf16 %v5735_v32, %v5733_v12  ;;  %v5751_v12 = vld [vmem:[#allocation37 + $0x270] sm:$0xff]  ;;  %v5642_v32 = vld [vmem:[#allocation35 + $0x288] sm:$0xff] }
 0xc96   :  { %9435 = vmatpush1.bf16.msra.mxu1 %v9434_v14  ;;  %v5740_v14 = vld [vmem:[#allocation37 + $0x218] sm:$0xff] }
 0xc97   :  { %9437 = vmatprep.subr.bf16.mxu1 %v9436_v26  ;;  %9339 = vmatpush1.bf16.msra.mxu0 %v9338_v7  ;;  %v9464_v26 = vpack.c.bf16 %v5740_v14, %v5738_v36  ;;  %v5737_v7 = vld [vmem:[#allocation37 + $0x200] sm:$0xff] }
 0xc98   :  { %9341 = vmatprep.subr.bf16.mxu0 %v9340_v16  ;;  %v5630_v16 = vld [vmem:[#allocation35 + $0x228] sm:$0xff] }
 0xc99   :  { %v9356_v25 = vpack.c.bf16 %v5632_v46, %v5630_v16  ;;  %v5755_v16 = vld [vmem:[#allocation37 + $0x290] sm:$0xff]  ;;  %v5758_v46 = vld [vmem:[#allocation37 + $0x2a8] sm:$0xff] }
 0xc9a   :  { %9439 = vmatpush1.bf16.msra.mxu1 %v9438_v2  ;;  %v5744_v2 = vld [vmem:[#allocation37 + $0x238] sm:$0xff] }
 0xc9b   :  { %9441 = vmatprep.subr.bf16.mxu1 %v9440_v9  ;;  %9343 = vmatpush1.bf16.msra.mxu0 %v9342_v1  ;;  %v9466_v1 = vpack.c.bf16 %v5739_v28, %v5737_v7  ;;  %v9468_v39 = vpack.c.bf16 %v5744_v2, %v5742_v34  ;;  %v9480_v7 = vpack.c.bf16 %v5756_v3, %v5754_v48  ;;  %v5753_v28 = vld [vmem:[#allocation37 + $0x280] sm:$0xff]  ;;  %v5760_v34 = vld [vmem:[#allocation37 + $0x2b8] sm:$0xff]  ;;  %v5659_v3 = vld [vmem:[#allocation35 + $0x310] sm:$0xff] }
 0xc9c   :  { %9345 = vmatprep.subr.bf16.mxu0 %v9344_v38  ;;  %v5631_v38 = vld [vmem:[#allocation35 + $0x230] sm:$0xff]  ;;  %v5657_v48 = vld [vmem:[#allocation35 + $0x300] sm:$0xff] }
 0xc9d   :  { %v9358_v41 = vpack.c.bf16 %v5631_v38, %v5629_v18 }
 0xc9e   :  { %9443 = vmatpush1.bf16.msra.mxu1 %v9442_v17  ;;  %v5741_v17 = vld [vmem:[#allocation37 + $0x220] sm:$0xff] }
 0xc9f   :  { %9445 = vmatprep.subr.bf16.mxu1 %v9444_v11  ;;  %9347 = vmatpush1.bf16.msra.mxu0 %v9346_v63  ;;  %v5743_v11 = vld [vmem:[#allocation37 + $0x230] sm:$0xff]  ;;  %v5636_v63 = vld [vmem:[#allocation35 + $0x258] sm:$0xff] }
 0xca0   :  { %9349 = vmatprep.subr.bf16.mxu0 %v9348_v55  ;;  %v9470_v24 = vpack.c.bf16 %v5743_v11, %v5741_v17  ;;  %v9360_v60 = vpack.c.bf16 %v5636_v63, %v5634_v51  ;;  %v5637_v55 = vld [vmem:[#allocation35 + $0x260] sm:$0xff]  ;;  %v5759_v17 = vld [vmem:[#allocation37 + $0x2b0] sm:$0xff]  ;;  %v5650_v11 = vld [vmem:[#allocation35 + $0x2c8] sm:$0xff] }
 0xca1   :  { %v5762_v63 = vld [vmem:[#allocation37 + $0x2c8] sm:$0xff] }
 0xca2   :  { %9447 = vmatpush1.bf16.msra.mxu1 %v9446_v21 }
 0xca3   :  { %9449 = vmatprep.subr.bf16.mxu1 %v9448_v31  ;;  %9351 = vmatpush1.bf16.msra.mxu0 %v9350_v29  ;;  %v5749_v29 = vld [vmem:[#allocation37 + $0x260] sm:$0xff] }
 0xca4   :  { %9353 = vmatprep.subr.bf16.mxu0 %v9352_v54  ;;  %v9366_v54 = vpack.c.bf16 %v5639_v44, %v5637_v55  ;;  %v9478_v14 = vpack.c.bf16 %v5751_v12, %v5749_v29  ;;  %v5765_v44 = vld [vmem:[#allocation37 + $0x2e0] sm:$0xff]  ;;  %v5770_v29 = vld [vmem:[#allocation37 + $0x308] sm:$0xff]  ;;  %v5772_v12 = vld [vmem:[#allocation37 + $0x318] sm:$0xff] }
 0xca6   :  { %9451 = vmatpush1.bf16.msra.mxu1 %v9450_v30  ;;  %v5633_v30 = vld [vmem:[#allocation35 + $0x240] sm:$0xff] }
 0xca7   :  { %9453 = vmatprep.subr.bf16.mxu1 %v9452_v33  ;;  %v5635_v33 = vld [vmem:[#allocation35 + $0x250] sm:$0xff] }
 0xca8   :  { %v9362_v45 = vpack.c.bf16 %v5635_v33, %v5633_v30  ;;  %v9488_v33 = vpack.c.bf16 %v5764_v37, %v5762_v63  ;;  %v5779_v63 = vld [vmem:[#allocation37 + $0x350] sm:$0xff]  ;;  %v5670_v37 = vld [vmem:[#allocation35 + $0x368] sm:$0xff] }
 0xcaa   :  { %9455 = vmatpush1.bf16.msra.mxu1 %v9454_v40  ;;  %v5747_v40 = vld [vmem:[#allocation37 + $0x250] sm:$0xff] }
 0xcab   :  { %9457 = vmatprep.subr.bf16.mxu1 %v9456_v56  ;;  %v5638_v56 = vld [vmem:[#allocation35 + $0x268] sm:$0xff]  ;;  %v9474_v61 = vpack.c.bf16 %v5747_v40, %v5745_v58  ;;  %v5656_v40 = vld [vmem:[#allocation35 + $0x2f8] sm:$0xff] }
 0xcac   :  { %v9364_v10 = vpack.c.bf16 %v5640_v49, %v5638_v56  ;;  %v5766_v56 = vld [vmem:[#allocation37 + $0x2e8] sm:$0xff]  ;;  %v5768_v49 = vld [vmem:[#allocation37 + $0x2f8] sm:$0xff] }
 0xcad   :  { %v9492_v55 = vpack.c.bf16 %v5768_v49, %v5766_v56  ;;  %v6451_v56 = vld [vmem:[#allocation38 + $0x40] sm:$0xff]  ;;  %v6446_v49 = vld [vmem:[#allocation38 + $0x18] sm:$0xff] }
 0xcae   :  { %9459 = vmatpush1.bf16.msra.mxu1 %v9458_v52  ;;  %v5752_v52 = vld [vmem:[#allocation37 + $0x278] sm:$0xff] }
 0xcaf   :  { %9461 = vmatprep.subr.bf16.mxu1 %v9460_v19  ;;  %v9476_v19 = vpack.c.bf16 %v5752_v52, %v5750_v53 }
 0xcb2   :  { %9463 = vmatpush1.bf16.msra.mxu1 %v9462_v5  ;;  %v5644_v5 = vld [vmem:[#allocation35 + $0x298] sm:$0xff] }
 0xcb3   :  { %9465 = vmatprep.subr.bf16.mxu1 %v9464_v26  ;;  %v5641_v26 = vld [vmem:[#allocation35 + $0x280] sm:$0xff] }
 0xd36   :  { %v5869_v27 = vpop.f32.mrb[70].mxu1 }
 0xd37   :  { %v6029_v42 = vpop.f32.mrb[98].mxu0  ;;  %v5871_v59 = vpop.f32.mrb[71].mxu1 }
 0xd38   :  { %v6117_v9 = vmax.f32 %v5869_v27, %v6029_v42  ;;  %v6031_v43 = vpop.f32.mrb[99].mxu0  ;;  %v9368_v27 = vpack.c.bf16 %v5644_v5, %v5642_v32  ;;  %v5646_v42 = vld [vmem:[#allocation35 + $0x2a8] sm:$0xff] }
 0xd39   :  { %v6118_v35 = vmax.f32 %v5871_v59, %v6031_v43  ;;  %v5648_v59 = vld [vmem:[#allocation35 + $0x2b8] sm:$0xff]  ;;  %v9482_v43 = vpack.c.bf16 %v5755_v16, %v5753_v28  ;;  %v9386_v28 = vpack.c.bf16 %v5659_v3, %v5657_v48  ;;  %v6457_v3 = vld [vmem:[#allocation38 + $0x70] sm:$0xff] }
 0xd3a   :  { %v5875_v50 = vpop.f32.mrb[72].mxu1  ;;  %v9372_v38 = vpack.c.bf16 %v5648_v59, %v5646_v42  ;;  %v5661_v42 = vld [vmem:[#allocation35 + $0x320] sm:$0xff]  ;;  %v5663_v59 = vld [vmem:[#allocation35 + $0x330] sm:$0xff] }
 0xd3b   :  { %6195 = vmatprep.mubr.f32.mxu0 %v6118_v35  ;;  %6349 = vmatprep.mubr.f32.mxu1 %v6118_v35  ;;  %v5877_v21 = vpop.f32.mrb[73].mxu1  ;;  %v6035_v31 = vpop.f32.mrb[100].mxu0  ;;  %v5645_v35 = vld [vmem:[#allocation35 + $0x2a0] sm:$0xff] }
 0xd3c   :  { %6196 = vmatmul.mubr.f32.vlgmr.msra.gmra.mrb[102].mxu0 %v6117_v9  ;;  %6350 = vmatmul.mubr.f32.vlgmr.msra.gmra.mrb[82].mxu1 %v6117_v9  ;;  %v6121_v62 = vmax.f32 %v5875_v50, %v6035_v31  ;;  %v6037_v22 = vpop.f32.mrb[101].mxu0  ;;  %v9370_v9 = vpack.c.bf16 %v5643_v20, %v5641_v26  ;;  %v5652_v50 = vld [vmem:[#allocation35 + $0x2d8] sm:$0xff]  ;;  %v5771_v26 = vld [vmem:[#allocation37 + $0x310] sm:$0xff]  ;;  %v5662_v20 = vld [vmem:[#allocation35 + $0x328] sm:$0xff] }
 0xd3d   :  { %9355 = vmatpush1.bf16.msra.mxu0 %v9354_v23  ;;  %9467 = vmatpush1.bf16.msra.mxu1 %v9466_v1  ;;  %v6122_v6 = vmax.f32 %v5877_v21, %v6037_v22  ;;  %v5647_v23 = vld [vmem:[#allocation35 + $0x2b0] sm:$0xff]  ;;  %v9376_v30 = vpack.c.bf16 %v5652_v50, %v5650_v11  ;;  %v5777_v50 = vld [vmem:[#allocation37 + $0x340] sm:$0xff] }
 0xd3e   :  { %9357 = vmatprep.subr.bf16.mxu0 %v9356_v25  ;;  %9469 = vmatprep.subr.bf16.mxu1 %v9468_v39  ;;  %v9484_v25 = vpack.c.bf16 %v5760_v34, %v5758_v46  ;;  %v5757_v39 = vld [vmem:[#allocation37 + $0x2a0] sm:$0xff]  ;;  %v9374_v21 = vpack.c.bf16 %v5647_v23, %v5645_v35  ;;  %v5651_v22 = vld [vmem:[#allocation35 + $0x2d0] sm:$0xff]  ;;  %v5668_v35 = vld [vmem:[#allocation35 + $0x358] sm:$0xff] }
 0xd3f   :  { %6201 = vmatprep.mubr.f32.mxu0 %v6122_v6  ;;  %6355 = vmatprep.mubr.f32.mxu1 %v6122_v6  ;;  %v9486_v31 = vpack.c.bf16 %v5759_v17, %v5757_v39  ;;  %v5761_v6 = vld [vmem:[#allocation37 + $0x2c0] sm:$0xff]  ;;  %v5778_v23 = vld [vmem:[#allocation37 + $0x348] sm:$0xff]  ;;  %v5667_v17 = vld [vmem:[#allocation35 + $0x350] sm:$0xff] }
 0xd40   :  { %v5946_v13 = vpop.f32.mrb[74].mxu1  ;;  %6202 = vmatmul.mubr.f32.gmra.mrb[104].mxu0 %v6121_v62  ;;  %6356 = vmatmul.mubr.f32.gmra.mrb[84].mxu1 %v6121_v62  ;;  %v5649_v62 = vld [vmem:[#allocation35 + $0x2c0] sm:$0xff] }
 0xd41   :  { %9359 = vmatpush1.bf16.msra.mxu0 %v9358_v41  ;;  %9471 = vmatpush1.bf16.msra.mxu1 %v9470_v24  ;;  %v5948_v0 = vpop.f32.mrb[75].mxu1  ;;  %v9378_v53 = vpack.c.bf16 %v5651_v22, %v5649_v62  ;;  %v5665_v39 = vld [vmem:[#allocation35 + $0x340] sm:$0xff]  ;;  %v9506_v22 = vpack.c.bf16 %v5779_v63, %v5777_v50  ;;  %v6494_v50 = vld [vmem:[#allocation38 + $0x198] sm:$0xff]  ;;  %v6500_v63 = vld [vmem:[#allocation38 + $0x1c8] sm:$0xff] }
 0xd42   :  { %9361 = vmatprep.subr.bf16.mxu0 %v9360_v60  ;;  %9473 = vmatprep.subr.bf16.mxu1 %v9472_v15  ;;  %v5763_v60 = vld [vmem:[#allocation37 + $0x2d0] sm:$0xff]  ;;  %v5654_v15 = vld [vmem:[#allocation35 + $0x2e8] sm:$0xff]  ;;  %v9394_v62 = vpack.c.bf16 %v5667_v17, %v5665_v39 }
 0xd43   :  { %v9490_v52 = vpack.c.bf16 %v5763_v60, %v5761_v6  ;;  %v5781_v60 = vld [vmem:[#allocation37 + $0x360] sm:$0xff]  ;;  %v6492_v39 = vld [vmem:[#allocation38 + $0x188] sm:$0xff] }
 0xd44   :  { %v5952_v36 = vpop.f32.mrb[76].mxu1 }
 0xd45   :  { %9363 = vmatpush1.bf16.msra.mxu0 %v9362_v45  ;;  %9475 = vmatpush1.bf16.msra.mxu1 %v9474_v61  ;;  %v5954_v4 = vpop.f32.mrb[77].mxu1  ;;  %v5655_v45 = vld [vmem:[#allocation35 + $0x2f0] sm:$0xff]  ;;  %v9380_v61 = vpack.c.bf16 %v5656_v40, %v5654_v15  ;;  %v6444_v40 = vld [vmem:[#allocation38 + $0x8] sm:$0xff] }
 0xd46   :  { %9365 = vmatprep.subr.bf16.mxu0 %v9364_v10  ;;  %9477 = vmatprep.subr.bf16.mxu1 %v9476_v19  ;;  %v5658_v10 = vld [vmem:[#allocation35 + $0x308] sm:$0xff]  ;;  %v5660_v19 = vld [vmem:[#allocation35 + $0x318] sm:$0xff]  ;;  %v5783_v15 = vld [vmem:[#allocation37 + $0x370] sm:$0xff] }
 0xd48   :  { %v6106_v2 = vpop.f32.mrb[78].mxu1 }
 0xd49   :  { %9367 = vmatpush1.bf16.msra.mxu0 %v9366_v54  ;;  %9479 = vmatpush1.bf16.msra.mxu1 %v9478_v14  ;;  %v12420_v1 = vmax.f32 %v5946_v13, %v6106_v2  ;;  %v6108_v18 = vpop.f32.mrb[79].mxu1  ;;  %v5653_v13 = vld [vmem:[#allocation35 + $0x2e0] sm:$0xff]  ;;  %v9496_v54 = vpack.c.bf16 %v5772_v12, %v5770_v29  ;;  %v6465_v29 = vld [vmem:[#allocation38 + $0xb0] sm:$0xff]  ;;  %v6460_v12 = vld [vmem:[#allocation38 + $0x88] sm:$0xff] }
 0xd4a   :  { %9369 = vmatprep.subr.bf16.mxu0 %v9368_v27  ;;  %9481 = vmatprep.subr.bf16.mxu1 %v9480_v7  ;;  %v6120_v51 = vmax.f32 %v5948_v0, %v6108_v18  ;;  %v5767_v0 = vld [vmem:[#allocation37 + $0x2f0] sm:$0xff]  ;;  %v9382_v32 = vpack.c.bf16 %v5655_v45, %v5653_v13  ;;  %v5769_v14 = vld [vmem:[#allocation37 + $0x300] sm:$0xff]  ;;  %v5774_v27 = vld [vmem:[#allocation37 + $0x328] sm:$0xff]  ;;  %v9510_v13 = vpack.c.bf16 %v5783_v15, %v5781_v60 }
 0xd4b   :  { %v9494_v5 = vpack.c.bf16 %v5767_v0, %v5765_v44  ;;  %v5776_v7 = vld [vmem:[#allocation37 + $0x338] sm:$0xff]  ;;  %v9498_v16 = vpack.c.bf16 %v5771_v26, %v5769_v14  ;;  %v5773_v2 = vld [vmem:[#allocation37 + $0x320] sm:$0xff]  ;;  %v9512_v45 = vpack.c.bf16 %v6451_v56, %v6444_v40  ;;  %v6445_v0 = vld [vmem:[#allocation38 + $0x10] sm:$0xff] }
 0xd4c   :  { %v6112_v57 = vpop.f32.mrb[80].mxu1  ;;  %7834 = vmatprep.mubr.msk.f32.mxu0 %vm1727_vm6, %v6120_v51  ;;  %7836 = vmatprep.mubr.msk.f32.mxu1 %vm1727_vm6, %v6120_v51  ;;  %v9500_v34 = vpack.c.bf16 %v5776_v7, %v5774_v27  ;;  %v5780_v18 = vld [vmem:[#allocation37 + $0x358] sm:$0xff]  ;;  %v6459_v26 = vld [vmem:[#allocation38 + $0x80] sm:$0xff]  ;;  %v6521_v15 = vld [vmem:[#allocation38 + $0x270] sm:$0xff] }
 0xd4d   :  { %9371 = vmatpush1.bf16.msra.mxu0 %v9370_v9  ;;  %9483 = vmatpush1.bf16.msra.mxu1 %v9482_v43  ;;  %v12424_v41 = vmax.f32 %v5952_v36, %v6112_v57  ;;  %v6114_v24 = vpop.f32.mrb[81].mxu1  ;;  %v9384_v36 = vpack.c.bf16 %v5660_v19, %v5658_v10  ;;  %v5775_v9 = vld [vmem:[#allocation37 + $0x330] sm:$0xff]  ;;  %v5666_v43 = vld [vmem:[#allocation35 + $0x348] sm:$0xff]  ;;  %v9504_v51 = vpack.c.bf16 %v5780_v18, %v5778_v23  ;;  %v5672_v57 = vld [vmem:[#allocation35 + $0x378] sm:$0xff] }
 0xd4e   :  { %9373 = vmatprep.subr.bf16.mxu0 %v9372_v38  ;;  %9485 = vmatprep.subr.bf16.mxu1 %v9484_v25  ;;  %v12426_v58 = vmax.f32 %v5954_v4, %v6114_v24  ;;  %v5664_v4 = vld [vmem:[#allocation35 + $0x338] sm:$0xff]  ;;  %v9390_v38 = vpack.c.bf16 %v5663_v59, %v5661_v42  ;;  %v9502_v25 = vpack.c.bf16 %v5775_v9, %v5773_v2  ;;  %v5669_v24 = vld [vmem:[#allocation35 + $0x360] sm:$0xff]  ;;  %v6452_v10 = vld [vmem:[#allocation38 + $0x48] sm:$0xff] }
 0xd4f   :  { %v9388_v46 = vpack.c.bf16 %v5664_v4, %v5662_v20  ;;  %v9392_v11 = vpack.c.bf16 %v5668_v35, %v5666_v43  ;;  %v6450_v44 = vld [vmem:[#allocation38 + $0x38] sm:$0xff]  ;;  %v9570_v48 = vpack.c.bf16 %v6452_v10, %v6445_v0  ;;  %v6472_v4 = vld [vmem:[#allocation38 + $0xe8] sm:$0xff]  ;;  %v6479_v27 = vld [vmem:[#allocation38 + $0x120] sm:$0xff] }
 0xd50   :  { %v6458_v19 = vld [vmem:[#allocation38 + $0x78] sm:$0xff]  ;;  %v6471_v59 = vld [vmem:[#allocation38 + $0xe0] sm:$0xff]  ;;  %v6480_v9 = vld [vmem:[#allocation38 + $0x128] sm:$0xff] }
 0xd51   :  { %9375 = vmatpush1.bf16.msra.mxu0 %v9374_v21  ;;  %9487 = vmatpush1.bf16.msra.mxu1 %v9486_v31  ;;  %v5782_v21 = vld [vmem:[#allocation37 + $0x368] sm:$0xff]  ;;  %v5784_v31 = vld [vmem:[#allocation37 + $0x378] sm:$0xff]  ;;  %v6493_v35 = vld [vmem:[#allocation38 + $0x190] sm:$0xff] }
 0xd52   :  { %9377 = vmatprep.subr.bf16.mxu0 %v9376_v30  ;;  %9489 = vmatprep.subr.bf16.mxu1 %v9488_v33  ;;  %v5671_v30 = vld [vmem:[#allocation35 + $0x370] sm:$0xff]  ;;  %v9396_v33 = vpack.c.bf16 %v5672_v57, %v5670_v37  ;;  %v9508_v6 = vpack.c.bf16 %v5784_v31, %v5782_v21  ;;  %v6466_v20 = vld [vmem:[#allocation38 + $0xb8] sm:$0xff]  ;;  %v6488_v23 = vld [vmem:[#allocation38 + $0x168] sm:$0xff] }
 0xd53   :  { %v6474_v7 = vld [vmem:[#allocation38 + $0xf8] sm:$0xff]  ;;  %v9574_v42 = vpack.c.bf16 %v6466_v20, %v6459_v26  ;;  %v6507_v37 = vld [vmem:[#allocation38 + $0x200] sm:$0xff]  ;;  %v6509_v21 = vld [vmem:[#allocation38 + $0x210] sm:$0xff] }
 0xd54   :  { %v6486_v43 = vld [vmem:[#allocation38 + $0x158] sm:$0xff]  ;;  %v6516_v40 = vld [vmem:[#allocation38 + $0x248] sm:$0xff]  ;;  %v6523_v56 = vld [vmem:[#allocation38 + $0x280] sm:$0xff] }
 0xd55   :  { %9379 = vmatpush1.bf16.msra.mxu0 %v9378_v53  ;;  %9491 = vmatpush1.bf16.msra.mxu1 %v9490_v52  ;;  %v6453_v53 = vld [vmem:[#allocation38 + $0x50] sm:$0xff]  ;;  %v9398_v52 = vpack.c.bf16 %v5671_v30, %v5669_v24  ;;  %v9524_v17 = vpack.c.bf16 %v6493_v35, %v6486_v43  ;;  %v6502_v57 = vld [vmem:[#allocation38 + $0x1d8] sm:$0xff]  ;;  %v9528_v24 = vpack.c.bf16 %v6507_v37, %v6500_v63  ;;  %v6528_v0 = vld [vmem:[#allocation38 + $0x2a8] sm:$0xff] }
 0xd56   :  { %9381 = vmatprep.subr.bf16.mxu0 %v9380_v61  ;;  %9493 = vmatprep.subr.bf16.mxu1 %v9492_v55  ;;  %v9568_v61 = vpack.c.bf16 %v6453_v53, %v6446_v49  ;;  %v6443_v55 = vld [vmem:[#allocation38] sm:$0xff]  ;;  %v9584_v30 = vpack.c.bf16 %v6509_v21, %v6502_v57  ;;  %v6514_v60 = vld [vmem:[#allocation38 + $0x238] sm:$0xff]  ;;  %v6549_v20 = vld [vmem:[#allocation38 + $0x350] sm:$0xff] }
 0xd57   :  { %v6535_v10 = vld [vmem:[#allocation38 + $0x2e0] sm:$0xff]  ;;  %v6542_v26 = vld [vmem:[#allocation38 + $0x318] sm:$0xff]  ;;  %v6565_v35 = vld [vmem:[#allocation38 + $0x3d0] sm:$0xff] }
 0xd58   :  { %v6558_v43 = vld [vmem:[#allocation38 + $0x398] sm:$0xff]  ;;  %v6572_v63 = vld [vmem:[#allocation38 + $0x408] sm:$0xff]  ;;  %v6579_v37 = vld [vmem:[#allocation38 + $0x440] sm:$0xff] }
 0xd59   :  { %9383 = vmatpush1.bf16.msra.mxu0 %v9382_v32  ;;  %9495 = vmatpush1.bf16.msra.mxu1 %v9494_v5  ;;  %v6467_v32 = vld [vmem:[#allocation38 + $0xc0] sm:$0xff]  ;;  %v9514_v5 = vpack.c.bf16 %v6450_v44, %v6443_v55  ;;  %v6522_v44 = vld [vmem:[#allocation38 + $0x278] sm:$0xff] }
 0xd5a   :  { %9385 = vmatprep.subr.bf16.mxu0 %v9384_v36  ;;  %9497 = vmatprep.subr.bf16.mxu1 %v9496_v54  ;;  %v6464_v36 = vld [vmem:[#allocation38 + $0xa8] sm:$0xff]  ;;  %v9516_v54 = vpack.c.bf16 %v6465_v29, %v6458_v19  ;;  %v9572_v14 = vpack.c.bf16 %v6467_v32, %v6460_v12  ;;  %v6515_v55 = vld [vmem:[#allocation38 + $0x240] sm:$0xff]  ;;  %v6530_v19 = vld [vmem:[#allocation38 + $0x2b8] sm:$0xff] }
 0xd5b   :  { %v6537_v29 = vld [vmem:[#allocation38 + $0x2f0] sm:$0xff]  ;;  %v9590_v32 = vpack.c.bf16 %v6522_v44, %v6515_v55  ;;  %v6598_v55 = vld [vmem:[#allocation38 + $0x4d8] sm:$0xff] }
 0xd5c   :  { %v6605_v44 = vld [vmem:[#allocation38 + $0x510] sm:$0xff] }
 0xd5d   :  { %9387 = vmatpush1.bf16.msra.mxu0 %v9386_v28  ;;  %9499 = vmatpush1.bf16.msra.mxu1 %v9498_v16  ;;  %v6481_v28 = vld [vmem:[#allocation38 + $0x130] sm:$0xff]  ;;  %v9518_v16 = vpack.c.bf16 %v6464_v36, %v6457_v3  ;;  %v9536_v3 = vpack.c.bf16 %v6535_v10, %v6528_v0  ;;  %v9592_v36 = vpack.c.bf16 %v6537_v29, %v6530_v19  ;;  %v6600_v0 = vld [vmem:[#allocation38 + $0x4e8] sm:$0xff]  ;;  %v6607_v10 = vld [vmem:[#allocation38 + $0x520] sm:$0xff] }
 0xd5e   :  { %9389 = vmatprep.subr.bf16.mxu0 %v9388_v46  ;;  %9501 = vmatprep.subr.bf16.mxu1 %v9500_v34  ;;  %v6478_v46 = vld [vmem:[#allocation38 + $0x118] sm:$0xff]  ;;  %v9520_v34 = vpack.c.bf16 %v6479_v27, %v6472_v4  ;;  %v9576_v2 = vpack.c.bf16 %v6481_v28, %v6474_v7  ;;  %v6544_v4 = vld [vmem:[#allocation38 + $0x328] sm:$0xff]  ;;  %v6551_v27 = vld [vmem:[#allocation38 + $0x360] sm:$0xff] }
 0xd5f   :  { %v9522_v18 = vpack.c.bf16 %v6478_v46, %v6471_v59  ;;  %v9540_v59 = vpack.c.bf16 %v6549_v20, %v6542_v26  ;;  %v9596_v46 = vpack.c.bf16 %v6551_v27, %v6544_v4  ;;  %v6614_v26 = vld [vmem:[#allocation38 + $0x558] sm:$0xff]  ;;  %v6621_v20 = vld [vmem:[#allocation38 + $0x590] sm:$0xff] }
 0xd61   :  { %9391 = vmatpush1.bf16.msra.mxu0 %v9390_v38  ;;  %9503 = vmatpush1.bf16.msra.mxu1 %v9502_v25  ;;  %v6485_v25 = vld [vmem:[#allocation38 + $0x150] sm:$0xff] }
 0xd62   :  { %9393 = vmatprep.subr.bf16.mxu0 %v9392_v11  ;;  %9505 = vmatprep.subr.bf16.mxu1 %v9504_v51  ;;  %v6487_v51 = vld [vmem:[#allocation38 + $0x160] sm:$0xff] }
 0xd63   :  { %v9582_v31 = vpack.c.bf16 %v6494_v50, %v6487_v51  ;;  %v6570_v51 = vld [vmem:[#allocation38 + $0x3f8] sm:$0xff]  ;;  %v6577_v50 = vld [vmem:[#allocation38 + $0x430] sm:$0xff] }
 0xd65   :  { %9395 = vmatpush1.bf16.msra.mxu0 %v9394_v62  ;;  %9507 = vmatpush1.bf16.msra.mxu1 %v9506_v22  ;;  %v6499_v62 = vld [vmem:[#allocation38 + $0x1c0] sm:$0xff]  ;;  %v6506_v22 = vld [vmem:[#allocation38 + $0x1f8] sm:$0xff] }
 0xd66   :  { %9397 = vmatprep.subr.bf16.mxu0 %v9396_v33  ;;  %9509 = vmatprep.subr.bf16.mxu1 %v9508_v6  ;;  %v6501_v33 = vld [vmem:[#allocation38 + $0x1d0] sm:$0xff]  ;;  %v6508_v6 = vld [vmem:[#allocation38 + $0x208] sm:$0xff]  ;;  %v9530_v49 = vpack.c.bf16 %v6506_v22, %v6499_v62  ;;  %v9548_v62 = vpack.c.bf16 %v6577_v50, %v6570_v51  ;;  %v9604_v22 = vpack.c.bf16 %v6579_v37, %v6572_v63  ;;  %v6455_v50 = vld [vmem:[#allocation38 + $0x60] sm:$0xff] }
 0xd67   :  { %v9586_v53 = vpack.c.bf16 %v6508_v6, %v6501_v33  ;;  %v6584_v33 = vld [vmem:[#allocation38 + $0x468] sm:$0xff]  ;;  %v6591_v6 = vld [vmem:[#allocation38 + $0x4a0] sm:$0xff] }
 0xd68   :  { %v6448_v51 = vld [vmem:[#allocation38 + $0x28] sm:$0xff]  ;;  %v6447_v37 = vld [vmem:[#allocation38 + $0x20] sm:$0xff] }
 0xd69   :  { %9399 = vmatpush1.bf16.msra.mxu0 %v9398_v52  ;;  %9511 = vmatpush1.bf16.msra.mxu1 %v9510_v13  ;;  %v6513_v52 = vld [vmem:[#allocation38 + $0x230] sm:$0xff]  ;;  %v6520_v13 = vld [vmem:[#allocation38 + $0x268] sm:$0xff]  ;;  %v9624_v63 = vpack.c.bf16 %v6455_v50, %v6448_v51  ;;  %v6519_v51 = vld [vmem:[#allocation38 + $0x260] sm:$0xff] }
 0xd6a   :  { %9513 = vmatprep.subr.bf16.mxu0 %v9512_v45  ;;  %9569 = vmatprep.subr.bf16.mxu1 %v9568_v61  ;;  %v9532_v45 = vpack.c.bf16 %v6521_v15, %v6514_v60  ;;  %v9588_v61 = vpack.c.bf16 %v6523_v56, %v6516_v40  ;;  %v9534_v12 = vpack.c.bf16 %v6520_v13, %v6513_v52  ;;  %v6586_v60 = vld [vmem:[#allocation38 + $0x478] sm:$0xff]  ;;  %v6593_v15 = vld [vmem:[#allocation38 + $0x4b0] sm:$0xff] }
 0xd6b   :  { %v9552_v52 = vpack.c.bf16 %v6591_v6, %v6584_v33  ;;  %v9608_v13 = vpack.c.bf16 %v6593_v15, %v6586_v60  ;;  %v6526_v50 = vld [vmem:[#allocation38 + $0x298] sm:$0xff] }
 0xd6c   :  { %6273 = vmatmul.mubr.f32.vlgmr.msra.gmra.mrb[102].mxu0 %v12420_v1  ;;  %6427 = vmatmul.mubr.f32.vlgmr.msra.gmra.mrb[82].mxu1 %v12420_v1  ;;  %v6473_v1 = vld [vmem:[#allocation38 + $0xf0] sm:$0xff] }
 0xd6d   :  { %7835 = vmatprep.mubr.msk.f32.mxu0 %vm1727_vm6, %v12426_v58  ;;  %7837 = vmatprep.mubr.msk.f32.mxu1 %vm1727_vm6, %v12426_v58  ;;  %v6495_v58 = vld [vmem:[#allocation38 + $0x1a0] sm:$0xff]  ;;  %v9578_v38 = vpack.c.bf16 %v6480_v9, %v6473_v1  ;;  %v6556_v1 = vld [vmem:[#allocation38 + $0x388] sm:$0xff] }
 0xd6e   :  { %9515 = vmatpush1.bf16.msra.mxu0 %v9514_v5  ;;  %9571 = vmatpush1.bf16.msra.mxu1 %v9570_v48  ;;  %v9580_v11 = vpack.c.bf16 %v6495_v58, %v6488_v23  ;;  %v6527_v5 = vld [vmem:[#allocation38 + $0x2a0] sm:$0xff]  ;;  %v6534_v48 = vld [vmem:[#allocation38 + $0x2d8] sm:$0xff] }
 0xd6f   :  { %9517 = vmatprep.subr.bf16.mxu0 %v9516_v54  ;;  %9573 = vmatprep.subr.bf16.mxu1 %v9572_v14  ;;  %v6529_v54 = vld [vmem:[#allocation38 + $0x2b0] sm:$0xff]  ;;  %v6536_v14 = vld [vmem:[#allocation38 + $0x2e8] sm:$0xff]  ;;  %v9538_v7 = vpack.c.bf16 %v6534_v48, %v6527_v5  ;;  %v6563_v9 = vld [vmem:[#allocation38 + $0x3c0] sm:$0xff]  ;;  %v9556_v5 = vpack.c.bf16 %v6605_v44, %v6598_v55  ;;  %v9612_v48 = vpack.c.bf16 %v6607_v10, %v6600_v0 }
 0xd70   :  { %6279 = vmatmul.mubr.f32.gmra.mrb[104].mxu0 %v12424_v41  ;;  %6433 = vmatmul.mubr.f32.gmra.mrb[84].mxu1 %v12424_v41  ;;  %v9526_v41 = vpack.c.bf16 %v6492_v39, %v6485_v25  ;;  %v9594_v28 = vpack.c.bf16 %v6536_v14, %v6529_v54  ;;  %v9544_v25 = vpack.c.bf16 %v6563_v9, %v6556_v1  ;;  %v6612_v54 = vld [vmem:[#allocation38 + $0x548] sm:$0xff]  ;;  %v6619_v14 = vld [vmem:[#allocation38 + $0x580] sm:$0xff]  ;;  %v6626_v1 = vld [vmem:[#allocation38 + $0x5b8] sm:$0xff] }
 0xd71   :  { %v9600_v39 = vpack.c.bf16 %v6565_v35, %v6558_v43  ;;  %v6633_v9 = vld [vmem:[#allocation38 + $0x5f0] sm:$0xff]  ;;  %v6628_v43 = vld [vmem:[#allocation38 + $0x5c8] sm:$0xff] }
 0xd72   :  { %9519 = vmatpush1.bf16.msra.mxu0 %v9518_v16  ;;  %9575 = vmatpush1.bf16.msra.mxu1 %v9574_v42  ;;  %v6541_v16 = vld [vmem:[#allocation38 + $0x310] sm:$0xff]  ;;  %v6548_v42 = vld [vmem:[#allocation38 + $0x348] sm:$0xff]  ;;  %v9564_v35 = vpack.c.bf16 %v6633_v9, %v6626_v1  ;;  %v6503_v1 = vld [vmem:[#allocation38 + $0x1e0] sm:$0xff] }
 0xd73   :  { %9521 = vmatprep.subr.bf16.mxu0 %v9520_v34  ;;  %9577 = vmatprep.subr.bf16.mxu1 %v9576_v2  ;;  %v6543_v34 = vld [vmem:[#allocation38 + $0x320] sm:$0xff]  ;;  %v6550_v2 = vld [vmem:[#allocation38 + $0x358] sm:$0xff]  ;;  %v9542_v23 = vpack.c.bf16 %v6548_v42, %v6541_v16  ;;  %v9616_v16 = vpack.c.bf16 %v6621_v20, %v6614_v26  ;;  %v6476_v10 = vld [vmem:[#allocation38 + $0x108] sm:$0xff] }
 0xd74   :  { %v9598_v58 = vpack.c.bf16 %v6550_v2, %v6543_v34  ;;  %v6618_v42 = vld [vmem:[#allocation38 + $0x578] sm:$0xff]  ;;  %v6497_v26 = vld [vmem:[#allocation38 + $0x1b0] sm:$0xff] }
 0xd76   :  { %9523 = vmatpush1.bf16.msra.mxu0 %v9522_v18  ;;  %9579 = vmatpush1.bf16.msra.mxu1 %v9578_v38  ;;  %v6555_v18 = vld [vmem:[#allocation38 + $0x380] sm:$0xff]  ;;  %v6562_v38 = vld [vmem:[#allocation38 + $0x3b8] sm:$0xff] }
 0xd77   :  { %9525 = vmatprep.subr.bf16.mxu0 %v9524_v17  ;;  %9581 = vmatprep.subr.bf16.mxu1 %v9580_v11  ;;  %v6557_v17 = vld [vmem:[#allocation38 + $0x390] sm:$0xff]  ;;  %v6564_v11 = vld [vmem:[#allocation38 + $0x3c8] sm:$0xff]  ;;  %v9546_v57 = vpack.c.bf16 %v6562_v38, %v6555_v18 }
 0xd78   :  { %v9602_v21 = vpack.c.bf16 %v6564_v11, %v6557_v17  ;;  %v6632_v18 = vld [vmem:[#allocation38 + $0x5e8] sm:$0xff]  ;;  %v6634_v17 = vld [vmem:[#allocation38 + $0x5f8] sm:$0xff] }
 0xd7a   :  { %9527 = vmatpush1.bf16.msra.mxu0 %v9526_v41  ;;  %9583 = vmatpush1.bf16.msra.mxu1 %v9582_v31  ;;  %v6569_v41 = vld [vmem:[#allocation38 + $0x3f0] sm:$0xff]  ;;  %v6576_v31 = vld [vmem:[#allocation38 + $0x428] sm:$0xff] }
 0xd7b   :  { %9529 = vmatprep.subr.bf16.mxu0 %v9528_v24  ;;  %9585 = vmatprep.subr.bf16.mxu1 %v9584_v30  ;;  %v6571_v24 = vld [vmem:[#allocation38 + $0x400] sm:$0xff]  ;;  %v6578_v30 = vld [vmem:[#allocation38 + $0x438] sm:$0xff]  ;;  %v9550_v40 = vpack.c.bf16 %v6576_v31, %v6569_v41  ;;  %v6456_v41 = vld [vmem:[#allocation38 + $0x68] sm:$0xff] }
 0xd7c   :  { %v9606_v56 = vpack.c.bf16 %v6578_v30, %v6571_v24  ;;  %v6469_v24 = vld [vmem:[#allocation38 + $0xd0] sm:$0xff] }
 0xd7e   :  { %9531 = vmatpush1.bf16.msra.mxu0 %v9530_v49  ;;  %9587 = vmatpush1.bf16.msra.mxu1 %v9586_v53  ;;  %v6583_v49 = vld [vmem:[#allocation38 + $0x460] sm:$0xff]  ;;  %v6590_v53 = vld [vmem:[#allocation38 + $0x498] sm:$0xff] }
 0xd7f   :  { %9533 = vmatprep.subr.bf16.mxu0 %v9532_v45  ;;  %9589 = vmatprep.subr.bf16.mxu1 %v9588_v61  ;;  %v6585_v45 = vld [vmem:[#allocation38 + $0x470] sm:$0xff]  ;;  %v6592_v61 = vld [vmem:[#allocation38 + $0x4a8] sm:$0xff]  ;;  %v9554_v19 = vpack.c.bf16 %v6590_v53, %v6583_v49 }
 0xd80   :  { %v9610_v29 = vpack.c.bf16 %v6592_v61, %v6585_v45  ;;  %v6468_v53 = vld [vmem:[#allocation38 + $0xc8] sm:$0xff] }
 0xd82   :  { %9535 = vmatpush1.bf16.msra.mxu0 %v9534_v12  ;;  %9591 = vmatpush1.bf16.msra.mxu1 %v9590_v32  ;;  %v6597_v12 = vld [vmem:[#allocation38 + $0x4d0] sm:$0xff]  ;;  %v6604_v32 = vld [vmem:[#allocation38 + $0x508] sm:$0xff] }
 0xd83   :  { %9537 = vmatprep.subr.bf16.mxu0 %v9536_v3  ;;  %9593 = vmatprep.subr.bf16.mxu1 %v9592_v36  ;;  %v6599_v3 = vld [vmem:[#allocation38 + $0x4e0] sm:$0xff]  ;;  %v6606_v36 = vld [vmem:[#allocation38 + $0x518] sm:$0xff]  ;;  %v9558_v4 = vpack.c.bf16 %v6604_v32, %v6597_v12 }
 0xd84   :  { %v9614_v27 = vpack.c.bf16 %v6606_v36, %v6599_v3  ;;  %v6477_v3 = vld [vmem:[#allocation38 + $0x110] sm:$0xff]  ;;  %v6484_v36 = vld [vmem:[#allocation38 + $0x148] sm:$0xff] }
 0xd86   :  { %9539 = vmatpush1.bf16.msra.mxu0 %v9538_v7  ;;  %9595 = vmatpush1.bf16.msra.mxu1 %v9594_v28  ;;  %v6611_v7 = vld [vmem:[#allocation38 + $0x540] sm:$0xff]  ;;  %v9560_v28 = vpack.c.bf16 %v6619_v14, %v6612_v54  ;;  %v6490_v14 = vld [vmem:[#allocation38 + $0x178] sm:$0xff] }
 0xd87   :  { %9541 = vmatprep.subr.bf16.mxu0 %v9540_v59  ;;  %9597 = vmatprep.subr.bf16.mxu1 %v9596_v46  ;;  %v6613_v59 = vld [vmem:[#allocation38 + $0x550] sm:$0xff]  ;;  %v6620_v46 = vld [vmem:[#allocation38 + $0x588] sm:$0xff]  ;;  %v9562_v34 = vpack.c.bf16 %v6618_v42, %v6611_v7  ;;  %v9636_v7 = vpack.c.bf16 %v6497_v26, %v6490_v14  ;;  %v6498_v42 = vld [vmem:[#allocation38 + $0x1b8] sm:$0xff] }
 0xd88   :  { %v9618_v2 = vpack.c.bf16 %v6620_v46, %v6613_v59  ;;  %v6504_v59 = vld [vmem:[#allocation38 + $0x1e8] sm:$0xff]  ;;  %v6511_v46 = vld [vmem:[#allocation38 + $0x220] sm:$0xff] }
 0xd89   :  { %v9640_v9 = vpack.c.bf16 %v6511_v46, %v6504_v59  ;;  %v6580_v26 = vld [vmem:[#allocation38 + $0x448] sm:$0xff]  ;;  %v6594_v46 = vld [vmem:[#allocation38 + $0x4b8] sm:$0xff] }
 0xd8a   :  { %9543 = vmatpush1.bf16.msra.mxu0 %v9542_v23  ;;  %9599 = vmatpush1.bf16.msra.mxu1 %v9598_v58  ;;  %v6635_v23 = vld [vmem:[#allocation38 + $0x600] sm:$0xff]  ;;  %v6625_v58 = vld [vmem:[#allocation38 + $0x5b0] sm:$0xff] }
 0xd8b   :  { %9545 = vmatprep.subr.bf16.mxu0 %v9544_v25  ;;  %9601 = vmatprep.subr.bf16.mxu1 %v9600_v39  ;;  %v9620_v38 = vpack.c.bf16 %v6635_v23, %v6628_v43  ;;  %v9566_v25 = vpack.c.bf16 %v6632_v18, %v6625_v58  ;;  %v6627_v39 = vld [vmem:[#allocation38 + $0x5c0] sm:$0xff]  ;;  %v6510_v43 = vld [vmem:[#allocation38 + $0x218] sm:$0xff]  ;;  %v6512_v23 = vld [vmem:[#allocation38 + $0x228] sm:$0xff] }
 0xd8c   :  { %v9622_v11 = vpack.c.bf16 %v6634_v17, %v6627_v39  ;;  %v6518_v58 = vld [vmem:[#allocation38 + $0x258] sm:$0xff]  ;;  %v6525_v18 = vld [vmem:[#allocation38 + $0x290] sm:$0xff] }
 0xd8d   :  { %v6517_v39 = vld [vmem:[#allocation38 + $0x250] sm:$0xff]  ;;  %v9644_v17 = vpack.c.bf16 %v6525_v18, %v6518_v58  ;;  %v6608_v18 = vld [vmem:[#allocation38 + $0x528] sm:$0xff] }
 0xd8e   :  { %9547 = vmatpush1.bf16.msra.mxu0 %v9546_v57  ;;  %9603 = vmatpush1.bf16.msra.mxu1 %v9602_v21  ;;  %v6454_v57 = vld [vmem:[#allocation38 + $0x58] sm:$0xff]  ;;  %v6449_v21 = vld [vmem:[#allocation38 + $0x30] sm:$0xff] }
 0xd8f   :  { %9549 = vmatprep.subr.bf16.mxu0 %v9548_v62  ;;  %9605 = vmatprep.subr.bf16.mxu1 %v9604_v22  ;;  %v6462_v22 = vld [vmem:[#allocation38 + $0x98] sm:$0xff]  ;;  %v9626_v15 = vpack.c.bf16 %v6454_v57, %v6447_v37  ;;  %v6539_v37 = vld [vmem:[#allocation38 + $0x300] sm:$0xff] }
 0xd90   :  { %v9628_v49 = vpack.c.bf16 %v6469_v24, %v6462_v22  ;;  %v6533_v22 = vld [vmem:[#allocation38 + $0x2d0] sm:$0xff]  ;;  %v6540_v24 = vld [vmem:[#allocation38 + $0x308] sm:$0xff] }
 0xd92   :  { %9551 = vmatpush1.bf16.msra.mxu0 %v9550_v40  ;;  %9607 = vmatpush1.bf16.msra.mxu1 %v9606_v56  ;;  %v9681_v40 = vpack.c.bf16 %v6456_v41, %v6449_v21  ;;  %v6461_v56 = vld [vmem:[#allocation38 + $0x90] sm:$0xff]  ;;  %v9696_v21 = vpack.c.bf16 %v6526_v50, %v6519_v51  ;;  %v6531_v41 = vld [vmem:[#allocation38 + $0x2c0] sm:$0xff] }
 0xd93   :  { %9553 = vmatprep.subr.bf16.mxu0 %v9552_v52  ;;  %9609 = vmatprep.subr.bf16.mxu1 %v9608_v13  ;;  %v6463_v52 = vld [vmem:[#allocation38 + $0xa0] sm:$0xff]  ;;  %v6470_v13 = vld [vmem:[#allocation38 + $0xd8] sm:$0xff]  ;;  %v9630_v12 = vpack.c.bf16 %v6468_v53, %v6461_v56 }
 0xd94   :  { %v9684_v32 = vpack.c.bf16 %v6470_v13, %v6463_v52  ;;  %v6547_v53 = vld [vmem:[#allocation38 + $0x340] sm:$0xff]  ;;  %v6554_v52 = vld [vmem:[#allocation38 + $0x378] sm:$0xff]  ;;  %v6560_v13 = vld [vmem:[#allocation38 + $0x3a8] sm:$0xff] }
 0xd95   :  { %v6615_v50 = vld [vmem:[#allocation38 + $0x560] sm:$0xff] }
 0xd96   :  { %9555 = vmatpush1.bf16.msra.mxu0 %v9554_v19  ;;  %9611 = vmatpush1.bf16.msra.mxu1 %v9610_v29  ;;  %v6483_v19 = vld [vmem:[#allocation38 + $0x140] sm:$0xff] }
 0xd97   :  { %9557 = vmatprep.subr.bf16.mxu0 %v9556_v5  ;;  %9613 = vmatprep.subr.bf16.mxu1 %v9612_v48  ;;  %v6475_v5 = vld [vmem:[#allocation38 + $0x100] sm:$0xff]  ;;  %v6482_v48 = vld [vmem:[#allocation38 + $0x138] sm:$0xff]  ;;  %v9632_v54 = vpack.c.bf16 %v6483_v19, %v6476_v10 }
 0xd98   :  { %v9634_v20 = vpack.c.bf16 %v6482_v48, %v6475_v5  ;;  %v6566_v19 = vld [vmem:[#allocation38 + $0x3d8] sm:$0xff]  ;;  %v6581_v48 = vld [vmem:[#allocation38 + $0x450] sm:$0xff] }
 0xd99   :  { %v6574_v5 = vld [vmem:[#allocation38 + $0x418] sm:$0xff] }
 0xd9a   :  { %9559 = vmatpush1.bf16.msra.mxu0 %v9558_v4  ;;  %9615 = vmatpush1.bf16.msra.mxu1 %v9614_v27  ;;  %v9687_v4 = vpack.c.bf16 %v6484_v36, %v6477_v3  ;;  %v6489_v27 = vld [vmem:[#allocation38 + $0x170] sm:$0xff]  ;;  %v9660_v14 = vpack.c.bf16 %v6581_v48, %v6574_v5  ;;  %v7188_v5 = vld [vmem:[#allocation40 + $0x6] sm:$0x3]  ;;  %v7109_v48 = vld [vmem:[#allocation40 + $0x4] sm:$0x3] }
 0xd9b   :  { %9561 = vmatprep.subr.bf16.mxu0 %v9560_v28  ;;  %9617 = vmatprep.subr.bf16.mxu1 %v9616_v16  ;;  %v6496_v28 = vld [vmem:[#allocation38 + $0x1a8] sm:$0xff]  ;;  %v6491_v16 = vld [vmem:[#allocation38 + $0x180] sm:$0xff] }
 0xd9e   :  { %9563 = vmatpush1.bf16.msra.mxu0 %v9562_v34  ;;  %9619 = vmatpush1.bf16.msra.mxu1 %v9618_v2  ;;  %v9638_v34 = vpack.c.bf16 %v6496_v28, %v6489_v27  ;;  %v9690_v2 = vpack.c.bf16 %v6498_v42, %v6491_v16  ;;  %v6588_v27 = vld [vmem:[#allocation38 + $0x488] sm:$0xff]  ;;  %v6587_v42 = vld [vmem:[#allocation38 + $0x480] sm:$0xff] }
 0xd9f   :  { %9565 = vmatprep.subr.bf16.mxu0 %v9564_v35  ;;  %9621 = vmatprep.subr.bf16.mxu1 %v9620_v38  ;;  %v6505_v35 = vld [vmem:[#allocation38 + $0x1f0] sm:$0xff]  ;;  %v9642_v38 = vpack.c.bf16 %v6510_v43, %v6503_v1  ;;  %v6602_v1 = vld [vmem:[#allocation38 + $0x4f8] sm:$0xff]  ;;  %v9666_v43 = vpack.c.bf16 %v6594_v46, %v6587_v42  ;;  %v7267_v46 = vld [vmem:[#allocation40 + $0x8] sm:$0x3] }
 0xda0   :  { %v7513_v42 = vld [vmem:[#allocation43 + $0x8] sm:$0xff] }
 0xda2   :  { %9567 = vmatpush1.bf16.msra.mxu0 %v9566_v25  ;;  %9623 = vmatpush1.bf16.msra.mxu1 %v9622_v11  ;;  %v9693_v25 = vpack.c.bf16 %v6512_v23, %v6505_v35  ;;  %v6524_v11 = vld [vmem:[#allocation38 + $0x288] sm:$0xff]  ;;  %v6601_v23 = vld [vmem:[#allocation38 + $0x4f0] sm:$0xff] }
 0xda3   :  { %9680 = vmatprep.subr.bf16.mxu1 %v12647_v47  ;;  %9625 = vmatprep.subr.bf16.mxu0 %v9624_v63  ;;  %v6532_v63 = vld [vmem:[#allocation38 + $0x2c8] sm:$0xff]  ;;  %v9646_v57 = vpack.c.bf16 %v6524_v11, %v6517_v39  ;;  %v9670_v11 = vpack.c.bf16 %v6608_v18, %v6601_v23  ;;  %v7516_v23 = vld [vmem:[#allocation43 + $0x20] sm:$0xff] }
 0xda4   :  { %v6616_v39 = vld [vmem:[#allocation38 + $0x568] sm:$0xff] }
 0xe3f   :  { %v6274_v31 = vpop.f32.mrb[102].mxu0  ;;  %v6428_v62 = vpop.f32.mrb[82].mxu1 }
 0xe40   :  { %v12437_v30 = vmax.f32 %v6274_v31, %v6428_v62  ;;  %v6276_v33 = vpop.f32.mrb[103].mxu0  ;;  %v6430_v6 = vpop.f32.mrb[83].mxu1  ;;  %v9648_v31 = vpack.c.bf16 %v6539_v37, %v6532_v63  ;;  %v6538_v62 = vld [vmem:[#allocation38 + $0x2f8] sm:$0xff] }
 0xe41   :  { %v6440_v60 = vmax.f32 %v6276_v33, %v6430_v6  ;;  %v6546_v33 = vld [vmem:[#allocation38 + $0x338] sm:$0xff]  ;;  %v6553_v6 = vld [vmem:[#allocation38 + $0x370] sm:$0xff] }
 0xe42   :  { %v9652_v56 = vpack.c.bf16 %v6553_v6, %v6546_v33  ;;  %v6622_v37 = vld [vmem:[#allocation38 + $0x598] sm:$0xff]  ;;  %v6636_v6 = vld [vmem:[#allocation38 + $0x608] sm:$0xff] }
 0xe43   :  { %v6280_v45 = vpop.f32.mrb[104].mxu0  ;;  %v6434_v61 = vpop.f32.mrb[84].mxu1  ;;  %7838 = vmatprep.mubr.msk.f32.mxu0 %vm3977_vm8, %v6440_v60  ;;  %7840 = vmatprep.mubr.msk.f32.mxu1 %vm3977_vm8, %v6440_v60 }
 0xe44   :  { %v12441_v55 = vmax.f32 %v6280_v45, %v6434_v61  ;;  %v6282_v44 = vpop.f32.mrb[105].mxu0  ;;  %v6436_v0 = vpop.f32.mrb[85].mxu1  ;;  %6710 = vmatmul.mubr.f32.vlgmr.msra.gmra.mrb[106].mxu0 %v12437_v30  ;;  %6787 = vmatmul.mubr.f32.vlgmr.msra.gmra.mrb[86].mxu1 %v12437_v30  ;;  %v6567_v45 = vld [vmem:[#allocation38 + $0x3e0] sm:$0xff] }
 0xe45   :  { %v12445_v29 = vmax.f32 %v6282_v44, %v6436_v0  ;;  %9627 = vmatpush1.bf16.msra.mxu0 %v9626_v15  ;;  %9682 = vmatpush1.bf16.msra.mxu1 %v9681_v40  ;;  %v9699_v15 = vpack.c.bf16 %v6540_v24, %v6533_v22  ;;  %v6545_v40 = vld [vmem:[#allocation38 + $0x330] sm:$0xff]  ;;  %v9702_v44 = vpack.c.bf16 %v6554_v52, %v6547_v53  ;;  %v6559_v0 = vld [vmem:[#allocation38 + $0x3a0] sm:$0xff] }
 0xe46   :  { %9629 = vmatprep.subr.bf16.mxu0 %v9628_v49  ;;  %9683 = vmatprep.subr.bf16.mxu1 %v12647_v47  ;;  %v6552_v49 = vld [vmem:[#allocation38 + $0x368] sm:$0xff]  ;;  %v9656_v10 = vpack.c.bf16 %v6567_v45, %v6560_v13  ;;  %v9658_v3 = vpack.c.bf16 %v6566_v19, %v6559_v0  ;;  %v6629_v24 = vld [vmem:[#allocation38 + $0x5d0] sm:$0xff] }
 0xe47   :  { %7839 = vmatprep.mubr.msk.f32.mxu0 %vm3977_vm8, %v12445_v29  ;;  %7841 = vmatprep.mubr.msk.f32.mxu1 %vm3977_vm8, %v12445_v29  ;;  %v9654_v61 = vpack.c.bf16 %v6552_v49, %v6545_v40  ;;  %v9678_v40 = vpack.c.bf16 %v6636_v6, %v6629_v24 }
 0xe48   :  { %6716 = vmatmul.mubr.f32.gmra.mrb[108].mxu0 %v12441_v55  ;;  %6793 = vmatmul.mubr.f32.gmra.mrb[88].mxu1 %v12441_v55 }
 0xe49   :  { %9631 = vmatpush1.bf16.msra.mxu0 %v9630_v12  ;;  %9685 = vmatpush1.bf16.msra.mxu1 %v9684_v32  ;;  %v6561_v12 = vld [vmem:[#allocation38 + $0x3b0] sm:$0xff]  ;;  %v6568_v32 = vld [vmem:[#allocation38 + $0x3e8] sm:$0xff] }
 0xe4a   :  { %7842 = vmatprep.mubr.msk.f32.mxu0 %vm3977_vm8, %v6440_v60  ;;  %7844 = vmatprep.mubr.msk.f32.mxu1 %vm3977_vm8, %v6440_v60  ;;  %v9650_v60 = vpack.c.bf16 %v6538_v62, %v6531_v41  ;;  %v9705_v36 = vpack.c.bf16 %v6568_v32, %v6561_v12  ;;  %v6630_v41 = vld [vmem:[#allocation38 + $0x5d8] sm:$0xff]  ;;  %v9674_v62 = vpack.c.bf16 %v6622_v37, %v6615_v50  ;;  %v6951_v12 = vld [vmem:[#allocation40] sm:$0x3]  ;;  %v6953_v32 = vld [vmem:[#allocation40 + $0x2] sm:$0x3] }
 0xe4b   :  { %9633 = vmatprep.subr.bf16.mxu0 %v9632_v54  ;;  %9686 = vmatprep.subr.bf16.mxu1 %v12647_v47  ;;  %v6573_v54 = vld [vmem:[#allocation38 + $0x410] sm:$0xff]  ;;  %v7523_v50 = vld [vmem:[#allocation43 + $0x58] sm:$0xff] }
 0xe4c   :  { %v9662_v28 = vpack.c.bf16 %v6580_v26, %v6573_v54  ;;  %v7524_v37 = vld [vmem:[#allocation43 + $0x60] sm:$0xff] }
 0xe4d   :  { %9635 = vmatpush1.bf16.msra.mxu0 %v9634_v20  ;;  %9688 = vmatpush1.bf16.msra.mxu1 %v9687_v4  ;;  %v6575_v20 = vld [vmem:[#allocation38 + $0x420] sm:$0xff]  ;;  %v6582_v4 = vld [vmem:[#allocation38 + $0x458] sm:$0xff] }
 0xe4e   :  { %9637 = vmatprep.subr.bf16.mxu0 %v9636_v7  ;;  %9689 = vmatprep.subr.bf16.mxu1 %v12647_v47  ;;  %v6595_v7 = vld [vmem:[#allocation38 + $0x4c0] sm:$0xff]  ;;  %v9708_v16 = vpack.c.bf16 %v6582_v4, %v6575_v20 }
 0xe4f   :  { %v9664_v59 = vpack.c.bf16 %v6595_v7, %v6588_v27 }
 0xe51   :  { %9639 = vmatpush1.bf16.msra.mxu0 %v9638_v34  ;;  %9691 = vmatpush1.bf16.msra.mxu1 %v9690_v2  ;;  %v6589_v34 = vld [vmem:[#allocation38 + $0x490] sm:$0xff]  ;;  %v6596_v2 = vld [vmem:[#allocation38 + $0x4c8] sm:$0xff] }
 0xe52   :  { %9641 = vmatprep.subr.bf16.mxu0 %v9640_v9  ;;  %9692 = vmatprep.subr.bf16.mxu1 %v12647_v47  ;;  %v6609_v9 = vld [vmem:[#allocation38 + $0x530] sm:$0xff]  ;;  %v9711_v35 = vpack.c.bf16 %v6596_v2, %v6589_v34  ;;  %v7346_v34 = vld [vmem:[#allocation40 + $0xa] sm:$0x3] }
 0xe53   :  { %v9668_v58 = vpack.c.bf16 %v6609_v9, %v6602_v1  ;;  %v7514_v1 = vld [vmem:[#allocation43 + $0x10] sm:$0xff]  ;;  %v7515_v9 = vld [vmem:[#allocation43 + $0x18] sm:$0xff] }
 0xe55   :  { %9643 = vmatpush1.bf16.msra.mxu0 %v9642_v38  ;;  %9694 = vmatpush1.bf16.msra.mxu1 %v9693_v25  ;;  %v6603_v38 = vld [vmem:[#allocation38 + $0x500] sm:$0xff]  ;;  %v6610_v25 = vld [vmem:[#allocation38 + $0x538] sm:$0xff] }
 0xe56   :  { %9645 = vmatprep.subr.bf16.mxu0 %v9644_v17  ;;  %9695 = vmatprep.subr.bf16.mxu1 %v12647_v47  ;;  %v6623_v17 = vld [vmem:[#allocation38 + $0x5a0] sm:$0xff]  ;;  %v9714_v51 = vpack.c.bf16 %v6610_v25, %v6603_v38  ;;  %v7519_v25 = vld [vmem:[#allocation43 + $0x38] sm:$0xff] }
 0xe57   :  { %v9672_v63 = vpack.c.bf16 %v6623_v17, %v6616_v39  ;;  %v7518_v38 = vld [vmem:[#allocation43 + $0x30] sm:$0xff]  ;;  %v7520_v17 = vld [vmem:[#allocation43 + $0x40] sm:$0xff] }
 0xe58   :  { %v9760_v39 = vpack.c.bf16 %v7519_v25, %v7518_v38 }
 0xe59   :  { %9647 = vmatpush1.bf16.msra.mxu0 %v9646_v57  ;;  %9697 = vmatpush1.bf16.msra.mxu1 %v9696_v21  ;;  %v6617_v57 = vld [vmem:[#allocation38 + $0x570] sm:$0xff]  ;;  %v6624_v21 = vld [vmem:[#allocation38 + $0x5a8] sm:$0xff] }
 0xe5a   :  { %9649 = vmatprep.subr.bf16.mxu0 %v9648_v31  ;;  %9698 = vmatprep.subr.bf16.mxu1 %v12647_v47  ;;  %v6637_v31 = vld [vmem:[#allocation38 + $0x610] sm:$0xff]  ;;  %v9717_v22 = vpack.c.bf16 %v6624_v21, %v6617_v57  ;;  %v7525_v57 = vld [vmem:[#allocation43 + $0x68] sm:$0xff] }
 0xe5b   :  { %v9676_v33 = vpack.c.bf16 %v6637_v31, %v6630_v41  ;;  %v9769_v21 = vpack.c.bf16 %v7525_v57, %v7524_v37  ;;  %v7526_v41 = vld [vmem:[#allocation43 + $0x70] sm:$0xff]  ;;  %v7527_v31 = vld [vmem:[#allocation43 + $0x78] sm:$0xff] }
 0xe5d   :  { %9651 = vmatpush1.bf16.msra.mxu0 %v9650_v60  ;;  %9700 = vmatpush1.bf16.msra.mxu1 %v9699_v15  ;;  %v6631_v60 = vld [vmem:[#allocation38 + $0x5e0] sm:$0xff]  ;;  %v6638_v15 = vld [vmem:[#allocation38 + $0x618] sm:$0xff] }
 0xe5e   :  { %9653 = vmatprep.subr.bf16.mxu0 %v9652_v56  ;;  %9701 = vmatprep.subr.bf16.mxu1 %v12647_v47  ;;  %v9720_v56 = vpack.c.bf16 %v6638_v15, %v6631_v60 }
 0xe61   :  { %9655 = vmatpush1.bf16.msra.mxu0 %v9654_v61  ;;  %9703 = vmatpush1.bf16.msra.mxu1 %v9702_v44 }
 0xe62   :  { %9657 = vmatprep.subr.bf16.mxu0 %v9656_v10  ;;  %9704 = vmatprep.subr.bf16.mxu1 %v12647_v47 }
 0xe65   :  { %9659 = vmatpush1.bf16.msra.mxu0 %v9658_v3  ;;  %9706 = vmatpush1.bf16.msra.mxu1 %v9705_v36 }
 0xe66   :  { %9661 = vmatprep.subr.bf16.mxu0 %v9660_v14  ;;  %9707 = vmatprep.subr.bf16.mxu1 %v12647_v47 }
 0xe69   :  { %9663 = vmatpush1.bf16.msra.mxu0 %v9662_v28  ;;  %9709 = vmatpush1.bf16.msra.mxu1 %v9708_v16  ;;  %v7512_v16 = vld [vmem:[#allocation43] sm:$0xff] }
 0xe6a   :  { %9665 = vmatprep.subr.bf16.mxu0 %v9664_v59  ;;  %9710 = vmatprep.subr.bf16.mxu1 %v12647_v47  ;;  %v9751_v2 = vpack.c.bf16 %v7513_v42, %v7512_v16 }
 0xe6d   :  { %9667 = vmatpush1.bf16.msra.mxu0 %v9666_v43  ;;  %9712 = vmatpush1.bf16.msra.mxu1 %v9711_v35  ;;  %v7425_v43 = vld [vmem:[#allocation40 + $0xc] sm:$0x3]  ;;  %v9754_v35 = vpack.c.bf16 %v7515_v9, %v7514_v1 }
 0xe6e   :  { %9669 = vmatprep.subr.bf16.mxu0 %v9668_v58  ;;  %9713 = vmatprep.subr.bf16.mxu1 %v12647_v47  ;;  %v7517_v58 = vld [vmem:[#allocation43 + $0x28] sm:$0xff] }
 0xe6f   :  { %v9757_v18 = vpack.c.bf16 %v7517_v58, %v7516_v23 }
 0xe71   :  { %9671 = vmatpush1.bf16.msra.mxu0 %v9670_v11  ;;  %9715 = vmatpush1.bf16.msra.mxu1 %v9714_v51  ;;  %v7521_v11 = vld [vmem:[#allocation43 + $0x48] sm:$0xff] }
 0xe72   :  { %9673 = vmatprep.subr.bf16.mxu0 %v9672_v63  ;;  %9716 = vmatprep.subr.bf16.mxu1 %v12647_v47  ;;  %v9763_v51 = vpack.c.bf16 %v7521_v11, %v7520_v17 }
 0xe75   :  { %9675 = vmatpush1.bf16.msra.mxu0 %v9674_v62  ;;  %9718 = vmatpush1.bf16.msra.mxu1 %v9717_v22  ;;  %v9772_v62 = vpack.c.bf16 %v7527_v31, %v7526_v41 }
 0xe76   :  { %9677 = vmatprep.subr.bf16.mxu0 %v9676_v33  ;;  %9719 = vmatprep.subr.bf16.mxu1 %v12647_v47 }
 0xe79   :  { %9679 = vmatpush1.bf16.msra.mxu0 %v9678_v40  ;;  %9721 = vmatpush1.bf16.msra.mxu1 %v9720_v56 }
 0xe7a   :  { %9726 = vmatprep.subr.bf16.mxu1 %v12647_v47  ;;  %9722 = vmatprep.subr.bf16.mxu0 %v12647_v47 }
 0xe7c   :  { %6864 = vmatmul.mubr.f32.vlgmr.msra.gmra.mrb[110].mxu0 %v12437_v30  ;;  %6941 = vmatmul.mubr.f32.vlgmr.msra.gmra.mrb[90].mxu1 %v12437_v30 }
 0xe7d   :  { %7843 = vmatprep.mubr.msk.f32.mxu0 %vm3977_vm8, %v12445_v29  ;;  %7845 = vmatprep.mubr.msk.f32.mxu1 %vm3977_vm8, %v12445_v29 }
 0xe80   :  { %6870 = vmatmul.mubr.f32.gmra.mrb[112].mxu0 %v12441_v55  ;;  %6946 = vmatmul.mubr.f32.gmra.mrb[92].mxu1 %v12441_v55 }
 0xe81   :  { %8149 = vmatprep.mubr.msk.f32.mxu1 %vm10712_vm0, %v12651_v8  ;;  %8142 = vmatprep.mubr.msk.f32.mxu0 %vm10712_vm0, %v12651_v8 }
 0xf17   :  { %v6711_v49 = vpop.f32.mrb[106].mxu0  ;;  %v6788_v53 = vpop.f32.mrb[86].mxu1 }
 0xf18   :  { %v6713_v52 = vpop.f32.mrb[107].mxu0  ;;  %v6790_v30 = vpop.f32.mrb[87].mxu1 }
 0xf1b   :  { %v6717_v13 = vpop.f32.mrb[108].mxu0  ;;  %v6794_v45 = vpop.f32.mrb[88].mxu1 }
 0xf1c   :  { %v9727_v61 = vpack.c.bf16 %v6717_v13, %v6711_v49  ;;  %v9731_v55 = vpack.c.bf16 %v6794_v45, %v6788_v53  ;;  %v6719_v44 = vpop.f32.mrb[109].mxu0  ;;  %v6796_v0 = vpop.f32.mrb[89].mxu1 }
 0xf1d   :  { %v9723_v10 = vpack.c.bf16 %v6719_v44, %v6713_v52  ;;  %v9735_v19 = vpack.c.bf16 %v6796_v0, %v6790_v30  ;;  %v7860_v44 = vld [vmem:[#allocation41] ss:$0 sm:$0xff] }
 0xf1e   :  { %9729 = vmatpush3.bf16.msk.msra.mxu1 %vm12483_vm12, %v9727_v61 }
 0xf1f   :  { %9725 = vmatpush3.bf16.msk.msra.mxu0 %vm12483_vm12, %v9723_v10  ;;  %9734 = vmatprep.subr.bf16.mxu1 %v12647_v47 }
 0xf20   :  { %9730 = vmatprep.subr.bf16.mxu0 %v12647_v47 }
 0xf21   :  { %8150 = vmatmul.mubr.msk.f32.vlgmr.msra.gmra.mrb[94].mxu1 %vm6954_vm13, %v6951_v12 }
 0xf22   :  { %9737 = vmatpush3.bf16.msk.msra.mxu1 %vm12483_vm12, %v9735_v19  ;;  %8143 = vmatmul.mubr.msk.f32.vlgmr.msra.gmra.mrb[114].mxu0 %vm6954_vm13, %v6953_v32  ;;  %v7861_v32 = vld [vmem:[#allocation44] ss:$0 sm:$0xff] }
 0xf23   :  { %9733 = vmatpush3.bf16.msk.msra.mxu0 %vm12483_vm12, %v9731_v55  ;;  %8156 = vmatprep.mubr.msk.f32.mxu0 %vm10712_vm0, %v12651_v8 }
 0xf24   :  { %9738 = vmatprep.subr.bf16.mxu0 %v12647_v47  ;;  %8163 = vmatprep.mubr.msk.f32.mxu1 %vm10712_vm0, %v12651_v8 }
 0xf25   :  { %9742 = vmatprep.subr.bf16.mxu1 %v12647_v47  ;;  %8164 = vmatmul.mubr.msk.f32.vlgmr.msra.gmra.mrb[96].mxu1 %vm6954_vm13, %v7188_v5 }
 0xf26   :  { %8157 = vmatmul.mubr.msk.f32.vlgmr.msra.gmra.mrb[116].mxu0 %vm6954_vm13, %v7109_v48  ;;  %8177 = vmatprep.mubr.msk.f32.mxu1 %vm10712_vm0, %v12651_v8 }
 0xf27   :  { %8170 = vmatprep.mubr.msk.f32.mxu0 %vm10712_vm0, %v12651_v8 }
 0xf4f   :  { %v6865_v3 = vpop.f32.mrb[110].mxu0  ;;  %v6942_v36 = vpop.f32.mrb[90].mxu1 }
 0xf50   :  { %v6867_v54 = vpop.f32.mrb[111].mxu0  ;;  %v6944_v14 = vpop.f32.mrb[91].mxu1 }
 0xf53   :  { %v6871_v26 = vpop.f32.mrb[112].mxu0  ;;  %v6947_v20 = vpop.f32.mrb[92].mxu1 }
 0xf54   :  { %v9739_v4 = vpack.c.bf16 %v6871_v26, %v6865_v3  ;;  %v9747_v27 = vpack.c.bf16 %v6947_v20, %v6942_v36  ;;  %v6873_v7 = vpop.f32.mrb[113].mxu0  ;;  %v6949_v28 = vpop.f32.mrb[93].mxu1 }
 0xf55   :  { %v9743_v59 = vpack.c.bf16 %v6873_v7, %v6867_v54 }
 0xf56   :  { %9741 = vmatpush3.bf16.msk.msra.mxu0 %vm12483_vm12, %v9739_v4 }
 0xf57   :  { %9745 = vmatpush3.bf16.msk.msra.mxu1 %vm12483_vm12, %v9743_v59  ;;  %9746 = vmatprep.subr.bf16.mxu0 %v12647_v47 }
 0xf58   :  { %9750 = vmatprep.subr.bf16.mxu1 %v12647_v47 }
 0xf59   :  { %8171 = vmatmul.mubr.msk.f32.vlgmr.msra.gmra.mrb[118].mxu0 %vm6954_vm13, %v7267_v46 }
 0xf5a   :  { %9749 = vmatpush3.bf16.msk.msra.mxu0 %vm12483_vm12, %v9747_v27  ;;  %8178 = vmatmul.mubr.msk.f32.vlgmr.msra.gmra.mrb[98].mxu1 %vm6954_vm13, %v7346_v34 }
 0xf5b   :  { %8184 = vmatprep.mubr.msk.f32.mxu0 %vm10712_vm0, %v12651_v8  ;;  %9752 = vmatpush3.bf16.msra.mxu1 %v9751_v2 }
 0xf5c   :  { %9753 = vmatprep.subr.bf16.mxu1 %v12647_v47  ;;  %8219 = vmatprep.mubr.msk.f32.mxu1 %vm10712_vm0, %v12651_v8  ;;  %v7522_v8 = vld [vmem:[#allocation43 + $0x50] sm:$0xff] }
 0xf5d   :  { %8185 = vmatmul.mubr.msk.f32.vlgmr.msra.gmra.mrb[120].mxu0 %vm6954_vm13, %v7425_v43  ;;  %v9766_v63 = vpack.c.bf16 %v7523_v50, %v7522_v8 }
 0xf5f   :  { %9755 = vmatpush3.bf16.msra.mxu1 %v9754_v35 }
 0xf60   :  { %9756 = vmatprep.subr.bf16.mxu1 %v12647_v47 }
 0xf63   :  { %9758 = vmatpush3.bf16.msra.mxu1 %v9757_v18 }
 0xf64   :  { %9759 = vmatprep.subr.bf16.mxu1 %v12647_v47 }
 0xf67   :  { %9761 = vmatpush3.bf16.msra.mxu1 %v9760_v39 }
 0xf68   :  { %9762 = vmatprep.subr.bf16.mxu1 %v12647_v47 }
 0xf6b   :  { %9764 = vmatpush3.bf16.msra.mxu1 %v9763_v51 }
 0xf6c   :  { %9765 = vmatprep.subr.bf16.mxu1 %v12647_v47 }
 0xf6f   :  { %9767 = vmatpush3.bf16.msra.mxu1 %v9766_v63 }
 0xf70   :  { %9768 = vmatprep.subr.bf16.mxu1 %v12647_v47 }
 0xf73   :  { %9770 = vmatpush3.bf16.msra.mxu1 %v9769_v21 }
 0xf74   :  { %9771 = vmatprep.subr.bf16.mxu1 %v12647_v47 }
 0xf77   :  { %9773 = vmatpush3.bf16.msra.mxu1 %v9772_v62 }
 0xff4   :  { %v7104_v22 = vpop.f32.mrb[94].mxu1 }
 0xff5   :  { %v7028_v24 = vpop.f32.mrb[114].mxu0  ;;  %v8151_v33 = vpop.f32.mrb[95].mxu1 }
 0xff6   :  { %v7105_v6 = vadd.f32 %v7104_v22, %v7028_v24  ;;  %v8144_v60 = vpop.f32.mrb[115].mxu0 }
 0xff8   :  { %v7261_v15 = vpop.f32.mrb[96].mxu1 }
 0xff9   :  { %v7182_v40 = vpop.f32.mrb[116].mxu0  ;;  %v8165_v56 = vpop.f32.mrb[97].mxu1 }
 0xffa   :  { %v7186_v49 = vadd.f32 %v7182_v40, %v7105_v6  ;;  %v8158_v53 = vpop.f32.mrb[117].mxu0 }
 0xffc   :  { %v7265_v52 = vadd.f32 %v7261_v15, %v7186_v49 }
0x102c   :  { %v7340_v30 = vpop.f32.mrb[118].mxu0 }
0x102d   :  { %v7344_v13 = vadd.f32 %v7340_v30, %v7265_v52  ;;  %v7419_v45 = vpop.f32.mrb[98].mxu1  ;;  %v8172_v29 = vpop.f32.mrb[119].mxu0 }
0x102e   :  { %v8179_v47 = vpop.f32.mrb[99].mxu1 }
0x102f   :  { %v7423_v61 = vadd.f32 %v7419_v45, %v7344_v13 }
0x1030   :  { %v7498_v55 = vpop.f32.mrb[120].mxu0 }
0x1031   :  { %v7502_v0 = vadd.f32 %v7498_v55, %v7423_v61  ;;  %v8186_v10 = vpop.f32.mrb[121].mxu0 }
0x1033   :  { %v7510_v19 = vadd.f32 %v7860_v44, %v7502_v0 }
0x1035   :  { %v7511_v12 = vmax.f32 %v7510_v19, 0.0 }
0x1037   :  { %8220 = vmatmul.mubr.f32.vlgmr.msra.gmra.mrb[100].mxu1 %v7511_v12 }
0x110a   :  { %v7601_v5 = vpop.f32.mrb[100].mxu1 }
0x110b   :  { %v7602_v48 = vadd.f32 %v7861_v32, %v7601_v5  ;;  %v8221_v3 = vpop.f32.mrb[101].mxu1 }
0x110d   :  { %v7606_v36 = vsel %vm7605_vm14, %v7602_v48, -inf }
0x110e   :  { %7607 = vmax.xlane.f32.xlu0 %v7606_v36 }
0x119b   :  { %v7608_v54 = vpop.xlane.xlu0 %7607 }
0x119c   :  { %v7609_v14 = vsub.f32 %v7602_v48, %v7608_v54 }
0x119e   :  { %v7610_v26 = vmul.f32 1.442695, %v7609_v14 }
0x11a0   :  { %9970 = vpow2.f32 %v7610_v26 }
0x11aa   :  { %v9971_v20 = vpop.eup %9970 }
0x11ab   :  { %v7612_v4 = vsel %vm7605_vm14, %v9971_v20, 0.0 }
0x11ac   :  { %7613 = vadd.xlane.f32.xlu0 %v7612_v4 }
0x1239   :  { %v7614_v27 = vpop.xlane.xlu0 %7613 }
0x123a   :  { %9972 = vlog2.f32 %v7614_v27 }
0x1244   :  { %v9973_v7 = vpop.eup %9972 }
0x1245   :  { %v7616_v28 = vmul.f32 0.6931472, %v9973_v7 }
0x1247   :  { %v7617_v16 = vsub.f32 %v7609_v14, %v7616_v28 }
0x1249   :  { %7618 = vst [vmem:[#allocation46] sm:$0x3] %v7617_v16 }
0x124a   :  { %10601 = shalt.err (!%p10598_p4)
}
0x124b   :  { %s10602_s18 = scalar_lea.hbm %s10874_s24, 32 }
0x124c   :  { %p10603_p5 = scmp.ne.s32.totalorder %s10874_s24, %s10602_s18  ;;  %p10606_p6 = scmp.lt.u32.totalorder %s10602_s18, %s10874_s24 }
0x124e   :  { %p10608_p7 = pnand %p10606_p6, %p10603_p5 }
0x1250   :  { %10611 = shalt.err (!%p10608_p7)
}
0x1251   :  { %7628 = dma.vmem_to_hbm [thread:$0]  %s7626_s28, 32, %s10874_s24, [#allocation4]  }
0x1252   :  { %10642 = dma.done.wait [#allocation4], 32  }
0x1253   :  { %10643 = vsyncadd [#allocation4], 4294967264 }
0x1254   :  { %7632 = vsyncpa [#allocation3], 1 }
0x1255   :  { %7633 = vsyncpa [#allocation6], 1 }
0x1256   :  { %7634 = vsyncpa [#allocation9], 1 }
0x1257   :  { %7635 = vsyncpa [#allocation12], 1 }
0x1258   :  { %7636 = vsyncpa [#allocation15], 1 }
0x1259   :  { %7637 = vsyncpa [#allocation18], 1 }
0x125a   :  { %7638 = vsyncpa [#allocation21], 1 }
0x125b   :  { %7639 = vsyncpa [#allocation24], 1 }
0x125c   :  { %7640 = vsyncpa [#allocation27], 1 }
0x125d   :  { %7641 = vsyncpa [#allocation30], 1 }
0x125e   :  { %7642 = vsyncpa [#allocation33], 1 }
0x125f   :  { %7643 = vsyncpa [#allocation36], 1 }
0x1260   :  { %7644 = vsyncpa [#allocation39], 1 }
0x1261   :  { %7645 = vsyncpa [#allocation42], 1 }
0x1262   :  { %7646 = vsyncpa [#allocation45], 1 }
0x1263   :  { %7647 = vsyncpa [#allocation4], 1 }

</bundles_post_ra>
